<compile_context>
chip_gen: v7x
topology: tpu7x:2x2x1
jax: 0.10.0
libtpu: 0.0.40
codegen_flags: <defaults>
</compile_context>

<pallas_src>
import functools

import numpy as np
import jax
import jax.numpy as jnp
from jax.experimental import pallas as pl
from jax.experimental.pallas import tpu as pltpu

DILATIONS = (1, 2, 4, 8)


# ----------------------------------------------------------------------------
# Fused Pallas kernel (one batch element per grid step)
# ----------------------------------------------------------------------------
def _tamm_kernel(x_ref, wdw_ref, bn0_ref, bnst_ref, w0_ref, wblk_ref,
                 wmask_ref, mpool_ref, w1_ref, w2t_ref, out_ref,
                 pad_ref, zst_ref, *, C, H, W, PAD):
    HW = H * W

    # Zero the halos of the padded line buffer (unconditionally each step; two
    # tiny stores).  Only the center [PAD:PAD+HW) is rewritten per conv stage.
    pad_ref[:, :PAD] = jnp.zeros((C, PAD), jnp.float32)
    pad_ref[:, PAD + HW:] = jnp.zeros((C, PAD), jnp.float32)

    def depthwise(idx, d):
        """3x3 depthwise conv (dilation d, zero 'same' padding) of the padded
        center buffer.  Returns the raw (C, HW) accumulation (pre-BN)."""
        di = DILATIONS.index(d)
        wd = wdw_ref[idx]                  # (C, 9) taps, lane j = 3*kh + kw
        wm = wmask_ref[di]                 # (2, HW) W-boundary masks
        acc = jnp.zeros((C, HW), jnp.float32)
        for kh in range(3):
            for kw in range(3):
                off = (kh - 1) * d * W + (kw - 1) * d
                t = pad_ref[:, PAD + off: PAD + off + HW]   # windowed load
                if kw == 0:                # zero pixels with w - d < 0
                    t = t * wm[0]
                elif kw == 2:              # zero pixels with w + d >= W
                    t = t * wm[1]
                acc = acc + t * wd[:, 3 * kh + kw: 3 * kh + kw + 1]
        return acc

    # ---- conv = DSConv3x3(x, dilation=1) -----------------------------------
    pad_ref[:, PAD:PAD + HW] = x_ref[0]
    z0 = jnp.maximum(depthwise(0, 1) * bn0_ref[:, 0:1] + bn0_ref[:, 1:2], 0.0)
    conv = jnp.dot(w0_ref[...], z0.astype(jnp.bfloat16),    # bf16 MXU, f32 acc
                   preferred_element_type=jnp.float32)
    conv = jnp.maximum(conv * bn0_ref[:, 2:3] + bn0_ref[:, 3:4], 0.0)
    pad_ref[:, PAD:PAD + HW] = conv        # branch input; reread for gather

    # ---- 4 dilated branches: depthwise into a stacked (4C, HW) scratch ------
    for i, d in enumerate(DILATIONS):
        zst_ref[i * C:(i + 1) * C, :] = depthwise(i + 1, d)
    zs = jnp.maximum(zst_ref[...] * bnst_ref[:, 0:1] + bnst_ref[:, 1:2], 0.0)
    # all 4 pointwise 1x1 convs as ONE block-diagonal (4C,4C)x(4C,HW) matmul
    pw = jnp.dot(wblk_ref[...], zs.astype(jnp.bfloat16),
                 preferred_element_type=jnp.float32)          # (4C, HW)
    pw = jnp.maximum(pw * bnst_ref[:, 2:3] + bnst_ref[:, 3:4], 0.0)

    # gather = conv + sum(branches)
    g = (pad_ref[:, PAD:PAD + HW] + pw[0:C] + pw[C:2 * C]
         + pw[2 * C:3 * C] + pw[3 * C:4 * C])                 # (C, HW)

    # ---- squeeze / excite ----------------------------------------------------
    # All 21 adaptive average pools (1x1 + 2x2 + 4x4) as one tiny matmul against
    # a constant pooling matrix.  Kept at HIGHEST: negligible cost, preserves the
    # exact power-of-two averages of the f32 reference.
    pooled = jnp.dot(g, mpool_ref[...], preferred_element_type=jnp.float32,
                     precision=jax.lax.Precision.HIGHEST)     # (C, 21)
    h = jnp.sum(w1_ref[...] * pooled, axis=2)                 # (R, C)
    h = jnp.maximum(jnp.sum(h, axis=1, keepdims=True), 0.0)   # (R, 1)
    # per-channel attention with channels on sublanes: (C,R)x(R,HW), K=8 -> one
    # cheap MXU pass; applied on the VPU (no diag(att) matmul, no eye weight).
    att = jax.nn.sigmoid(
        jnp.dot(w2t_ref[...], jnp.broadcast_to(h, (h.shape[0], HW)),
                preferred_element_type=jnp.float32,
                precision=jax.lax.Precision.HIGHEST))         # (C, HW)
    out_ref[0] = g * att + x_ref[0]


# ----------------------------------------------------------------------------
# Host-built constants
# ----------------------------------------------------------------------------
def _pool_matrix(H, W):
    """(HW, 21) matrix whose columns are the 1x1, 2x2, 4x4 avg-pool weights."""
    HW = H * W
    m = np.zeros((HW, 21), np.float32)
    s = 0
    for n in (1, 2, 4):
        bh, bw = H // n, W // n
        for i in range(n):
            for j in range(n):
                blk = np.zeros((H, W), np.float32)
                blk[i * bh:(i + 1) * bh, j * bw:(j + 1) * bw] = 1.0 / (bh * bw)
                m[:, s] = blk.reshape(HW)
                s += 1
    return m


def _w_masks(H, W):
    """Per-dilation masks killing W-boundary wrap-around of the lane shifts."""
    col = np.arange(H * W) % W
    m = np.zeros((len(DILATIONS), 2, H * W), np.float32)
    for i, d in enumerate(DILATIONS):
        m[i, 0] = (col >= d)          # taps with dw = -d
        m[i, 1] = (col < W - d)       # taps with dw = +d
    return m


def _block_diag(blocks):
    n = len(blocks)
    c = blocks[0].shape[0]
    out = jnp.zeros((n * c, n * c), blocks[0].dtype)
    for i, b in enumerate(blocks):
        out = out.at[i * c:(i + 1) * c, i * c:(i + 1) * c].set(b)
    return out


# ----------------------------------------------------------------------------
# Wrapper
# ----------------------------------------------------------------------------
@jax.jit
def tamm_forward(x, params):
    """x: (B, C, H, W) float32 (PyTorch NCHW layout)."""
    B, C, H, W = x.shape
    HW = H * W
    R = params["w2"].shape[0]
    dmax = max(DILATIONS)
    PAD = ((dmax * W + dmax) + 127) // 128 * 128   # lane-aligned halo padding

    def bn4(p):      # folded-BN params, lane-packed [dw_s, dw_b, pw_s, pw_b]
        return jnp.stack([p["dw_scale"], p["dw_bias"],
                          p["pw_scale"], p["pw_bias"]], axis=1)

    all5 = [params["conv"]] + list(params["branches"])
    # depthwise taps lane-packed: (5, C, 9), lane j = 3*kh + kw
    wdw = jnp.stack([p["wdw"].reshape(9, C).T for p in all5])
    bn0 = bn4(params["conv"])                                        # (C, 4)
    bnst = jnp.concatenate([bn4(p) for p in params["branches"]], 0)  # (4C, 4)
    # pointwise weights pre-cast to bf16 on the host; branch weights fused into
    # one block-diagonal (4C, 4C) matrix.
    w0 = params["conv"]["wpw"].T.astype(jnp.bfloat16)                # (C, C)
    wblk = _block_diag([p["wpw"].T for p in params["branches"]]
                       ).astype(jnp.bfloat16)                        # (4C, 4C)
    w1k = jnp.transpose(params["w1"], (2, 1, 0))                     # (R, C, 21)
    w2t = params["w2"].T                                             # (C, R)
    wmask = jnp.asarray(_w_masks(H, W))                              # (4, 2, HW)
    mpool = jnp.asarray(_pool_matrix(H, W))                          # (HW, 21)

    x2 = x.reshape(B, C, HW)
    kern = functools.partial(_tamm_kernel, C=C, H=H, W=W, PAD=PAD)
    # grid=(B,) "parallel": one batch element per TensorCore on v7x.  On the
    # single-core v5e/v6e this is just a short sequential loop; merging B into
    # the lane axis is an optional further tweak there.
    out = pl.pallas_call(
        kern,
        out_shape=jax.ShapeDtypeStruct((B, C, HW), jnp.float32),
        grid=(B,),
        in_specs=[
            pl.BlockSpec((1, C, HW), lambda b: (b, 0, 0)),
            pl.BlockSpec((5, C, 9), lambda b: (0, 0, 0)),
            pl.BlockSpec((C, 4), lambda b: (0, 0)),
            pl.BlockSpec((4 * C, 4), lambda b: (0, 0)),
            pl.BlockSpec((C, C), lambda b: (0, 0)),
            pl.BlockSpec((4 * C, 4 * C), lambda b: (0, 0)),
            pl.BlockSpec((len(DILATIONS), 2, HW), lambda b: (0, 0, 0)),
            pl.BlockSpec((HW, 21), lambda b: (0, 0)),
            pl.BlockSpec((R, C, 21), lambda b: (0, 0, 0)),
            pl.BlockSpec((C, R), lambda b: (0, 0)),
        ],
        out_specs=pl.BlockSpec((1, C, HW), lambda b: (b, 0, 0)),
        scratch_shapes=[
            pltpu.VMEM((C, HW + 2 * PAD), jnp.float32),   # zero-halo line buffer
            pltpu.VMEM((4 * C, HW), jnp.float32),         # stacked branch acts
        ],
        input_output_aliases={0: 0},        # output reuses x's HBM buffer
        compiler_params=pltpu.CompilerParams(
            dimension_semantics=("parallel",)),
    )(x2, wdw, bn0, bnst, w0, wblk, wmask, mpool, w1k, w2t)
    return out.reshape(B, C, H, W)


# ----------------------------------------------------------------------------
# Deterministic parameter init (synthetic; BN folded in inference mode)
# ----------------------------------------------------------------------------
def _bn_fold(key, C):
    k1, k2, k3, k4 = jax.random.split(key, 4)
    gamma = 1.0 + 0.1 * jax.random.normal(k1, (C,), jnp.float32)
    beta = 0.1 * jax.random.normal(k2, (C,), jnp.float32)
    mean = 0.1 * jax.random.normal(k3, (C,), jnp.float32)
    var = 0.5 + jax.random.uniform(k4, (C,), jnp.float32)
    scale = gamma / jnp.sqrt(var + 1e-5)
    bias = beta - mean * scale
    return scale, bias


def init_dsconv_params(key, C):
    kd, kp, kb1, kb2 = jax.random.split(key, 4)
    # PyTorch depthwise weight (C,1,3,3) stored as (3,3,C);
    # 1x1 conv weight (Cout,Cin,1,1) stored as (Cin,Cout).
    wdw = 0.2 * jax.random.normal(kd, (3, 3, C), jnp.float32)
    wpw = jax.random.normal(kp, (C, C), jnp.float32) / jnp.sqrt(C)
    dws, dwb = _bn_fold(kb1, C)
    pws, pwb = _bn_fold(kb2, C)
    return dict(wdw=wdw, dw_scale=dws, dw_bias=dwb,
                wpw=wpw, pw_scale=pws, pw_bias=pwb)


def init_tamm_params(key, C, reduce_factor=4):
    R = C // reduce_factor
    keys = jax.random.split(key, 7)
    # w1 rows ordered: [1x1 pool, 2x2 pool row-major, 4x4 pool row-major],
    # channel fastest (a fixed permutation of the PyTorch Linear's input).
    return dict(
        conv=init_dsconv_params(keys[0], C),
        branches=[init_dsconv_params(keys[1 + i], C) for i in range(4)],
        w1=jax.random.normal(keys[5], (21, C, R), jnp.float32) / jnp.sqrt(21 * C),
        w2=jax.random.normal(keys[6], (R, C), jnp.float32) / jnp.sqrt(R),
    )


# ----------------------------------------------------------------------------
# Pure-JAX reference (same math; emulates the kernel's bf16 MXU matmuls with
# bf16-rounded operands + f32 accumulation so it runs on any backend).
# ----------------------------------------------------------------------------
def _dsconv_ref(x, p, d):
    B, C, H, W = x.shape
    xp = jnp.pad(x, ((0, 0), (0, 0), (d, d), (d, d)))
    acc = jnp.zeros_like(x)
    for kh in range(3):
        for kw in range(3):
            acc = acc + (xp[:, :, kh * d:kh * d + H, kw * d:kw * d + W]
                         * p["wdw"][kh, kw][None, :, None, None])
    z = jnp.maximum(acc * p["dw_scale"][None, :, None, None]
                    + p["dw_bias"][None, :, None, None], 0.0)
    # bf16-rounded operands, f32 accumulation (no bf16 x bf16 dot on CPU).
    z16 = z.astype(jnp.bfloat16).astype(jnp.float32)
    w16 = p["wpw"].astype(jnp.bfloat16).astype(jnp.float32)
    pw = jnp.einsum("bchw,cd->bdhw", z16, w16, precision="highest")
    return jnp.maximum(pw * p["pw_scale"][None, :, None, None]
                       + p["pw_bias"][None, :, None, None], 0.0)


@jax.jit
def tamm_reference(x, params):
    B, C, H, W = x.shape
    conv = _dsconv_ref(x, params["conv"], 1)
    gather = conv
    for i, d in enumerate(DILATIONS):
        gather = gather + _dsconv_ref(conv, params["branches"][i], d)

    def pool(n):
        return gather.reshape(B, C, n, H // n, n, W // n).mean(axis=(3, 5)) \
                     .reshape(B, C, n * n)

    P = jnp.concatenate(
        [gather.mean(axis=(2, 3))[:, :, None], pool(2), pool(4)], axis=2)  # (B,C,21)
    hidden = jnp.maximum(
        jnp.einsum("bcs,scr->br", P, params["w1"], precision="highest"), 0.0)
    att = jax.nn.sigmoid(
        jnp.einsum("br,rc->bc", hidden, params["w2"], precision="highest"))
    return gather * att[:, :, None, None] + x


# ----------------------------------------------------------------------------
if __name__ == "__main__":
    # TODO(synk): BatchNorm2d is folded in inference mode; training-mode batch
    # statistics are not modeled.
    B, C, H, W = 2, 32, 16, 16            # PyTorch NCHW input (2, 32, 16, 16)
    key = jax.random.PRNGKey(0)
    kp, kx = jax.random.split(key)
    params = init_tamm_params(kp, C)
    x = jax.random.normal(kx, (B, C, H, W), jnp.float32)

    out = jax.block_until_ready(tamm_forward(x, params))
    ref = jax.block_until_ready(tamm_reference(x, params))

    assert out.shape == (B, C, H, W)
    err = float(jnp.max(jnp.abs(out - ref)))
    assert err < 1e-3, f"max abs error too large: {err}"
    print("KERNEL_OK")
</pallas_src>

<mosaic_0001>
module attributes {stable_mosaic.version = 11 : i64} {
  func.func @_tamm_kernel(%arg0: i32, %arg1: memref<1x32x256xf32, #tpu.memory_space<vmem>>, %arg2: memref<5x32x9xf32, #tpu.memory_space<vmem>>, %arg3: memref<32x4xf32, #tpu.memory_space<vmem>>, %arg4: memref<128x4xf32, #tpu.memory_space<vmem>>, %arg5: memref<32x32xbf16, #tpu.memory_space<vmem>>, %arg6: memref<128x128xbf16, #tpu.memory_space<vmem>>, %arg7: memref<4x2x256xf32, #tpu.memory_space<vmem>>, %arg8: memref<256x21xf32, #tpu.memory_space<vmem>>, %arg9: memref<8x32x21xf32, #tpu.memory_space<vmem>>, %arg10: memref<32x8xf32, #tpu.memory_space<vmem>>, %arg11: memref<1x32x256xf32, #tpu.memory_space<vmem>>, %arg12: memref<32x768xf32, #tpu.memory_space<vmem>>, %arg13: memref<128x256xf32, #tpu.memory_space<vmem>>) attributes {dimension_semantics = [#tpu.dimension_semantics<parallel>], iteration_bounds = array<i64: 2>, scalar_prefetch = 0 : i64, scratch_operands = 2 : i64, tpu.core_type = #tpu.core_type<tc>, window_params = [{transform_indices = @transform_0, window_bounds = array<i64: 1, 32, 256>}, {pipeline_mode = #tpu.pipeline_mode<synchronous>, transform_indices = @transform_1, window_bounds = array<i64: 5, 32, 9>}, {pipeline_mode = #tpu.pipeline_mode<synchronous>, transform_indices = @transform_2, window_bounds = array<i64: 32, 4>}, {pipeline_mode = #tpu.pipeline_mode<synchronous>, transform_indices = @transform_3, window_bounds = array<i64: 128, 4>}, {pipeline_mode = #tpu.pipeline_mode<synchronous>, transform_indices = @transform_4, window_bounds = array<i64: 32, 32>}, {pipeline_mode = #tpu.pipeline_mode<synchronous>, transform_indices = @transform_5, window_bounds = array<i64: 128, 128>}, {pipeline_mode = #tpu.pipeline_mode<synchronous>, transform_indices = @transform_6, window_bounds = array<i64: 4, 2, 256>}, {pipeline_mode = #tpu.pipeline_mode<synchronous>, transform_indices = @transform_7, window_bounds = array<i64: 256, 21>}, {pipeline_mode = #tpu.pipeline_mode<synchronous>, transform_indices = @transform_8, window_bounds = array<i64: 8, 32, 21>}, {pipeline_mode = #tpu.pipeline_mode<synchronous>, transform_indices = @transform_9, window_bounds = array<i64: 32, 8>}, {transform_indices = @transform_10, window_bounds = array<i64: 1, 32, 256>}]} {
    %cst = arith.constant 0.000000e+00 : f32
    %0 = vector.broadcast %cst : f32 to vector<32x256xf32>
    %c0 = arith.constant 0 : index
    %c0_0 = arith.constant 0 : index
    %1 = vector.load %arg12[%c0, %c0_0] : memref<32x768xf32, #tpu.memory_space<vmem>>, vector<32x256xf32>
    tpu.vector_store %arg12[%c0, %c0_0], %0 {strides = array<i32>} : memref<32x768xf32, #tpu.memory_space<vmem>>, vector<32x256xf32>,
    %cst_1 = arith.constant 0.000000e+00 : f32
    %2 = vector.broadcast %cst_1 : f32 to vector<32x256xf32>
    %c0_2 = arith.constant 0 : index
    %c512 = arith.constant 512 : index
    %3 = vector.load %arg12[%c0_2, %c512] : memref<32x768xf32, #tpu.memory_space<vmem>>, vector<32x256xf32>
    tpu.vector_store %arg12[%c0_2, %c512], %2 {strides = array<i32>} : memref<32x768xf32, #tpu.memory_space<vmem>>, vector<32x256xf32>,
    %c0_3 = arith.constant 0 : index
    %c0_4 = arith.constant 0 : index
    %c0_5 = arith.constant 0 : index
    %4 = vector.load %arg1[%c0_3, %c0_4, %c0_5] : memref<1x32x256xf32, #tpu.memory_space<vmem>>, vector<1x32x256xf32>
    %5 = vector.shape_cast %4 : vector<1x32x256xf32> to vector<32x256xf32>
    %c0_6 = arith.constant 0 : index
    %c256 = arith.constant 256 : index
    %6 = vector.load %arg12[%c0_6, %c256] : memref<32x768xf32, #tpu.memory_space<vmem>>, vector<32x256xf32>
    tpu.vector_store %arg12[%c0_6, %c256], %5 {strides = array<i32>} : memref<32x768xf32, #tpu.memory_space<vmem>>, vector<32x256xf32>,
    %c0_7 = arith.constant 0 : index
    %c0_8 = arith.constant 0 : index
    %c0_9 = arith.constant 0 : index
    %7 = vector.load %arg2[%c0_7, %c0_8, %c0_9] : memref<5x32x9xf32, #tpu.memory_space<vmem>>, vector<1x32x9xf32>
    %8 = vector.shape_cast %7 : vector<1x32x9xf32> to vector<32x9xf32>
    %c0_10 = arith.constant 0 : index
    %c0_11 = arith.constant 0 : index
    %c0_12 = arith.constant 0 : index
    %9 = vector.load %arg7[%c0_10, %c0_11, %c0_12] : memref<4x2x256xf32, #tpu.memory_space<vmem>>, vector<1x2x256xf32>
    %10 = vector.shape_cast %9 : vector<1x2x256xf32> to vector<2x256xf32>
    %cst_13 = arith.constant 0.000000e+00 : f32
    %11 = vector.broadcast %cst_13 : f32 to vector<32x256xf32>
    %c0_14 = arith.constant 0 : index
    %c239 = arith.constant 239 : index
    %12 = vector.load %arg12[%c0_14, %c239] : memref<32x768xf32, #tpu.memory_space<vmem>>, vector<32x256xf32>
    %13 = vector.extract_strided_slice %10 {offsets = [0, 0], sizes = [1, 256], strides = [1, 1]} : vector<2x256xf32> to vector<1x256xf32>
    %14 = vector.shape_cast %13 : vector<1x256xf32> to vector<256xf32>
    %15 = vector.shape_cast %14 : vector<256xf32> to vector<1x256xf32>
    %16 = vector.broadcast %15 : vector<1x256xf32> to vector<32x256xf32>
    %17 = arith.mulf %12, %16 : vector<32x256xf32>
    %18 = vector.extract_strided_slice %8 {offsets = [0, 0], sizes = [32, 1], strides = [1, 1]} : vector<32x9xf32> to vector<32x1xf32>
    %19 = vector.broadcast %18 : vector<32x1xf32> to vector<32x256xf32>
    %20 = arith.mulf %17, %19 : vector<32x256xf32>
    %21 = arith.addf %11, %20 : vector<32x256xf32>
    %c0_15 = arith.constant 0 : index
    %c240 = arith.constant 240 : index
    %22 = vector.load %arg12[%c0_15, %c240] : memref<32x768xf32, #tpu.memory_space<vmem>>, vector<32x256xf32>
    %23 = vector.extract_strided_slice %8 {offsets = [0, 1], sizes = [32, 1], strides = [1, 1]} : vector<32x9xf32> to vector<32x1xf32>
    %24 = vector.broadcast %23 : vector<32x1xf32> to vector<32x256xf32>
    %25 = arith.mulf %22, %24 : vector<32x256xf32>
    %26 = arith.addf %21, %25 : vector<32x256xf32>
    %c0_16 = arith.constant 0 : index
    %c241 = arith.constant 241 : index
    %27 = vector.load %arg12[%c0_16, %c241] : memref<32x768xf32, #tpu.memory_space<vmem>>, vector<32x256xf32>
    %28 = vector.extract_strided_slice %10 {offsets = [1, 0], sizes = [1, 256], strides = [1, 1]} : vector<2x256xf32> to vector<1x256xf32>
    %29 = vector.shape_cast %28 : vector<1x256xf32> to vector<256xf32>
    %30 = vector.shape_cast %29 : vector<256xf32> to vector<1x256xf32>
    %31 = vector.broadcast %30 : vector<1x256xf32> to vector<32x256xf32>
    %32 = arith.mulf %27, %31 : vector<32x256xf32>
    %33 = vector.extract_strided_slice %8 {offsets = [0, 2], sizes = [32, 1], strides = [1, 1]} : vector<32x9xf32> to vector<32x1xf32>
    %34 = vector.broadcast %33 : vector<32x1xf32> to vector<32x256xf32>
    %35 = arith.mulf %32, %34 : vector<32x256xf32>
    %36 = arith.addf %26, %35 : vector<32x256xf32>
    %c0_17 = arith.constant 0 : index
    %c255 = arith.constant 255 : index
    %37 = vector.load %arg12[%c0_17, %c255] : memref<32x768xf32, #tpu.memory_space<vmem>>, vector<32x256xf32>
    %38 = vector.extract_strided_slice %10 {offsets = [0, 0], sizes = [1, 256], strides = [1, 1]} : vector<2x256xf32> to vector<1x256xf32>
    %39 = vector.shape_cast %38 : vector<1x256xf32> to vector<256xf32>
    %40 = vector.shape_cast %39 : vector<256xf32> to vector<1x256xf32>
    %41 = vector.broadcast %40 : vector<1x256xf32> to vector<32x256xf32>
    %42 = arith.mulf %37, %41 : vector<32x256xf32>
    %43 = vector.extract_strided_slice %8 {offsets = [0, 3], sizes = [32, 1], strides = [1, 1]} : vector<32x9xf32> to vector<32x1xf32>
    %44 = vector.broadcast %43 : vector<32x1xf32> to vector<32x256xf32>
    %45 = arith.mulf %42, %44 : vector<32x256xf32>
    %46 = arith.addf %36, %45 : vector<32x256xf32>
    %c0_18 = arith.constant 0 : index
    %c256_19 = arith.constant 256 : index
    %47 = vector.load %arg12[%c0_18, %c256_19] : memref<32x768xf32, #tpu.memory_space<vmem>>, vector<32x256xf32>
    %48 = vector.extract_strided_slice %8 {offsets = [0, 4], sizes = [32, 1], strides = [1, 1]} : vector<32x9xf32> to vector<32x1xf32>
    %49 = vector.broadcast %48 : vector<32x1xf32> to vector<32x256xf32>
    %50 = arith.mulf %47, %49 : vector<32x256xf32>
    %51 = arith.addf %46, %50 : vector<32x256xf32>
    %c0_20 = arith.constant 0 : index
    %c257 = arith.constant 257 : index
    %52 = vector.load %arg12[%c0_20, %c257] : memref<32x768xf32, #tpu.memory_space<vmem>>, vector<32x256xf32>
    %53 = vector.extract_strided_slice %10 {offsets = [1, 0], sizes = [1, 256], strides = [1, 1]} : vector<2x256xf32> to vector<1x256xf32>
    %54 = vector.shape_cast %53 : vector<1x256xf32> to vector<256xf32>
    %55 = vector.shape_cast %54 : vector<256xf32> to vector<1x256xf32>
    %56 = vector.broadcast %55 : vector<1x256xf32> to vector<32x256xf32>
    %57 = arith.mulf %52, %56 : vector<32x256xf32>
    %58 = vector.extract_strided_slice %8 {offsets = [0, 5], sizes = [32, 1], strides = [1, 1]} : vector<32x9xf32> to vector<32x1xf32>
    %59 = vector.broadcast %58 : vector<32x1xf32> to vector<32x256xf32>
    %60 = arith.mulf %57, %59 : vector<32x256xf32>
    %61 = arith.addf %51, %60 : vector<32x256xf32>
    %c0_21 = arith.constant 0 : index
    %c271 = arith.constant 271 : index
    %62 = vector.load %arg12[%c0_21, %c271] : memref<32x768xf32, #tpu.memory_space<vmem>>, vector<32x256xf32>
    %63 = vector.extract_strided_slice %10 {offsets = [0, 0], sizes = [1, 256], strides = [1, 1]} : vector<2x256xf32> to vector<1x256xf32>
    %64 = vector.shape_cast %63 : vector<1x256xf32> to vector<256xf32>
    %65 = vector.shape_cast %64 : vector<256xf32> to vector<1x256xf32>
    %66 = vector.broadcast %65 : vector<1x256xf32> to vector<32x256xf32>
    %67 = arith.mulf %62, %66 : vector<32x256xf32>
    %68 = vector.extract_strided_slice %8 {offsets = [0, 6], sizes = [32, 1], strides = [1, 1]} : vector<32x9xf32> to vector<32x1xf32>
    %69 = vector.broadcast %68 : vector<32x1xf32> to vector<32x256xf32>
    %70 = arith.mulf %67, %69 : vector<32x256xf32>
    %71 = arith.addf %61, %70 : vector<32x256xf32>
    %c0_22 = arith.constant 0 : index
    %c272 = arith.constant 272 : index
    %72 = vector.load %arg12[%c0_22, %c272] : memref<32x768xf32, #tpu.memory_space<vmem>>, vector<32x256xf32>
    %73 = vector.extract_strided_slice %8 {offsets = [0, 7], sizes = [32, 1], strides = [1, 1]} : vector<32x9xf32> to vector<32x1xf32>
    %74 = vector.broadcast %73 : vector<32x1xf32> to vector<32x256xf32>
    %75 = arith.mulf %72, %74 : vector<32x256xf32>
    %76 = arith.addf %71, %75 : vector<32x256xf32>
    %c0_23 = arith.constant 0 : index
    %c273 = arith.constant 273 : index
    %77 = vector.load %arg12[%c0_23, %c273] : memref<32x768xf32, #tpu.memory_space<vmem>>, vector<32x256xf32>
    %78 = vector.extract_strided_slice %10 {offsets = [1, 0], sizes = [1, 256], strides = [1, 1]} : vector<2x256xf32> to vector<1x256xf32>
    %79 = vector.shape_cast %78 : vector<1x256xf32> to vector<256xf32>
    %80 = vector.shape_cast %79 : vector<256xf32> to vector<1x256xf32>
    %81 = vector.broadcast %80 : vector<1x256xf32> to vector<32x256xf32>
    %82 = arith.mulf %77, %81 : vector<32x256xf32>
    %83 = vector.extract_strided_slice %8 {offsets = [0, 8], sizes = [32, 1], strides = [1, 1]} : vector<32x9xf32> to vector<32x1xf32>
    %84 = vector.broadcast %83 : vector<32x1xf32> to vector<32x256xf32>
    %85 = arith.mulf %82, %84 : vector<32x256xf32>
    %86 = arith.addf %76, %85 : vector<32x256xf32>
    %c0_24 = arith.constant 0 : index
    %c0_25 = arith.constant 0 : index
    %87 = vector.load %arg3[%c0_24, %c0_25] : memref<32x4xf32, #tpu.memory_space<vmem>>, vector<32x1xf32>
    %88 = vector.broadcast %87 : vector<32x1xf32> to vector<32x256xf32>
    %89 = arith.mulf %86, %88 : vector<32x256xf32>
    %c0_26 = arith.constant 0 : index
    %c1 = arith.constant 1 : index
    %90 = vector.load %arg3[%c0_26, %c1] : memref<32x4xf32, #tpu.memory_space<vmem>>, vector<32x1xf32>
    %91 = vector.broadcast %90 : vector<32x1xf32> to vector<32x256xf32>
    %92 = arith.addf %89, %91 : vector<32x256xf32>
    %cst_27 = arith.constant 0.000000e+00 : f32
    %93 = vector.broadcast %cst_27 : f32 to vector<32x256xf32>
    %94 = arith.maximumf %92, %93 : vector<32x256xf32>
    %c0_28 = arith.constant 0 : index
    %c0_29 = arith.constant 0 : index
    %95 = vector.load %arg5[%c0_28, %c0_29] : memref<32x32xbf16, #tpu.memory_space<vmem>>, vector<32x32xbf16>
    %96 = arith.truncf %94 : vector<32x256xf32> to vector<32x256xbf16>
    %cst_30 = arith.constant dense<0.000000e+00> : vector<32x256xf32>
    %97 = tpu.matmul %95, %96, %cst_30 {dimension_numbers = #tpu.dot_dimension_numbers<[1], [0], [0], [1], [0, 0, 1, 1], [], []>} : vector<32x32xbf16>, vector<32x256xbf16>, vector<32x256xf32> -> vector<32x256xf32>
    %c0_31 = arith.constant 0 : index
    %c2 = arith.constant 2 : index
    %98 = vector.load %arg3[%c0_31, %c2] : memref<32x4xf32, #tpu.memory_space<vmem>>, vector<32x1xf32>
    %99 = vector.broadcast %98 : vector<32x1xf32> to vector<32x256xf32>
    %100 = arith.mulf %97, %99 : vector<32x256xf32>
    %c0_32 = arith.constant 0 : index
    %c3 = arith.constant 3 : index
    %101 = vector.load %arg3[%c0_32, %c3] : memref<32x4xf32, #tpu.memory_space<vmem>>, vector<32x1xf32>
    %102 = vector.broadcast %101 : vector<32x1xf32> to vector<32x256xf32>
    %103 = arith.addf %100, %102 : vector<32x256xf32>
    %cst_33 = arith.constant 0.000000e+00 : f32
    %104 = vector.broadcast %cst_33 : f32 to vector<32x256xf32>
    %105 = arith.maximumf %103, %104 : vector<32x256xf32>
    %c0_34 = arith.constant 0 : index
    %c256_35 = arith.constant 256 : index
    %106 = vector.load %arg12[%c0_34, %c256_35] : memref<32x768xf32, #tpu.memory_space<vmem>>, vector<32x256xf32>
    tpu.vector_store %arg12[%c0_34, %c256_35], %105 {strides = array<i32>} : memref<32x768xf32, #tpu.memory_space<vmem>>, vector<32x256xf32>,
    %c1_36 = arith.constant 1 : index
    %c0_37 = arith.constant 0 : index
    %c0_38 = arith.constant 0 : index
    %107 = vector.load %arg2[%c1_36, %c0_37, %c0_38] : memref<5x32x9xf32, #tpu.memory_space<vmem>>, vector<1x32x9xf32>
    %108 = vector.shape_cast %107 : vector<1x32x9xf32> to vector<32x9xf32>
    %c0_39 = arith.constant 0 : index
    %c0_40 = arith.constant 0 : index
    %c0_41 = arith.constant 0 : index
    %109 = vector.load %arg7[%c0_39, %c0_40, %c0_41] : memref<4x2x256xf32, #tpu.memory_space<vmem>>, vector<1x2x256xf32>
    %110 = vector.shape_cast %109 : vector<1x2x256xf32> to vector<2x256xf32>
    %cst_42 = arith.constant 0.000000e+00 : f32
    %111 = vector.broadcast %cst_42 : f32 to vector<32x256xf32>
    %c0_43 = arith.constant 0 : index
    %c239_44 = arith.constant 239 : index
    %112 = vector.load %arg12[%c0_43, %c239_44] : memref<32x768xf32, #tpu.memory_space<vmem>>, vector<32x256xf32>
    %113 = vector.extract_strided_slice %110 {offsets = [0, 0], sizes = [1, 256], strides = [1, 1]} : vector<2x256xf32> to vector<1x256xf32>
    %114 = vector.shape_cast %113 : vector<1x256xf32> to vector<256xf32>
    %115 = vector.shape_cast %114 : vector<256xf32> to vector<1x256xf32>
    %116 = vector.broadcast %115 : vector<1x256xf32> to vector<32x256xf32>
    %117 = arith.mulf %112, %116 : vector<32x256xf32>
    %118 = vector.extract_strided_slice %108 {offsets = [0, 0], sizes = [32, 1], strides = [1, 1]} : vector<32x9xf32> to vector<32x1xf32>
    %119 = vector.broadcast %118 : vector<32x1xf32> to vector<32x256xf32>
    %120 = arith.mulf %117, %119 : vector<32x256xf32>
    %121 = arith.addf %111, %120 : vector<32x256xf32>
    %c0_45 = arith.constant 0 : index
    %c240_46 = arith.constant 240 : index
    %122 = vector.load %arg12[%c0_45, %c240_46] : memref<32x768xf32, #tpu.memory_space<vmem>>, vector<32x256xf32>
    %123 = vector.extract_strided_slice %108 {offsets = [0, 1], sizes = [32, 1], strides = [1, 1]} : vector<32x9xf32> to vector<32x1xf32>
    %124 = vector.broadcast %123 : vector<32x1xf32> to vector<32x256xf32>
    %125 = arith.mulf %122, %124 : vector<32x256xf32>
    %126 = arith.addf %121, %125 : vector<32x256xf32>
    %c0_47 = arith.constant 0 : index
    %c241_48 = arith.constant 241 : index
    %127 = vector.load %arg12[%c0_47, %c241_48] : memref<32x768xf32, #tpu.memory_space<vmem>>, vector<32x256xf32>
    %128 = vector.extract_strided_slice %110 {offsets = [1, 0], sizes = [1, 256], strides = [1, 1]} : vector<2x256xf32> to vector<1x256xf32>
    %129 = vector.shape_cast %128 : vector<1x256xf32> to vector<256xf32>
    %130 = vector.shape_cast %129 : vector<256xf32> to vector<1x256xf32>
    %131 = vector.broadcast %130 : vector<1x256xf32> to vector<32x256xf32>
    %132 = arith.mulf %127, %131 : vector<32x256xf32>
    %133 = vector.extract_strided_slice %108 {offsets = [0, 2], sizes = [32, 1], strides = [1, 1]} : vector<32x9xf32> to vector<32x1xf32>
    %134 = vector.broadcast %133 : vector<32x1xf32> to vector<32x256xf32>
    %135 = arith.mulf %132, %134 : vector<32x256xf32>
    %136 = arith.addf %126, %135 : vector<32x256xf32>
    %c0_49 = arith.constant 0 : index
    %c255_50 = arith.constant 255 : index
    %137 = vector.load %arg12[%c0_49, %c255_50] : memref<32x768xf32, #tpu.memory_space<vmem>>, vector<32x256xf32>
    %138 = vector.extract_strided_slice %110 {offsets = [0, 0], sizes = [1, 256], strides = [1, 1]} : vector<2x256xf32> to vector<1x256xf32>
    %139 = vector.shape_cast %138 : vector<1x256xf32> to vector<256xf32>
    %140 = vector.shape_cast %139 : vector<256xf32> to vector<1x256xf32>
    %141 = vector.broadcast %140 : vector<1x256xf32> to vector<32x256xf32>
    %142 = arith.mulf %137, %141 : vector<32x256xf32>
    %143 = vector.extract_strided_slice %108 {offsets = [0, 3], sizes = [32, 1], strides = [1, 1]} : vector<32x9xf32> to vector<32x1xf32>
    %144 = vector.broadcast %143 : vector<32x1xf32> to vector<32x256xf32>
    %145 = arith.mulf %142, %144 : vector<32x256xf32>
    %146 = arith.addf %136, %145 : vector<32x256xf32>
    %c0_51 = arith.constant 0 : index
    %c256_52 = arith.constant 256 : index
    %147 = vector.load %arg12[%c0_51, %c256_52] : memref<32x768xf32, #tpu.memory_space<vmem>>, vector<32x256xf32>
    %148 = vector.extract_strided_slice %108 {offsets = [0, 4], sizes = [32, 1], strides = [1, 1]} : vector<32x9xf32> to vector<32x1xf32>
    %149 = vector.broadcast %148 : vector<32x1xf32> to vector<32x256xf32>
    %150 = arith.mulf %147, %149 : vector<32x256xf32>
    %151 = arith.addf %146, %150 : vector<32x256xf32>
    %c0_53 = arith.constant 0 : index
    %c257_54 = arith.constant 257 : index
    %152 = vector.load %arg12[%c0_53, %c257_54] : memref<32x768xf32, #tpu.memory_space<vmem>>, vector<32x256xf32>
    %153 = vector.extract_strided_slice %110 {offsets = [1, 0], sizes = [1, 256], strides = [1, 1]} : vector<2x256xf32> to vector<1x256xf32>
    %154 = vector.shape_cast %153 : vector<1x256xf32> to vector<256xf32>
    %155 = vector.shape_cast %154 : vector<256xf32> to vector<1x256xf32>
    %156 = vector.broadcast %155 : vector<1x256xf32> to vector<32x256xf32>
    %157 = arith.mulf %152, %156 : vector<32x256xf32>
    %158 = vector.extract_strided_slice %108 {offsets = [0, 5], sizes = [32, 1], strides = [1, 1]} : vector<32x9xf32> to vector<32x1xf32>
    %159 = vector.broadcast %158 : vector<32x1xf32> to vector<32x256xf32>
    %160 = arith.mulf %157, %159 : vector<32x256xf32>
    %161 = arith.addf %151, %160 : vector<32x256xf32>
    %c0_55 = arith.constant 0 : index
    %c271_56 = arith.constant 271 : index
    %162 = vector.load %arg12[%c0_55, %c271_56] : memref<32x768xf32, #tpu.memory_space<vmem>>, vector<32x256xf32>
    %163 = vector.extract_strided_slice %110 {offsets = [0, 0], sizes = [1, 256], strides = [1, 1]} : vector<2x256xf32> to vector<1x256xf32>
    %164 = vector.shape_cast %163 : vector<1x256xf32> to vector<256xf32>
    %165 = vector.shape_cast %164 : vector<256xf32> to vector<1x256xf32>
    %166 = vector.broadcast %165 : vector<1x256xf32> to vector<32x256xf32>
    %167 = arith.mulf %162, %166 : vector<32x256xf32>
    %168 = vector.extract_strided_slice %108 {offsets = [0, 6], sizes = [32, 1], strides = [1, 1]} : vector<32x9xf32> to vector<32x1xf32>
    %169 = vector.broadcast %168 : vector<32x1xf32> to vector<32x256xf32>
    %170 = arith.mulf %167, %169 : vector<32x256xf32>
    %171 = arith.addf %161, %170 : vector<32x256xf32>
    %c0_57 = arith.constant 0 : index
    %c272_58 = arith.constant 272 : index
    %172 = vector.load %arg12[%c0_57, %c272_58] : memref<32x768xf32, #tpu.memory_space<vmem>>, vector<32x256xf32>
    %173 = vector.extract_strided_slice %108 {offsets = [0, 7], sizes = [32, 1], strides = [1, 1]} : vector<32x9xf32> to vector<32x1xf32>
    %174 = vector.broadcast %173 : vector<32x1xf32> to vector<32x256xf32>
    %175 = arith.mulf %172, %174 : vector<32x256xf32>
    %176 = arith.addf %171, %175 : vector<32x256xf32>
    %c0_59 = arith.constant 0 : index
    %c273_60 = arith.constant 273 : index
    %177 = vector.load %arg12[%c0_59, %c273_60] : memref<32x768xf32, #tpu.memory_space<vmem>>, vector<32x256xf32>
    %178 = vector.extract_strided_slice %110 {offsets = [1, 0], sizes = [1, 256], strides = [1, 1]} : vector<2x256xf32> to vector<1x256xf32>
    %179 = vector.shape_cast %178 : vector<1x256xf32> to vector<256xf32>
    %180 = vector.shape_cast %179 : vector<256xf32> to vector<1x256xf32>
    %181 = vector.broadcast %180 : vector<1x256xf32> to vector<32x256xf32>
    %182 = arith.mulf %177, %181 : vector<32x256xf32>
    %183 = vector.extract_strided_slice %108 {offsets = [0, 8], sizes = [32, 1], strides = [1, 1]} : vector<32x9xf32> to vector<32x1xf32>
    %184 = vector.broadcast %183 : vector<32x1xf32> to vector<32x256xf32>
    %185 = arith.mulf %182, %184 : vector<32x256xf32>
    %186 = arith.addf %176, %185 : vector<32x256xf32>
    %c0_61 = arith.constant 0 : index
    %c0_62 = arith.constant 0 : index
    %187 = vector.load %arg13[%c0_61, %c0_62] : memref<128x256xf32, #tpu.memory_space<vmem>>, vector<32x256xf32>
    tpu.vector_store %arg13[%c0_61, %c0_62], %186 {strides = array<i32>} : memref<128x256xf32, #tpu.memory_space<vmem>>, vector<32x256xf32>,
    %c2_63 = arith.constant 2 : index
    %c0_64 = arith.constant 0 : index
    %c0_65 = arith.constant 0 : index
    %188 = vector.load %arg2[%c2_63, %c0_64, %c0_65] : memref<5x32x9xf32, #tpu.memory_space<vmem>>, vector<1x32x9xf32>
    %189 = vector.shape_cast %188 : vector<1x32x9xf32> to vector<32x9xf32>
    %c1_66 = arith.constant 1 : index
    %c0_67 = arith.constant 0 : index
    %c0_68 = arith.constant 0 : index
    %190 = vector.load %arg7[%c1_66, %c0_67, %c0_68] : memref<4x2x256xf32, #tpu.memory_space<vmem>>, vector<1x2x256xf32>
    %191 = vector.shape_cast %190 : vector<1x2x256xf32> to vector<2x256xf32>
    %cst_69 = arith.constant 0.000000e+00 : f32
    %192 = vector.broadcast %cst_69 : f32 to vector<32x256xf32>
    %c0_70 = arith.constant 0 : index
    %c222 = arith.constant 222 : index
    %193 = vector.load %arg12[%c0_70, %c222] : memref<32x768xf32, #tpu.memory_space<vmem>>, vector<32x256xf32>
    %194 = vector.extract_strided_slice %191 {offsets = [0, 0], sizes = [1, 256], strides = [1, 1]} : vector<2x256xf32> to vector<1x256xf32>
    %195 = vector.shape_cast %194 : vector<1x256xf32> to vector<256xf32>
    %196 = vector.shape_cast %195 : vector<256xf32> to vector<1x256xf32>
    %197 = vector.broadcast %196 : vector<1x256xf32> to vector<32x256xf32>
    %198 = arith.mulf %193, %197 : vector<32x256xf32>
    %199 = vector.extract_strided_slice %189 {offsets = [0, 0], sizes = [32, 1], strides = [1, 1]} : vector<32x9xf32> to vector<32x1xf32>
    %200 = vector.broadcast %199 : vector<32x1xf32> to vector<32x256xf32>
    %201 = arith.mulf %198, %200 : vector<32x256xf32>
    %202 = arith.addf %192, %201 : vector<32x256xf32>
    %c0_71 = arith.constant 0 : index
    %c224 = arith.constant 224 : index
    %203 = vector.load %arg12[%c0_71, %c224] : memref<32x768xf32, #tpu.memory_space<vmem>>, vector<32x256xf32>
    %204 = vector.extract_strided_slice %189 {offsets = [0, 1], sizes = [32, 1], strides = [1, 1]} : vector<32x9xf32> to vector<32x1xf32>
    %205 = vector.broadcast %204 : vector<32x1xf32> to vector<32x256xf32>
    %206 = arith.mulf %203, %205 : vector<32x256xf32>
    %207 = arith.addf %202, %206 : vector<32x256xf32>
    %c0_72 = arith.constant 0 : index
    %c226 = arith.constant 226 : index
    %208 = vector.load %arg12[%c0_72, %c226] : memref<32x768xf32, #tpu.memory_space<vmem>>, vector<32x256xf32>
    %209 = vector.extract_strided_slice %191 {offsets = [1, 0], sizes = [1, 256], strides = [1, 1]} : vector<2x256xf32> to vector<1x256xf32>
    %210 = vector.shape_cast %209 : vector<1x256xf32> to vector<256xf32>
    %211 = vector.shape_cast %210 : vector<256xf32> to vector<1x256xf32>
    %212 = vector.broadcast %211 : vector<1x256xf32> to vector<32x256xf32>
    %213 = arith.mulf %208, %212 : vector<32x256xf32>
    %214 = vector.extract_strided_slice %189 {offsets = [0, 2], sizes = [32, 1], strides = [1, 1]} : vector<32x9xf32> to vector<32x1xf32>
    %215 = vector.broadcast %214 : vector<32x1xf32> to vector<32x256xf32>
    %216 = arith.mulf %213, %215 : vector<32x256xf32>
    %217 = arith.addf %207, %216 : vector<32x256xf32>
    %c0_73 = arith.constant 0 : index
    %c254 = arith.constant 254 : index
    %218 = vector.load %arg12[%c0_73, %c254] : memref<32x768xf32, #tpu.memory_space<vmem>>, vector<32x256xf32>
    %219 = vector.extract_strided_slice %191 {offsets = [0, 0], sizes = [1, 256], strides = [1, 1]} : vector<2x256xf32> to vector<1x256xf32>
    %220 = vector.shape_cast %219 : vector<1x256xf32> to vector<256xf32>
    %221 = vector.shape_cast %220 : vector<256xf32> to vector<1x256xf32>
    %222 = vector.broadcast %221 : vector<1x256xf32> to vector<32x256xf32>
    %223 = arith.mulf %218, %222 : vector<32x256xf32>
    %224 = vector.extract_strided_slice %189 {offsets = [0, 3], sizes = [32, 1], strides = [1, 1]} : vector<32x9xf32> to vector<32x1xf32>
    %225 = vector.broadcast %224 : vector<32x1xf32> to vector<32x256xf32>
    %226 = arith.mulf %223, %225 : vector<32x256xf32>
    %227 = arith.addf %217, %226 : vector<32x256xf32>
    %c0_74 = arith.constant 0 : index
    %c256_75 = arith.constant 256 : index
    %228 = vector.load %arg12[%c0_74, %c256_75] : memref<32x768xf32, #tpu.memory_space<vmem>>, vector<32x256xf32>
    %229 = vector.extract_strided_slice %189 {offsets = [0, 4], sizes = [32, 1], strides = [1, 1]} : vector<32x9xf32> to vector<32x1xf32>
    %230 = vector.broadcast %229 : vector<32x1xf32> to vector<32x256xf32>
    %231 = arith.mulf %228, %230 : vector<32x256xf32>
    %232 = arith.addf %227, %231 : vector<32x256xf32>
    %c0_76 = arith.constant 0 : index
    %c258 = arith.constant 258 : index
    %233 = vector.load %arg12[%c0_76, %c258] : memref<32x768xf32, #tpu.memory_space<vmem>>, vector<32x256xf32>
    %234 = vector.extract_strided_slice %191 {offsets = [1, 0], sizes = [1, 256], strides = [1, 1]} : vector<2x256xf32> to vector<1x256xf32>
    %235 = vector.shape_cast %234 : vector<1x256xf32> to vector<256xf32>
    %236 = vector.shape_cast %235 : vector<256xf32> to vector<1x256xf32>
    %237 = vector.broadcast %236 : vector<1x256xf32> to vector<32x256xf32>
    %238 = arith.mulf %233, %237 : vector<32x256xf32>
    %239 = vector.extract_strided_slice %189 {offsets = [0, 5], sizes = [32, 1], strides = [1, 1]} : vector<32x9xf32> to vector<32x1xf32>
    %240 = vector.broadcast %239 : vector<32x1xf32> to vector<32x256xf32>
    %241 = arith.mulf %238, %240 : vector<32x256xf32>
    %242 = arith.addf %232, %241 : vector<32x256xf32>
    %c0_77 = arith.constant 0 : index
    %c286 = arith.constant 286 : index
    %243 = vector.load %arg12[%c0_77, %c286] : memref<32x768xf32, #tpu.memory_space<vmem>>, vector<32x256xf32>
    %244 = vector.extract_strided_slice %191 {offsets = [0, 0], sizes = [1, 256], strides = [1, 1]} : vector<2x256xf32> to vector<1x256xf32>
    %245 = vector.shape_cast %244 : vector<1x256xf32> to vector<256xf32>
    %246 = vector.shape_cast %245 : vector<256xf32> to vector<1x256xf32>
    %247 = vector.broadcast %246 : vector<1x256xf32> to vector<32x256xf32>
    %248 = arith.mulf %243, %247 : vector<32x256xf32>
    %249 = vector.extract_strided_slice %189 {offsets = [0, 6], sizes = [32, 1], strides = [1, 1]} : vector<32x9xf32> to vector<32x1xf32>
    %250 = vector.broadcast %249 : vector<32x1xf32> to vector<32x256xf32>
    %251 = arith.mulf %248, %250 : vector<32x256xf32>
    %252 = arith.addf %242, %251 : vector<32x256xf32>
    %c0_78 = arith.constant 0 : index
    %c288 = arith.constant 288 : index
    %253 = vector.load %arg12[%c0_78, %c288] : memref<32x768xf32, #tpu.memory_space<vmem>>, vector<32x256xf32>
    %254 = vector.extract_strided_slice %189 {offsets = [0, 7], sizes = [32, 1], strides = [1, 1]} : vector<32x9xf32> to vector<32x1xf32>
    %255 = vector.broadcast %254 : vector<32x1xf32> to vector<32x256xf32>
    %256 = arith.mulf %253, %255 : vector<32x256xf32>
    %257 = arith.addf %252, %256 : vector<32x256xf32>
    %c0_79 = arith.constant 0 : index
    %c290 = arith.constant 290 : index
    %258 = vector.load %arg12[%c0_79, %c290] : memref<32x768xf32, #tpu.memory_space<vmem>>, vector<32x256xf32>
    %259 = vector.extract_strided_slice %191 {offsets = [1, 0], sizes = [1, 256], strides = [1, 1]} : vector<2x256xf32> to vector<1x256xf32>
    %260 = vector.shape_cast %259 : vector<1x256xf32> to vector<256xf32>
    %261 = vector.shape_cast %260 : vector<256xf32> to vector<1x256xf32>
    %262 = vector.broadcast %261 : vector<1x256xf32> to vector<32x256xf32>
    %263 = arith.mulf %258, %262 : vector<32x256xf32>
    %264 = vector.extract_strided_slice %189 {offsets = [0, 8], sizes = [32, 1], strides = [1, 1]} : vector<32x9xf32> to vector<32x1xf32>
    %265 = vector.broadcast %264 : vector<32x1xf32> to vector<32x256xf32>
    %266 = arith.mulf %263, %265 : vector<32x256xf32>
    %267 = arith.addf %257, %266 : vector<32x256xf32>
    %c32 = arith.constant 32 : index
    %c0_80 = arith.constant 0 : index
    %268 = vector.load %arg13[%c32, %c0_80] : memref<128x256xf32, #tpu.memory_space<vmem>>, vector<32x256xf32>
    tpu.vector_store %arg13[%c32, %c0_80], %267 {strides = array<i32>} : memref<128x256xf32, #tpu.memory_space<vmem>>, vector<32x256xf32>,
    %c3_81 = arith.constant 3 : index
    %c0_82 = arith.constant 0 : index
    %c0_83 = arith.constant 0 : index
    %269 = vector.load %arg2[%c3_81, %c0_82, %c0_83] : memref<5x32x9xf32, #tpu.memory_space<vmem>>, vector<1x32x9xf32>
    %270 = vector.shape_cast %269 : vector<1x32x9xf32> to vector<32x9xf32>
    %c2_84 = arith.constant 2 : index
    %c0_85 = arith.constant 0 : index
    %c0_86 = arith.constant 0 : index
    %271 = vector.load %arg7[%c2_84, %c0_85, %c0_86] : memref<4x2x256xf32, #tpu.memory_space<vmem>>, vector<1x2x256xf32>
    %272 = vector.shape_cast %271 : vector<1x2x256xf32> to vector<2x256xf32>
    %cst_87 = arith.constant 0.000000e+00 : f32
    %273 = vector.broadcast %cst_87 : f32 to vector<32x256xf32>
    %c0_88 = arith.constant 0 : index
    %c188 = arith.constant 188 : index
    %274 = vector.load %arg12[%c0_88, %c188] : memref<32x768xf32, #tpu.memory_space<vmem>>, vector<32x256xf32>
    %275 = vector.extract_strided_slice %272 {offsets = [0, 0], sizes = [1, 256], strides = [1, 1]} : vector<2x256xf32> to vector<1x256xf32>
    %276 = vector.shape_cast %275 : vector<1x256xf32> to vector<256xf32>
    %277 = vector.shape_cast %276 : vector<256xf32> to vector<1x256xf32>
    %278 = vector.broadcast %277 : vector<1x256xf32> to vector<32x256xf32>
    %279 = arith.mulf %274, %278 : vector<32x256xf32>
    %280 = vector.extract_strided_slice %270 {offsets = [0, 0], sizes = [32, 1], strides = [1, 1]} : vector<32x9xf32> to vector<32x1xf32>
    %281 = vector.broadcast %280 : vector<32x1xf32> to vector<32x256xf32>
    %282 = arith.mulf %279, %281 : vector<32x256xf32>
    %283 = arith.addf %273, %282 : vector<32x256xf32>
    %c0_89 = arith.constant 0 : index
    %c192 = arith.constant 192 : index
    %284 = vector.load %arg12[%c0_89, %c192] : memref<32x768xf32, #tpu.memory_space<vmem>>, vector<32x256xf32>
    %285 = vector.extract_strided_slice %270 {offsets = [0, 1], sizes = [32, 1], strides = [1, 1]} : vector<32x9xf32> to vector<32x1xf32>
    %286 = vector.broadcast %285 : vector<32x1xf32> to vector<32x256xf32>
    %287 = arith.mulf %284, %286 : vector<32x256xf32>
    %288 = arith.addf %283, %287 : vector<32x256xf32>
    %c0_90 = arith.constant 0 : index
    %c196 = arith.constant 196 : index
    %289 = vector.load %arg12[%c0_90, %c196] : memref<32x768xf32, #tpu.memory_space<vmem>>, vector<32x256xf32>
    %290 = vector.extract_strided_slice %272 {offsets = [1, 0], sizes = [1, 256], strides = [1, 1]} : vector<2x256xf32> to vector<1x256xf32>
    %291 = vector.shape_cast %290 : vector<1x256xf32> to vector<256xf32>
    %292 = vector.shape_cast %291 : vector<256xf32> to vector<1x256xf32>
    %293 = vector.broadcast %292 : vector<1x256xf32> to vector<32x256xf32>
    %294 = arith.mulf %289, %293 : vector<32x256xf32>
    %295 = vector.extract_strided_slice %270 {offsets = [0, 2], sizes = [32, 1], strides = [1, 1]} : vector<32x9xf32> to vector<32x1xf32>
    %296 = vector.broadcast %295 : vector<32x1xf32> to vector<32x256xf32>
    %297 = arith.mulf %294, %296 : vector<32x256xf32>
    %298 = arith.addf %288, %297 : vector<32x256xf32>
    %c0_91 = arith.constant 0 : index
    %c252 = arith.constant 252 : index
    %299 = vector.load %arg12[%c0_91, %c252] : memref<32x768xf32, #tpu.memory_space<vmem>>, vector<32x256xf32>
    %300 = vector.extract_strided_slice %272 {offsets = [0, 0], sizes = [1, 256], strides = [1, 1]} : vector<2x256xf32> to vector<1x256xf32>
    %301 = vector.shape_cast %300 : vector<1x256xf32> to vector<256xf32>
    %302 = vector.shape_cast %301 : vector<256xf32> to vector<1x256xf32>
    %303 = vector.broadcast %302 : vector<1x256xf32> to vector<32x256xf32>
    %304 = arith.mulf %299, %303 : vector<32x256xf32>
    %305 = vector.extract_strided_slice %270 {offsets = [0, 3], sizes = [32, 1], strides = [1, 1]} : vector<32x9xf32> to vector<32x1xf32>
    %306 = vector.broadcast %305 : vector<32x1xf32> to vector<32x256xf32>
    %307 = arith.mulf %304, %306 : vector<32x256xf32>
    %308 = arith.addf %298, %307 : vector<32x256xf32>
    %c0_92 = arith.constant 0 : index
    %c256_93 = arith.constant 256 : index
    %309 = vector.load %arg12[%c0_92, %c256_93] : memref<32x768xf32, #tpu.memory_space<vmem>>, vector<32x256xf32>
    %310 = vector.extract_strided_slice %270 {offsets = [0, 4], sizes = [32, 1], strides = [1, 1]} : vector<32x9xf32> to vector<32x1xf32>
    %311 = vector.broadcast %310 : vector<32x1xf32> to vector<32x256xf32>
    %312 = arith.mulf %309, %311 : vector<32x256xf32>
    %313 = arith.addf %308, %312 : vector<32x256xf32>
    %c0_94 = arith.constant 0 : index
    %c260 = arith.constant 260 : index
    %314 = vector.load %arg12[%c0_94, %c260] : memref<32x768xf32, #tpu.memory_space<vmem>>, vector<32x256xf32>
    %315 = vector.extract_strided_slice %272 {offsets = [1, 0], sizes = [1, 256], strides = [1, 1]} : vector<2x256xf32> to vector<1x256xf32>
    %316 = vector.shape_cast %315 : vector<1x256xf32> to vector<256xf32>
    %317 = vector.shape_cast %316 : vector<256xf32> to vector<1x256xf32>
    %318 = vector.broadcast %317 : vector<1x256xf32> to vector<32x256xf32>
    %319 = arith.mulf %314, %318 : vector<32x256xf32>
    %320 = vector.extract_strided_slice %270 {offsets = [0, 5], sizes = [32, 1], strides = [1, 1]} : vector<32x9xf32> to vector<32x1xf32>
    %321 = vector.broadcast %320 : vector<32x1xf32> to vector<32x256xf32>
    %322 = arith.mulf %319, %321 : vector<32x256xf32>
    %323 = arith.addf %313, %322 : vector<32x256xf32>
    %c0_95 = arith.constant 0 : index
    %c316 = arith.constant 316 : index
    %324 = vector.load %arg12[%c0_95, %c316] : memref<32x768xf32, #tpu.memory_space<vmem>>, vector<32x256xf32>
    %325 = vector.extract_strided_slice %272 {offsets = [0, 0], sizes = [1, 256], strides = [1, 1]} : vector<2x256xf32> to vector<1x256xf32>
    %326 = vector.shape_cast %325 : vector<1x256xf32> to vector<256xf32>
    %327 = vector.shape_cast %326 : vector<256xf32> to vector<1x256xf32>
    %328 = vector.broadcast %327 : vector<1x256xf32> to vector<32x256xf32>
    %329 = arith.mulf %324, %328 : vector<32x256xf32>
    %330 = vector.extract_strided_slice %270 {offsets = [0, 6], sizes = [32, 1], strides = [1, 1]} : vector<32x9xf32> to vector<32x1xf32>
    %331 = vector.broadcast %330 : vector<32x1xf32> to vector<32x256xf32>
    %332 = arith.mulf %329, %331 : vector<32x256xf32>
    %333 = arith.addf %323, %332 : vector<32x256xf32>
    %c0_96 = arith.constant 0 : index
    %c320 = arith.constant 320 : index
    %334 = vector.load %arg12[%c0_96, %c320] : memref<32x768xf32, #tpu.memory_space<vmem>>, vector<32x256xf32>
    %335 = vector.extract_strided_slice %270 {offsets = [0, 7], sizes = [32, 1], strides = [1, 1]} : vector<32x9xf32> to vector<32x1xf32>
    %336 = vector.broadcast %335 : vector<32x1xf32> to vector<32x256xf32>
    %337 = arith.mulf %334, %336 : vector<32x256xf32>
    %338 = arith.addf %333, %337 : vector<32x256xf32>
    %c0_97 = arith.constant 0 : index
    %c324 = arith.constant 324 : index
    %339 = vector.load %arg12[%c0_97, %c324] : memref<32x768xf32, #tpu.memory_space<vmem>>, vector<32x256xf32>
    %340 = vector.extract_strided_slice %272 {offsets = [1, 0], sizes = [1, 256], strides = [1, 1]} : vector<2x256xf32> to vector<1x256xf32>
    %341 = vector.shape_cast %340 : vector<1x256xf32> to vector<256xf32>
    %342 = vector.shape_cast %341 : vector<256xf32> to vector<1x256xf32>
    %343 = vector.broadcast %342 : vector<1x256xf32> to vector<32x256xf32>
    %344 = arith.mulf %339, %343 : vector<32x256xf32>
    %345 = vector.extract_strided_slice %270 {offsets = [0, 8], sizes = [32, 1], strides = [1, 1]} : vector<32x9xf32> to vector<32x1xf32>
    %346 = vector.broadcast %345 : vector<32x1xf32> to vector<32x256xf32>
    %347 = arith.mulf %344, %346 : vector<32x256xf32>
    %348 = arith.addf %338, %347 : vector<32x256xf32>
    %c64 = arith.constant 64 : index
    %c0_98 = arith.constant 0 : index
    %349 = vector.load %arg13[%c64, %c0_98] : memref<128x256xf32, #tpu.memory_space<vmem>>, vector<32x256xf32>
    tpu.vector_store %arg13[%c64, %c0_98], %348 {strides = array<i32>} : memref<128x256xf32, #tpu.memory_space<vmem>>, vector<32x256xf32>,
    %c4 = arith.constant 4 : index
    %c0_99 = arith.constant 0 : index
    %c0_100 = arith.constant 0 : index
    %350 = vector.load %arg2[%c4, %c0_99, %c0_100] : memref<5x32x9xf32, #tpu.memory_space<vmem>>, vector<1x32x9xf32>
    %351 = vector.shape_cast %350 : vector<1x32x9xf32> to vector<32x9xf32>
    %c3_101 = arith.constant 3 : index
    %c0_102 = arith.constant 0 : index
    %c0_103 = arith.constant 0 : index
    %352 = vector.load %arg7[%c3_101, %c0_102, %c0_103] : memref<4x2x256xf32, #tpu.memory_space<vmem>>, vector<1x2x256xf32>
    %353 = vector.shape_cast %352 : vector<1x2x256xf32> to vector<2x256xf32>
    %cst_104 = arith.constant 0.000000e+00 : f32
    %354 = vector.broadcast %cst_104 : f32 to vector<32x256xf32>
    %c0_105 = arith.constant 0 : index
    %c120 = arith.constant 120 : index
    %355 = vector.load %arg12[%c0_105, %c120] : memref<32x768xf32, #tpu.memory_space<vmem>>, vector<32x256xf32>
    %356 = vector.extract_strided_slice %353 {offsets = [0, 0], sizes = [1, 256], strides = [1, 1]} : vector<2x256xf32> to vector<1x256xf32>
    %357 = vector.shape_cast %356 : vector<1x256xf32> to vector<256xf32>
    %358 = vector.shape_cast %357 : vector<256xf32> to vector<1x256xf32>
    %359 = vector.broadcast %358 : vector<1x256xf32> to vector<32x256xf32>
    %360 = arith.mulf %355, %359 : vector<32x256xf32>
    %361 = vector.extract_strided_slice %351 {offsets = [0, 0], sizes = [32, 1], strides = [1, 1]} : vector<32x9xf32> to vector<32x1xf32>
    %362 = vector.broadcast %361 : vector<32x1xf32> to vector<32x256xf32>
    %363 = arith.mulf %360, %362 : vector<32x256xf32>
    %364 = arith.addf %354, %363 : vector<32x256xf32>
    %c0_106 = arith.constant 0 : index
    %c128 = arith.constant 128 : index
    %365 = vector.load %arg12[%c0_106, %c128] : memref<32x768xf32, #tpu.memory_space<vmem>>, vector<32x256xf32>
    %366 = vector.extract_strided_slice %351 {offsets = [0, 1], sizes = [32, 1], strides = [1, 1]} : vector<32x9xf32> to vector<32x1xf32>
    %367 = vector.broadcast %366 : vector<32x1xf32> to vector<32x256xf32>
    %368 = arith.mulf %365, %367 : vector<32x256xf32>
    %369 = arith.addf %364, %368 : vector<32x256xf32>
    %c0_107 = arith.constant 0 : index
    %c136 = arith.constant 136 : index
    %370 = vector.load %arg12[%c0_107, %c136] : memref<32x768xf32, #tpu.memory_space<vmem>>, vector<32x256xf32>
    %371 = vector.extract_strided_slice %353 {offsets = [1, 0], sizes = [1, 256], strides = [1, 1]} : vector<2x256xf32> to vector<1x256xf32>
    %372 = vector.shape_cast %371 : vector<1x256xf32> to vector<256xf32>
    %373 = vector.shape_cast %372 : vector<256xf32> to vector<1x256xf32>
    %374 = vector.broadcast %373 : vector<1x256xf32> to vector<32x256xf32>
    %375 = arith.mulf %370, %374 : vector<32x256xf32>
    %376 = vector.extract_strided_slice %351 {offsets = [0, 2], sizes = [32, 1], strides = [1, 1]} : vector<32x9xf32> to vector<32x1xf32>
    %377 = vector.broadcast %376 : vector<32x1xf32> to vector<32x256xf32>
    %378 = arith.mulf %375, %377 : vector<32x256xf32>
    %379 = arith.addf %369, %378 : vector<32x256xf32>
    %c0_108 = arith.constant 0 : index
    %c248 = arith.constant 248 : index
    %380 = vector.load %arg12[%c0_108, %c248] : memref<32x768xf32, #tpu.memory_space<vmem>>, vector<32x256xf32>
    %381 = vector.extract_strided_slice %353 {offsets = [0, 0], sizes = [1, 256], strides = [1, 1]} : vector<2x256xf32> to vector<1x256xf32>
    %382 = vector.shape_cast %381 : vector<1x256xf32> to vector<256xf32>
    %383 = vector.shape_cast %382 : vector<256xf32> to vector<1x256xf32>
    %384 = vector.broadcast %383 : vector<1x256xf32> to vector<32x256xf32>
    %385 = arith.mulf %380, %384 : vector<32x256xf32>
    %386 = vector.extract_strided_slice %351 {offsets = [0, 3], sizes = [32, 1], strides = [1, 1]} : vector<32x9xf32> to vector<32x1xf32>
    %387 = vector.broadcast %386 : vector<32x1xf32> to vector<32x256xf32>
    %388 = arith.mulf %385, %387 : vector<32x256xf32>
    %389 = arith.addf %379, %388 : vector<32x256xf32>
    %c0_109 = arith.constant 0 : index
    %c256_110 = arith.constant 256 : index
    %390 = vector.load %arg12[%c0_109, %c256_110] : memref<32x768xf32, #tpu.memory_space<vmem>>, vector<32x256xf32>
    %391 = vector.extract_strided_slice %351 {offsets = [0, 4], sizes = [32, 1], strides = [1, 1]} : vector<32x9xf32> to vector<32x1xf32>
    %392 = vector.broadcast %391 : vector<32x1xf32> to vector<32x256xf32>
    %393 = arith.mulf %390, %392 : vector<32x256xf32>
    %394 = arith.addf %389, %393 : vector<32x256xf32>
    %c0_111 = arith.constant 0 : index
    %c264 = arith.constant 264 : index
    %395 = vector.load %arg12[%c0_111, %c264] : memref<32x768xf32, #tpu.memory_space<vmem>>, vector<32x256xf32>
    %396 = vector.extract_strided_slice %353 {offsets = [1, 0], sizes = [1, 256], strides = [1, 1]} : vector<2x256xf32> to vector<1x256xf32>
    %397 = vector.shape_cast %396 : vector<1x256xf32> to vector<256xf32>
    %398 = vector.shape_cast %397 : vector<256xf32> to vector<1x256xf32>
    %399 = vector.broadcast %398 : vector<1x256xf32> to vector<32x256xf32>
    %400 = arith.mulf %395, %399 : vector<32x256xf32>
    %401 = vector.extract_strided_slice %351 {offsets = [0, 5], sizes = [32, 1], strides = [1, 1]} : vector<32x9xf32> to vector<32x1xf32>
    %402 = vector.broadcast %401 : vector<32x1xf32> to vector<32x256xf32>
    %403 = arith.mulf %400, %402 : vector<32x256xf32>
    %404 = arith.addf %394, %403 : vector<32x256xf32>
    %c0_112 = arith.constant 0 : index
    %c376 = arith.constant 376 : index
    %405 = vector.load %arg12[%c0_112, %c376] : memref<32x768xf32, #tpu.memory_space<vmem>>, vector<32x256xf32>
    %406 = vector.extract_strided_slice %353 {offsets = [0, 0], sizes = [1, 256], strides = [1, 1]} : vector<2x256xf32> to vector<1x256xf32>
    %407 = vector.shape_cast %406 : vector<1x256xf32> to vector<256xf32>
    %408 = vector.shape_cast %407 : vector<256xf32> to vector<1x256xf32>
    %409 = vector.broadcast %408 : vector<1x256xf32> to vector<32x256xf32>
    %410 = arith.mulf %405, %409 : vector<32x256xf32>
    %411 = vector.extract_strided_slice %351 {offsets = [0, 6], sizes = [32, 1], strides = [1, 1]} : vector<32x9xf32> to vector<32x1xf32>
    %412 = vector.broadcast %411 : vector<32x1xf32> to vector<32x256xf32>
    %413 = arith.mulf %410, %412 : vector<32x256xf32>
    %414 = arith.addf %404, %413 : vector<32x256xf32>
    %c0_113 = arith.constant 0 : index
    %c384 = arith.constant 384 : index
    %415 = vector.load %arg12[%c0_113, %c384] : memref<32x768xf32, #tpu.memory_space<vmem>>, vector<32x256xf32>
    %416 = vector.extract_strided_slice %351 {offsets = [0, 7], sizes = [32, 1], strides = [1, 1]} : vector<32x9xf32> to vector<32x1xf32>
    %417 = vector.broadcast %416 : vector<32x1xf32> to vector<32x256xf32>
    %418 = arith.mulf %415, %417 : vector<32x256xf32>
    %419 = arith.addf %414, %418 : vector<32x256xf32>
    %c0_114 = arith.constant 0 : index
    %c392 = arith.constant 392 : index
    %420 = vector.load %arg12[%c0_114, %c392] : memref<32x768xf32, #tpu.memory_space<vmem>>, vector<32x256xf32>
    %421 = vector.extract_strided_slice %353 {offsets = [1, 0], sizes = [1, 256], strides = [1, 1]} : vector<2x256xf32> to vector<1x256xf32>
    %422 = vector.shape_cast %421 : vector<1x256xf32> to vector<256xf32>
    %423 = vector.shape_cast %422 : vector<256xf32> to vector<1x256xf32>
    %424 = vector.broadcast %423 : vector<1x256xf32> to vector<32x256xf32>
    %425 = arith.mulf %420, %424 : vector<32x256xf32>
    %426 = vector.extract_strided_slice %351 {offsets = [0, 8], sizes = [32, 1], strides = [1, 1]} : vector<32x9xf32> to vector<32x1xf32>
    %427 = vector.broadcast %426 : vector<32x1xf32> to vector<32x256xf32>
    %428 = arith.mulf %425, %427 : vector<32x256xf32>
    %429 = arith.addf %419, %428 : vector<32x256xf32>
    %c96 = arith.constant 96 : index
    %c0_115 = arith.constant 0 : index
    %430 = vector.load %arg13[%c96, %c0_115] : memref<128x256xf32, #tpu.memory_space<vmem>>, vector<32x256xf32>
    tpu.vector_store %arg13[%c96, %c0_115], %429 {strides = array<i32>} : memref<128x256xf32, #tpu.memory_space<vmem>>, vector<32x256xf32>,
    %c0_116 = arith.constant 0 : index
    %c0_117 = arith.constant 0 : index
    %431 = vector.load %arg13[%c0_116, %c0_117] : memref<128x256xf32, #tpu.memory_space<vmem>>, vector<128x256xf32>
    %c0_118 = arith.constant 0 : index
    %c0_119 = arith.constant 0 : index
    %432 = vector.load %arg4[%c0_118, %c0_119] : memref<128x4xf32, #tpu.memory_space<vmem>>, vector<128x1xf32>
    %433 = vector.broadcast %432 : vector<128x1xf32> to vector<128x256xf32>
    %434 = arith.mulf %431, %433 : vector<128x256xf32>
    %c0_120 = arith.constant 0 : index
    %c1_121 = arith.constant 1 : index
    %435 = vector.load %arg4[%c0_120, %c1_121] : memref<128x4xf32, #tpu.memory_space<vmem>>, vector<128x1xf32>
    %436 = vector.broadcast %435 : vector<128x1xf32> to vector<128x256xf32>
    %437 = arith.addf %434, %436 : vector<128x256xf32>
    %cst_122 = arith.constant 0.000000e+00 : f32
    %438 = vector.broadcast %cst_122 : f32 to vector<128x256xf32>
    %439 = arith.maximumf %437, %438 : vector<128x256xf32>
    %c0_123 = arith.constant 0 : index
    %c0_124 = arith.constant 0 : index
    %440 = vector.load %arg6[%c0_123, %c0_124] : memref<128x128xbf16, #tpu.memory_space<vmem>>, vector<128x128xbf16>
    %441 = arith.truncf %439 : vector<128x256xf32> to vector<128x256xbf16>
    %cst_125 = arith.constant dense<0.000000e+00> : vector<128x256xf32>
    %442 = tpu.matmul %440, %441, %cst_125 {dimension_numbers = #tpu.dot_dimension_numbers<[1], [0], [0], [1], [0, 0, 1, 1], [], []>} : vector<128x128xbf16>, vector<128x256xbf16>, vector<128x256xf32> -> vector<128x256xf32>
    %c0_126 = arith.constant 0 : index
    %c2_127 = arith.constant 2 : index
    %443 = vector.load %arg4[%c0_126, %c2_127] : memref<128x4xf32, #tpu.memory_space<vmem>>, vector<128x1xf32>
    %444 = vector.broadcast %443 : vector<128x1xf32> to vector<128x256xf32>
    %445 = arith.mulf %442, %444 : vector<128x256xf32>
    %c0_128 = arith.constant 0 : index
    %c3_129 = arith.constant 3 : index
    %446 = vector.load %arg4[%c0_128, %c3_129] : memref<128x4xf32, #tpu.memory_space<vmem>>, vector<128x1xf32>
    %447 = vector.broadcast %446 : vector<128x1xf32> to vector<128x256xf32>
    %448 = arith.addf %445, %447 : vector<128x256xf32>
    %cst_130 = arith.constant 0.000000e+00 : f32
    %449 = vector.broadcast %cst_130 : f32 to vector<128x256xf32>
    %450 = arith.maximumf %448, %449 : vector<128x256xf32>
    %c0_131 = arith.constant 0 : index
    %c256_132 = arith.constant 256 : index
    %451 = vector.load %arg12[%c0_131, %c256_132] : memref<32x768xf32, #tpu.memory_space<vmem>>, vector<32x256xf32>
    %452 = vector.extract_strided_slice %450 {offsets = [0, 0], sizes = [32, 256], strides = [1, 1]} : vector<128x256xf32> to vector<32x256xf32>
    %453 = arith.addf %451, %452 : vector<32x256xf32>
    %454 = vector.extract_strided_slice %450 {offsets = [32, 0], sizes = [32, 256], strides = [1, 1]} : vector<128x256xf32> to vector<32x256xf32>
    %455 = arith.addf %453, %454 : vector<32x256xf32>
    %456 = vector.extract_strided_slice %450 {offsets = [64, 0], sizes = [32, 256], strides = [1, 1]} : vector<128x256xf32> to vector<32x256xf32>
    %457 = arith.addf %455, %456 : vector<32x256xf32>
    %458 = vector.extract_strided_slice %450 {offsets = [96, 0], sizes = [32, 256], strides = [1, 1]} : vector<128x256xf32> to vector<32x256xf32>
    %459 = arith.addf %457, %458 : vector<32x256xf32>
    %c0_133 = arith.constant 0 : index
    %c0_134 = arith.constant 0 : index
    %460 = vector.load %arg8[%c0_133, %c0_134] : memref<256x21xf32, #tpu.memory_space<vmem>>, vector<256x21xf32>
    %cst_135 = arith.constant dense<0.000000e+00> : vector<32x21xf32>
    %461 = tpu.matmul %459, %460, %cst_135 {dimension_numbers = #tpu.dot_dimension_numbers<[1], [0], [0], [1], [0, 0, 1, 1], [], []>, precision = #tpu.contract_precision<fp32>} : vector<32x256xf32>, vector<256x21xf32>, vector<32x21xf32> -> vector<32x21xf32>
    %c0_136 = arith.constant 0 : index
    %c0_137 = arith.constant 0 : index
    %c0_138 = arith.constant 0 : index
    %462 = vector.load %arg9[%c0_136, %c0_137, %c0_138] : memref<8x32x21xf32, #tpu.memory_space<vmem>>, vector<8x32x21xf32>
    %463 = vector.shape_cast %461 : vector<32x21xf32> to vector<1x32x21xf32>
    %464 = vector.broadcast %463 : vector<1x32x21xf32> to vector<8x32x21xf32>
    %465 = arith.mulf %462, %464 : vector<8x32x21xf32>
    %cst_139 = arith.constant dense<0.000000e+00> : vector<8x32xf32>
    %466 = vector.multi_reduction <add>, %465, %cst_139 [2] : vector<8x32x21xf32> to vector<8x32xf32>
    %cst_140 = arith.constant dense<0.000000e+00> : vector<8xf32>
    %467 = vector.multi_reduction <add>, %466, %cst_140 [1] : vector<8x32xf32> to vector<8xf32>
    %468 = vector.shape_cast %467 : vector<8xf32> to vector<8x1xf32>
    %cst_141 = arith.constant 0.000000e+00 : f32
    %469 = vector.broadcast %cst_141 : f32 to vector<8x1xf32>
    %470 = arith.maximumf %468, %469 : vector<8x1xf32>
    %c0_142 = arith.constant 0 : index
    %c0_143 = arith.constant 0 : index
    %471 = vector.load %arg10[%c0_142, %c0_143] : memref<32x8xf32, #tpu.memory_space<vmem>>, vector<32x8xf32>
    %472 = vector.shape_cast %470 : vector<8x1xf32> to vector<8x1xf32>
    %473 = vector.broadcast %472 : vector<8x1xf32> to vector<8x256xf32>
    %cst_144 = arith.constant dense<0.000000e+00> : vector<32x256xf32>
    %474 = tpu.matmul %471, %473, %cst_144 {dimension_numbers = #tpu.dot_dimension_numbers<[1], [0], [0], [1], [0, 0, 1, 1], [], []>, precision = #tpu.contract_precision<fp32>} : vector<32x8xf32>, vector<8x256xf32>, vector<32x256xf32> -> vector<32x256xf32>
    %475 = arith.negf %474 : vector<32x256xf32>
    %476 = math.exp %475 : vector<32x256xf32>
    %cst_145 = arith.constant 1.000000e+00 : f32
    %477 = vector.broadcast %cst_145 : f32 to vector<32x256xf32>
    %478 = arith.addf %477, %476 : vector<32x256xf32>
    %479 = arith.divf %477, %478 : vector<32x256xf32>
    %480 = arith.mulf %459, %479 : vector<32x256xf32>
    %c0_146 = arith.constant 0 : index
    %c0_147 = arith.constant 0 : index
    %c0_148 = arith.constant 0 : index
    %481 = vector.load %arg1[%c0_146, %c0_147, %c0_148] : memref<1x32x256xf32, #tpu.memory_space<vmem>>, vector<1x32x256xf32>
    %482 = vector.shape_cast %481 : vector<1x32x256xf32> to vector<32x256xf32>
    %483 = arith.addf %480, %482 : vector<32x256xf32>
    %c0_149 = arith.constant 0 : index
    %c0_150 = arith.constant 0 : index
    %c0_151 = arith.constant 0 : index
    %484 = vector.load %arg11[%c0_149, %c0_150, %c0_151] : memref<1x32x256xf32, #tpu.memory_space<vmem>>, vector<1x32x256xf32>
    %485 = vector.shape_cast %484 : vector<1x32x256xf32> to vector<32x256xf32>
    %486 = vector.shape_cast %483 : vector<32x256xf32> to vector<1x32x256xf32>
    tpu.vector_store %arg11[%c0_149, %c0_150, %c0_151], %486 {strides = array<i32>} : memref<1x32x256xf32, #tpu.memory_space<vmem>>, vector<1x32x256xf32>,
    return
  }
  func.func @transform_0(%arg0: i32) -> (i32, i32, i32) {
    %c0_i32 = arith.constant 0 : i32
    %c0_i32_0 = arith.constant 0 : i32
    %c0_i32_1 = arith.constant 0 : i32
    return %arg0, %c0_i32, %c0_i32_0 : i32, i32, i32
  }
  func.func @transform_1(%arg0: i32) -> (i32, i32, i32) {
    %c0_i32 = arith.constant 0 : i32
    %c0_i32_0 = arith.constant 0 : i32
    %c0_i32_1 = arith.constant 0 : i32
    %c0_i32_2 = arith.constant 0 : i32
    return %c0_i32, %c0_i32_0, %c0_i32_1 : i32, i32, i32
  }
  func.func @transform_2(%arg0: i32) -> (i32, i32) {
    %c0_i32 = arith.constant 0 : i32
    %c0_i32_0 = arith.constant 0 : i32
    %c0_i32_1 = arith.constant 0 : i32
    return %c0_i32, %c0_i32_0 : i32, i32
  }
  func.func @transform_3(%arg0: i32) -> (i32, i32) {
    %c0_i32 = arith.constant 0 : i32
    %c0_i32_0 = arith.constant 0 : i32
    %c0_i32_1 = arith.constant 0 : i32
    return %c0_i32, %c0_i32_0 : i32, i32
  }
  func.func @transform_4(%arg0: i32) -> (i32, i32) {
    %c0_i32 = arith.constant 0 : i32
    %c0_i32_0 = arith.constant 0 : i32
    %c0_i32_1 = arith.constant 0 : i32
    return %c0_i32, %c0_i32_0 : i32, i32
  }
  func.func @transform_5(%arg0: i32) -> (i32, i32) {
    %c0_i32 = arith.constant 0 : i32
    %c0_i32_0 = arith.constant 0 : i32
    %c0_i32_1 = arith.constant 0 : i32
    return %c0_i32, %c0_i32_0 : i32, i32
  }
  func.func @transform_6(%arg0: i32) -> (i32, i32, i32) {
    %c0_i32 = arith.constant 0 : i32
    %c0_i32_0 = arith.constant 0 : i32
    %c0_i32_1 = arith.constant 0 : i32
    %c0_i32_2 = arith.constant 0 : i32
    return %c0_i32, %c0_i32_0, %c0_i32_1 : i32, i32, i32
  }
  func.func @transform_7(%arg0: i32) -> (i32, i32) {
    %c0_i32 = arith.constant 0 : i32
    %c0_i32_0 = arith.constant 0 : i32
    %c0_i32_1 = arith.constant 0 : i32
    return %c0_i32, %c0_i32_0 : i32, i32
  }
  func.func @transform_8(%arg0: i32) -> (i32, i32, i32) {
    %c0_i32 = arith.constant 0 : i32
    %c0_i32_0 = arith.constant 0 : i32
    %c0_i32_1 = arith.constant 0 : i32
    %c0_i32_2 = arith.constant 0 : i32
    return %c0_i32, %c0_i32_0, %c0_i32_1 : i32, i32, i32
  }
  func.func @transform_9(%arg0: i32) -> (i32, i32) {
    %c0_i32 = arith.constant 0 : i32
    %c0_i32_0 = arith.constant 0 : i32
    %c0_i32_1 = arith.constant 0 : i32
    return %c0_i32, %c0_i32_0 : i32, i32
  }
  func.func @transform_10(%arg0: i32) -> (i32, i32, i32) {
    %c0_i32 = arith.constant 0 : i32
    %c0_i32_0 = arith.constant 0 : i32
    %c0_i32_1 = arith.constant 0 : i32
    return %arg0, %c0_i32, %c0_i32_0 : i32, i32, i32
  }
}

</mosaic_0001>

<bundles_post_ra>
// kernel: tamm_forward.1
= control target key start
LH: loop header
LB: loop body
LE: loop exit
PB: predicated region body
PF: predicated region fallthrough
CT: control target
= control target key end

     0   :  { %s9444_s13 = smov 0   ;;  %s15685_s0 = inlined_call_operand.vmem [shape: f32[2,32,256], index: 0, kind: input, shape index: {}, may-alias: {0,10}]   ;;  %s15686_s1 = inlined_call_operand.vmem [shape: f32[5,32,9], index: 1, kind: input, shape index: {}]   ;;  %s15687_s2 = inlined_call_operand.vmem [shape: f32[32,4], index: 2, kind: input, shape index: {}]   ;;  %s15688_s3 = inlined_call_operand.vmem [shape: f32[128,4], index: 3, kind: input, shape index: {}]   ;;  %s15689_s4 = inlined_call_operand.vmem [shape: bf16[32,32], index: 4, kind: input, shape index: {}]   ;;  %s15690_s5 = inlined_call_operand.vmem [shape: bf16[128,128], index: 5, kind: input, shape index: {}]   ;;  %s15691_s6 = inlined_call_operand.vmem [shape: f32[4,2,256], index: 6, kind: input, shape index: {}]   ;;  %s15692_s7 = inlined_call_operand.vmem [shape: f32[256,21], index: 7, kind: input, shape index: {}]   ;;  %s15693_s8 = inlined_call_operand.vmem [shape: f32[8,32,21], index: 8, kind: input, shape index: {}]   ;;  %s15694_s9 = inlined_call_operand.vmem [shape: f32[32,8], index: 9, kind: input, shape index: {}]   ;;  %s15695_s10 = inlined_call_operand.vmem [shape: f32[2,32,256], index: 10, kind: output, shape index: {}, may-alias: {0,10}]  }
   0x1 LB: > { %s8533_s14 = sadd.s32 4294967295, %s9351_s13   ;;  %p8537_p0 = scmp.ge.s32.totalorder %s9351_s13, 1  ;;  %s9351_s13 = sphi %s9444_s13, %s20_s13  }
   0x2   : > { %p312_p1 = scmp.lt.s32.totalorder %s9351_s13, 3 }
   0x4   : > { %p313_p2 = pnand %p8537_p0, %p312_p1 }
   0x6   : > { %316 = sbr.rel (%p313_p2) target bundleno = 4731 (0x127b), region = 60 }
   0xd   : > { %v9455_v0 = vld [vmem:[%s15686_s1] sm:$0xff]  ;;  %v15696_v1 = vlaneseq  ;;  %v15707_v2 = vmov 0   ;;  %v9463_v3 = vld [vmem:[%s15686_s1 + $0x8] sm:$0xff]  ;;  %v15709_v6 = vmov 1   ;;  %v9484_v10 = vld [vmem:[%s15686_s1 + $0x18] sm:$0xff]  ;;  %s9355_s23 = smov 111  }
   0xe   : > { %9143 = vset.pattern.permute.xlu1 %v15707_v2  ;;  %1549 = vmatprep.mubr.bf16.mxu0 %v15707_v2  ;;  %v397_v4 = vld [vmem:[%s15691_s6] sm:$0xf]  ;;  %v9510_v17 = vld [vmem:[%s15686_s1 + $0x10] sm:$0xff]  ;;  %s9356_s26 = smov 113   ;;  %v15705_v20 = vmov 2   ;;  %s9358_s27 = smov 127  }
   0xf   : > { %454 = vperm.xlu1 %9143, %v9455_v0   ;;  %v9469_v5 = vshrl.u32 %v15696_v1, 7  ;;  %9145 = vset.pattern.permute.xlu0 %v15709_v6  ;;  %v15703_v22 = vmov 3   ;;  %v15701_v23 = vmov 4   ;;  %v15699_v24 = vmov 5   ;;  %p350_p3 = scmp.lt.s32.totalorder %s8533_s14, 1  ;;  %s9362_s12 = smov 126  }
  0x10   : > { %6031 = vmatprep.mubr.bf16.mxu1 %v15707_v2  ;;  %vm617_vm0 = vcmask 924672   ;;  %vm560_vm1 = vcmask 1039360   ;;  %s9363_s15 = smov 112   ;;  %s9364_s16 = smov 1   ;;  %vm940_vm2 = vcmask 7168   ;;  %vm1058_vm3 = vcmask 121856  }
  0x11   : > { %16174 = vst [vmem:[#allocation4_spill] sm:$0xff] %v9469_v5  ;;  %v9474_v7 = vsub.s32 0, %v9469_v5  ;;  %v9477_v8 = vsub.s32 2, %v9469_v5  ;;  %v9497_v14 = vsub.s32 1, %v9469_v5  ;;  %v9505_v16 = vsub.s32 3, %v9469_v5  ;;  %s17265_s14 = smov (!%p350_p3, %s8533_s14), 1 }
  0x12   : > { %s15759_s28 = sshll.u32 %s17265_s14, 6  ;;  %s9366_s17 = smov 110   ;;  %vm1273_vm4 = vcmask 138240   ;;  %vm435_vm5 = vcmask 908288   ;;  %vm698_vm6 = vcmask 1031168   ;;  %vm815_vm7 = vcmask 916480  }
  0x13   : > { %16175 = vst [vmem:[#allocation5_spill] sm:$0xff] %v9474_v7  ;;  %16176 = vst [vmem:[#allocation6_spill] sm:$0xff] %v9477_v8  ;;  %459 = vperm.xlu1 %9143, %v9463_v3   ;;  %v414_v9 = vrot.slane %v397_v4, %v9474_v7  ;;  %v418_v11 = vrot.slane %v397_v4, %v9477_v8  ;;  %v596_v15 = vrot.slane %v397_v4, %v9497_v14  ;;  %s9570_s11 = scalar_lea.vmem %s15685_s0, %s15759_s28  ;;  %s9367_s18 = smov 15   ;;  %vm1021_vm8 = vcmask 900096  }
  0x14   : > { %16177 = vst [vmem:[#allocation7_spill] sm:$0xff] %v9497_v14  ;;  %16178 = vst [vmem:[#allocation8_spill] sm:$0xff] %v9505_v16  ;;  %v600_v19 = vrot.slane %v397_v4, %v9505_v16  ;;  %v9575_v30 = vld [vmem:[%s9570_s11] sm:$0xff]  ;;  %v9581_v36 = vld [vmem:[%s9570_s11 + $0x8] sm:$0xff]  ;;  %s9369_s19 = smov 96   ;;  %s15760_s20 = smov 95  }
  0x15   : > { %v9488_v12 = vrot.slane %v414_v9, %v9474_v7  ;;  %v9494_v13 = vrot.slane %v418_v11, %v9474_v7  ;;  %v9514_v18 = vrot.slane %v596_v15, %v9497_v14  ;;  %v9587_v39 = vld [vmem:[%s9570_s11 + $0x10] sm:$0xff]  ;;  %v9590_v40 = vld [vmem:[%s9570_s11 + $0x18] sm:$0xff]  ;;  %v9597_v44 = vld [vmem:[%s9570_s11 + $0x20] sm:$0xff]  ;;  %s9372_s21 = smov 17   ;;  %s9373_s22 = smov 94   ;;  %vm1139_vm9 = vcmask 785408  }
  0x16   : > { %v9523_v21 = vrot.slane %v600_v19, %v9497_v14  ;;  %v9603_v49 = vld [vmem:[%s9570_s11 + $0x28] sm:$0xff]  ;;  %v9610_v53 = vld [vmem:[%s9570_s11 + $0x30] sm:$0xff]  ;;  %v9613_v54 = vld [vmem:[%s9570_s11 + $0x38] sm:$0xff]  ;;  %vm1236_vm10 = vcmask 777216   ;;  %vm1354_vm11 = vcmask 769024   ;;  %vm1510_vm12 = vcmask 261120  }
  0x17   : > { %431 = vrot.lane.b32.xlu0 %v9488_v12, %s9355_s23  ;;  %469 = vperm.xlu1 %9143, %v9484_v10   ;;  %s9380_s25 = smov 30   ;;  %s9381_s29 = smov 68   ;;  %vm2901_vm13 = vcmask 801792   ;;  %vm3223_vm14 = vcmask 15360   ;;  %vm3341_vm15 = vcmask 244736  }
  0x18   : > { %s9382_s30 = smov 60   ;;  %s9385_s24 = smov 120  }
  0x1b   : > { %433 = vrot.lane.b32.xlu0 %v9494_v13, %s9355_s23  ;;  %9144 = vset.pattern.permute.xlu1 %v15709_v6 }
  0x1c   : > { %497 = vperm.xlu1 %9144, %v9455_v0  }
  0x1f   : > { %501 = vperm.xlu0 %9145, %v9463_v3  }
  0x20   : > { %505 = vperm.xlu1 %9144, %v9510_v17  }
  0x23   : > { %613 = vrot.lane.b32.xlu0 %v9514_v18, %s9356_s26 }
  0x24   : > { %509 = vperm.xlu1 %9144, %v9484_v10   ;;  %9146 = vset.pattern.permute.xlu0 %v15705_v20 }
  0x27   : > { %635 = vperm.xlu0 %9146, %v9455_v0  }
  0x28   : > { %615 = vrot.lane.b32.xlu1 %v9523_v21, %s9356_s26 }
  0x29   : > { %9147 = vset.pattern.permute.xlu1 %v15705_v20 }
  0x2b   : > { %647 = vperm.xlu0 %9146, %v9484_v10  }
  0x2c   : > { %639 = vperm.xlu1 %9147, %v9463_v3  }
  0x2f   : > { %733 = vrot.lane.b32.xlu0 %v9494_v13, %s9358_s27 }
  0x30   : > { %643 = vperm.xlu1 %9147, %v9510_v17   ;;  %9149 = vset.pattern.permute.xlu0 %v15703_v22 }
  0x33   : > { %756 = vperm.xlu0 %9149, %v9463_v3  }
  0x34   : > { %731 = vrot.lane.b32.xlu1 %v9488_v12, %s9358_s27 }
  0x35   : > { %9148 = vset.pattern.permute.xlu1 %v15703_v22 }
  0x37   : > { %9150 = vset.pattern.permute.xlu0 %v15701_v23 }
  0x38   : > { %752 = vperm.xlu1 %9148, %v9455_v0   ;;  %849 = vperm.xlu0 %9150, %v9455_v0  }
  0x3c   : > { %760 = vperm.xlu1 %9148, %v9510_v17   ;;  %861 = vperm.xlu0 %9150, %v9484_v10  }
  0x40   : > { %764 = vperm.xlu1 %9148, %v9484_v10   ;;  %9153 = vset.pattern.permute.xlu0 %v15699_v24 }
  0x44   : > { %9151 = vset.pattern.permute.xlu1 %v15701_v23 }
  0x45   : > { %853 = vperm.xlu1 %9151, %v9463_v3  }
  0x49   : > { %857 = vperm.xlu1 %9151, %v9510_v17  }
  0x4d   : > { %9152 = vset.pattern.permute.xlu1 %v15699_v24 }
  0x89   : > { %v9560_v27 = vpop.permute.xlu0 %431 }
  0x8d   : > { %v9572_v29 = vpop.permute.xlu0 %433 }
  0x8e   : > { %v9552_v25 = vpop.permute.xlu1 %454 }
  0x92   : > { %v9558_v26 = vpop.permute.xlu1 %459 }
  0x96   : > { %v9563_v28 = vpop.permute.xlu1 %469 }
  0x9b   : > { %v498_v31 = vpop.permute.xlu1 %497 }
  0x9c   : > { %v512_v32 = vmul.f32 0.0, %v498_v31  ;;  %v513_v33 = vmul.f32 %v498_v31, %v9575_v30  ;;  %v514_v38 = vmul.f32 %v498_v31, %v9581_v36 }
  0x9e   : > { %v502_v34 = vpop.permute.xlu0 %501  ;;  %536 = vrot.lane.b32.xlu0 %v512_v32, %s9358_s27  ;;  %538 = vrot.lane.b32.xlu1 %v513_v33, %s9358_s27 }
  0x9f   : > { %v506_v35 = vpop.permute.xlu1 %505  ;;  %v515_v37 = vmul.f32 0.0, %v502_v34  ;;  %v516_v42 = vmul.f32 %v502_v34, %v9587_v39  ;;  %v517_v43 = vmul.f32 %v502_v34, %v9590_v40 }
  0xa0   : > { %v518_v45 = vmul.f32 0.0, %v506_v35  ;;  %v519_v46 = vmul.f32 %v506_v35, %v9597_v44  ;;  %v520_v50 = vmul.f32 %v506_v35, %v9603_v49 }
  0xa2   : > { %540 = vrot.lane.b32.xlu0 %v514_v38, %s9358_s27  ;;  %542 = vrot.lane.b32.xlu1 %v515_v37, %s9358_s27  ;;  %v614_v48 = vpop.permute.xlu0 %613 }
  0xa3   : > { %v510_v41 = vpop.permute.xlu1 %509  ;;  %v622_v59 = vmul.f32 0.0, %v614_v48 }
  0xa4   : > { %v521_v51 = vmul.f32 0.0, %v510_v41  ;;  %v522_v55 = vmul.f32 %v510_v41, %v9610_v53  ;;  %v523_v56 = vmul.f32 %v510_v41, %v9613_v54 }
  0xa6   : > { %544 = vrot.lane.b32.xlu0 %v516_v42, %s9358_s27  ;;  %546 = vrot.lane.b32.xlu1 %v517_v43, %s9358_s27  ;;  %v636_v58 = vpop.permute.xlu0 %635 }
  0xa7   : > { %v616_v47 = vpop.permute.xlu1 %615  ;;  %v650_v61 = vmul.f32 %v636_v58, %v622_v59 }
  0xa8   : > { %v618_v52 = vsel %vm617_vm0, %v614_v48, %v616_v47  ;;  %v624_v62 = vmul.f32 %v616_v47, %v9581_v36  ;;  %v627_v11 = vmul.f32 %v616_v47, %v9590_v40  ;;  %v630_v38 = vmul.f32 %v616_v47, %v9603_v49 }
  0xa9   : > { %v623_v57 = vmul.f32 %v618_v52, %v9575_v30  ;;  %v626_v15 = vmul.f32 %v618_v52, %v9587_v39  ;;  %v629_v33 = vmul.f32 %v618_v52, %v9597_v44  ;;  %v632_v48 = vmul.f32 %v618_v52, %v9610_v53 }
  0xaa   : > { %548 = vrot.lane.b32.xlu0 %v518_v45, %s9358_s27  ;;  %550 = vrot.lane.b32.xlu1 %v519_v46, %s9358_s27  ;;  %v652_v9 = vmul.f32 %v636_v58, %v624_v62  ;;  %v648_v34 = vpop.permute.xlu0 %647  ;;  %v633_v46 = vmul.f32 %v616_v47, %v9613_v54 }
  0xab   : > { %v651_v60 = vmul.f32 %v636_v58, %v623_v57  ;;  %v640_v63 = vpop.permute.xlu1 %639  ;;  %v659_v43 = vmul.f32 %v648_v34, %v622_v59 }
  0xac   : > { %v653_v4 = vmul.f32 %v640_v63, %v622_v59  ;;  %v655_v19 = vmul.f32 %v640_v63, %v627_v11  ;;  %v654_v31 = vmul.f32 %v640_v63, %v626_v15 }
  0xae   : > { %552 = vrot.lane.b32.xlu0 %v520_v50, %s9358_s27  ;;  %554 = vrot.lane.b32.xlu1 %v521_v51, %s9358_s27  ;;  %v734_v42 = vpop.permute.xlu0 %733 }
  0xaf   : > { %v644_v32 = vpop.permute.xlu1 %643  ;;  %v741_v52 = vmul.f32 %v734_v42, %v9581_v36 }
  0xb0   : > { %v657_v35 = vmul.f32 %v644_v32, %v629_v33  ;;  %v656_v37 = vmul.f32 %v644_v32, %v622_v59  ;;  %v658_v45 = vmul.f32 %v644_v32, %v630_v38  ;;  %v747_v33 = vmul.f32 %v734_v42, %v9603_v49 }
  0xb1   : > { %v750_v38 = vmul.f32 %v734_v42, %v9613_v54 }
  0xb2   : > { %556 = vrot.lane.b32.xlu0 %v522_v55, %s9358_s27  ;;  %558 = vrot.lane.b32.xlu1 %v523_v56, %s9358_s27  ;;  %v661_v55 = vmul.f32 %v648_v34, %v633_v46  ;;  %v660_v56 = vmul.f32 %v648_v34, %v632_v48 }
  0xb3   : > { %v732_v41 = vpop.permute.xlu1 %731 }
  0xb4   : > { %v735_v50 = vsel %vm560_vm1, %v732_v41, %v734_v42  ;;  %v739_v51 = vmul.f32 0.0, %v732_v41 }
  0xb5   : > { %v740_v57 = vmul.f32 %v735_v50, %v9575_v30  ;;  %v743_v63 = vmul.f32 %v735_v50, %v9587_v39  ;;  %v749_v41 = vmul.f32 %v735_v50, %v9610_v53 }
  0xb6   : > { %676 = vrot.lane.b32.xlu0 %v651_v60, %s9362_s12  ;;  %674 = vrot.lane.b32.xlu1 %v650_v61, %s9362_s12  ;;  %v757_v60 = vpop.permute.xlu0 %756 }
  0xb7   : > { %v753_v58 = vpop.permute.xlu1 %752  ;;  %v770_v62 = vmul.f32 %v757_v60, %v739_v51  ;;  %v771_v11 = vmul.f32 %v757_v60, %v743_v63 }
  0xb8   : > { %v767_v59 = vmul.f32 %v753_v58, %v739_v51  ;;  %v768_v47 = vmul.f32 %v753_v58, %v740_v57  ;;  %v769_v61 = vmul.f32 %v753_v58, %v741_v52 }
  0xba   : > { %680 = vrot.lane.b32.xlu0 %v653_v4, %s9362_s12  ;;  %678 = vrot.lane.b32.xlu1 %v652_v9, %s9362_s12  ;;  %v744_v4 = vmul.f32 %v734_v42, %v9590_v40  ;;  %v850_v46 = vpop.permute.xlu0 %849 }
  0xbb   : > { %v761_v9 = vpop.permute.xlu1 %760  ;;  %v864_v48 = vmul.f32 %v850_v46, %v9575_v30 }
  0xbc   : > { %v772_v15 = vmul.f32 %v757_v60, %v744_v4  ;;  %v15697_v4 = vmov 6  }
  0xbe   : > { %684 = vrot.lane.b32.xlu0 %v655_v19, %s9362_s12  ;;  %682 = vrot.lane.b32.xlu1 %v654_v31, %s9362_s12  ;;  %v746_v19 = vmul.f32 %v735_v50, %v9597_v44  ;;  %v773_v31 = vmul.f32 %v761_v9, %v739_v51 }
  0xbf   : > { %v765_v34 = vpop.permute.xlu1 %764 }
  0xc0   : > { %v774_v32 = vmul.f32 %v761_v9, %v746_v19 }
  0xc2   : > { %688 = vrot.lane.b32.xlu0 %v657_v35, %s9362_s12  ;;  %686 = vrot.lane.b32.xlu1 %v656_v37, %s9362_s12  ;;  %v775_v35 = vmul.f32 %v761_v9, %v747_v33  ;;  %v776_v37 = vmul.f32 %v765_v34, %v739_v51 }
  0xc4   : > { %v854_v51 = vpop.permute.xlu1 %853 }
  0xc5   : > { %v866_v42 = vmul.f32 %v854_v51, %v9587_v39 }
  0xc6   : > { %692 = vrot.lane.b32.xlu0 %v659_v43, %s9362_s12  ;;  %690 = vrot.lane.b32.xlu1 %v658_v45, %s9362_s12  ;;  %v777_v43 = vmul.f32 %v765_v34, %v749_v41  ;;  %v778_v45 = vmul.f32 %v765_v34, %v750_v38 }
  0xc8   : > { %v858_v50 = vpop.permute.xlu1 %857 }
  0xc9   : > { %v868_v57 = vmul.f32 %v858_v50, %v9597_v44  ;;  %v869_v58 = vmul.f32 %v858_v50, %v9603_v49 }
  0xca   : > { %696 = vrot.lane.b32.xlu0 %v661_v55, %s9362_s12  ;;  %694 = vrot.lane.b32.xlu1 %v660_v56, %s9362_s12  ;;  %v865_v55 = vmul.f32 %v850_v46, %v9581_v36  ;;  %v867_v56 = vmul.f32 %v854_v51, %v9590_v40 }
  0xce   : > { %791 = vrot.lane.b32.xlu0 %v767_v59, %s9363_s15  ;;  %793 = vrot.lane.b32.xlu1 %v768_v47, %s9363_s15  ;;  %v862_v59 = vpop.permute.xlu0 %861 }
  0xcf   : > { %v870_v47 = vmul.f32 %v862_v59, %v9610_v53  ;;  %v871_v52 = vmul.f32 %v862_v59, %v9613_v54 }
  0xd2   : > { %795 = vrot.lane.b32.xlu0 %v769_v61, %s9363_s15  ;;  %797 = vrot.lane.b32.xlu1 %v770_v62, %s9363_s15 }
  0xd6   : > { %799 = vrot.lane.b32.xlu0 %v771_v11, %s9363_s15  ;;  %801 = vrot.lane.b32.xlu1 %v772_v15, %s9363_s15 }
  0xda   : > { %803 = vrot.lane.b32.xlu0 %v773_v31, %s9363_s15  ;;  %805 = vrot.lane.b32.xlu1 %v774_v32, %s9363_s15 }
  0xde   : > { %807 = vrot.lane.b32.xlu0 %v775_v35, %s9363_s15  ;;  %809 = vrot.lane.b32.xlu1 %v776_v37, %s9363_s15 }
  0xe2   : > { %811 = vrot.lane.b32.xlu0 %v777_v43, %s9363_s15  ;;  %813 = vrot.lane.b32.xlu1 %v778_v45, %s9363_s15 }
  0xe6   : > { %882 = vrot.lane.b32.xlu0 %v865_v55, %s9355_s23  ;;  %880 = vrot.lane.b32.xlu1 %v864_v48, %s9355_s23 }
  0xea   : > { %886 = vrot.lane.b32.xlu0 %v867_v56, %s9355_s23  ;;  %884 = vrot.lane.b32.xlu1 %v866_v42, %s9355_s23 }
  0xee   : > { %890 = vrot.lane.b32.xlu0 %v869_v58, %s9355_s23  ;;  %888 = vrot.lane.b32.xlu1 %v868_v57, %s9355_s23 }
  0xf2   : > { %894 = vrot.lane.b32.xlu0 %v871_v52, %s9355_s23  ;;  %892 = vrot.lane.b32.xlu1 %v870_v47, %s9355_s23 }
  0xf6   : > { %938 = vrot.lane.b32.xlu0 %v9523_v21, %s9364_s16  ;;  %936 = vrot.lane.b32.xlu1 %v9514_v18, %s9364_s16 }
  0xfa   : > { %962 = vperm.xlu0 %9153, %v9463_v3   ;;  %958 = vperm.xlu1 %9152, %v9455_v0  }
  0xfe   : > { %966 = vperm.xlu1 %9152, %v9510_v17   ;;  %9154 = vset.pattern.permute.xlu0 %v15697_v4 }
 0x102   : > { %970 = vperm.xlu1 %9152, %v9484_v10  }
 0x106   : > { %9155 = vset.pattern.permute.xlu1 %v15697_v4 }
 0x110   : > { %v9684_v60 = vpop.permute.xlu0 %536  ;;  %v9686_v61 = vpop.permute.xlu1 %538 }
 0x114   : > { %v9688_v62 = vpop.permute.xlu0 %540  ;;  %v9690_v63 = vpop.permute.xlu1 %542 }
 0x118   : > { %v9694_v9 = vpop.permute.xlu0 %544  ;;  %v9696_v11 = vpop.permute.xlu1 %546 }
 0x11c   : > { %v9698_v15 = vpop.permute.xlu0 %548  ;;  %v9700_v19 = vpop.permute.xlu1 %550 }
 0x120   : > { %v9702_v31 = vpop.permute.xlu0 %552  ;;  %v9704_v32 = vpop.permute.xlu1 %554 }
 0x124   : > { %v9706_v33 = vpop.permute.xlu0 %556  ;;  %v9708_v34 = vpop.permute.xlu1 %558 }
 0x128   : > { %v9710_v35 = vpop.permute.xlu0 %676  ;;  %v9712_v37 = vpop.permute.xlu1 %674 }
 0x12c   : > { %v9714_v38 = vpop.permute.xlu0 %680  ;;  %v9716_v41 = vpop.permute.xlu1 %678 }
 0x130   : > { %v9718_v43 = vpop.permute.xlu0 %684  ;;  %v9720_v45 = vpop.permute.xlu1 %682 }
 0x134   : > { %v9722_v46 = vpop.permute.xlu0 %688  ;;  %v9724_v48 = vpop.permute.xlu1 %686 }
 0x138   : > { %v9726_v55 = vpop.permute.xlu0 %692  ;;  %v9728_v51 = vpop.permute.xlu1 %690 }
 0x13c   : > { %v9730_v42 = vpop.permute.xlu0 %696  ;;  %v9732_v56 = vpop.permute.xlu1 %694 }
 0x140   : > { %v9734_v50 = vpop.permute.xlu0 %791  ;;  %v9736_v57 = vpop.permute.xlu1 %793 }
 0x144   : > { %v9738_v58 = vpop.permute.xlu0 %795  ;;  %v9740_v59 = vpop.permute.xlu1 %797 }
 0x145   : > { %16179 = vst [vmem:[#allocation9_spill] sm:$0xff] %v9740_v59 }
 0x148   : > { %v9742_v47 = vpop.permute.xlu0 %799  ;;  %v9744_v52 = vpop.permute.xlu1 %801 }
 0x149   : > { %16180 = vst [vmem:[#allocation10_spill] sm:$0xff] %v9742_v47  ;;  %16181 = vst [vmem:[#allocation11_spill] sm:$0xff] %v9744_v52 }
 0x14c   : > { %v9746_v1 = vpop.permute.xlu0 %803  ;;  %v9748_v4 = vpop.permute.xlu1 %805 }
 0x14d   : > { %16182 = vst [vmem:[#allocation12_spill] sm:$0xff] %v9746_v1  ;;  %16183 = vst [vmem:[#allocation13_spill] sm:$0xff] %v9748_v4 }
 0x150   : > { %v9750_v24 = vpop.permute.xlu0 %807  ;;  %v9752_v23 = vpop.permute.xlu1 %809 }
 0x151   : > { %16184 = vst [vmem:[#allocation14_spill] sm:$0xff] %v9750_v24  ;;  %16185 = vst [vmem:[#allocation15_spill] sm:$0xff] %v9752_v23 }
 0x154   : > { %v9754_v22 = vpop.permute.xlu0 %811  ;;  %v9756_v20 = vpop.permute.xlu1 %813 }
 0x155   : > { %16186 = vst [vmem:[#allocation16_spill] sm:$0xff] %v9754_v22  ;;  %16187 = vst [vmem:[#allocation17_spill] sm:$0xff] %v9756_v20 }
 0x158   : > { %v9758_v2 = vpop.permute.xlu0 %882  ;;  %v9760_v6 = vpop.permute.xlu1 %880 }
 0x159   : > { %16188 = vst [vmem:[#allocation18_spill] sm:$0xff] %v9758_v2  ;;  %16189 = vst [vmem:[#allocation19_spill] sm:$0xff] %v9760_v6 }
 0x15c   : > { %v9762_v5 = vpop.permute.xlu0 %886  ;;  %v9764_v16 = vpop.permute.xlu1 %884 }
 0x15d   : > { %16190 = vst [vmem:[#allocation20_spill] sm:$0xff] %v9762_v5  ;;  %16191 = vst [vmem:[#allocation21_spill] sm:$0xff] %v9764_v16 }
 0x160   : > { %v9766_v14 = vpop.permute.xlu0 %890  ;;  %v9768_v7 = vpop.permute.xlu1 %888 }
 0x161   : > { %16192 = vst [vmem:[#allocation22_spill] sm:$0xff] %v9766_v14  ;;  %16193 = vst [vmem:[#allocation23_spill] sm:$0xff] %v9768_v7 }
 0x164   : > { %v9770_v8 = vpop.permute.xlu0 %894  ;;  %v9772_v24 = vpop.permute.xlu1 %892 }
 0x165   : > { %16194 = vst [vmem:[#allocation24_spill] sm:$0xff] %v9770_v8  ;;  %16195 = vst [vmem:[#allocation25_spill] sm:$0xff] %v9772_v24 }
 0x168   : > { %v939_v1 = vpop.permute.xlu0 %938  ;;  %v937_v4 = vpop.permute.xlu1 %936 }
 0x169   : > { %v941_v20 = vsel %vm940_vm2, %v937_v4, %v939_v1  ;;  %v945_v6 = vmul.f32 %v937_v4, %v9575_v30  ;;  %v947_v14 = vmul.f32 0.0, %v939_v1  ;;  %v948_v7 = vmul.f32 %v937_v4, %v9587_v39 }
 0x16a   : > { %v946_v2 = vmul.f32 %v941_v20, %v9581_v36  ;;  %v949_v52 = vmul.f32 %v941_v20, %v9590_v40  ;;  %v952_v1 = vmul.f32 %v941_v20, %v9603_v49 }
 0x179   : > { %v959_v5 = vpop.permute.xlu1 %958  ;;  %v963_v22 = vpop.permute.xlu0 %962 }
 0x17a   : > { %v974_v23 = vmul.f32 %v959_v5, %v946_v2  ;;  %v973_v16 = vmul.f32 %v959_v5, %v945_v6  ;;  %v976_v24 = vmul.f32 %v963_v22, %v948_v7  ;;  %v975_v8 = vmul.f32 %v959_v5, %v947_v14 }
 0x17b   : > { %v978_v2 = vmul.f32 %v963_v22, %v947_v14  ;;  %v977_v6 = vmul.f32 %v963_v22, %v949_v52  ;;  %v955_v22 = vmul.f32 %v941_v20, %v9613_v54 }
 0x17c   : > { %999 = vrot.lane.b32.xlu1 %v974_v23, %s9366_s17  ;;  %997 = vrot.lane.b32.xlu0 %v973_v16, %s9366_s17  ;;  %v951_v16 = vmul.f32 %v937_v4, %v9597_v44 }
 0x17d   : > { %v967_v59 = vpop.permute.xlu1 %966 }
 0x17e   : > { %v980_v23 = vmul.f32 %v967_v59, %v952_v1  ;;  %v979_v7 = vmul.f32 %v967_v59, %v951_v16 }
 0x180   : > { %1003 = vrot.lane.b32.xlu1 %v976_v24, %s9366_s17  ;;  %1001 = vrot.lane.b32.xlu0 %v975_v8, %s9366_s17  ;;  %v954_v8 = vmul.f32 %v937_v4, %v9610_v53  ;;  %v981_v24 = vmul.f32 %v967_v59, %v947_v14 }
 0x181   : > { %v971_v5 = vpop.permute.xlu1 %970 }
 0x182   : > { %v982_v47 = vmul.f32 %v971_v5, %v954_v8  ;;  %v983_v52 = vmul.f32 %v971_v5, %v955_v22 }
 0x184   : > { %1007 = vrot.lane.b32.xlu1 %v978_v2, %s9366_s17  ;;  %1005 = vrot.lane.b32.xlu0 %v977_v6, %s9366_s17  ;;  %v984_v2 = vmul.f32 %v971_v5, %v947_v14  ;;  %v15735_v14 = vmov 7  }
 0x188   : > { %1011 = vrot.lane.b32.xlu1 %v980_v23, %s9366_s17  ;;  %1009 = vrot.lane.b32.xlu0 %v979_v7, %s9366_s17 }
 0x18c   : > { %1013 = vrot.lane.b32.xlu0 %v981_v24, %s9366_s17  ;;  %1015 = vrot.lane.b32.xlu1 %v982_v47, %s9366_s17 }
 0x190   : > { %1017 = vrot.lane.b32.xlu0 %v983_v52, %s9366_s17  ;;  %1019 = vrot.lane.b32.xlu1 %v984_v2, %s9366_s17 }
 0x194   : > { %1054 = vrot.lane.b32.xlu0 %v9488_v12, %s9367_s18  ;;  %1056 = vrot.lane.b32.xlu1 %v9494_v13, %s9367_s18 }
 0x198   : > { %1076 = vperm.xlu0 %9154, %v9455_v0   ;;  %1080 = vperm.xlu1 %9155, %v9463_v3  }
 0x19c   : > { %1088 = vperm.xlu0 %9154, %v9484_v10   ;;  %1084 = vperm.xlu1 %9155, %v9510_v17  }
 0x1a0   : > { %9156 = vset.pattern.permute.xlu1 %v15735_v14  ;;  %9157 = vset.pattern.permute.xlu0 %v15735_v14 }
 0x1ee   : > { %v9805_v20 = vpop.permute.xlu0 %997  ;;  %v9807_v4 = vpop.permute.xlu1 %999 }
 0x1f2   : > { %v9809_v12 = vpop.permute.xlu0 %1001  ;;  %v9811_v13 = vpop.permute.xlu1 %1003 }
 0x1f3   : > { %16196 = vst [vmem:[#allocation26_spill] sm:$0xff] %v9811_v13 }
 0x1f6   : > { %v9813_v59 = vpop.permute.xlu0 %1005  ;;  %v9815_v47 = vpop.permute.xlu1 %1007 }
 0x1f7   : > { %16197 = vst [vmem:[#allocation27_spill] sm:$0xff] %v9813_v59  ;;  %16198 = vst [vmem:[#allocation28_spill] sm:$0xff] %v9815_v47 }
 0x1fa   : > { %v9817_v6 = vpop.permute.xlu0 %1009  ;;  %v9819_v1 = vpop.permute.xlu1 %1011 }
 0x1fb   : > { %16199 = vst [vmem:[#allocation29_spill] sm:$0xff] %v9817_v6  ;;  %16200 = vst [vmem:[#allocation30_spill] sm:$0xff] %v9819_v1 }
 0x1fe   : > { %v9821_v16 = vpop.permute.xlu0 %1013  ;;  %v9823_v23 = vpop.permute.xlu1 %1015 }
 0x1ff   : > { %16201 = vst [vmem:[#allocation31_spill] sm:$0xff] %v9821_v16  ;;  %16202 = vst [vmem:[#allocation32_spill] sm:$0xff] %v9823_v23 }
 0x202   : > { %v9825_v7 = vpop.permute.xlu0 %1017  ;;  %v9827_v5 = vpop.permute.xlu1 %1019 }
 0x203   : > { %16203 = vst [vmem:[#allocation33_spill] sm:$0xff] %v9825_v7  ;;  %16204 = vst [vmem:[#allocation34_spill] sm:$0xff] %v9827_v5 }
 0x206   : > { %v1055_v8 = vpop.permute.xlu0 %1054  ;;  %v1057_v24 = vpop.permute.xlu1 %1056 }
 0x207   : > { %v1059_v22 = vsel %vm1058_vm3, %v1055_v8, %v1057_v24  ;;  %v1063_v52 = vmul.f32 %v1055_v8, %v9575_v30  ;;  %v1065_v16 = vmul.f32 0.0, %v1057_v24  ;;  %v1066_v5 = vmul.f32 %v1055_v8, %v9587_v39 }
 0x208   : > { %v1064_v2 = vmul.f32 %v1059_v22, %v9581_v36  ;;  %v1067_v13 = vmul.f32 %v1059_v22, %v9590_v40  ;;  %v1069_v24 = vmul.f32 %v1055_v8, %v9597_v44 }
 0x217   : > { %v1077_v14 = vpop.permute.xlu0 %1076  ;;  %v1081_v47 = vpop.permute.xlu1 %1080 }
 0x218   : > { %v1091_v6 = vmul.f32 %v1077_v14, %v1063_v52  ;;  %v1092_v1 = vmul.f32 %v1077_v14, %v1064_v2  ;;  %v1093_v23 = vmul.f32 %v1077_v14, %v1065_v16  ;;  %v1094_v7 = vmul.f32 %v1081_v47, %v1066_v5 }
 0x219   : > { %v1095_v59 = vmul.f32 %v1081_v47, %v1067_v13  ;;  %v1096_v52 = vmul.f32 %v1081_v47, %v1065_v16 }
 0x21a   : > { %1115 = vrot.lane.b32.xlu1 %v1091_v6, %s9369_s19  ;;  %1117 = vrot.lane.b32.xlu0 %v1092_v1, %s9369_s19  ;;  %v1070_v6 = vmul.f32 %v1059_v22, %v9603_v49 }
 0x21b   : > { %v1085_v2 = vpop.permute.xlu1 %1084  ;;  %v1089_v5 = vpop.permute.xlu0 %1088 }
 0x21c   : > { %v1097_v1 = vmul.f32 %v1085_v2, %v1069_v24  ;;  %v1098_v14 = vmul.f32 %v1085_v2, %v1070_v6  ;;  %v1099_v13 = vmul.f32 %v1085_v2, %v1065_v16 }
 0x21e   : > { %1119 = vrot.lane.b32.xlu1 %v1093_v23, %s9369_s19  ;;  %1121 = vrot.lane.b32.xlu0 %v1094_v7, %s9369_s19  ;;  %v1072_v23 = vmul.f32 %v1055_v8, %v9610_v53  ;;  %v1073_v7 = vmul.f32 %v1059_v22, %v9613_v54  ;;  %v15743_v8 = vmov 8  }
 0x220   : > { %v1100_v47 = vmul.f32 %v1089_v5, %v1072_v23 }
 0x222   : > { %1123 = vrot.lane.b32.xlu1 %v1095_v59, %s9369_s19  ;;  %1125 = vrot.lane.b32.xlu0 %v1096_v52, %s9369_s19  ;;  %v1101_v59 = vmul.f32 %v1089_v5, %v1073_v7  ;;  %v1102_v52 = vmul.f32 %v1089_v5, %v1065_v16 }
 0x226   : > { %1129 = vrot.lane.b32.xlu0 %v1098_v14, %s9369_s19  ;;  %1127 = vrot.lane.b32.xlu1 %v1097_v1, %s9369_s19 }
 0x22a   : > { %1133 = vrot.lane.b32.xlu0 %v1100_v47, %s9369_s19  ;;  %1131 = vrot.lane.b32.xlu1 %v1099_v13, %s9369_s19 }
 0x22e   : > { %1137 = vrot.lane.b32.xlu0 %v1102_v52, %s9369_s19  ;;  %1135 = vrot.lane.b32.xlu1 %v1101_v59, %s9369_s19 }
 0x232   : > { %1173 = vperm.xlu1 %9156, %v9455_v0   ;;  %1177 = vperm.xlu0 %9157, %v9463_v3  }
 0x236   : > { %1181 = vperm.xlu1 %9156, %v9510_v17   ;;  %9158 = vset.pattern.permute.xlu0 %v15743_v8 }
 0x23a   : > { %1185 = vperm.xlu1 %9156, %v9484_v10  }
 0x23e   : > { %9159 = vset.pattern.permute.xlu1 %v15743_v8 }
 0x28c   : > { %v9856_v22 = vpop.permute.xlu0 %1117  ;;  %v9858_v16 = vpop.permute.xlu1 %1115 }
 0x290   : > { %v9860_v2 = vpop.permute.xlu0 %1121  ;;  %v9862_v24 = vpop.permute.xlu1 %1119 }
 0x291   : > { %16205 = vst [vmem:[#allocation35_spill] sm:$0xff] %v9860_v2  ;;  %16206 = vst [vmem:[#allocation36_spill] sm:$0xff] %v9862_v24 }
 0x294   : > { %v9864_v6 = vpop.permute.xlu0 %1125  ;;  %v9866_v1 = vpop.permute.xlu1 %1123 }
 0x295   : > { %16207 = vst [vmem:[#allocation37_spill] sm:$0xff] %v9864_v6  ;;  %16208 = vst [vmem:[#allocation38_spill] sm:$0xff] %v9866_v1 }
 0x298   : > { %v9868_v14 = vpop.permute.xlu0 %1129  ;;  %v9870_v5 = vpop.permute.xlu1 %1127 }
 0x299   : > { %16209 = vst [vmem:[#allocation39_spill] sm:$0xff] %v9868_v14  ;;  %16210 = vst [vmem:[#allocation40_spill] sm:$0xff] %v9870_v5 }
 0x29c   : > { %v9872_v23 = vpop.permute.xlu0 %1133  ;;  %v9874_v13 = vpop.permute.xlu1 %1131 }
 0x29d   : > { %16211 = vst [vmem:[#allocation41_spill] sm:$0xff] %v9872_v23  ;;  %16212 = vst [vmem:[#allocation42_spill] sm:$0xff] %v9874_v13 }
 0x2a0   : > { %v9876_v47 = vpop.permute.xlu0 %1137  ;;  %v9878_v7 = vpop.permute.xlu1 %1135 }
 0x2a1   : > { %16213 = vst [vmem:[#allocation43_spill] sm:$0xff] %v9876_v47  ;;  %16214 = vst [vmem:[#allocation44_spill] sm:$0xff] %v9878_v7 }
 0x2b1   : > { %v1174_v59 = vpop.permute.xlu1 %1173  ;;  %v1178_v52 = vpop.permute.xlu0 %1177 }
 0x2b2   : > { %v1188_v8 = vmul.f32 %v1174_v59, %v9575_v30  ;;  %v1189_v6 = vmul.f32 %v1174_v59, %v9581_v36  ;;  %v1191_v5 = vmul.f32 %v1178_v52, %v9587_v39  ;;  %v1190_v14 = vmul.f32 0.0, %v1174_v59 }
 0x2b3   : > { %v1192_v13 = vmul.f32 %v1178_v52, %v9590_v40  ;;  %v1193_v23 = vmul.f32 0.0, %v1178_v52 }
 0x2b4   : > { %1214 = vrot.lane.b32.xlu1 %v1189_v6, %s15760_s20  ;;  %1212 = vrot.lane.b32.xlu0 %v1188_v8, %s15760_s20 }
 0x2b5   : > { %v1182_v47 = vpop.permute.xlu1 %1181 }
 0x2b6   : > { %v1194_v7 = vmul.f32 %v1182_v47, %v9597_v44  ;;  %v1195_v6 = vmul.f32 %v1182_v47, %v9603_v49  ;;  %v1196_v59 = vmul.f32 0.0, %v1182_v47 }
 0x2b8   : > { %1218 = vrot.lane.b32.xlu1 %v1191_v5, %s15760_s20  ;;  %1216 = vrot.lane.b32.xlu0 %v1190_v14, %s15760_s20 }
 0x2b9   : > { %v1186_v8 = vpop.permute.xlu1 %1185 }
 0x2ba   : > { %v1197_v52 = vmul.f32 %v1186_v8, %v9610_v53  ;;  %v1198_v14 = vmul.f32 %v1186_v8, %v9613_v54  ;;  %v1199_v5 = vmul.f32 0.0, %v1186_v8 }
 0x2bc   : > { %1222 = vrot.lane.b32.xlu1 %v1193_v23, %s15760_s20  ;;  %1220 = vrot.lane.b32.xlu0 %v1192_v13, %s15760_s20  ;;  %v16215_v23 = vmov 1   ;;  %v16216_v13 = vmov 0  }
 0x2c0   : > { %1226 = vrot.lane.b32.xlu1 %v1195_v6, %s15760_s20  ;;  %1224 = vrot.lane.b32.xlu0 %v1194_v7, %s15760_s20 }
 0x2c4   : > { %1228 = vrot.lane.b32.xlu0 %v1196_v59, %s15760_s20  ;;  %1230 = vrot.lane.b32.xlu1 %v1197_v52, %s15760_s20 }
 0x2c8   : > { %1232 = vrot.lane.b32.xlu0 %v1198_v14, %s15760_s20  ;;  %1234 = vrot.lane.b32.xlu1 %v1199_v5, %s15760_s20  ;;  %s9374_s20 = smov 98  }
 0x2cc   : > { %1269 = vrot.lane.b32.xlu0 %v9514_v18, %s9372_s21  ;;  %1271 = vrot.lane.b32.xlu1 %v9523_v21, %s9372_s21 }
 0x2d0   : > { %1291 = vperm.xlu0 %9158, %v9455_v0   ;;  %1295 = vperm.xlu1 %9159, %v9463_v3  }
 0x2d4   : > { %1303 = vperm.xlu0 %9158, %v9484_v10   ;;  %1299 = vperm.xlu1 %9159, %v9510_v17  }
 0x2d8   : > { %9161 = vset.pattern.permute.xlu0 %v16215_v23  ;;  %9160 = vset.pattern.permute.xlu1 %v16216_v13 }
 0x326   : > { %v9910_v47 = vpop.permute.xlu0 %1212  ;;  %v9912_v7 = vpop.permute.xlu1 %1214 }
 0x327   : > { %16217 = vst [vmem:[#allocation45_spill] sm:$0xff] %v9910_v47  ;;  %16218 = vst [vmem:[#allocation46_spill] sm:$0xff] %v9912_v7 }
 0x32a   : > { %v9914_v18 = vpop.permute.xlu0 %1216  ;;  %v9916_v6 = vpop.permute.xlu1 %1218 }
 0x32b   : > { %16219 = vst [vmem:[#allocation47_spill] sm:$0xff] %v9914_v18  ;;  %16220 = vst [vmem:[#allocation48_spill] sm:$0xff] %v9916_v6 }
 0x32e   : > { %v9918_v21 = vpop.permute.xlu0 %1220  ;;  %v9920_v0 = vpop.permute.xlu1 %1222 }
 0x32f   : > { %16221 = vst [vmem:[#allocation49_spill] sm:$0xff] %v9918_v21  ;;  %16222 = vst [vmem:[#allocation50_spill] sm:$0xff] %v9920_v0 }
 0x332   : > { %v9922_v3 = vpop.permute.xlu0 %1224  ;;  %v9924_v10 = vpop.permute.xlu1 %1226 }
 0x333   : > { %16223 = vst [vmem:[#allocation51_spill] sm:$0xff] %v9922_v3  ;;  %16224 = vst [vmem:[#allocation52_spill] sm:$0xff] %v9924_v10 }
 0x336   : > { %v9926_v8 = vpop.permute.xlu0 %1228  ;;  %v9928_v59 = vpop.permute.xlu1 %1230 }
 0x337   : > { %16225 = vst [vmem:[#allocation53_spill] sm:$0xff] %v9926_v8  ;;  %16226 = vst [vmem:[#allocation54_spill] sm:$0xff] %v9928_v59 }
 0x33a   : > { %v9930_v52 = vpop.permute.xlu0 %1232  ;;  %v9932_v14 = vpop.permute.xlu1 %1234 }
 0x33b   : > { %16227 = vst [vmem:[#allocation55_spill] sm:$0xff] %v9930_v52  ;;  %16228 = vst [vmem:[#allocation56_spill] sm:$0xff] %v9932_v14 }
 0x33e   : > { %v1270_v5 = vpop.permute.xlu0 %1269  ;;  %v1272_v18 = vpop.permute.xlu1 %1271 }
 0x33f   : > { %v1274_v6 = vsel %vm1273_vm4, %v1270_v5, %v1272_v18  ;;  %v1278_v0 = vmul.f32 %v1270_v5, %v9575_v30  ;;  %v1280_v8 = vmul.f32 0.0, %v1272_v18  ;;  %v1281_v59 = vmul.f32 %v1270_v5, %v9587_v39 }
 0x340   : > { %v1279_v21 = vmul.f32 %v1274_v6, %v9581_v36  ;;  %v1282_v2 = vmul.f32 %v1274_v6, %v9590_v40  ;;  %v1285_v18 = vmul.f32 %v1274_v6, %v9603_v49  ;;  %v1284_v24 = vmul.f32 %v1270_v5, %v9597_v44 }
 0x34f   : > { %v1292_v3 = vpop.permute.xlu0 %1291  ;;  %v1296_v7 = vpop.permute.xlu1 %1295 }
 0x350   : > { %v1306_v47 = vmul.f32 %v1292_v3, %v1278_v0  ;;  %v1307_v10 = vmul.f32 %v1292_v3, %v1279_v21  ;;  %v1308_v14 = vmul.f32 %v1292_v3, %v1280_v8  ;;  %v1309_v52 = vmul.f32 %v1296_v7, %v1281_v59 }
 0x351   : > { %v1310_v1 = vmul.f32 %v1296_v7, %v1282_v2  ;;  %v1311_v0 = vmul.f32 %v1296_v7, %v1280_v8  ;;  %v1287_v59 = vmul.f32 %v1270_v5, %v9610_v53  ;;  %v9980_v5 = vld [vmem:[%s15687_s2 + $0x8] sm:$0xff] }
 0x352   : > { %1330 = vrot.lane.b32.xlu1 %v1306_v47, %s9373_s22  ;;  %1332 = vrot.lane.b32.xlu0 %v1307_v10, %s9373_s22  ;;  %16232 = vst [vmem:[#allocation60_spill] sm:$0xff] %v9980_v5 }
 0x353   : > { %v1300_v21 = vpop.permute.xlu1 %1299  ;;  %v1304_v10 = vpop.permute.xlu0 %1303 }
 0x354   : > { %v1312_v47 = vmul.f32 %v1300_v21, %v1284_v24  ;;  %v1313_v3 = vmul.f32 %v1300_v21, %v1285_v18  ;;  %v1315_v2 = vmul.f32 %v1304_v10, %v1287_v59  ;;  %v1314_v7 = vmul.f32 %v1300_v21, %v1280_v8  ;;  %v9958_v24 = vld [vmem:[%s15687_s2] sm:$0xff] }
 0x355   : > { %16229 = vst [vmem:[#allocation57_spill] sm:$0xff] %v9958_v24  ;;  %v442_v59 = vmul.f32 %v9572_v29, %v9581_v36 }
 0x356   : > { %1334 = vrot.lane.b32.xlu1 %v1308_v14, %s9373_s22  ;;  %1336 = vrot.lane.b32.xlu0 %v1309_v52, %s9373_s22  ;;  %v1288_v52 = vmul.f32 %v1274_v6, %v9613_v54  ;;  %v1317_v14 = vmul.f32 %v1304_v10, %v1280_v8  ;;  %v9965_v6 = vld [vmem:[%s15687_s2 + $0x18] sm:$0xff]  ;;  %v9970_v8 = vld [vmem:[%s15687_s2 + $0x10] sm:$0xff] }
 0x357   : > { %16230 = vst [vmem:[#allocation58_spill] sm:$0xff] %v9965_v6  ;;  %16231 = vst [vmem:[#allocation59_spill] sm:$0xff] %v9970_v8  ;;  %v474_v36 = vmul.f32 %v9552_v25, %v442_v59 }
 0x35a   : > { %1338 = vrot.lane.b32.xlu1 %v1310_v1, %s9373_s22  ;;  %1340 = vrot.lane.b32.xlu0 %v1311_v0, %s9373_s22  ;;  %v1316_v1 = vmul.f32 %v1304_v10, %v1288_v52  ;;  %v16233_v0 = vmov 2  }
 0x35e   : > { %1344 = vrot.lane.b32.xlu0 %v1313_v3, %s9373_s22  ;;  %1342 = vrot.lane.b32.xlu1 %v1312_v47, %s9373_s22 }
 0x362   : > { %1348 = vrot.lane.b32.xlu0 %v1315_v2, %s9373_s22  ;;  %1346 = vrot.lane.b32.xlu1 %v1314_v7, %s9373_s22  ;;  %v10002_v2 = vmul.f32 0.0, %v9560_v27  ;;  %v445_v7 = vmul.f32 %v9572_v29, %v9590_v40  ;;  %v10019_v40 = vmul.f32 %v9572_v29, %v9603_v49 }
 0x364   : > { %v472_v52 = vmul.f32 %v9552_v25, %v10002_v2 }
 0x366   : > { %1352 = vrot.lane.b32.xlu0 %v1317_v14, %s9373_s22  ;;  %1350 = vrot.lane.b32.xlu1 %v1316_v1, %s9373_s22 }
 0x36a   : > { %1424 = vperm.xlu0 %9161, %v9958_v24   ;;  %1393 = vperm.xlu1 %9160, %v9958_v24  }
 0x36e   : > { %1436 = vperm.xlu0 %9161, %v9965_v6   ;;  %1403 = vperm.xlu1 %9160, %v9970_v8  }
 0x372   : > { %9163 = vset.pattern.permute.xlu0 %v16216_v13  ;;  %1408 = vperm.xlu1 %9160, %v9965_v6   ;;  %v451_v13 = vmul.f32 %v9572_v29, %v9613_v54  ;;  %v16266_v6 = vld [vmem:[#allocation43_spill] sm:$0xff] }
 0x373   : > { %464 = vperm.xlu0 %9163, %v9510_v17   ;;  %v436_v17 = vsel %vm435_vm5, %v9560_v27, %v9572_v29  ;;  %v481_v29 = vmul.f32 %v9563_v28, %v10002_v2 }
 0x374   : > { %v441_v10 = vmul.f32 %v436_v17, %v9575_v30  ;;  %v444_v1 = vmul.f32 %v436_v17, %v9587_v39  ;;  %v450_v14 = vmul.f32 %v436_v17, %v9610_v53  ;;  %v10015_v27 = vmul.f32 %v436_v17, %v9597_v44 }
 0x375   : > { %v561_v53 = vsel %vm560_vm1, %v9684_v60, %v9686_v61  ;;  %v477_v17 = vmul.f32 %v9558_v26, %v445_v7  ;;  %v563_v60 = vsel %vm560_vm1, %v9690_v63, %v9694_v9  ;;  %v568_v63 = vsel %vm560_vm1, %v9706_v33, %v9708_v34 }
 0x376   : > { %9162 = vset.pattern.permute.xlu1 %v16215_v23  ;;  %v473_v30 = vmul.f32 %v9552_v25, %v441_v10  ;;  %v476_v39 = vmul.f32 %v9558_v26, %v444_v1  ;;  %v562_v25 = vsel %vm560_vm1, %v9686_v61, %v9688_v62  ;;  %v482_v49 = vmul.f32 %v9563_v28, %v450_v14 }
 0x377   : > { %1398 = vperm.xlu0 %9163, %v9980_v5   ;;  %1428 = vperm.xlu1 %9162, %v9980_v5   ;;  %v564_v61 = vsel %vm560_vm1, %v9694_v9, %v9696_v11  ;;  %v483_v10 = vmul.f32 %v9563_v28, %v451_v13  ;;  %v581_v59 = vadd.f32 %v561_v53, %v472_v52 }
 0x378   : > { %v582_v1 = vadd.f32 %v562_v25, %v473_v30  ;;  %v583_v5 = vadd.f32 %v9688_v62, %v474_v36  ;;  %v586_v7 = vadd.f32 %v9696_v11, %v477_v17  ;;  %v699_v9 = vsel %vm698_vm6, %v9712_v37, %v9710_v35 }
 0x379   : > { %v700_v28 = vsel %vm698_vm6, %v9710_v35, %v9716_v41  ;;  %v585_v62 = vadd.f32 %v564_v61, %v476_v39  ;;  %v10067_v11 = vsel %vm560_vm1, %v9700_v19, %v9702_v31  ;;  %v592_v52 = vadd.f32 %v9708_v34, %v483_v10 }
 0x37a   : > { %v701_v37 = vsel %vm698_vm6, %v9714_v38, %v9720_v45  ;;  %v702_v35 = vsel %vm698_vm6, %v9720_v45, %v9718_v43  ;;  %v591_v14 = vadd.f32 %v568_v63, %v482_v49  ;;  %v719_v30 = vadd.f32 %v699_v9, %v581_v59  ;;  %v16236_v49 = vld [vmem:[#allocation11_spill] sm:$0xff] }
 0x37b   : > { %1432 = vperm.xlu1 %9162, %v9970_v8   ;;  %v720_v36 = vadd.f32 %v700_v28, %v582_v1  ;;  %v724_v39 = vadd.f32 %v9718_v43, %v586_v7  ;;  %v705_v34 = vsel %vm698_vm6, %v9726_v55, %v9732_v56  ;;  %v706_v38 = vsel %vm698_vm6, %v9732_v56, %v9730_v42  ;;  %v16238_v1 = vld [vmem:[#allocation15_spill] sm:$0xff] }
 0x37c   : > { %v816_v45 = vsel %vm815_vm7, %v9734_v50, %v9736_v57  ;;  %v723_v25 = vadd.f32 %v702_v35, %v585_v62  ;;  %v817_v43 = vsel %vm815_vm7, %v9736_v57, %v9738_v58  ;;  %v10102_v55 = vsel %vm698_vm6, %v9722_v46, %v9728_v51  ;;  %v16235_v50 = vld [vmem:[#allocation9_spill] sm:$0xff]  ;;  %v16240_v62 = vld [vmem:[#allocation18_spill] sm:$0xff] }
 0x37d   : > { %v730_v56 = vadd.f32 %v9730_v42, %v592_v52  ;;  %v836_v61 = vadd.f32 %v816_v45, %v719_v30  ;;  %v837_v10 = vadd.f32 %v817_v43, %v720_v36  ;;  %v841_v59 = vadd.f32 %v16236_v49, %v724_v39  ;;  %v16242_v52 = vld [vmem:[#allocation13_spill] sm:$0xff] }
 0x37e   : > { %v16246_v39 = vld [vmem:[#allocation21_spill] sm:$0xff] }
 0x37f   : > { %9164 = vset.pattern.permute.xlu1 %v16233_v0  ;;  %v475_v0 = vmul.f32 %v9558_v26, %v10002_v2  ;;  %v567_v26 = vsel %vm560_vm1, %v9704_v32, %v9706_v33  ;;  %v10062_v32 = vsel %vm560_vm1, %v9698_v15, %v9700_v19  ;;  %v721_v19 = vadd.f32 %v9716_v41, %v583_v5  ;;  %v16234_v5 = vld [vmem:[#allocation10_spill] sm:$0xff] }
 0x380   : > { %v590_v33 = vadd.f32 %v567_v26, %v481_v29  ;;  %v10094_v41 = vsel %vm698_vm6, %v9724_v48, %v9722_v46  ;;  %v818_v29 = vsel %vm815_vm7, %v16235_v50, %v16234_v5  ;;  %v819_v48 = vsel %vm815_vm7, %v16234_v5, %v16236_v49  ;;  %v16237_v46 = vld [vmem:[#allocation16_spill] sm:$0xff]  ;;  %v16239_v26 = vld [vmem:[#allocation17_spill] sm:$0xff] }
 0x381   : > { %v584_v13 = vadd.f32 %v563_v60, %v475_v0  ;;  %v729_v60 = vadd.f32 %v706_v38, %v591_v14  ;;  %v838_v57 = vadd.f32 %v9738_v58, %v721_v19  ;;  %v822_v42 = vsel %vm815_vm7, %v16238_v1, %v16237_v46  ;;  %v16244_v14 = vld [vmem:[#allocation14_spill] sm:$0xff]  ;;  %v16245_v19 = vld [vmem:[#allocation20_spill] sm:$0xff] }
 0x382   : > { %v728_v17 = vadd.f32 %v705_v34, %v590_v33  ;;  %v823_v7 = vsel %vm815_vm7, %v16237_v46, %v16239_v26  ;;  %v16241_v33 = vld [vmem:[#allocation19_spill] sm:$0xff]  ;;  %v10134_v30 = vsel %vm815_vm7, %v16242_v52, %v16244_v14  ;;  %v847_v36 = vadd.f32 %v16239_v26, %v730_v56  ;;  %v16247_v50 = vld [vmem:[#allocation24_spill] sm:$0xff]  ;;  %v16252_v1 = vld [vmem:[#allocation26_spill] sm:$0xff] }
 0x383   : > { %v722_v53 = vadd.f32 %v701_v37, %v584_v13  ;;  %v840_v13 = vadd.f32 %v819_v48, %v723_v25  ;;  %v896_v58 = vsel %vm435_vm5, %v16241_v33, %v16240_v62  ;;  %v16243_v37 = vld [vmem:[#allocation12_spill] sm:$0xff]  ;;  %v897_v34 = vsel %vm435_vm5, %v16246_v39, %v16245_v19 }
 0x384   : > { %v10129_v35 = vsel %vm815_vm7, %v16243_v37, %v16242_v52  ;;  %v845_v38 = vadd.f32 %v822_v42, %v728_v17  ;;  %v846_v45 = vadd.f32 %v823_v7, %v729_v60  ;;  %v912_v25 = vadd.f32 %v16241_v33, %v836_v61  ;;  %v16249_v17 = vld [vmem:[#allocation22_spill] sm:$0xff]  ;;  %v16250_v60 = vld [vmem:[#allocation23_spill] sm:$0xff]  ;;  %v16253_v26 = vld [vmem:[#allocation28_spill] sm:$0xff] }
 0x385   : > { %v839_v28 = vadd.f32 %v818_v29, %v722_v53  ;;  %v914_v53 = vadd.f32 %v16240_v62, %v838_v57  ;;  %v913_v43 = vadd.f32 %v896_v58, %v837_v10  ;;  %v917_v5 = vadd.f32 %v16245_v19, %v841_v59  ;;  %v16248_v29 = vld [vmem:[#allocation25_spill] sm:$0xff]  ;;  %v16251_v59 = vld [vmem:[#allocation27_spill] sm:$0xff] }
 0x386   : > { %v899_v49 = vsel %vm435_vm5, %v16248_v29, %v16247_v50  ;;  %v1022_v56 = vsel %vm1021_vm8, %v9805_v20, %v9807_v4  ;;  %v916_v46 = vadd.f32 %v897_v34, %v840_v13  ;;  %v10153_v57 = vsel %vm435_vm5, %v16250_v60, %v16249_v17  ;;  %v16254_v37 = vld [vmem:[#allocation33_spill] sm:$0xff] }
 0x387   : > { %v915_v48 = vadd.f32 %v16246_v39, %v839_v28  ;;  %v1023_v61 = vsel %vm1021_vm8, %v9807_v4, %v9809_v12  ;;  %v923_v10 = vadd.f32 %v16247_v50, %v847_v36  ;;  %v1024_v42 = vsel %vm1021_vm8, %v16252_v1, %v16251_v59  ;;  %v16255_v36 = vld [vmem:[#allocation32_spill] sm:$0xff]  ;;  %v16256_v39 = vld [vmem:[#allocation34_spill] sm:$0xff] }
 0x388   : > { %v1025_v7 = vsel %vm1021_vm8, %v16251_v59, %v16253_v26  ;;  %v921_v62 = vadd.f32 %v16248_v29, %v845_v38  ;;  %v922_v33 = vadd.f32 %v899_v49, %v846_v45  ;;  %v1042_v4 = vadd.f32 %v9805_v20, %v912_v25  ;;  %v16257_v45 = vld [vmem:[#allocation36_spill] sm:$0xff]  ;;  %v16259_v25 = vld [vmem:[#allocation29_spill] sm:$0xff]  ;;  %v16260_v29 = vld [vmem:[#allocation31_spill] sm:$0xff] }
 0x389   : > { %v1043_v12 = vadd.f32 %v1022_v56, %v913_v43  ;;  %v1044_v58 = vadd.f32 %v1023_v61, %v914_v53  ;;  %v1045_v52 = vadd.f32 %v16252_v1, %v915_v48  ;;  %v1028_v19 = vsel %vm1021_vm8, %v16255_v36, %v16254_v37  ;;  %v16258_v53 = vld [vmem:[#allocation30_spill] sm:$0xff]  ;;  %v16262_v48 = vld [vmem:[#allocation35_spill] sm:$0xff]  ;;  %v16263_v26 = vld [vmem:[#allocation37_spill] sm:$0xff] }
 0x38a   : > { %v1029_v34 = vsel %vm1021_vm8, %v16254_v37, %v16256_v39  ;;  %v1046_v50 = vadd.f32 %v1024_v42, %v916_v46  ;;  %v1047_v59 = vadd.f32 %v1025_v7, %v917_v5  ;;  %v1140_v38 = vsel %vm1139_vm9, %v9858_v16, %v9856_v22  ;;  %v16261_v56 = vld [vmem:[#allocation38_spill] sm:$0xff] }
 0x38b   : > { %v1141_v20 = vsel %vm1139_vm9, %v9856_v22, %v16257_v45  ;;  %v10187_v43 = vsel %vm1021_vm8, %v16259_v25, %v16258_v53  ;;  %v10192_v49 = vsel %vm1021_vm8, %v16258_v53, %v16260_v29  ;;  %v1051_v5 = vadd.f32 %v16255_v36, %v921_v62  ;;  %v16264_v53 = vld [vmem:[#allocation44_spill] sm:$0xff]  ;;  %v16265_v29 = vld [vmem:[#allocation41_spill] sm:$0xff] }
 0x38c   : > { %v1142_v46 = vsel %vm1139_vm9, %v16262_v48, %v16261_v56  ;;  %v1052_v22 = vadd.f32 %v1028_v19, %v922_v33  ;;  %v1053_v42 = vadd.f32 %v1029_v34, %v923_v10  ;;  %v1143_v7 = vsel %vm1139_vm9, %v16261_v56, %v16263_v26  ;;  %v16267_v19 = vld [vmem:[#allocation39_spill] sm:$0xff]  ;;  %v16268_v34 = vld [vmem:[#allocation40_spill] sm:$0xff]  ;;  %v16276_v26 = vld [vmem:[#allocation50_spill] sm:$0xff] }
 0x38d   : > { %v1160_v37 = vadd.f32 %v9858_v16, %v1042_v4  ;;  %v1161_v39 = vadd.f32 %v1140_v38, %v1043_v12  ;;  %v1163_v45 = vadd.f32 %v16262_v48, %v1045_v52  ;;  %v1162_v62 = vadd.f32 %v1141_v20, %v1044_v58  ;;  %v16269_v16 = vld [vmem:[#allocation46_spill] sm:$0xff]  ;;  %v16270_v4 = vld [vmem:[#allocation45_spill] sm:$0xff]  ;;  %v16271_v58 = vld [vmem:[#allocation47_spill] sm:$0xff] }
 0x38e   : > { %v1164_v36 = vadd.f32 %v1142_v46, %v1046_v50  ;;  %v1146_v23 = vsel %vm1139_vm9, %v16265_v29, %v16264_v53  ;;  %v1147_v10 = vsel %vm1139_vm9, %v16264_v53, %v16266_v6  ;;  %v1165_v33 = vadd.f32 %v1143_v7, %v1047_v59  ;;  %v16274_v20 = vld [vmem:[#allocation49_spill] sm:$0xff]  ;;  %v16275_v48 = vld [vmem:[#allocation48_spill] sm:$0xff]  ;;  %v16277_v53 = vld [vmem:[#allocation42_spill] sm:$0xff] }
 0x38f   : > { %v10214_v56 = vsel %vm1139_vm9, %v16268_v34, %v16267_v19  ;;  %v1237_v12 = vsel %vm1236_vm10, %v16270_v4, %v16269_v16  ;;  %v1238_v52 = vsel %vm1236_vm10, %v16269_v16, %v16271_v58  ;;  %v1169_v6 = vadd.f32 %v16265_v29, %v1051_v5 }
 0x390   : > { %v1257_v59 = vadd.f32 %v16270_v4, %v1160_v37  ;;  %v1239_v46 = vsel %vm1236_vm10, %v16275_v48, %v16274_v20  ;;  %v1240_v7 = vsel %vm1236_vm10, %v16274_v20, %v16276_v26  ;;  %v10237_v16 = vsel %vm1139_vm9, %v16267_v19, %v16277_v53  ;;  %v16278_v26 = vld [vmem:[#allocation52_spill] sm:$0xff] }
 0x391   : > { %v1170_v58 = vadd.f32 %v1146_v23, %v1052_v22  ;;  %v10239_v8 = vadd.f32 %v1147_v10, %v1053_v42  ;;  %v1258_v37 = vadd.f32 %v1237_v12, %v1161_v39  ;;  %v1259_v29 = vadd.f32 %v1238_v52, %v1162_v62  ;;  %v16280_v22 = vld [vmem:[#allocation54_spill] sm:$0xff] }
 0x392   : > { %v1260_v4 = vadd.f32 %v16275_v48, %v1163_v45  ;;  %v1262_v20 = vadd.f32 %v1240_v7, %v1165_v33  ;;  %v1266_v42 = vadd.f32 %v16280_v22, %v1169_v6  ;;  %v16282_v6 = vld [vmem:[#allocation56_spill] sm:$0xff] }
 0x3c4   : > { %v9987_v21 = vpop.permute.xlu0 %1332  ;;  %v9989_v18 = vpop.permute.xlu1 %1330 }
 0x3c5   : > { %v1355_v5 = vsel %vm1354_vm11, %v9989_v18, %v9987_v21  ;;  %v1375_v24 = vadd.f32 %v9989_v18, %v1257_v59 }
 0x3c6   : > { %v1376_v10 = vadd.f32 %v1355_v5, %v1258_v37 }
 0x3c8   : > { %v9994_v47 = vpop.permute.xlu0 %1336  ;;  %v9996_v3 = vpop.permute.xlu1 %1334 }
 0x3c9   : > { %v1356_v23 = vsel %vm1354_vm11, %v9987_v21, %v9996_v3  ;;  %v16281_v3 = vld [vmem:[#allocation55_spill] sm:$0xff] }
 0x3ca   : > { %v1243_v52 = vsel %vm1236_vm10, %v16280_v22, %v16281_v3  ;;  %v1377_v59 = vadd.f32 %v1356_v23, %v1259_v29 }
 0x3cc   : > { %v10030_v54 = vpop.permute.xlu0 %1340  ;;  %v10032_v44 = vpop.permute.xlu1 %1338 }
 0x3cd   : > { %v1357_v39 = vsel %vm1354_vm11, %v9994_v47, %v10032_v44 }
 0x3d0   : > { %v10076_v0 = vpop.permute.xlu0 %1344  ;;  %v10078_v15 = vpop.permute.xlu1 %1342 }
 0x3d4   : > { %v10119_v63 = vpop.permute.xlu0 %1348  ;;  %v10121_v9 = vpop.permute.xlu1 %1346 }
 0x3d8   : > { %v10165_v28 = vpop.permute.xlu0 %1352  ;;  %v10167_v13 = vpop.permute.xlu1 %1350 }
 0x3e9   : > { %v10198_v61 = vpop.permute.xlu0 %1424  ;;  %v1394_v1 = vpop.permute.xlu1 %1393 }
 0x3ea   : > { %v1411_v45 = vmul.f32 %v1394_v1, %v1375_v24  ;;  %v1244_v24 = vsel %vm1236_vm10, %v16281_v3, %v16282_v6  ;;  %v1412_v48 = vmul.f32 %v1394_v1, %v1376_v10  ;;  %v1413_v7 = vmul.f32 %v1394_v1, %v1377_v59 }
 0x3eb   : > { %v1384_v59 = vadd.f32 %v10119_v63, %v1266_v42 }
 0x3ec   : > { %v1439_v53 = vadd.f32 %v10198_v61, %v1411_v45 }
 0x3ed   : > { %v10222_v50 = vpop.permute.xlu0 %1436  ;;  %v10224_v38 = vpop.permute.xlu1 %1403 }
 0x3ee   : > { %16272 = vst [vmem:[#allocation10_spill] sm:$0xff] %v10222_v50  ;;  %16273 = vst [vmem:[#allocation9_spill] sm:$0xff] %v10224_v38  ;;  %v1261_v38 = vadd.f32 %v1239_v46, %v1164_v36  ;;  %v16279_v50 = vld [vmem:[#allocation51_spill] sm:$0xff]  ;;  %v1358_v36 = vsel %vm1354_vm11, %v10032_v44, %v10030_v54  ;;  %v1378_v46 = vadd.f32 %v9994_v47, %v1260_v4  ;;  %v1451_v10 = vmax.f32 %v1439_v53, 0.0 }
 0x3ef   : > { %v10249_v19 = vsel %vm1236_vm10, %v16279_v50, %v16278_v26 }
 0x3f0   : > { %v1379_v44 = vadd.f32 %v1357_v39, %v1261_v38 }
 0x3f1   : > { %v10258_v18 = vpop.permute.xlu1 %1408 }
 0x3f2   : > { %v465_v62 = vpop.permute.xlu0 %464  ;;  %v1420_v42 = vmul.f32 %v10258_v18, %v1384_v59 }
 0x3f3   : > { %v478_v33 = vmul.f32 %v465_v62, %v10002_v2  ;;  %v479_v12 = vmul.f32 %v465_v62, %v10015_v27  ;;  %v480_v21 = vmul.f32 %v465_v62, %v10019_v40  ;;  %v1380_v40 = vadd.f32 %v1358_v36, %v1262_v20 }
 0x3f5   : > { %v587_v54 = vadd.f32 %v10062_v32, %v478_v33  ;;  %v588_v2 = vadd.f32 %v10067_v11, %v479_v12  ;;  %v589_v27 = vadd.f32 %v9702_v31, %v480_v21  ;;  %v1361_v32 = vsel %vm1354_vm11, %v10119_v63, %v10167_v13 }
 0x3f6   : > { %v1399_v5 = vpop.permute.xlu0 %1398  ;;  %v1429_v37 = vpop.permute.xlu1 %1428  ;;  %v1440_v31 = vadd.f32 %v10198_v61, %v1412_v48  ;;  %v1267_v12 = vadd.f32 %v1243_v52, %v1170_v58  ;;  %v1268_v63 = vadd.f32 %v1244_v24, %v10239_v8  ;;  %v1360_v8 = vsel %vm1354_vm11, %v10076_v0, %v10121_v9 }
 0x3f7   : > { %v725_v22 = vadd.f32 %v10094_v41, %v587_v54  ;;  %v726_v29 = vadd.f32 %v10102_v55, %v588_v2  ;;  %v727_v23 = vadd.f32 %v9728_v51, %v589_v27  ;;  %v1414_v47 = vmul.f32 %v1399_v5, %v1378_v46 }
 0x3f8   : > { %v1415_v11 = vmul.f32 %v1399_v5, %v1379_v44  ;;  %v1416_v38 = vmul.f32 %v1399_v5, %v1380_v40  ;;  %v1441_v55 = vadd.f32 %v10198_v61, %v1413_v7  ;;  %v1452_v21 = vmax.f32 %v1440_v31, 0.0  ;;  %v16285_v40 = vld [vmem:[#allocation9_spill] sm:$0xff] }
 0x3f9   : > { %v842_v1 = vadd.f32 %v10129_v35, %v725_v22  ;;  %v843_v4 = vadd.f32 %v10134_v30, %v726_v29  ;;  %v844_v20 = vadd.f32 %v16244_v14, %v727_v23  ;;  %v1442_v41 = vadd.f32 %v1429_v37, %v1414_v47 }
 0x3fa   : > { %v1443_v51 = vadd.f32 %v1429_v37, %v1415_v11  ;;  %v1444_v39 = vadd.f32 %v1429_v37, %v1416_v38  ;;  %v1453_v48 = vmax.f32 %v1441_v55, 0.0  ;;  %v1359_v46 = vsel %vm1354_vm11, %v10078_v15, %v10076_v0  ;;  %v1433_v0 = vpop.permute.xlu1 %1432  ;;  %v16287_v55 = vld [vmem:[#allocation57_spill] sm:$0xff] }
 0x3fb   : > { %v918_v45 = vadd.f32 %v16250_v60, %v842_v1  ;;  %v919_v62 = vadd.f32 %v10153_v57, %v843_v4  ;;  %v920_v36 = vadd.f32 %v16249_v17, %v844_v20  ;;  %v1454_v33 = vmax.f32 %v1442_v41, 0.0  ;;  %v16286_v4 = vld [vmem:[#allocation6_spill] sm:$0xff] }
 0x3fc   : > { %v1455_v35 = vmax.f32 %v1443_v51, 0.0  ;;  %v1456_v3 = vmax.f32 %v1444_v39, 0.0  ;;  %v1362_v60 = vsel %vm1354_vm11, %v10167_v13, %v10165_v28  ;;  %v1385_v57 = vadd.f32 %v1361_v32, %v1267_v12  ;;  %v10329_v32 = vld [vmem:[%s15691_s6] sm:$0xf]  ;;  %v16289_v39 = vld [vmem:[#allocation59_spill] sm:$0xff] }
 0x3fd   : > { %v1048_v30 = vadd.f32 %v16259_v25, %v918_v45  ;;  %v1049_v14 = vadd.f32 %v10187_v43, %v919_v62  ;;  %v1050_v61 = vadd.f32 %v10192_v49, %v920_v36  ;;  %v1467_v6 = vpack.c.bf16 %v1454_v33, %v1451_v10  ;;  %v16283_v43 = vld [vmem:[#allocation53_spill] sm:$0xff]  ;;  %v16290_v62 = vld [vmem:[#allocation58_spill] sm:$0xff]  ;;  %v10354_v33 = vld [vmem:[%s15686_s1 + $0x20] sm:$0xff] }
 0x3fe   : > { %v1468_v17 = vpack.c.bf16 %v1455_v35, %v1452_v21  ;;  %v1242_v49 = vsel %vm1236_vm10, %v16278_v26, %v16283_v43  ;;  %v1421_v28 = vmul.f32 %v10258_v18, %v1385_v57  ;;  %v1386_v26 = vadd.f32 %v1362_v60, %v1268_v63  ;;  %v16288_v10 = vld [vmem:[#allocation5_spill] sm:$0xff]  ;;  %v16293_v21 = vld [vmem:[#allocation60_spill] sm:$0xff] }
 0x3ff   : > { %v1166_v58 = vadd.f32 %v16268_v34, %v1048_v30  ;;  %v1167_v52 = vadd.f32 %v10214_v56, %v1049_v14  ;;  %v1168_v25 = vadd.f32 %v10237_v16, %v1050_v61  ;;  %1489 = vrot.lane.b32.xlu1 %v1467_v6, %s9372_s21  ;;  %v1469_v16 = vpack.c.bf16 %v1456_v3, %v1453_v48  ;;  %v10346_v45 = vld [vmem:[%s15686_s1 + $0x28] sm:$0xff]  ;;  %v10364_v3 = vld [vmem:[%s15686_s1 + $0x38] sm:$0xff]  ;;  %v10380_v6 = vld [vmem:[%s15686_s1 + $0x30] sm:$0xff] }
 0x400   : > { %1491 = vrot.lane.b32.xlu0 %v1468_v17, %s9372_s21  ;;  %v1660_v20 = vrot.slane %v10329_v32, %v16286_v4  ;;  %v16291_v36 = vmov 3   ;;  %v16292_v12 = vmov 1   ;;  %v1656_v35 = vrot.slane %v10329_v32, %v16288_v10  ;;  %v9279_v63 = vld [vmem:[%s15689_s4] sm:$0xff]  }
 0x401   : > { %v1263_v13 = vadd.f32 %v16279_v50, %v1166_v58  ;;  %v1264_v34 = vadd.f32 %v10249_v19, %v1167_v52  ;;  %v1265_v56 = vadd.f32 %v1242_v49, %v1168_v25  ;;  %v1422_v50 = vmul.f32 %v10258_v18, %v1386_v26  ;;  %v16284_v19 = vld [vmem:[#allocation10_spill] sm:$0xff] }
 0x402   : > { %v1448_v27 = vadd.f32 %v16284_v19, %v1420_v42  ;;  %v1449_v44 = vadd.f32 %v16284_v19, %v1421_v28  ;;  %v10338_v51 = vrot.slane %v1660_v20, %v16288_v10  ;;  %v10368_v30 = vrot.slane %v1656_v35, %v16288_v10  ;;  %v9280_v42 = vld [vmem:[%s15689_s4 + $0x8] sm:$0xff]  }
 0x403   : > { %v1381_v24 = vadd.f32 %v10078_v15, %v1263_v13  ;;  %v1382_v54 = vadd.f32 %v1359_v46, %v1264_v34  ;;  %v1383_v2 = vadd.f32 %v1360_v8, %v1265_v56  ;;  %1493 = vrot.lane.b32.xlu1 %v1469_v16, %s9372_s21  ;;  %v1450_v22 = vadd.f32 %v16284_v19, %v1422_v50 }
 0x404   : > { %v1460_v29 = vmax.f32 %v1448_v27, 0.0  ;;  %v1461_v23 = vmax.f32 %v1449_v44, 0.0  ;;  %v16294_v14 = vmov 2   ;;  %v16295_v61 = vmov 0  }
 0x405   : > { %v1417_v7 = vmul.f32 %v16285_v40, %v1381_v24  ;;  %v1418_v53 = vmul.f32 %v16285_v40, %v1382_v54  ;;  %v1419_v5 = vmul.f32 %v16285_v40, %v1383_v2  ;;  %v1462_v1 = vmax.f32 %v1450_v22, 0.0 }
 0x407   : > { %v1445_v9 = vadd.f32 %v1433_v0, %v1417_v7  ;;  %v1446_v37 = vadd.f32 %v1433_v0, %v1418_v53  ;;  %v1447_v15 = vadd.f32 %v1433_v0, %v1419_v5  ;;  %v16302_v7 = vld [vmem:[#allocation7_spill] sm:$0xff]  ;;  %v16303_v5 = vld [vmem:[#allocation8_spill] sm:$0xff] }
 0x408   : > { %v1836_v53 = vrot.slane %v10329_v32, %v16302_v7  ;;  %v1840_v0 = vrot.slane %v10329_v32, %v16303_v5 }
 0x409   : > { %v1457_v47 = vmax.f32 %v1445_v9, 0.0  ;;  %v1458_v18 = vmax.f32 %v1446_v37, 0.0  ;;  %v1459_v31 = vmax.f32 %v1447_v15, 0.0 }
 0x40a   : > { %v10445_v22 = vrot.slane %v1836_v53, %v16302_v7 }
 0x40b   : > { %v1471_v11 = vpack.c.bf16 %v1461_v23, %v1458_v18  ;;  %v1470_v38 = vpack.c.bf16 %v1460_v29, %v1457_v47  ;;  %v1472_v41 = vpack.c.bf16 %v1462_v1, %v1459_v31  ;;  %v10448_v29 = vrot.slane %v1840_v0, %v16302_v7 }
 0x40d   : > { %1497 = vrot.lane.b32.xlu1 %v1471_v11, %s9372_s21  ;;  %1495 = vrot.lane.b32.xlu0 %v1470_v38, %s9372_s21 }
 0x411   : > { %1571 = vperm.xlu1 %9164, %v16287_v55   ;;  %1499 = vrot.lane.b32.xlu0 %v1472_v41, %s9372_s21 }
 0x415   : > { %1579 = vperm.xlu1 %9164, %v16289_v39   ;;  %1675 = vrot.lane.b32.xlu0 %v10338_v51, %s9355_s23 }
 0x419   : > { %1583 = vperm.xlu1 %9164, %v16290_v62   ;;  %1700 = vperm.xlu0 %9163, %v10346_v45  }
 0x41d   : > { %9165 = vset.pattern.permute.xlu1 %v16291_v36  ;;  %9167 = vset.pattern.permute.xlu0 %v16292_v12 }
 0x41e   : > { %1599 = vperm.xlu1 %9165, %v16293_v21   ;;  %1738 = vperm.xlu0 %9167, %v10354_v33  }
 0x422   : > { %1603 = vperm.xlu1 %9165, %v16289_v39   ;;  %1750 = vperm.xlu0 %9167, %v10364_v3  }
 0x426   : > { %1673 = vrot.lane.b32.xlu1 %v10368_v30, %s9355_s23  ;;  %9169 = vset.pattern.permute.xlu0 %v16294_v14 }
 0x427   : > { %9166 = vset.pattern.permute.xlu1 %v16295_v61  ;;  %1575 = vperm.xlu0 %9169, %v16293_v21  }
 0x42a   : > { %1695 = vperm.xlu1 %9166, %v10354_v33  }
 0x42e   : > { %1705 = vperm.xlu1 %9166, %v10380_v6  }
 0x432   : > { %1710 = vperm.xlu1 %9166, %v10364_v3  }
 0x436   : > { %9168 = vset.pattern.permute.xlu1 %v16292_v12 }
 0x437   : > { %1742 = vperm.xlu1 %9168, %v10346_v45  }
 0x43b   : > { %1746 = vperm.xlu1 %9168, %v10380_v6  }
 0x43f   : > { %9170 = vset.pattern.permute.xlu1 %v16294_v14 }
 0x471   : > { %v1490_v59 = vpop.permute.xlu1 %1489 }
 0x472   : > { %v1492_v60 = vpop.permute.xlu0 %1491 }
 0x473   : > { %v1502_v48 = vsel %vm1273_vm4, %v1490_v59, %v1492_v60 }
 0x475   : > { %v1494_v57 = vpop.permute.xlu1 %1493 }
 0x476   : > { %v1503_v17 = vsel %vm1273_vm4, %v1492_v60, %v1494_v57  ;;  %v16309_v60 = vmov 4  }
 0x477   : > { %1517 = vmatprep.subr.bf16.mxu0 %v1503_v17 }
 0x478   : > { %1518 = vmatpush1.bf16.msra.mxu0 %v1502_v48 }
 0x47f   : > { %v1496_v58 = vpop.permute.xlu0 %1495  ;;  %v1498_v52 = vpop.permute.xlu1 %1497 }
 0x480   : > { %v1504_v49 = vsel %vm1273_vm4, %v1496_v58, %v1498_v52 }
 0x483   : > { %v1500_v25 = vpop.permute.xlu0 %1499 }
 0x484   : > { %v1505_v43 = vsel %vm1273_vm4, %v1498_v52, %v1500_v25 }
 0x485   : > { %1519 = vmatprep.subr.bf16.mxu0 %v1505_v43 }
 0x486   : > { %1520 = vmatpush1.bf16.msra.mxu0 %v1504_v49 }
 0x487   : > { %v10404_v13 = vpop.permute.xlu0 %1675 }
 0x488   : > { %16296 = vst [vmem:[#allocation11_spill] sm:$0xff] %v10404_v13 }
 0x489   : > { %8544 = vmatmul.mubr.msk.bf16.vlgmr.msra.gmra.mrb[0].mxu0 %vm1510_vm12, %v9279_v63 }
 0x48a   : > { %1559 = vmatprep.mubr.bf16.mxu0 %v16295_v61 }
 0x490   : > { %v10400_v28 = vpop.permute.xlu1 %1571 }
 0x491   : > { %8545 = vmatmul.mubr.msk.bf16.gmra.mrb[4].mxu0 %vm1510_vm12, %v9280_v42 }
 0x492   : > { %5991 = vmatprep.mubr.bf16.mxu0 %v16295_v61 }
 0x494   : > { %v10406_v34 = vpop.permute.xlu1 %1579 }
 0x498   : > { %v10408_v56 = vpop.permute.xlu1 %1583  ;;  %v10410_v16 = vpop.permute.xlu0 %1700 }
 0x499   : > { %16297 = vst [vmem:[#allocation16_spill] sm:$0xff] %v10410_v16 }
 0x49d   : > { %v10412_v46 = vpop.permute.xlu1 %1599  ;;  %v10414_v8 = vpop.permute.xlu0 %1738 }
 0x49e   : > { %v1753_v26 = vmul.f32 0.0, %v10414_v8 }
 0x4a0   : > { %1777 = vrot.lane.b32.xlu1 %v1753_v26, %s9358_s27 }
 0x4a1   : > { %v10418_v24 = vpop.permute.xlu1 %1603  ;;  %v10431_v40 = vpop.permute.xlu0 %1750 }
 0x4a2   : > { %v1762_v37 = vmul.f32 0.0, %v10431_v40 }
 0x4a5   : > { %v10420_v54 = vpop.permute.xlu1 %1673 }
 0x4a6   : > { %16298 = vst [vmem:[#allocation15_spill] sm:$0xff] %v10420_v54  ;;  %v10462_v23 = vpop.permute.xlu0 %1575 }
 0x4a9   : > { %v10422_v2 = vpop.permute.xlu1 %1695 }
 0x4aa   : > { %16299 = vst [vmem:[#allocation17_spill] sm:$0xff] %v10422_v2 }
 0x4ad   : > { %v10424_v50 = vpop.permute.xlu1 %1705 }
 0x4ae   : > { %16300 = vst [vmem:[#allocation18_spill] sm:$0xff] %v10424_v50 }
 0x4b1   : > { %v10426_v19 = vpop.permute.xlu1 %1710 }
 0x4b2   : > { %16301 = vst [vmem:[#allocation19_spill] sm:$0xff] %v10426_v19 }
 0x4b6   : > { %v10428_v27 = vpop.permute.xlu1 %1742 }
 0x4b7   : > { %v1756_v44 = vmul.f32 0.0, %v10428_v27 }
 0x4b9   : > { %1783 = vrot.lane.b32.xlu0 %v1756_v44, %s9358_s27 }
 0x4ba   : > { %v10438_v9 = vpop.permute.xlu1 %1746 }
 0x4bb   : > { %v1759_v15 = vmul.f32 0.0, %v10438_v9 }
 0x4bd   : > { %1789 = vrot.lane.b32.xlu1 %v1759_v15, %s9358_s27  ;;  %1795 = vrot.lane.b32.xlu0 %v1762_v37, %s9358_s27 }
 0x4c1   : > { %1853 = vrot.lane.b32.xlu1 %v10445_v22, %s9356_s26  ;;  %1855 = vrot.lane.b32.xlu0 %v10448_v29, %s9356_s26  ;;  %s16330_s26 = smov 95  }
 0x4c5   : > { %1874 = vperm.xlu1 %9170, %v10354_v33   ;;  %1878 = vperm.xlu0 %9169, %v10346_v45  }
 0x4c9   : > { %1882 = vperm.xlu1 %9170, %v10380_v6   ;;  %9171 = vset.pattern.permute.xlu0 %v16291_v36 }
 0x4ca   : > { %1595 = vperm.xlu0 %9171, %v16287_v55  }
 0x4cd   : > { %1886 = vperm.xlu1 %9170, %v10364_v3  }
 0x4ce   : > { %1607 = vperm.xlu0 %9171, %v16290_v62  }
 0x4d1   : > { %9172 = vset.pattern.permute.xlu1 %v16291_v36 }
 0x512   : > { %v10464_v47 = vpop.permute.xlu1 %1777 }
 0x513   : > { %16304 = vst [vmem:[#allocation13_spill] sm:$0xff] %v10464_v47 }
 0x52b   : > { %v10466_v18 = vpop.permute.xlu0 %1783 }
 0x52c   : > { %16305 = vst [vmem:[#allocation12_spill] sm:$0xff] %v10466_v18 }
 0x52f   : > { %v10468_v32 = vpop.permute.xlu1 %1789  ;;  %v10470_v31 = vpop.permute.xlu0 %1795 }
 0x530   : > { %16306 = vst [vmem:[#allocation14_spill] sm:$0xff] %v10468_v32  ;;  %16307 = vst [vmem:[#allocation20_spill] sm:$0xff] %v10470_v31 }
 0x533   : > { %v10472_v11 = vpop.permute.xlu1 %1853  ;;  %v10474_v38 = vpop.permute.xlu0 %1855 }
 0x534   : > { %v1861_v1 = vmul.f32 0.0, %v10472_v11 }
 0x544   : > { %v10477_v20 = vpop.permute.xlu1 %1874  ;;  %v10479_v41 = vpop.permute.xlu0 %1878 }
 0x545   : > { %v1889_v55 = vmul.f32 %v10477_v20, %v1861_v1  ;;  %v1892_v39 = vmul.f32 %v10479_v41, %v1861_v1 }
 0x547   : > { %1913 = vrot.lane.b32.xlu0 %v1889_v55, %s9362_s12  ;;  %1919 = vrot.lane.b32.xlu1 %v1892_v39, %s9362_s12 }
 0x548   : > { %v10485_v62 = vpop.permute.xlu1 %1882 }
 0x549   : > { %v1895_v21 = vmul.f32 %v10485_v62, %v1861_v1  ;;  %v10519_v63 = vpop.permute.xlu0 %1595 }
 0x54b   : > { %1925 = vrot.lane.b32.xlu0 %v1895_v21, %s9362_s12 }
 0x54c   : > { %v10489_v35 = vpop.permute.xlu1 %1886 }
 0x54d   : > { %16308 = vst [vmem:[#allocation21_spill] sm:$0xff] %v10489_v35  ;;  %v1898_v59 = vmul.f32 %v10489_v35, %v1861_v1  ;;  %v10521_v42 = vpop.permute.xlu0 %1607 }
 0x54f   : > { %1969 = vrot.lane.b32.xlu0 %v10368_v30, %s9358_s27  ;;  %1931 = vrot.lane.b32.xlu1 %v1898_v59, %s9362_s12 }
 0x553   : > { %1990 = vperm.xlu0 %9171, %v10354_v33   ;;  %1971 = vrot.lane.b32.xlu1 %v10338_v51, %s9358_s27 }
 0x557   : > { %2002 = vperm.xlu0 %9171, %v10364_v3   ;;  %1994 = vperm.xlu1 %9172, %v10346_v45  }
 0x55b   : > { %1998 = vperm.xlu1 %9172, %v10380_v6   ;;  %9174 = vset.pattern.permute.xlu0 %v16309_v60 }
 0x55c   : > { %v10502_v57 = vpop.f32.mrb[0].mxu0 }
 0x55d   : > { %v10504_v17 = vpop.f32.mrb[1].mxu0 }
 0x55e   : > { %v10506_v48 = vpop.f32.mrb[2].mxu0 }
 0x55f   : > { %v10508_v58 = vpop.f32.mrb[3].mxu0  ;;  %9173 = vset.pattern.permute.xlu1 %v16309_v60 }
 0x564   : > { %v10511_v52 = vpop.f32.mrb[4].mxu0 }
 0x565   : > { %v10513_v25 = vpop.f32.mrb[5].mxu0 }
 0x566   : > { %v10515_v43 = vpop.f32.mrb[6].mxu0 }
 0x567   : > { %v10517_v49 = vpop.f32.mrb[7].mxu0 }
 0x5b9   : > { %v10523_v26 = vpop.permute.xlu0 %1913  ;;  %v10525_v44 = vpop.permute.xlu1 %1919 }
 0x5ba   : > { %16310 = vst [vmem:[#allocation24_spill] sm:$0xff] %v10523_v26  ;;  %16311 = vst [vmem:[#allocation25_spill] sm:$0xff] %v10525_v44 }
 0x5bd   : > { %v10527_v53 = vpop.permute.xlu0 %1925 }
 0x5be   : > { %16312 = vst [vmem:[#allocation22_spill] sm:$0xff] %v10527_v53 }
 0x5c1   : > { %v10529_v0 = vpop.permute.xlu1 %1931  ;;  %v10531_v37 = vpop.permute.xlu0 %1969 }
 0x5c2   : > { %16313 = vst [vmem:[#allocation23_spill] sm:$0xff] %v10529_v0  ;;  %v1977_v15 = vmul.f32 0.0, %v10531_v37 }
 0x5c5   : > { %v10534_v1 = vpop.permute.xlu1 %1971 }
 0x5d2   : > { %v10536_v55 = vpop.permute.xlu0 %1990 }
 0x5d3   : > { %v2005_v39 = vmul.f32 %v10536_v55, %v1977_v15 }
 0x5d5   : > { %2029 = vrot.lane.b32.xlu1 %v2005_v39, %s9363_s15  ;;  %v16314_v39 = vmov 5  }
 0x5d6   : > { %v10540_v21 = vpop.permute.xlu1 %1994  ;;  %v10543_v31 = vpop.permute.xlu0 %2002 }
 0x5d7   : > { %v2008_v59 = vmul.f32 %v10540_v21, %v1977_v15  ;;  %v2014_v19 = vmul.f32 %v10543_v31, %v1977_v15 }
 0x5d9   : > { %2035 = vrot.lane.b32.xlu0 %v2008_v59, %s9363_s15 }
 0x5da   : > { %v10546_v0 = vpop.permute.xlu1 %1998 }
 0x5db   : > { %v2011_v44 = vmul.f32 %v10546_v0, %v1977_v15 }
 0x5dd   : > { %2041 = vrot.lane.b32.xlu1 %v2011_v44, %s9363_s15  ;;  %2047 = vrot.lane.b32.xlu0 %v2014_v19, %s9363_s15  ;;  %v16315_v19 = vmov 6  }
 0x5e1   : > { %2086 = vperm.xlu1 %9173, %v10354_v33   ;;  %2090 = vperm.xlu0 %9174, %v10346_v45  }
 0x5e5   : > { %2094 = vperm.xlu1 %9173, %v10380_v6   ;;  %2173 = vrot.lane.b32.xlu0 %v10445_v22, %s9364_s16 }
 0x5e6   : > { %9175 = vset.pattern.permute.xlu0 %v16314_v39 }
 0x5e9   : > { %2098 = vperm.xlu1 %9173, %v10364_v3   ;;  %2194 = vperm.xlu0 %9175, %v10354_v33  }
 0x5ed   : > { %2175 = vrot.lane.b32.xlu1 %v10448_v29, %s9364_s16  ;;  %2206 = vperm.xlu0 %9175, %v10364_v3   ;;  %s9378_s16 = smov 4  }
 0x5ee   : > { %9176 = vset.pattern.permute.xlu1 %v16314_v39 }
 0x5f1   : > { %2198 = vperm.xlu1 %9176, %v10346_v45   ;;  %9178 = vset.pattern.permute.xlu0 %v16315_v19 }
 0x5f5   : > { %2202 = vperm.xlu1 %9176, %v10380_v6  }
 0x5f9   : > { %9177 = vset.pattern.permute.xlu1 %v16315_v19 }
 0x647   : > { %v10568_v44 = vpop.permute.xlu1 %2029 }
 0x648   : > { %16316 = vst [vmem:[#allocation27_spill] sm:$0xff] %v10568_v44 }
 0x64b   : > { %v10570_v15 = vpop.permute.xlu0 %2035 }
 0x64c   : > { %16317 = vst [vmem:[#allocation26_spill] sm:$0xff] %v10570_v15 }
 0x64f   : > { %v10572_v59 = vpop.permute.xlu1 %2041  ;;  %v10574_v18 = vpop.permute.xlu0 %2047 }
 0x650   : > { %16318 = vst [vmem:[#allocation28_spill] sm:$0xff] %v10572_v59  ;;  %16319 = vst [vmem:[#allocation33_spill] sm:$0xff] %v10574_v18 }
 0x660   : > { %v10576_v60 = vpop.permute.xlu1 %2086  ;;  %v10578_v5 = vpop.permute.xlu0 %2090 }
 0x664   : > { %v10580_v39 = vpop.permute.xlu1 %2094  ;;  %v10582_v36 = vpop.permute.xlu0 %2173 }
 0x668   : > { %v10584_v53 = vpop.permute.xlu1 %2098  ;;  %v10589_v50 = vpop.permute.xlu0 %2194 }
 0x66c   : > { %v10586_v32 = vpop.permute.xlu1 %2175  ;;  %v10597_v16 = vpop.permute.xlu0 %2206 }
 0x66d   : > { %v2183_v19 = vmul.f32 0.0, %v10586_v32  ;;  %16320 = vst [vmem:[#allocation32_spill] sm:$0xff] %v10597_v16 }
 0x66f   : > { %v2211_v15 = vmul.f32 %v10589_v50, %v2183_v19  ;;  %v2220_v44 = vmul.f32 %v10597_v16, %v2183_v19 }
 0x670   : > { %v10592_v59 = vpop.permute.xlu1 %2198 }
 0x671   : > { %v2214_v18 = vmul.f32 %v10592_v59, %v2183_v19  ;;  %2237 = vrot.lane.b32.xlu1 %v2211_v15, %s9366_s17 }
 0x673   : > { %2243 = vrot.lane.b32.xlu0 %v2214_v18, %s9366_s17  ;;  %v16321_v18 = vmov 7  }
 0x674   : > { %v10599_v7 = vpop.permute.xlu1 %2202 }
 0x675   : > { %v2217_v26 = vmul.f32 %v10599_v7, %v2183_v19 }
 0x677   : > { %2249 = vrot.lane.b32.xlu1 %v2217_v26, %s9366_s17  ;;  %2255 = vrot.lane.b32.xlu0 %v2220_v44, %s9366_s17 }
 0x67b   : > { %2289 = vrot.lane.b32.xlu1 %v10368_v30, %s9367_s18  ;;  %2291 = vrot.lane.b32.xlu0 %v10338_v51, %s9367_s18  ;;  %s9375_s18 = smov 2  }
 0x67f   : > { %2310 = vperm.xlu1 %9177, %v10354_v33   ;;  %2314 = vperm.xlu0 %9178, %v10346_v45  }
 0x683   : > { %2318 = vperm.xlu1 %9177, %v10380_v6   ;;  %9179 = vset.pattern.permute.xlu0 %v16321_v18 }
 0x687   : > { %2322 = vperm.xlu1 %9177, %v10364_v3  }
 0x68b   : > { %9180 = vset.pattern.permute.xlu1 %v16321_v18 }
 0x6e3   : > { %v10617_v19 = vpop.permute.xlu1 %2237 }
 0x6e4   : > { %16323 = vst [vmem:[#allocation36_spill] sm:$0xff] %v10617_v19 }
 0x6e5   : > { %v10615_v26 = vpop.permute.xlu0 %2243 }
 0x6e6   : > { %16322 = vst [vmem:[#allocation34_spill] sm:$0xff] %v10615_v26 }
 0x6e9   : > { %v10619_v30 = vpop.permute.xlu1 %2249  ;;  %v10621_v44 = vpop.permute.xlu0 %2255 }
 0x6ea   : > { %16324 = vst [vmem:[#allocation30_spill] sm:$0xff] %v10619_v30  ;;  %16325 = vst [vmem:[#allocation29_spill] sm:$0xff] %v10621_v44 }
 0x6ed   : > { %v10623_v51 = vpop.permute.xlu1 %2289  ;;  %v10625_v15 = vpop.permute.xlu0 %2291 }
 0x6ee   : > { %v2299_v2 = vmul.f32 0.0, %v10625_v15 }
 0x6fe   : > { %v10628_v47 = vpop.permute.xlu1 %2310  ;;  %v10630_v13 = vpop.permute.xlu0 %2314 }
 0x6ff   : > { %v2327_v18 = vmul.f32 %v10628_v47, %v2299_v2  ;;  %v2330_v26 = vmul.f32 %v10630_v13, %v2299_v2 }
 0x701   : > { %2353 = vrot.lane.b32.xlu0 %v2327_v18, %s9369_s19  ;;  %2359 = vrot.lane.b32.xlu1 %v2330_v26, %s9369_s19  ;;  %v16326_v18 = vmov 8  }
 0x702   : > { %v10636_v30 = vpop.permute.xlu1 %2318 }
 0x703   : > { %v2333_v44 = vmul.f32 %v10636_v30, %v2299_v2 }
 0x705   : > { %2365 = vrot.lane.b32.xlu0 %v2333_v44, %s9369_s19 }
 0x706   : > { %v10640_v19 = vpop.permute.xlu1 %2322 }
 0x707   : > { %v2336_v54 = vmul.f32 %v10640_v19, %v2299_v2 }
 0x709   : > { %2406 = vperm.xlu0 %9179, %v10354_v33   ;;  %2371 = vrot.lane.b32.xlu1 %v2336_v54, %s9369_s19 }
 0x70d   : > { %2418 = vperm.xlu0 %9179, %v10364_v3   ;;  %2410 = vperm.xlu1 %9180, %v10346_v45  }
 0x711   : > { %2414 = vperm.xlu1 %9180, %v10380_v6   ;;  %9182 = vset.pattern.permute.xlu0 %v16326_v18 }
 0x715   : > { %9181 = vset.pattern.permute.xlu1 %v16326_v18 }
 0x773   : > { %v10650_v26 = vpop.permute.xlu0 %2353  ;;  %v10652_v44 = vpop.permute.xlu1 %2359 }
 0x774   : > { %16327 = vst [vmem:[#allocation31_spill] sm:$0xff] %v10652_v44 }
 0x777   : > { %v10654_v14 = vpop.permute.xlu0 %2365 }
 0x778   : > { %16328 = vst [vmem:[#allocation38_spill] sm:$0xff] %v10654_v14 }
 0x77b   : > { %v10656_v2 = vpop.permute.xlu1 %2371 }
 0x77c   : > { %16329 = vst [vmem:[#allocation35_spill] sm:$0xff] %v10656_v2 }
 0x788   : > { %v10658_v10 = vpop.permute.xlu0 %2406 }
 0x789   : > { %v2423_v54 = vmul.f32 0.0, %v10658_v10 }
 0x78b   : > { %2449 = vrot.lane.b32.xlu1 %v2423_v54, %s16330_s26  ;;  %v1586_v54 = vmul.f32 %v10400_v28, %v10502_v57 }
 0x78c   : > { %v10662_v4 = vpop.permute.xlu1 %2410  ;;  %v10665_v35 = vpop.permute.xlu0 %2418 }
 0x78d   : > { %v2426_v16 = vmul.f32 0.0, %v10662_v4  ;;  %v2432_v44 = vmul.f32 0.0, %v10665_v35 }
 0x78f   : > { %2455 = vrot.lane.b32.xlu0 %v2426_v16, %s16330_s26  ;;  %v1587_v16 = vmul.f32 %v10400_v28, %v10504_v17  ;;  %v10711_v17 = vsel %vm617_vm0, %v10472_v11, %v10474_v38  ;;  %vm3954_vm0 = vcmask 556032  }
 0x790   : > { %v10668_v18 = vpop.permute.xlu1 %2414 }
 0x791   : > { %v2429_v2 = vmul.f32 0.0, %v10668_v18 }
 0x793   : > { %2461 = vrot.lane.b32.xlu1 %v2429_v2, %s16330_s26  ;;  %2467 = vrot.lane.b32.xlu0 %v2432_v44, %s16330_s26  ;;  %v1610_v2 = vadd.f32 %v10519_v63, %v1586_v54 }
 0x795   : > { %v10688_v44 = vmax.f32 %v1610_v2, 0.0 }
 0x797   : > { %2501 = vrot.lane.b32.xlu1 %v10445_v22, %s9372_s21  ;;  %2503 = vrot.lane.b32.xlu0 %v10448_v29, %s9372_s21  ;;  %v1611_v22 = vadd.f32 %v10519_v63, %v1587_v16  ;;  %16331 = vst [vmem:[#allocation37_spill] sm:$0xff] %v10688_v44  ;;  %v1862_v63 = vmul.f32 %v10711_v17, %v10688_v44 }
 0x798   : > { %v1589_v16 = vmul.f32 %v10462_v23, %v10508_v58  ;;  %v2181_v2 = vmul.f32 %v10582_v36, %v10688_v44 }
 0x799   : > { %v10693_v29 = vmax.f32 %v1611_v22, 0.0  ;;  %v1890_v54 = vmul.f32 %v10477_v20, %v1862_v63 }
 0x79a   : > { %v2209_v11 = vmul.f32 %v10589_v50, %v2181_v2  ;;  %v1613_v22 = vadd.f32 %v10412_v46, %v1589_v16 }
 0x79b   : > { %2522 = vperm.xlu1 %9181, %v10354_v33   ;;  %2526 = vperm.xlu0 %9182, %v10346_v45   ;;  %v1588_v33 = vmul.f32 %v10462_v23, %v10506_v48  ;;  %16332 = vst [vmem:[#allocation44_spill] sm:$0xff] %v10693_v29  ;;  %v2421_v45 = vmul.f32 %v10658_v10, %v10688_v44 }
 0x79c   : > { %v1755_v28 = vmul.f32 %v10414_v8, %v10693_v29  ;;  %v2102_v57 = vmul.f32 %v10576_v60, %v10693_v29  ;;  %v10736_v23 = vsel %vm1058_vm3, %v10623_v51, %v10625_v15  ;;  %vm2982_vm3 = vcmask 1014784  }
 0x79f   : > { %2530 = vperm.xlu1 %9181, %v10380_v6   ;;  %9185 = vset.pattern.permute.xlu0 %v16292_v12  ;;  %v1612_v6 = vadd.f32 %v10412_v46, %v1588_v33  ;;  %v1979_v33 = vmul.f32 %v10534_v1, %v10693_v29  ;;  %v2298_v46 = vmul.f32 %v10736_v23, %v10693_v29 }
 0x7a3   : > { %2534 = vperm.xlu1 %9181, %v10364_v3   ;;  %v10703_v3 = vmax.f32 %v1612_v6, 0.0  ;;  %v10730_v6 = vmax.f32 %v1613_v22, 0.0 }
 0x7a5   : > { %16333 = vst [vmem:[#allocation41_spill] sm:$0xff] %v10703_v3  ;;  %v1757_v48 = vmul.f32 %v10428_v27, %v10703_v3  ;;  %16334 = vst [vmem:[#allocation43_spill] sm:$0xff] %v10730_v6  ;;  %v2104_v58 = vmul.f32 %v10578_v5, %v10730_v6 }
 0x7a7   : > { %2445 = vrot.lane.b32.xlu1 %v2421_v45, %s16330_s26  ;;  %v2007_v45 = vmul.f32 %v10536_v55, %v1979_v33 }
 0x7a8   : > { %9183 = vset.pattern.permute.xlu1 %v16295_v61 }
 0x7ab   : > { %1781 = vrot.lane.b32.xlu1 %v1755_v28, %s9358_s27  ;;  %v2326_v28 = vmul.f32 %v10628_v47, %v2298_v46 }
 0x7af   : > { %2119 = vrot.lane.b32.xlu1 %v2102_v57, %s9355_s23  ;;  %v2425_v57 = vmul.f32 %v10662_v4, %v10730_v6 }
 0x7b3   : > { %1785 = vrot.lane.b32.xlu1 %v1757_v48, %s9358_s27 }
 0x7b7   : > { %1915 = vrot.lane.b32.xlu1 %v1890_v54, %s9362_s12 }
 0x7bb   : > { %2233 = vrot.lane.b32.xlu1 %v2209_v11, %s9366_s17 }
 0x7bf   : > { %2033 = vrot.lane.b32.xlu1 %v2007_v45, %s9363_s15  ;;  %v10769_v45 = vsel %vm560_vm1, %v10531_v37, %v10534_v1  ;;  %v2300_v37 = vmul.f32 %v10623_v51, %v10703_v3 }
 0x7c3   : > { %2123 = vrot.lane.b32.xlu1 %v2104_v58, %s9355_s23 }
 0x7c7   : > { %2351 = vrot.lane.b32.xlu1 %v2326_v28, %s9369_s19 }
 0x7cb   : > { %2453 = vrot.lane.b32.xlu1 %v2425_v57, %s16330_s26  ;;  %v1981_v57 = vmul.f32 %v10769_v45, %v10703_v3 }
 0x7cd   : > { %v2009_v61 = vmul.f32 %v10540_v21, %v1981_v57 }
 0x7fd   : > { %v10748_v48 = vpop.permute.xlu1 %2449 }
 0x801   : > { %v10750_v15 = vpop.permute.xlu0 %2455 }
 0x802   : > { %16335 = vst [vmem:[#allocation39_spill] sm:$0xff] %v10750_v15 }
 0x805   : > { %v10752_v63 = vpop.permute.xlu1 %2461  ;;  %v10754_v54 = vpop.permute.xlu0 %2467 }
 0x806   : > { %16336 = vst [vmem:[#allocation40_spill] sm:$0xff] %v10752_v63  ;;  %16337 = vst [vmem:[#allocation46_spill] sm:$0xff] %v10754_v54  ;;  %v2328_v54 = vmul.f32 %v10630_v13, %v2300_v37  ;;  %v1978_v37 = vmul.f32 %v10769_v45, %v10688_v44 }
 0x809   : > { %v10756_v16 = vpop.permute.xlu1 %2501  ;;  %v2504_v2 = vpop.permute.xlu0 %2503 }
 0x80a   : > { %v10760_v11 = vsel %vm1273_vm4, %v10756_v16, %v2504_v2  ;;  %v10762_v22 = vmul.f32 0.0, %v2504_v2  ;;  %v1754_v2 = vmul.f32 %v10414_v8, %v10688_v44  ;;  %v1866_v8 = vmul.f32 %v10474_v38, %v10730_v6 }
 0x80b   : > { %v2510_v33 = vmul.f32 %v10760_v11, %v10693_v29 }
 0x81a   : > { %v2523_v58 = vpop.permute.xlu1 %2522 }
 0x81b   : > { %v2538_v46 = vmul.f32 %v2523_v58, %v2510_v33  ;;  %v2539_v28 = vmul.f32 %v2523_v58, %v10762_v22  ;;  %v2101_v33 = vmul.f32 %v10576_v60, %v10688_v44  ;;  %v10800_v60 = vsel %vm940_vm2, %v10582_v36, %v10586_v32 }
 0x81c   : > { %v2185_v32 = vmul.f32 %v10800_v60, %v10730_v6  ;;  %vm4276_vm2 = vcmask 31744  }
 0x81d   : > { %2565 = vrot.lane.b32.xlu0 %v2539_v28, %s9373_s22  ;;  %2563 = vrot.lane.b32.xlu1 %v2538_v46, %s9373_s22  ;;  %v10786_v28 = vpop.permute.xlu0 %2526  ;;  %v2512_v46 = vmul.f32 %v10756_v16, %v10703_v3 }
 0x81f   : > { %v2540_v57 = vmul.f32 %v10786_v28, %v2512_v46 }
 0x821   : > { %1779 = vrot.lane.b32.xlu0 %v1754_v2, %s9358_s27  ;;  %2037 = vrot.lane.b32.xlu1 %v2009_v61, %s9363_s15  ;;  %v2422_v61 = vmul.f32 %v10658_v10, %v10693_v29  ;;  %v1590_v2 = vmul.f32 %v10406_v34, %v10511_v52  ;;  %v1591_v10 = vmul.f32 %v10406_v34, %v10513_v25 }
 0x822   : > { %v2297_v34 = vmul.f32 %v10623_v51, %v10688_v44 }
 0x823   : > { %v1614_v46 = vadd.f32 %v10418_v24, %v1590_v2  ;;  %v1615_v52 = vadd.f32 %v10418_v24, %v1591_v10 }
 0x824   : > { %v2325_v24 = vmul.f32 %v10628_v47, %v2297_v34 }
 0x825   : > { %2117 = vrot.lane.b32.xlu0 %v2101_v33, %s9355_s23  ;;  %2355 = vrot.lane.b32.xlu1 %v2328_v54, %s9369_s19  ;;  %v1894_v54 = vmul.f32 %v10479_v41, %v1866_v8  ;;  %v2006_v33 = vmul.f32 %v10536_v55, %v1978_v37  ;;  %v2213_v8 = vmul.f32 %v10592_v59, %v2185_v32  ;;  %v10827_v25 = vmax.f32 %v1615_v52, 0.0 }
 0x826   : > { %v1592_v55 = vmul.f32 %v10408_v56, %v10515_v43  ;;  %v2509_v43 = vmul.f32 %v10756_v16, %v10688_v44  ;;  %v1758_v32 = vmul.f32 %v10428_v27, %v10730_v6  ;;  %v1593_v27 = vmul.f32 %v10408_v56, %v10517_v49  ;;  %v10878_v56 = vpop.permute.xlu1 %2530 }
 0x827   : > { %16339 = vst [vmem:[#allocation47_spill] sm:$0xff] %v10827_v25  ;;  %v1761_v2 = vmul.f32 %v10438_v9, %v10827_v25  ;;  %v2106_v10 = vmul.f32 %v10580_v39, %v10827_v25 }
 0x828   : > { %v1616_v37 = vadd.f32 %v10521_v42, %v1592_v55  ;;  %v1865_v55 = vmul.f32 %v10711_v17, %v10703_v3 }
 0x829   : > { %2447 = vrot.lane.b32.xlu0 %v2422_v61, %s16330_s26  ;;  %2567 = vrot.lane.b32.xlu1 %v2540_v57, %s9373_s22  ;;  %v2103_v61 = vmul.f32 %v10578_v5, %v10703_v3  ;;  %v10821_v57 = vmax.f32 %v1614_v46, 0.0 }
 0x82a   : > { %v10845_v47 = vmax.f32 %v1616_v37, 0.0  ;;  %v1893_v49 = vmul.f32 %v10479_v41, %v1865_v55  ;;  %v1982_v41 = vmul.f32 %v10534_v1, %v10730_v6 }
 0x82b   : > { %16338 = vst [vmem:[#allocation45_spill] sm:$0xff] %v10821_v57  ;;  %v2427_v5 = vmul.f32 %v10668_v18, %v10821_v57  ;;  %v1868_v46 = vmul.f32 %v10711_v17, %v10821_v57  ;;  %v2187_v34 = vmul.f32 %v10582_v36, %v10821_v57  ;;  %v2105_v55 = vmul.f32 %v10580_v39, %v10821_v57 }
 0x82c   : > { %16340 = vst [vmem:[#allocation49_spill] sm:$0xff] %v10845_v47  ;;  %v1763_v52 = vmul.f32 %v10431_v40, %v10845_v47 }
 0x82d   : > { %2031 = vrot.lane.b32.xlu0 %v2006_v33, %s9363_s15  ;;  %1923 = vrot.lane.b32.xlu1 %v1894_v54, %s9362_s12  ;;  %v2424_v54 = vmul.f32 %v10662_v4, %v10703_v3  ;;  %v2537_v33 = vmul.f32 %v2523_v58, %v2509_v43  ;;  %v1863_v4 = vmul.f32 %v10474_v38, %v10693_v29 }
 0x82f   : > { %v1891_v58 = vmul.f32 %v10477_v20, %v1863_v4  ;;  %v2215_v20 = vmul.f32 %v10599_v7, %v2187_v34  ;;  %v2010_v4 = vmul.f32 %v10540_v21, %v1982_v41  ;;  %v1760_v21 = vmul.f32 %v10438_v9, %v10821_v57 }
 0x830   : > { %v2303_v41 = vmul.f32 %v10623_v51, %v10821_v57 }
 0x831   : > { %2121 = vrot.lane.b32.xlu0 %v2103_v61, %s9355_s23  ;;  %2241 = vrot.lane.b32.xlu1 %v2213_v8, %s9366_s17  ;;  %v1896_v61 = vmul.f32 %v10485_v62, %v1868_v46  ;;  %v2182_v8 = vmul.f32 %v10800_v60, %v10693_v29  ;;  %v2301_v46 = vmul.f32 %v10736_v23, %v10730_v6 }
 0x835   : > { %2349 = vrot.lane.b32.xlu0 %v2325_v24, %s9369_s19  ;;  %2457 = vrot.lane.b32.xlu1 %v2427_v5, %s16330_s26  ;;  %v2210_v24 = vmul.f32 %v10589_v50, %v2182_v8  ;;  %v1617_v5 = vadd.f32 %v10521_v42, %v1593_v27  ;;  %v2184_v50 = vmul.f32 %v10582_v36, %v10703_v3 }
 0x837   : > { %v2212_v43 = vmul.f32 %v10592_v59, %v2184_v50  ;;  %v16343_v50 = vld [vmem:[#allocation32_spill] sm:$0xff] }
 0x839   : > { %2451 = vrot.lane.b32.xlu0 %v2424_v54, %s16330_s26  ;;  %1793 = vrot.lane.b32.xlu1 %v1761_v2, %s9358_s27  ;;  %v1985_v2 = vmul.f32 %v10534_v1, %v10827_v25  ;;  %v10884_v54 = vmax.f32 %v1617_v5, 0.0 }
 0x83b   : > { %v2013_v37 = vmul.f32 %v10546_v0, %v1985_v2  ;;  %16341 = vst [vmem:[#allocation48_spill] sm:$0xff] %v10884_v54  ;;  %v2108_v42 = vmul.f32 %v10584_v53, %v10884_v54  ;;  %v1872_v34 = vmul.f32 %v10474_v38, %v10884_v54  ;;  %v2191_v2 = vmul.f32 %v10800_v60, %v10884_v54 }
 0x83d   : > { %2561 = vrot.lane.b32.xlu0 %v2537_v33, %s9373_s22  ;;  %2127 = vrot.lane.b32.xlu1 %v2106_v10, %s9355_s23  ;;  %v10893_v10 = vpop.permute.xlu1 %2534  ;;  %v2304_v33 = vmul.f32 %v10736_v23, %v10827_v25 }
 0x841   : > { %1787 = vrot.lane.b32.xlu0 %v1758_v32, %s9358_s27  ;;  %1797 = vrot.lane.b32.xlu1 %v1763_v52, %s9358_s27  ;;  %v2332_v32 = vmul.f32 %v10636_v30, %v2304_v33  ;;  %v10905_v59 = vpop.permute.xlu1 %2445  ;;  %v2329_v52 = vmul.f32 %v10630_v13, %v2301_v46  ;;  %v2306_v13 = vmul.f32 %v10623_v51, %v10845_v47  ;;  %v10970_v51 = vld [vmem:[%s15691_s6 + $0x4] sm:$0xf] }
 0x842   : > { %v2430_v46 = vmul.f32 %v10665_v35, %v10845_v47 }
 0x845   : > { %1917 = vrot.lane.b32.xlu0 %v1891_v58, %s9362_s12  ;;  %1927 = vrot.lane.b32.xlu1 %v1896_v61, %s9362_s12  ;;  %v2431_v58 = vmul.f32 %v10665_v35, %v10884_v54  ;;  %v1987_v61 = vmul.f32 %v10769_v45, %v10845_v47  ;;  %v10919_v27 = vpop.permute.xlu1 %1781  ;;  %v2548_v35 = vmul.f32 %v10893_v10, %v10762_v22 }
 0x847   : > { %v2015_v8 = vmul.f32 %v10543_v31, %v1987_v61 }
 0x849   : > { %2235 = vrot.lane.b32.xlu0 %v2210_v24, %s9366_s17  ;;  %2245 = vrot.lane.b32.xlu1 %v2215_v20, %s9366_s17  ;;  %v2334_v20 = vmul.f32 %v10640_v19, %v2306_v13  ;;  %v10930_v9 = vpop.permute.xlu1 %2119  ;;  %v16342_v24 = vld [vmem:[#allocation21_spill] sm:$0xff] }
 0x84a   : > { %v1900_v5 = vmul.f32 %v16342_v24, %v1872_v34  ;;  %v16346_v34 = vld [vmem:[#allocation5_spill] sm:$0xff] }
 0x84d   : > { %1921 = vrot.lane.b32.xlu0 %v1893_v49, %s9362_s12  ;;  %2045 = vrot.lane.b32.xlu1 %v2013_v37, %s9363_s15  ;;  %v2428_v49 = vmul.f32 %v10668_v18, %v10827_v25  ;;  %v1984_v37 = vmul.f32 %v10769_v45, %v10821_v57  ;;  %v2107_v18 = vmul.f32 %v10584_v53, %v10845_v47 }
 0x84e   : > { %v2542_v45 = vmul.f32 %v10786_v28, %v10762_v22  ;;  %v2518_v53 = vmul.f32 %v10756_v16, %v10845_v47 }
 0x84f   : > { %v2012_v39 = vmul.f32 %v10546_v0, %v1984_v37  ;;  %v2516_v0 = vmul.f32 %v10760_v11, %v10827_v25  ;;  %v2190_v37 = vmul.f32 %v10582_v36, %v10845_v47 }
 0x851   : > { %2239 = vrot.lane.b32.xlu0 %v2212_v43, %s9366_s17  ;;  %2131 = vrot.lane.b32.xlu1 %v2108_v42, %s9355_s23  ;;  %v2219_v42 = vmul.f32 %v16343_v50, %v2191_v2  ;;  %v10945_v43 = vpop.permute.xlu1 %1785 }
 0x855   : > { %2039 = vrot.lane.b32.xlu0 %v2010_v4, %s9363_s15  ;;  %2363 = vrot.lane.b32.xlu1 %v2332_v32, %s9369_s19  ;;  %v10957_v33 = vpop.permute.xlu1 %1915  ;;  %v2331_v4 = vmul.f32 %v10636_v30, %v2303_v41  ;;  %v2544_v32 = vmul.f32 %v10878_v56, %v2516_v0  ;;  %v11050_v41 = vld [vmem:[%s15686_s1 + $0x58] sm:$0xff] }
 0x856   : > { %16344 = vst [vmem:[#allocation50_spill] sm:$0xff] %v10957_v33  ;;  %16351 = vst [vmem:[#allocation55_spill] sm:$0xff] %v11050_v41 }
 0x859   : > { %2357 = vrot.lane.b32.xlu0 %v2329_v52, %s9369_s19  ;;  %2465 = vrot.lane.b32.xlu1 %v2431_v58, %s16330_s26  ;;  %v2546_v52 = vmul.f32 %v10893_v10, %v2518_v53  ;;  %v10975_v30 = vpop.permute.xlu1 %2233  ;;  %v16345_v58 = vld [vmem:[#allocation6_spill] sm:$0xff] }
 0x85a   : > { %v2704_v61 = vrot.slane %v10970_v51, %v16345_v58 }
 0x85d   : > { %1791 = vrot.lane.b32.xlu0 %v1760_v21, %s9358_s27  ;;  %2049 = vrot.lane.b32.xlu1 %v2015_v8, %s9363_s15  ;;  %v1869_v21 = vmul.f32 %v10474_v38, %v10827_v25  ;;  %v1764_v8 = vmul.f32 %v10431_v40, %v10884_v54  ;;  %v10987_v13 = vpop.permute.xlu1 %2033  ;;  %v2188_v38 = vmul.f32 %v10800_v60, %v10827_v25  ;;  %v11003_v40 = vld [vmem:[%s15686_s1 + $0x48] sm:$0xff] }
 0x85f   : > { %v2216_v2 = vmul.f32 %v10599_v7, %v2188_v38  ;;  %v2218_v7 = vmul.f32 %v16343_v50, %v2190_v37  ;;  %v2307_v50 = vmul.f32 %v10736_v23, %v10884_v54 }
 0x861   : > { %2125 = vrot.lane.b32.xlu0 %v2105_v55, %s9355_s23  ;;  %2367 = vrot.lane.b32.xlu1 %v2334_v20, %s9369_s19  ;;  %v10992_v55 = vrot.slane %v2704_v61, %v16346_v34  ;;  %v1897_v20 = vmul.f32 %v10485_v62, %v1869_v21  ;;  %v11015_v62 = vld [vmem:[%s15686_s1 + $0x50] sm:$0xff] }
 0x862   : > { %16348 = vst [vmem:[#allocation52_spill] sm:$0xff] %v11015_v62 }
 0x863   : > { %16347 = vst [vmem:[#allocation42_spill] sm:$0xff] %v10992_v55 }
 0x865   : > { %2459 = vrot.lane.b32.xlu0 %v2428_v49, %s16330_s26  ;;  %1935 = vrot.lane.b32.xlu1 %v1900_v5, %s9362_s12  ;;  %v1871_v5 = vmul.f32 %v10711_v17, %v10845_v47  ;;  %v11008_v49 = vpop.permute.xlu1 %2123  ;;  %v11028_v17 = vld [vmem:[%s15686_s1 + $0x40] sm:$0xff] }
 0x867   : > { %v1899_v60 = vmul.f32 %v16342_v24, %v1871_v5 }
 0x869   : > { %2043 = vrot.lane.b32.xlu0 %v2012_v39, %s9363_s15  ;;  %2253 = vrot.lane.b32.xlu1 %v2219_v42, %s9366_s17  ;;  %v11020_v39 = vpop.permute.xlu1 %2351  ;;  %v1988_v42 = vmul.f32 %v10534_v1, %v10884_v54 }
 0x86b   : > { %v2016_v36 = vmul.f32 %v10543_v31, %v1988_v42  ;;  %v2513_v31 = vmul.f32 %v10760_v11, %v10730_v6 }
 0x86d   : > { %2129 = vrot.lane.b32.xlu0 %v2107_v18, %s9355_s23  ;;  %2571 = vrot.lane.b32.xlu1 %v2542_v45, %s9373_s22  ;;  %v11036_v24 = vpop.permute.xlu1 %2453  ;;  %v2335_v18 = vmul.f32 %v10640_v19, %v2307_v50  ;;  %v2541_v23 = vmul.f32 %v10786_v28, %v2513_v31  ;;  %v2545_v28 = vmul.f32 %v10878_v56, %v10762_v22  ;;  %s9379_s23 = smov 8  }
 0x86e   : > { %16349 = vst [vmem:[#allocation51_spill] sm:$0xff] %v11036_v24 }
 0x871   : > { %2361 = vrot.lane.b32.xlu0 %v2331_v4, %s9369_s19  ;;  %2575 = vrot.lane.b32.xlu1 %v2544_v32, %s9373_s22  ;;  %v2515_v4 = vmul.f32 %v10756_v16, %v10821_v57  ;;  %v16352_v32 = vmov 2   ;;  %v2519_v16 = vmul.f32 %v10760_v11, %v10884_v54 }
 0x873   : > { %v2543_v53 = vmul.f32 %v10878_v56, %v2515_v4 }
 0x875   : > { %2463 = vrot.lane.b32.xlu0 %v2430_v46, %s16330_s26  ;;  %2579 = vrot.lane.b32.xlu1 %v2546_v52, %s9373_s22  ;;  %s9377_s26 = smov 34  }
 0x879   : > { %1799 = vrot.lane.b32.xlu0 %v1764_v8, %s9358_s27  ;;  %2583 = vrot.lane.b32.xlu1 %v2548_v35, %s9373_s22  ;;  %v2700_v8 = vrot.slane %v10970_v51, %v16346_v34  ;;  %v2547_v35 = vmul.f32 %v10893_v10, %v2519_v16 }
 0x87b   : > { %v11089_v22 = vrot.slane %v2700_v8, %v16346_v34 }
 0x87d   : > { %1929 = vrot.lane.b32.xlu0 %v1897_v20, %s9362_s12  ;;  %2719 = vrot.lane.b32.xlu1 %v10992_v55, %s9373_s22  ;;  %16357 = vst [vmem:[#allocation57_spill] sm:$0xff] %v11089_v22 }
 0x881   : > { %2247 = vrot.lane.b32.xlu0 %v2216_v2, %s9366_s17  ;;  %2744 = vperm.xlu1 %9183, %v11003_v40  }
 0x885   : > { %1933 = vrot.lane.b32.xlu0 %v1899_v60, %s9362_s12  ;;  %2749 = vperm.xlu1 %9183, %v11015_v62  }
 0x889   : > { %2251 = vrot.lane.b32.xlu0 %v2218_v7, %s9366_s17  ;;  %9184 = vset.pattern.permute.xlu1 %v16292_v12  ;;  %s9376_s17 = smov 124  }
 0x88a   : > { %2782 = vperm.xlu1 %9184, %v11028_v17  }
 0x88d   : > { %2051 = vrot.lane.b32.xlu0 %v2016_v36, %s9363_s15 }
 0x88e   : > { %2790 = vperm.xlu1 %9184, %v11015_v62  }
 0x88f   : > { %v11043_v1 = vpop.permute.xlu1 %2563  ;;  %v11045_v45 = vpop.permute.xlu0 %2565 }
 0x890   : > { %16350 = vst [vmem:[#allocation54_spill] sm:$0xff] %v11043_v1  ;;  %v16398_v1 = vld [vmem:[#allocation27_spill] sm:$0xff] }
 0x891   : > { %2369 = vrot.lane.b32.xlu0 %v2335_v18, %s9369_s19 }
 0x892   : > { %2794 = vperm.xlu1 %9184, %v11050_v41  }
 0x893   : > { %v11057_v0 = vpop.permute.xlu1 %2037  ;;  %v11059_v19 = vpop.permute.xlu0 %1779 }
 0x895   : > { %2569 = vrot.lane.b32.xlu0 %v2541_v23, %s9373_s22 }
 0x896   : > { %9186 = vset.pattern.permute.xlu1 %v16352_v32 }
 0x897   : > { %v11066_v46 = vpop.permute.xlu1 %2355  ;;  %v11068_v52 = vpop.permute.xlu0 %2117 }
 0x898   : > { %16353 = vst [vmem:[#allocation56_spill] sm:$0xff] %v11068_v52 }
 0x899   : > { %2573 = vrot.lane.b32.xlu0 %v2543_v53, %s9373_s22 }
 0x89b   : > { %v11073_v61 = vpop.permute.xlu1 %2567  ;;  %v11075_v21 = vpop.permute.xlu0 %2447 }
 0x89c   : > { %16354 = vst [vmem:[#allocation53_spill] sm:$0xff] %v11073_v61 }
 0x89d   : > { %2577 = vrot.lane.b32.xlu0 %v2545_v28, %s9373_s22 }
 0x89f   : > { %v11083_v20 = vpop.permute.xlu1 %1923  ;;  %v11085_v38 = vpop.permute.xlu0 %2031 }
 0x8a0   : > { %16355 = vst [vmem:[#allocation10_spill] sm:$0xff] %v11083_v20  ;;  %16356 = vst [vmem:[#allocation9_spill] sm:$0xff] %v11085_v38 }
 0x8a1   : > { %2581 = vrot.lane.b32.xlu0 %v2547_v35, %s9373_s22 }
 0x8a3   : > { %v11091_v56 = vpop.permute.xlu1 %2241  ;;  %v11093_v5 = vpop.permute.xlu0 %2121 }
 0x8a5   : > { %2717 = vrot.lane.b32.xlu0 %v11089_v22, %s9373_s22 }
 0x8a7   : > { %v11097_v11 = vpop.permute.xlu1 %2457  ;;  %v11099_v2 = vpop.permute.xlu0 %2349 }
 0x8a8   : > { %16358 = vst [vmem:[#allocation59_spill] sm:$0xff] %v11097_v11 }
 0x8a9   : > { %2786 = vperm.xlu0 %9185, %v11003_v40  }
 0x8ab   : > { %v11102_v10 = vpop.permute.xlu1 %1793  ;;  %v11104_v60 = vpop.permute.xlu0 %2451 }
 0x8ac   : > { %16359 = vst [vmem:[#allocation58_spill] sm:$0xff] %v11104_v60 }
 0x8af   : > { %v11106_v37 = vpop.permute.xlu1 %2127  ;;  %v11108_v7 = vpop.permute.xlu0 %2561 }
 0x8b3   : > { %v11110_v42 = vpop.permute.xlu1 %1797  ;;  %v11112_v36 = vpop.permute.xlu0 %1787 }
 0x8b4   : > { %16360 = vst [vmem:[#allocation60_spill] sm:$0xff] %v11110_v42  ;;  %16361 = vst [vmem:[#allocation21_spill] sm:$0xff] %v11112_v36 }
 0x8b7   : > { %v11114_v50 = vpop.permute.xlu1 %1927  ;;  %v11116_v18 = vpop.permute.xlu0 %1917 }
 0x8bb   : > { %v11118_v31 = vpop.permute.xlu1 %2245  ;;  %v11120_v23 = vpop.permute.xlu0 %2235 }
 0x8bc   : > { %16362 = vst [vmem:[#allocation32_spill] sm:$0xff] %v11118_v31 }
 0x8bf   : > { %v11122_v4 = vpop.permute.xlu1 %2045  ;;  %v11124_v53 = vpop.permute.xlu0 %1921 }
 0x8c3   : > { %v11126_v28 = vpop.permute.xlu1 %2131  ;;  %v11128_v16 = vpop.permute.xlu0 %2239 }
 0x8c4   : > { %16363 = vst [vmem:[#allocation61_spill] sm:$0xff] %v11126_v28 }
 0x8c7   : > { %v11130_v8 = vpop.permute.xlu1 %2363  ;;  %v11132_v35 = vpop.permute.xlu0 %2039 }
 0x8c8   : > { %16364 = vst [vmem:[#allocation62_spill] sm:$0xff] %v11130_v8 }
 0x8cb   : > { %v11134_v58 = vpop.permute.xlu1 %2465  ;;  %v11136_v34 = vpop.permute.xlu0 %2357 }
 0x8cc   : > { %16365 = vst [vmem:[#allocation63_spill] sm:$0xff] %v11134_v58 }
 0x8cf   : > { %v11138_v15 = vpop.permute.xlu1 %2049  ;;  %v11140_v12 = vpop.permute.xlu0 %1791 }
 0x8d0   : > { %16366 = vst [vmem:[#allocation64_spill] sm:$0xff] %v11138_v15  ;;  %16367 = vst [vmem:[#allocation65_spill] sm:$0xff] %v11140_v12 }
 0x8d3   : > { %v11142_v54 = vpop.permute.xlu1 %2367  ;;  %v11144_v42 = vpop.permute.xlu0 %2125 }
 0x8d4   : > { %16368 = vst [vmem:[#allocation66_spill] sm:$0xff] %v11142_v54 }
 0x8d7   : > { %v11146_v62 = vpop.permute.xlu0 %2459  ;;  %v11148_v28 = vpop.permute.xlu1 %1935 }
 0x8d8   : > { %16369 = vst [vmem:[#allocation67_spill] sm:$0xff] %v11146_v62  ;;  %16370 = vst [vmem:[#allocation68_spill] sm:$0xff] %v11148_v28 }
 0x8db   : > { %v11150_v47 = vpop.permute.xlu0 %2043  ;;  %v11152_v22 = vpop.permute.xlu1 %2253 }
 0x8dc   : > { %16371 = vst [vmem:[#allocation69_spill] sm:$0xff] %v11152_v22 }
 0x8df   : > { %v11154_v63 = vpop.permute.xlu0 %2129  ;;  %v11158_v11 = vpop.permute.xlu1 %2571 }
 0x8e0   : > { %16372 = vst [vmem:[#allocation70_spill] sm:$0xff] %v11154_v63  ;;  %16374 = vst [vmem:[#allocation72_spill] sm:$0xff] %v11158_v11 }
 0x8e3   : > { %v11156_v58 = vpop.permute.xlu0 %2361  ;;  %v11162_v8 = vpop.permute.xlu1 %2575 }
 0x8e4   : > { %16373 = vst [vmem:[#allocation71_spill] sm:$0xff] %v11156_v58  ;;  %16376 = vst [vmem:[#allocation74_spill] sm:$0xff] %v11162_v8 }
 0x8e7   : > { %v11160_v15 = vpop.permute.xlu0 %2463  ;;  %v11168_v62 = vpop.permute.xlu1 %2579 }
 0x8e8   : > { %16375 = vst [vmem:[#allocation73_spill] sm:$0xff] %v11160_v15  ;;  %16378 = vst [vmem:[#allocation76_spill] sm:$0xff] %v11168_v62 }
 0x8eb   : > { %v11164_v54 = vpop.permute.xlu0 %1799  ;;  %v11172_v41 = vpop.permute.xlu1 %2583 }
 0x8ec   : > { %16377 = vst [vmem:[#allocation75_spill] sm:$0xff] %v11164_v54  ;;  %16380 = vst [vmem:[#allocation78_spill] sm:$0xff] %v11172_v41 }
 0x8ef   : > { %v11166_v14 = vpop.permute.xlu0 %1929  ;;  %v11178_v58 = vpop.permute.xlu1 %2719 }
 0x8f0   : > { %16383 = vst [vmem:[#allocation81_spill] sm:$0xff] %v11178_v58 }
 0x8f3   : > { %v11170_v28 = vpop.permute.xlu0 %2247 }
 0x8f4   : > { %16379 = vst [vmem:[#allocation77_spill] sm:$0xff] %v11170_v28 }
 0x8f7   : > { %v11174_v22 = vpop.permute.xlu0 %1933 }
 0x8f8   : > { %16381 = vst [vmem:[#allocation79_spill] sm:$0xff] %v11174_v22  ;;  %v16394_v22 = vld [vmem:[#allocation11_spill] sm:$0xff] }
 0x8fb   : > { %v11176_v63 = vpop.permute.xlu0 %2251 }
 0x8fc   : > { %16382 = vst [vmem:[#allocation80_spill] sm:$0xff] %v11176_v63 }
 0x8ff   : > { %v11180_v11 = vpop.permute.xlu0 %2051 }
 0x900   : > { %16384 = vst [vmem:[#allocation82_spill] sm:$0xff] %v11180_v11  ;;  %v11182_v15 = vpop.permute.xlu1 %2744 }
 0x901   : > { %16385 = vst [vmem:[#allocation83_spill] sm:$0xff] %v11182_v15 }
 0x903   : > { %v11186_v54 = vpop.permute.xlu0 %2369 }
 0x904   : > { %v11184_v8 = vpop.permute.xlu1 %2749  ;;  %16387 = vst [vmem:[#allocation85_spill] sm:$0xff] %v11186_v54  ;;  %v16392_v54 = vld [vmem:[#allocation15_spill] sm:$0xff] }
 0x905   : > { %16386 = vst [vmem:[#allocation84_spill] sm:$0xff] %v11184_v8  ;;  %v11202_v63 = vmul.f32 0.0, %v16392_v54 }
 0x907   : > { %v11189_v24 = vpop.permute.xlu0 %2569 }
 0x908   : > { %16388 = vst [vmem:[#allocation86_spill] sm:$0xff] %v11189_v24 }
 0x909   : > { %v2783_v61 = vpop.permute.xlu1 %2782 }
 0x90a   : > { %v2797_v62 = vmul.f32 0.0, %v2783_v61  ;;  %v2798_v60 = vmul.f32 %v2783_v61, %v10688_v44  ;;  %v2799_v58 = vmul.f32 %v2783_v61, %v10693_v29 }
 0x90b   : > { %v11195_v41 = vpop.permute.xlu0 %2573 }
 0x90c   : > { %2823 = vrot.lane.b32.xlu1 %v2798_v60, %s9362_s12  ;;  %2821 = vrot.lane.b32.xlu0 %v2797_v62, %s9362_s12  ;;  %16389 = vst [vmem:[#allocation87_spill] sm:$0xff] %v11195_v41  ;;  %v1683_v60 = vmul.f32 %v16394_v22, %v10693_v29  ;;  %v16395_v62 = vld [vmem:[#allocation13_spill] sm:$0xff] }
 0x90d   : > { %v1801_v61 = vsel %vm560_vm1, %v16395_v62, %v11059_v19  ;;  %v2053_v62 = vsel %vm815_vm7, %v16398_v1, %v11085_v38  ;;  %v16402_v38 = vld [vmem:[#allocation14_spill] sm:$0xff] }
 0x90f   : > { %v11197_v15 = vpop.permute.xlu0 %2577 }
 0x910   : > { %2825 = vrot.lane.b32.xlu0 %v2799_v58, %s9362_s12  ;;  %16390 = vst [vmem:[#allocation88_spill] sm:$0xff] %v11197_v15  ;;  %v16396_v58 = vld [vmem:[#allocation17_spill] sm:$0xff] }
 0x911   : > { %v1713_v44 = vmul.f32 %v16396_v58, %v11202_v63  ;;  %v1715_v15 = vmul.f32 %v16396_v58, %v1683_v60 }
 0x913   : > { %v11199_v8 = vpop.permute.xlu0 %2581  ;;  %v1821_v41 = vadd.f32 %v1801_v61, %v1713_v44  ;;  %v1823_v28 = vadd.f32 %v10919_v27, %v1715_v15  ;;  %v11227_v44 = vsel %vm435_vm5, %v16392_v54, %v16394_v22  ;;  %v2791_v61 = vpop.permute.xlu1 %2790  ;;  %v16400_v54 = vld [vmem:[#allocation16_spill] sm:$0xff] }
 0x914   : > { %16391 = vst [vmem:[#allocation89_spill] sm:$0xff] %v11199_v8  ;;  %v1685_v15 = vmul.f32 %v11227_v44, %v10703_v3 }
 0x917   : > { %v11204_v11 = vpop.permute.xlu0 %2717 }
 0x918   : > { %16393 = vst [vmem:[#allocation15_spill] sm:$0xff] %v11204_v11  ;;  %v16397_v11 = vld [vmem:[#allocation24_spill] sm:$0xff] }
 0x919   : > { %v1937_v29 = vsel %vm698_vm6, %v16397_v11, %v10957_v33  ;;  %v1959_v11 = vadd.f32 %v11116_v18, %v1823_v28  ;;  %v2803_v33 = vmul.f32 0.0, %v2791_v61  ;;  %v2804_v28 = vmul.f32 %v2791_v61, %v10821_v57 }
 0x91a   : > { %v1957_v60 = vadd.f32 %v1937_v29, %v1821_v41  ;;  %v1804_v29 = vsel %vm560_vm1, %v10945_v43, %v11112_v36  ;;  %v1717_v41 = vmul.f32 %v16400_v54, %v1685_v15  ;;  %v1805_v36 = vsel %vm560_vm1, %v16402_v38, %v11140_v12  ;;  %v16404_v12 = vld [vmem:[#allocation36_spill] sm:$0xff] }
 0x91b   : > { %v1689_v15 = vmul.f32 %v16394_v22, %v10827_v25 }
 0x91c   : > { %v2073_v1 = vadd.f32 %v2053_v62, %v1957_v60  ;;  %v16401_v62 = vld [vmem:[#allocation18_spill] sm:$0xff]  ;;  %v1940_v60 = vsel %vm698_vm6, %v11124_v53, %v11083_v20 }
 0x928   : > { %v2787_v24 = vpop.permute.xlu0 %2786 }
 0x929   : > { %v2800_v8 = vmul.f32 0.0, %v2787_v24  ;;  %v2801_v32 = vmul.f32 %v2787_v24, %v10703_v3  ;;  %v2802_v58 = vmul.f32 %v2787_v24, %v10730_v6  ;;  %v2075_v3 = vadd.f32 %v10987_v13, %v1959_v11 }
 0x92a   : > { %v2805_v24 = vmul.f32 %v2791_v61, %v10827_v25  ;;  %v1825_v11 = vadd.f32 %v1804_v29, %v1717_v41  ;;  %v2258_v29 = vsel %vm1021_vm8, %v11120_v23, %v16404_v12  ;;  %v1721_v41 = vmul.f32 %v16401_v62, %v1689_v15  ;;  %v16419_v25 = vld [vmem:[#allocation71_spill] sm:$0xff] }
 0x92b   : > { %2829 = vrot.lane.b32.xlu0 %v2801_v32, %s9362_s12  ;;  %2827 = vrot.lane.b32.xlu1 %v2800_v8, %s9362_s12  ;;  %v16399_v32 = vld [vmem:[#allocation7_spill] sm:$0xff]  ;;  %v2151_v20 = vadd.f32 %v10930_v9, %v2075_v3 }
 0x92c   : > { %v2880_v8 = vrot.slane %v10970_v51, %v16399_v32 }
 0x92d   : > { %v2279_v12 = vadd.f32 %v2258_v29, %v2151_v20  ;;  %v2374_v20 = vsel %vm1139_vm9, %v11020_v39, %v10650_v26 }
 0x92e   : > { %v11258_v61 = vrot.slane %v2880_v8, %v16399_v32  ;;  %v16405_v8 = vld [vmem:[#allocation22_spill] sm:$0xff] }
 0x92f   : > { %2833 = vrot.lane.b32.xlu0 %v2803_v33, %s9362_s12  ;;  %2831 = vrot.lane.b32.xlu1 %v2802_v58, %s9362_s12  ;;  %v1719_v33 = vmul.f32 %v16401_v62, %v11202_v63  ;;  %v2149_v58 = vadd.f32 %v11068_v52, %v2073_v1  ;;  %v2056_v1 = vsel %vm815_vm7, %v11057_v0, %v11132_v35 }
 0x930   : > { %16403 = vst [vmem:[#allocation11_spill] sm:$0xff] %v11258_v61  ;;  %v1961_v52 = vadd.f32 %v1940_v60, %v1825_v11  ;;  %v1941_v3 = vsel %vm698_vm6, %v16405_v8, %v11114_v50  ;;  %v16407_v8 = vmov 3  }
 0x931   : > { %v1827_v57 = vadd.f32 %v1805_v36, %v1719_v33  ;;  %v2277_v38 = vadd.f32 %v10975_v30, %v2149_v58  ;;  %v16406_v36 = vld [vmem:[#allocation28_spill] sm:$0xff]  ;;  %v1829_v33 = vadd.f32 %v11102_v10, %v1721_v41  ;;  %v2395_v41 = vadd.f32 %v2374_v20, %v2279_v12  ;;  %v16412_v20 = vld [vmem:[#allocation30_spill] sm:$0xff] }
 0x933   : > { %2837 = vrot.lane.b32.xlu0 %v2805_v24, %s9362_s12  ;;  %2835 = vrot.lane.b32.xlu1 %v2804_v28, %s9362_s12  ;;  %v2077_v28 = vadd.f32 %v2056_v1, %v1961_v52  ;;  %v2057_v24 = vsel %vm815_vm7, %v16406_v36, %v11150_v47  ;;  %v1963_v58 = vadd.f32 %v1941_v3, %v1827_v57  ;;  %v11294_v57 = vld [vmem:[%s15686_s1 + $0x60] sm:$0xff] }
 0x934   : > { %v2134_v52 = vsel %vm435_vm5, %v11093_v5, %v11008_v49  ;;  %v2393_v60 = vadd.f32 %v11099_v2, %v2277_v38  ;;  %v1965_v1 = vadd.f32 %v11166_v14, %v1829_v33  ;;  %16408 = vst [vmem:[#allocation13_spill] sm:$0xff] %v11294_v57  ;;  %v16409_v38 = vld [vmem:[#allocation8_spill] sm:$0xff]  ;;  %v2470_v33 = vsel %vm1236_vm10, %v11075_v21, %v10748_v48  ;;  %v16411_v48 = vld [vmem:[#allocation54_spill] sm:$0xff] }
 0x935   : > { %v2153_v15 = vadd.f32 %v2134_v52, %v2077_v28  ;;  %v2079_v11 = vadd.f32 %v2057_v24, %v1963_v58  ;;  %v2884_v29 = vrot.slane %v10970_v51, %v16409_v38  ;;  %v2259_v28 = vsel %vm1021_vm8, %v11128_v16, %v11091_v56 }
 0x936   : > { %v2489_v3 = vadd.f32 %v10905_v59, %v2393_v60  ;;  %v2081_v24 = vadd.f32 %v11122_v4, %v1965_v1  ;;  %v2491_v58 = vadd.f32 %v2470_v33, %v2395_v41  ;;  %v2375_v52 = vsel %vm1139_vm9, %v11066_v46, %v11136_v34  ;;  %v16417_v33 = vld [vmem:[#allocation86_spill] sm:$0xff] }
 0x937   : > { %2897 = vrot.lane.b32.xlu0 %v11258_v61, %s9374_s20  ;;  %2919 = vperm.xlu1 %9186, %v11028_v17   ;;  %v2281_v36 = vadd.f32 %v2259_v28, %v2153_v15  ;;  %v2155_v26 = vadd.f32 %v11144_v42, %v2079_v11  ;;  %v11310_v51 = vrot.slane %v2884_v29, %v16399_v32  ;;  %v16413_v29 = vld [vmem:[#allocation77_spill] sm:$0xff]  ;;  %v16422_v32 = vld [vmem:[#allocation38_spill] sm:$0xff] }
 0x938   : > { %v2605_v12 = vadd.f32 %v11108_v7, %v2489_v3  ;;  %v2157_v11 = vadd.f32 %v11106_v37, %v2081_v24  ;;  %v2586_v1 = vsel %vm1354_vm11, %v16411_v48, %v11045_v45  ;;  %v2262_v28 = vsel %vm1021_vm8, %v16413_v29, %v16412_v20  ;;  %v16420_v20 = vld [vmem:[#allocation55_spill] sm:$0xff] }
 0x939   : > { %16410 = vst [vmem:[#allocation24_spill] sm:$0xff] %v11310_v51  ;;  %v2397_v60 = vadd.f32 %v2375_v52, %v2281_v36  ;;  %v2283_v15 = vadd.f32 %v11118_v31, %v2155_v26  ;;  %v2607_v41 = vadd.f32 %v2586_v1, %v2491_v58  ;;  %v16414_v3 = vmov 2   ;;  %v16415_v36 = vld [vmem:[#allocation51_spill] sm:$0xff]  ;;  %v16416_v26 = vld [vmem:[#allocation58_spill] sm:$0xff]  ;;  %v16421_v58 = vld [vmem:[#allocation37_spill] sm:$0xff] }
 0x93a   : > { %v2471_v24 = vsel %vm1236_vm10, %v16416_v26, %v16415_v36  ;;  %v1682_v1 = vmul.f32 %v11227_v44, %v16421_v58  ;;  %v16424_v29 = vld [vmem:[#allocation59_spill] sm:$0xff] }
 0x93b   : > { %3017 = vrot.lane.b32.xlu0 %v10992_v55, %s9362_s12  ;;  %9187 = vset.pattern.permute.xlu1 %v16407_v8  ;;  %v2399_v45 = vadd.f32 %v16419_v25, %v2283_v15  ;;  %v2285_v55 = vadd.f32 %v2262_v28, %v2157_v11  ;;  %v2493_v38 = vadd.f32 %v2471_v24, %v2397_v60  ;;  %v16425_v15 = vmov 4   ;;  %v16426_v11 = vld [vmem:[#allocation87_spill] sm:$0xff]  ;;  %v16427_v28 = vld [vmem:[#allocation17_spill] sm:$0xff]  ;;  %v16428_v24 = vld [vmem:[#allocation40_spill] sm:$0xff] }
 0x93c   : > { %3036 = vperm.xlu1 %9187, %v11028_v17   ;;  %v1802_v60 = vsel %vm560_vm1, %v11059_v19, %v10919_v27  ;;  %v16433_v19 = vld [vmem:[#allocation12_spill] sm:$0xff] }
 0x93d   : > { %v2495_v26 = vadd.f32 %v16424_v29, %v2399_v45  ;;  %v16432_v45 = vld [vmem:[#allocation50_spill] sm:$0xff]  ;;  %v16451_v29 = vld [vmem:[#allocation65_spill] sm:$0xff] }
 0x93e   : > { %v1938_v58 = vsel %vm698_vm6, %v16432_v45, %v11116_v18  ;;  %v16439_v45 = vld [vmem:[#allocation75_spill] sm:$0xff] }
 0x93f   : > { %3835 = vperm.xlu0 %9185, %v11294_v57   ;;  %v16423_v57 = vld [vmem:[#allocation62_spill] sm:$0xff] }
 0x940   : > { %3040 = vperm.xlu1 %9187, %v11003_v40   ;;  %v2378_v36 = vsel %vm1139_vm9, %v16423_v57, %v16422_v32  ;;  %v16430_v32 = vld [vmem:[#allocation88_spill] sm:$0xff] }
 0x941   : > { %v2401_v31 = vadd.f32 %v2378_v36, %v2285_v55  ;;  %v16431_v36 = vld [vmem:[#allocation74_spill] sm:$0xff] }
 0x943   : > { %2629 = vrot.lane.b32.xlu0 %v2605_v12, %s9372_s21  ;;  %v16418_v12 = vld [vmem:[#allocation53_spill] sm:$0xff] }
 0x944   : > { %2899 = vrot.lane.b32.xlu1 %v11310_v51, %s9374_s20  ;;  %v2587_v52 = vsel %vm1354_vm11, %v16418_v12, %v16417_v33 }
 0x945   : > { %9188 = vset.pattern.permute.xlu1 %v16414_v3  ;;  %v2609_v61 = vadd.f32 %v2587_v52, %v2493_v38  ;;  %v2611_v38 = vadd.f32 %v16426_v11, %v2495_v26  ;;  %v16429_v52 = vld [vmem:[#allocation67_spill] sm:$0xff]  ;;  %v1803_v26 = vsel %vm560_vm1, %v16433_v19, %v10945_v43  ;;  %v16435_v11 = vld [vmem:[#allocation49_spill] sm:$0xff] }
 0x946   : > { %v2474_v55 = vsel %vm1236_vm10, %v16429_v52, %v16428_v24  ;;  %v1716_v24 = vmul.f32 %v16400_v54, %v11202_v63  ;;  %v1691_v18 = vmul.f32 %v11227_v44, %v16435_v11  ;;  %v16441_v11 = vld [vmem:[#allocation19_spill] sm:$0xff] }
 0x947   : > { %2633 = vrot.lane.b32.xlu0 %v2607_v41, %s9372_s21  ;;  %v1714_v41 = vmul.f32 %v16427_v28, %v1682_v1  ;;  %v16434_v28 = vld [vmem:[#allocation57_spill] sm:$0xff] }
 0x948   : > { %2931 = vperm.xlu1 %9188, %v16420_v20   ;;  %v2497_v20 = vadd.f32 %v2474_v55, %v2401_v31  ;;  %v1686_v31 = vmul.f32 %v16394_v22, %v10730_v6  ;;  %v1723_v6 = vmul.f32 %v16441_v11, %v1691_v18  ;;  %v16445_v18 = vld [vmem:[#allocation26_spill] sm:$0xff] }
 0x949   : > { %v1822_v27 = vadd.f32 %v1802_v60, %v1714_v41  ;;  %v16436_v60 = vld [vmem:[#allocation25_spill] sm:$0xff] }
 0x94a   : > { %v1939_v43 = vsel %vm698_vm6, %v16436_v60, %v11124_v53  ;;  %v16442_v53 = vld [vmem:[#allocation45_spill] sm:$0xff] }
 0x94b   : > { %2637 = vrot.lane.b32.xlu0 %v2609_v61, %s9372_s21  ;;  %v2590_v61 = vsel %vm1354_vm11, %v16431_v36, %v16430_v32  ;;  %v1958_v32 = vadd.f32 %v1938_v58, %v1822_v27  ;;  %v16438_v58 = vld [vmem:[#allocation52_spill] sm:$0xff] }
 0x94c   : > { %9189 = vset.pattern.permute.xlu1 %v16425_v15  ;;  %v2613_v1 = vadd.f32 %v2590_v61, %v2497_v20  ;;  %v1824_v20 = vadd.f32 %v1803_v26, %v1716_v24  ;;  %v16440_v27 = vld [vmem:[#allocation60_spill] sm:$0xff]  ;;  %v1688_v26 = vmul.f32 %v11227_v44, %v16442_v53 }
 0x94d   : > { %3136 = vperm.xlu1 %9189, %v11003_v40   ;;  %v1808_v19 = vsel %vm560_vm1, %v16440_v27, %v16439_v45 }
 0x94e   : > { %v1960_v61 = vadd.f32 %v1939_v43, %v1824_v20  ;;  %v16447_v43 = vld [vmem:[#allocation21_spill] sm:$0xff]  ;;  %v1831_v44 = vadd.f32 %v1808_v19, %v1723_v6  ;;  %v16452_v6 = vld [vmem:[#allocation20_spill] sm:$0xff] }
 0x94f   : > { %2641 = vrot.lane.b32.xlu0 %v2611_v38, %s9372_s21  ;;  %v16437_v38 = vld [vmem:[#allocation9_spill] sm:$0xff] }
 0x950   : > { %v2054_v41 = vsel %vm815_vm7, %v16437_v38, %v10987_v13  ;;  %v16443_v13 = vld [vmem:[#allocation68_spill] sm:$0xff]  ;;  %v16448_v38 = vmov 5  }
 0x951   : > { %3015 = vrot.lane.b32.xlu1 %v16434_v28, %s9362_s12  ;;  %v2074_v55 = vadd.f32 %v2054_v41, %v1958_v32  ;;  %v1718_v28 = vmul.f32 %v16400_v54, %v1686_v31  ;;  %v11396_v32 = vld [vmem:[%s15686_s1 + $0x70] sm:$0xff]  ;;  %v2055_v54 = vsel %vm815_vm7, %v16445_v18, %v11057_v0  ;;  %v16446_v31 = vld [vmem:[#allocation56_spill] sm:$0xff]  ;;  %v1806_v0 = vsel %vm560_vm1, %v16451_v29, %v11102_v10 }
 0x952   : > { %9190 = vset.pattern.permute.xlu1 %v16407_v8  ;;  %v2133_v60 = vsel %vm435_vm5, %v16446_v31, %v10930_v9  ;;  %v2076_v53 = vadd.f32 %v2055_v54, %v1960_v61  ;;  %v16450_v8 = vld [vmem:[#allocation64_spill] sm:$0xff]  ;;  %v1720_v9 = vmul.f32 %v16401_v62, %v1688_v26  ;;  %v16453_v61 = vld [vmem:[#allocation10_spill] sm:$0xff]  ;;  %v1942_v54 = vsel %vm698_vm6, %v11114_v50, %v11166_v14  ;;  %v16456_v14 = vld [vmem:[#allocation61_spill] sm:$0xff] }
 0x953   : > { %2645 = vrot.lane.b32.xlu0 %v2613_v1, %s9372_s21  ;;  %v16444_v1 = vld [vmem:[#allocation79_spill] sm:$0xff]  ;;  %v1826_v20 = vadd.f32 %v16447_v43, %v1718_v28  ;;  %v2150_v41 = vadd.f32 %v2133_v60, %v2074_v55  ;;  %v1807_v28 = vsel %vm560_vm1, %v16452_v6, %v16440_v27  ;;  %v2257_v55 = vsel %vm1021_vm8, %v10975_v30, %v11120_v23  ;;  %v16457_v50 = vld [vmem:[#allocation70_spill] sm:$0xff] }
 0x954   : > { %v1944_v24 = vsel %vm698_vm6, %v16444_v1, %v16443_v13  ;;  %v1722_v29 = vmul.f32 %v16441_v11, %v11202_v63  ;;  %v2152_v62 = vadd.f32 %v11093_v5, %v2076_v53  ;;  %v1828_v26 = vadd.f32 %v1806_v0, %v1720_v9  ;;  %v16454_v30 = vld [vmem:[#allocation23_spill] sm:$0xff]  ;;  %v16458_v63 = vld [vmem:[#allocation48_spill] sm:$0xff] }
 0x955   : > { %3044 = vperm.xlu1 %9190, %v16438_v58   ;;  %v1967_v18 = vadd.f32 %v1944_v24, %v1831_v44  ;;  %v1962_v19 = vadd.f32 %v16453_v61, %v1826_v20  ;;  %v2278_v24 = vadd.f32 %v2257_v55, %v2150_v41  ;;  %v1943_v23 = vsel %vm698_vm6, %v16454_v30, %v16444_v1 }
 0x956   : > { %v16455_v31 = vmov 6   ;;  %v1830_v60 = vadd.f32 %v1807_v28, %v1722_v29  ;;  %v1692_v43 = vmul.f32 %v16394_v22, %v16458_v63  ;;  %v1964_v5 = vadd.f32 %v1942_v54, %v1828_v26  ;;  %v16460_v28 = vld [vmem:[#allocation69_spill] sm:$0xff] }
 0x957   : > { %3221 = vrot.lane.b32.xlu0 %v11310_v51, %s9375_s18  ;;  %v16449_v51 = vld [vmem:[#allocation82_spill] sm:$0xff]  ;;  %v2078_v27 = vadd.f32 %v11132_v35, %v1962_v19  ;;  %v11443_v35 = vld [vmem:[%s15686_s1 + $0x68] sm:$0xff]  ;;  %v2373_v53 = vsel %vm1139_vm9, %v11099_v2, %v11020_v39  ;;  %v2280_v44 = vadd.f32 %v11128_v16, %v2152_v62  ;;  %v16459_v0 = vmov 1   ;;  %v16461_v39 = vld [vmem:[#allocation80_spill] sm:$0xff] }
 0x958   : > { %v2060_v36 = vsel %vm815_vm7, %v16450_v8, %v16449_v51  ;;  %v2394_v20 = vadd.f32 %v2373_v53, %v2278_v24  ;;  %v1966_v41 = vadd.f32 %v1943_v23, %v1830_v60  ;;  %v1724_v9 = vmul.f32 %v16441_v11, %v1692_v43  ;;  %v16465_v24 = vld [vmem:[#allocation85_spill] sm:$0xff]  ;;  %v16466_v62 = vld [vmem:[#allocation66_spill] sm:$0xff] }
 0x959   : > { %9191 = vset.pattern.permute.xlu1 %v16448_v38  ;;  %v2083_v10 = vadd.f32 %v2060_v36, %v1967_v18  ;;  %v2136_v36 = vsel %vm435_vm5, %v16457_v50, %v16456_v14  ;;  %v2154_v22 = vadd.f32 %v11008_v49, %v2078_v27  ;;  %v2058_v18 = vsel %vm815_vm7, %v11150_v47, %v11122_v4  ;;  %v16462_v49 = vld [vmem:[#allocation34_spill] sm:$0xff]  ;;  %v16463_v47 = vld [vmem:[#allocation33_spill] sm:$0xff] }
 0x95a   : > { %3241 = vperm.xlu1 %9191, %v11028_v17   ;;  %v2080_v6 = vadd.f32 %v2058_v18, %v1964_v5  ;;  %v2263_v2 = vsel %vm1021_vm8, %v16461_v39, %v16460_v28  ;;  %v2469_v16 = vsel %vm1236_vm10, %v10905_v59, %v11075_v21  ;;  %v2260_v55 = vsel %vm1021_vm8, %v11091_v56, %v16462_v49  ;;  %v16464_v21 = vld [vmem:[#allocation31_spill] sm:$0xff]  ;;  %v16468_v60 = vld [vmem:[#allocation77_spill] sm:$0xff]  ;;  %v16477_v49 = vld [vmem:[#allocation72_spill] sm:$0xff] }
 0x95b   : > { %3843 = vperm.xlu0 %9185, %v11396_v32   ;;  %v2159_v1 = vadd.f32 %v2136_v36, %v2083_v10  ;;  %v2059_v4 = vsel %vm815_vm7, %v16463_v47, %v16450_v8  ;;  %v2490_v61 = vadd.f32 %v2469_v16, %v2394_v20  ;;  %v2396_v19 = vadd.f32 %v11066_v46, %v2280_v44  ;;  %v16469_v36 = vld [vmem:[#allocation32_spill] sm:$0xff]  ;;  %v16470_v5 = vld [vmem:[#allocation63_spill] sm:$0xff]  ;;  %v16471_v53 = vld [vmem:[#allocation73_spill] sm:$0xff] }
 0x95c   : > { %v1832_v54 = vadd.f32 %v16439_v45, %v1724_v9  ;;  %v2082_v10 = vadd.f32 %v2059_v4, %v1966_v41  ;;  %v2282_v29 = vadd.f32 %v2260_v55, %v2154_v22  ;;  %v2135_v59 = vsel %vm435_vm5, %v11144_v42, %v11106_v37  ;;  %v16467_v37 = vld [vmem:[#allocation58_spill] sm:$0xff]  ;;  %v16472_v20 = vld [vmem:[#allocation89_spill] sm:$0xff]  ;;  %v16473_v44 = vld [vmem:[#allocation76_spill] sm:$0xff] }
 0x95d   : > { %v2287_v11 = vadd.f32 %v2263_v2, %v2159_v1  ;;  %v2376_v56 = vsel %vm1139_vm9, %v11136_v34, %v16464_v21  ;;  %v2156_v8 = vadd.f32 %v2135_v59, %v2080_v6  ;;  %v2379_v26 = vsel %vm1139_vm9, %v16466_v62, %v16465_v24  ;;  %v11508_v9 = vld [vmem:[%s15691_s6 + $0x8] sm:$0xf]  ;;  %v16476_v6 = vld [vmem:[#allocation51_spill] sm:$0xff] }
 0x95e   : > { %3245 = vperm.xlu1 %9191, %v11003_v40   ;;  %v2585_v46 = vsel %vm1354_vm11, %v11108_v7, %v16411_v48  ;;  %v2492_v42 = vadd.f32 %v16467_v37, %v2396_v19  ;;  %v2158_v27 = vadd.f32 %v16457_v50, %v2082_v10  ;;  %v1968_v34 = vadd.f32 %v16443_v13, %v1832_v54  ;;  %v16474_v50 = vld [vmem:[#allocation13_spill] sm:$0xff] }
 0x95f   : > { %9200 = vset.pattern.permute.xlu0 %v16455_v31  ;;  %v2403_v45 = vadd.f32 %v2379_v26, %v2287_v11  ;;  %v2606_v30 = vadd.f32 %v2585_v46, %v2490_v61  ;;  %v2398_v23 = vadd.f32 %v2376_v56, %v2282_v29  ;;  %v2261_v43 = vsel %vm1021_vm8, %v16469_v36, %v16468_v60  ;;  %v16478_v11 = vld [vmem:[#allocation5_spill] sm:$0xff]  ;;  %v16482_v29 = vld [vmem:[#allocation87_spill] sm:$0xff] }
 0x960   : > { %3367 = vperm.xlu0 %9200, %v16438_v58   ;;  %v2475_v1 = vsel %vm1236_vm10, %v16471_v53, %v16470_v5  ;;  %v2284_v7 = vadd.f32 %v2261_v43, %v2156_v8  ;;  %v2084_v48 = vadd.f32 %v16449_v51, %v1968_v34  ;;  %v2591_v41 = vsel %vm1354_vm11, %v16473_v44, %v16472_v20  ;;  %v16475_v51 = vld [vmem:[#allocation39_spill] sm:$0xff] }
 0x961   : > { %v2499_v13 = vadd.f32 %v2475_v1, %v2403_v45  ;;  %v2286_v22 = vadd.f32 %v16461_v39, %v2158_v27  ;;  %v2608_v18 = vadd.f32 %v16418_v12, %v2492_v42  ;;  %v2472_v2 = vsel %vm1236_vm10, %v16476_v6, %v16475_v51  ;;  %v16483_v8 = vld [vmem:[#allocation35_spill] sm:$0xff]  ;;  %v11552_v42 = vld [vmem:[%s15691_s6 + $0xc] sm:$0xf]  ;;  %v16486_v27 = vld [vmem:[#allocation46_spill] sm:$0xff] }
 0x962   : > { %9192 = vset.pattern.permute.xlu1 %v16459_v0  ;;  %v2377_v16 = vsel %vm1139_vm9, %v16419_v25, %v16423_v57  ;;  %v2588_v55 = vsel %vm1354_vm11, %v16417_v33, %v16477_v49  ;;  %v2160_v12 = vadd.f32 %v16456_v14, %v2084_v48  ;;  %v2494_v4 = vadd.f32 %v2472_v2, %v2398_v23  ;;  %v16479_v25 = vld [vmem:[#allocation59_spill] sm:$0xff]  ;;  %v16480_v33 = vld [vmem:[#allocation29_spill] sm:$0xff]  ;;  %v16481_v14 = vld [vmem:[#allocation74_spill] sm:$0xff] }
 0x963   : > { %3839 = vperm.xlu1 %9192, %v11443_v35   ;;  %v2615_v39 = vadd.f32 %v2591_v41, %v2499_v13  ;;  %v2400_v47 = vadd.f32 %v2377_v16, %v2284_v7  ;;  %v3753_v61 = vrot.slane %v11508_v9, %v16478_v11  ;;  %v2402_v19 = vadd.f32 %v16466_v62, %v2286_v22  ;;  %v16484_v45 = vld [vmem:[#allocation7_spill] sm:$0xff]  ;;  %v11604_v22 = vld [vmem:[%s15686_s1 + $0x90] sm:$0xff] }
 0x964   : > { %9201 = vset.pattern.permute.xlu0 %v16414_v3  ;;  %v2610_v54 = vadd.f32 %v2588_v55, %v2494_v4  ;;  %v2473_v57 = vsel %vm1236_vm10, %v16479_v25, %v16429_v52  ;;  %v2264_v10 = vsel %vm1021_vm8, %v16460_v28, %v16480_v33  ;;  %v2589_v59 = vsel %vm1354_vm11, %v16482_v29, %v16481_v14  ;;  %v16488_v36 = vld [vmem:[#allocation11_spill] sm:$0xff] }
 0x965   : > { %2923 = vperm.xlu0 %9201, %v11003_v40   ;;  %v2288_v21 = vadd.f32 %v2264_v10, %v2160_v12  ;;  %v2496_v56 = vadd.f32 %v2473_v57, %v2400_v47  ;;  %v2380_v62 = vsel %vm1139_vm9, %v16465_v24, %v16483_v8  ;;  %v11540_v52 = vrot.slane %v3753_v61, %v16478_v11  ;;  %v11577_v48 = vld [vmem:[%s15686_s1 + $0x98] sm:$0xff]  ;;  %v16500_v47 = vld [vmem:[#allocation57_spill] sm:$0xff]  ;;  %v16502_v61 = vld [vmem:[#allocation42_spill] sm:$0xff] }
 0x966   : > { %v2498_v26 = vadd.f32 %v16471_v53, %v2402_v19  ;;  %v3933_v37 = vrot.slane %v11508_v9, %v16484_v45  ;;  %16485 = vst [vmem:[#allocation27_spill] sm:$0xff] %v11552_v42  ;;  %v2476_v34 = vsel %vm1236_vm10, %v16470_v5, %v16486_v27  ;;  %v16489_v53 = vld [vmem:[#allocation8_spill] sm:$0xff]  ;;  %v16492_v13 = vmov 7   ;;  %v11634_v12 = vld [vmem:[%s15686_s1 + $0x88] sm:$0xff] }
 0x967   : > { %9193 = vset.pattern.permute.xlu1 %v16425_v15  ;;  %v2612_v28 = vadd.f32 %v2589_v59, %v2496_v56  ;;  %v2404_v46 = vadd.f32 %v2380_v62, %v2288_v21  ;;  %v4905_v1 = vrot.slane %v11552_v42, %v16489_v53  ;;  %v16497_v49 = vmov 3   ;;  %v11676_v59 = vld [vmem:[%s15686_s1 + $0x80] sm:$0xff] }
 0x968   : > { %3140 = vperm.xlu1 %9193, %v16438_v58   ;;  %v2614_v24 = vadd.f32 %v16473_v44, %v2498_v26  ;;  %v11564_v43 = vrot.slane %v3933_v37, %v16484_v45  ;;  %v11594_v44 = vld [vmem:[%s15686_s1 + $0x78] sm:$0xff]  ;;  %v16504_v57 = vmov 8   ;;  %v3937_v33 = vrot.slane %v11508_v9, %v16489_v53  ;;  %v16509_v37 = vld [vmem:[#allocation6_spill] sm:$0xff] }
 0x969   : > { %2927 = vperm.xlu0 %9201, %v16438_v58   ;;  %v2500_v60 = vadd.f32 %v2476_v34, %v2404_v46  ;;  %v4915_v5 = vrot.slane %v4905_v1, %v16484_v45  ;;  %vm3556_vm1 = vcmask 277504   ;;  %vm4922_vm5 = vcmask 64512  }
 0x96a   : > { %v11663_v29 = vrot.slane %v3937_v33, %v16484_v45  ;;  %vm3304_vm8 = vcmask 752640   ;;  %vm3422_vm10 = vcmask 523264  }
 0x96c   : > { %2631 = vrot.lane.b32.xlu1 %v2606_v30, %s9372_s21  ;;  %v16487_v30 = vld [vmem:[#allocation78_spill] sm:$0xff] }
 0x96d   : > { %3972 = vperm.xlu0 %9201, %v16474_v50   ;;  %9194 = vset.pattern.permute.xlu1 %v16455_v31  ;;  %v2592_v23 = vsel %vm1354_vm11, %v16472_v20, %v16487_v30  ;;  %v16490_v20 = vld [vmem:[#allocation55_spill] sm:$0xff] }
 0x96e   : > { %v2616_v7 = vadd.f32 %v2592_v23, %v2500_v60 }
 0x970   : > { %2635 = vrot.lane.b32.xlu1 %v2608_v18, %s9372_s21  ;;  %v11606_v18 = vpop.permute.xlu1 %2794 }
 0x971   : > { %2649 = vrot.lane.b32.xlu0 %v2615_v39, %s9372_s21 }
 0x974   : > { %2639 = vrot.lane.b32.xlu1 %v2610_v54, %s9372_s21 }
 0x975   : > { %3980 = vperm.xlu0 %9201, %v11396_v32  }
 0x978   : > { %2643 = vrot.lane.b32.xlu1 %v2612_v28, %s9372_s21 }
 0x979   : > { %4068 = vrot.lane.b32.xlu0 %v11540_v52, %s9376_s17 }
 0x97c   : > { %2647 = vrot.lane.b32.xlu1 %v2614_v24, %s9372_s21  ;;  %v3757_v24 = vrot.slane %v11508_v9, %v16509_v37 }
 0x97d   : > { %3552 = vrot.lane.b32.xlu0 %v16488_v36, %s9377_s26 }
 0x97e   : > { %v11596_v41 = vpop.permute.xlu0 %2821  ;;  %v11612_v6 = vpop.permute.xlu1 %2823  ;;  %v3767_v30 = vrot.slane %v3757_v24, %v16478_v11 }
 0x97f   : > { %16491 = vst [vmem:[#allocation16_spill] sm:$0xff] %v11596_v41  ;;  %16494 = vst [vmem:[#allocation14_spill] sm:$0xff] %v11612_v6  ;;  %v16530_v6 = vld [vmem:[#allocation37_spill] sm:$0xff] }
 0x980   : > { %2651 = vrot.lane.b32.xlu1 %v2616_v7, %s9372_s21  ;;  %s17263_s21 = sshll.u32 %s17265_s14, 6 }
 0x981   : > { %4272 = vrot.lane.b32.xlu0 %v11564_v43, %s9378_s16 }
 0x982   : > { %v11608_v51 = vpop.permute.xlu0 %2825 }
 0x983   : > { %16493 = vst [vmem:[#allocation18_spill] sm:$0xff] %v11608_v51 }
 0x984   : > { %3359 = vperm.xlu1 %9194, %v11028_v17  }
 0x985   : > { %4920 = vrot.lane.b32.xlu0 %v4915_v5, %s9379_s23 }
 0x988   : > { %3363 = vperm.xlu1 %9194, %v11003_v40  }
 0x989   : > { %4952 = vperm.xlu0 %9201, %v11577_v48  }
 0x98c   : > { %9195 = vset.pattern.permute.xlu1 %v16414_v3 }
 0x98d   : > { %9218 = vset.pattern.permute.xlu0 %v16425_v15  ;;  %3976 = vperm.xlu1 %9195, %v11443_v35  }
 0x98e   : > { %3132 = vperm.xlu0 %9218, %v11028_v17  }
 0x991   : > { %3219 = vrot.lane.b32.xlu1 %v16488_v36, %s9375_s18  ;;  %v16511_v36 = vld [vmem:[#allocation44_spill] sm:$0xff]  ;;  %s9384_s18 = smov 64  }
 0x992   : > { %3144 = vperm.xlu0 %9218, %v16490_v20   ;;  %9196 = vset.pattern.permute.xlu1 %v16448_v38 }
 0x995   : > { %3249 = vperm.xlu1 %9196, %v16438_v58  }
 0x996   : > { %4189 = vperm.xlu0 %9218, %v11443_v35  }
 0x999   : > { %9197 = vset.pattern.permute.xlu1 %v16492_v13 }
 0x99a   : > { %4197 = vperm.xlu0 %9218, %v11594_v44   ;;  %3456 = vperm.xlu1 %9197, %v11028_v17  }
 0x99d   : > { %v11614_v2 = vpop.permute.xlu0 %2829  ;;  %v11620_v16 = vpop.permute.xlu1 %2827 }
 0x99e   : > { %5096 = vperm.xlu0 %9218, %v11604_v22   ;;  %3460 = vperm.xlu1 %9197, %v11003_v40   ;;  %16495 = vst [vmem:[#allocation36_spill] sm:$0xff] %v11614_v2  ;;  %16496 = vst [vmem:[#allocation22_spill] sm:$0xff] %v11620_v16 }
 0x9a1   : > { %v11624_v55 = vpop.permute.xlu0 %2833  ;;  %v11628_v39 = vpop.permute.xlu1 %2831 }
 0x9a2   : > { %9223 = vset.pattern.permute.xlu0 %v16448_v38  ;;  %9198 = vset.pattern.permute.xlu1 %v16459_v0  ;;  %16498 = vst [vmem:[#allocation28_spill] sm:$0xff] %v11624_v55  ;;  %16499 = vst [vmem:[#allocation54_spill] sm:$0xff] %v11628_v39 }
 0x9a3   : > { %3253 = vperm.xlu0 %9223, %v16490_v20   ;;  %3847 = vperm.xlu1 %9198, %v11594_v44  }
 0x9a5   : > { %v11637_v4 = vpop.permute.xlu0 %2837  ;;  %v11641_v19 = vpop.permute.xlu1 %2835 }
 0x9a6   : > { %16501 = vst [vmem:[#allocation30_spill] sm:$0xff] %v11637_v4  ;;  %16503 = vst [vmem:[#allocation86_spill] sm:$0xff] %v11641_v19 }
 0x9a7   : > { %4298 = vperm.xlu0 %9223, %v11443_v35   ;;  %9199 = vset.pattern.permute.xlu1 %v16497_v49 }
 0x9a8   : > { %4089 = vperm.xlu1 %9199, %v16474_v50  }
 0x9a9   : > { %v11644_v54 = vpop.permute.xlu0 %2897 }
 0x9aa   : > { %v11743_v24 = vmul.f32 0.0, %v11644_v54 }
 0x9ab   : > { %4302 = vperm.xlu0 %9223, %v11396_v32  }
 0x9ac   : > { %3337 = vrot.lane.b32.xlu1 %v16500_v47, %s9380_s25  ;;  %v16513_v47 = vld [vmem:[#allocation43_spill] sm:$0xff] }
 0x9ad   : > { %9202 = vset.pattern.permute.xlu1 %v16455_v31  ;;  %v11655_v10 = vpop.permute.xlu0 %3017 }
 0x9ae   : > { %v3028_v19 = vmul.f32 %v11655_v10, %v16513_v47 }
 0x9af   : > { %5192 = vperm.xlu0 %9223, %v11634_v12  }
 0x9b0   : > { %3339 = vrot.lane.b32.xlu1 %v16502_v61, %s9380_s25  ;;  %s9387_s25 = smov 56  }
 0x9b3   : > { %5200 = vperm.xlu0 %9223, %v11577_v48  }
 0x9b4   : > { %3371 = vperm.xlu1 %9202, %v16490_v20  }
 0x9b6   : > { %v11647_v25 = vpop.permute.xlu1 %2919 }
 0x9b7   : > { %9226 = vset.pattern.permute.xlu0 %v16504_v57 }
 0x9b8   : > { %3578 = vperm.xlu0 %9226, %v11003_v40   ;;  %9203 = vset.pattern.permute.xlu1 %v16504_v57 }
 0x9b9   : > { %3574 = vperm.xlu1 %9203, %v11028_v17  }
 0x9bb   : > { %v11657_v14 = vpop.permute.xlu1 %3036 }
 0x9bc   : > { %3582 = vperm.xlu0 %9226, %v16438_v58  }
 0x9bd   : > { %3950 = vrot.lane.b32.xlu1 %v11564_v43, %s9381_s29 }
 0x9be   : > { %v11665_v40 = vpop.permute.xlu0 %3835  ;;  %9204 = vset.pattern.permute.xlu1 %v16414_v3 }
 0x9bf   : > { %v11668_v17 = vpop.permute.xlu1 %3040 }
 0x9c0   : > { %4551 = vperm.xlu0 %9226, %v16474_v50   ;;  %v3056_v41 = vmul.f32 %v11668_v17, %v3028_v19 }
 0x9c1   : > { %3952 = vrot.lane.b32.xlu1 %v11663_v29, %s9381_s29 }
 0x9c2   : > { %v11678_v21 = vpop.permute.xlu0 %2629 }
 0x9c3   : > { %16505 = vst [vmem:[#allocation53_spill] sm:$0xff] %v11678_v21  ;;  %v11680_v56 = vpop.permute.xlu1 %2899  ;;  %v16515_v21 = vld [vmem:[#allocation24_spill] sm:$0xff] }
 0x9c4   : > { %5436 = vperm.xlu0 %9226, %v11676_v59   ;;  %v2908_v43 = vmul.f32 %v11680_v56, %v16511_v36  ;;  %v2911_v61 = vmul.f32 %v11680_v56, %v16513_v47  ;;  %v11799_v19 = vsel %vm2901_vm13, %v11644_v54, %v11680_v56  ;;  %vm3519_vm13 = vcmask 506880  }
 0x9c5   : > { %3984 = vperm.xlu1 %9204, %v11594_v44  }
 0x9c6   : > { %v11684_v8 = vpop.permute.xlu0 %2633  ;;  %v2936_v7 = vmul.f32 %v11647_v25, %v2908_v43 }
 0x9c7   : > { %16506 = vst [vmem:[#allocation71_spill] sm:$0xff] %v11684_v8  ;;  %v11686_v62 = vpop.permute.xlu1 %2931 }
 0x9c8   : > { %9228 = vset.pattern.permute.xlu0 %v16492_v13 }
 0x9c9   : > { %4447 = vperm.xlu0 %9228, %v11443_v35   ;;  %9205 = vset.pattern.permute.xlu1 %v16425_v15 }
 0x9ca   : > { %4185 = vperm.xlu1 %9205, %v16474_v50   ;;  %v11692_v26 = vpop.permute.xlu0 %2637 }
 0x9cb   : > { %16507 = vst [vmem:[#allocation38_spill] sm:$0xff] %v11692_v26 }
 0x9cc   : > { %v11694_v28 = vpop.permute.xlu1 %3136 }
 0x9cd   : > { %4451 = vperm.xlu0 %9228, %v11396_v32  }
 0x9ce   : > { %9206 = vset.pattern.permute.xlu1 %v16492_v13  ;;  %v11698_v46 = vpop.permute.xlu0 %2641 }
 0x9cf   : > { %16508 = vst [vmem:[#allocation62_spill] sm:$0xff] %v11698_v46  ;;  %3464 = vperm.xlu1 %9206, %v16438_v58  }
 0x9d0   : > { %v11703_v27 = vpop.permute.xlu1 %3015 }
 0x9d1   : > { %5348 = vperm.xlu0 %9228, %v11577_v48  }
 0x9d2   : > { %v11706_v34 = vpop.permute.xlu0 %2645 }
 0x9d3   : > { %16510 = vst [vmem:[#allocation17_spill] sm:$0xff] %v11706_v34  ;;  %3468 = vperm.xlu1 %9206, %v16490_v20  }
 0x9d4   : > { %v11710_v23 = vpop.permute.xlu1 %3044 }
 0x9d5   : > { %9231 = vset.pattern.permute.xlu0 %v16497_v49 }
 0x9d6   : > { %3048 = vperm.xlu0 %9231, %v16490_v20   ;;  %v11714_v58 = vpop.permute.xlu0 %3221 }
 0x9d7   : > { %4070 = vrot.lane.b32.xlu1 %v3767_v30, %s9376_s17 }
 0x9d8   : > { %9207 = vset.pattern.permute.xlu1 %v16497_v49 }
 0x9d9   : > { %v11718_v9 = vpop.permute.xlu1 %3241 }
 0x9da   : > { %4093 = vperm.xlu0 %9231, %v11443_v35   ;;  %v11721_v60 = vpop.permute.xlu0 %3843 }
 0x9db   : > { %4101 = vperm.xlu1 %9207, %v11594_v44  }
 0x9dd   : > { %v11726_v53 = vpop.permute.xlu1 %3245 }
 0x9de   : > { %4097 = vperm.xlu0 %9231, %v11396_v32  }
 0x9df   : > { %9208 = vset.pattern.permute.xlu1 %v16448_v38  ;;  %v11730_v1 = vpop.permute.xlu0 %3367 }
 0x9e0   : > { %16512 = vst [vmem:[#allocation40_spill] sm:$0xff] %v11730_v1  ;;  %4294 = vperm.xlu1 %9208, %v16474_v50  }
 0x9e2   : > { %2962 = vrot.lane.b32.xlu0 %v2936_v7, %s9376_s17  ;;  %v11735_v5 = vpop.permute.xlu1 %3839 }
 0x9e4   : > { %9209 = vset.pattern.permute.xlu1 %v16459_v0  ;;  %v11740_v33 = vpop.permute.xlu0 %2923 }
 0x9e5   : > { %v2939_v34 = vmul.f32 %v11740_v33, %v2911_v61  ;;  %4811 = vperm.xlu1 %9209, %v11676_v59   ;;  %v2937_v43 = vmul.f32 %v11740_v33, %v11743_v24  ;;  %v2808_v61 = vmul.f32 %v11606_v18, %v16458_v63 }
 0x9e7   : > { %v11749_v7 = vpop.permute.xlu1 %3140  ;;  %2968 = vrot.lane.b32.xlu0 %v2939_v34, %s9376_s17  ;;  %v3025_v34 = vmul.f32 %v11655_v10, %v16511_v36 }
 0x9e8   : > { %v11752_v46 = vpop.permute.xlu0 %2927 }
 0x9e9   : > { %4815 = vperm.xlu1 %9209, %v11634_v12  }
 0x9eb   : > { %v11755_v26 = vpop.permute.xlu1 %2631  ;;  %2964 = vrot.lane.b32.xlu0 %v2937_v43, %s9376_s17  ;;  %v3053_v43 = vmul.f32 %v11657_v14, %v3025_v34  ;;  %v11790_v34 = vmul.f32 0.0, %v11703_v27 }
 0x9ec   : > { %16514 = vst [vmem:[#allocation67_spill] sm:$0xff] %v11755_v26  ;;  %v11758_v8 = vpop.permute.xlu0 %3972 }
 0x9ed   : > { %3554 = vrot.lane.b32.xlu1 %v16515_v21, %s9377_s26 }
 0x9ee   : > { %9210 = vset.pattern.permute.xlu1 %v16504_v57 }
 0x9ef   : > { %v11767_v55 = vpop.permute.xlu1 %2635  ;;  %2843 = vrot.lane.b32.xlu0 %v2808_v61, %s9362_s12 }
 0x9f0   : > { %16516 = vst [vmem:[#allocation88_spill] sm:$0xff] %v11767_v55  ;;  %v11770_v26 = vpop.permute.xlu0 %2649 }
 0x9f1   : > { %16517 = vst [vmem:[#allocation50_spill] sm:$0xff] %v11770_v26  ;;  %3586 = vperm.xlu1 %9210, %v16490_v20   ;;  %v16524_v26 = vld [vmem:[#allocation45_spill] sm:$0xff] }
 0x9f3   : > { %v11776_v4 = vpop.permute.xlu1 %2639  ;;  %3079 = vrot.lane.b32.xlu0 %v3053_v43, %s9369_s19 }
 0x9f4   : > { %16518 = vst [vmem:[#allocation12_spill] sm:$0xff] %v11776_v4  ;;  %v11779_v21 = vpop.permute.xlu0 %3980  ;;  %v2913_v4 = vmul.f32 %v11799_v19, %v16524_v26 }
 0x9f5   : > { %16519 = vst [vmem:[#allocation25_spill] sm:$0xff] %v11779_v21  ;;  %9211 = vset.pattern.permute.xlu1 %v16425_v15  ;;  %v4901_v21 = vrot.slane %v11552_v42, %v16484_v45 }
 0x9f6   : > { %4193 = vperm.xlu1 %9211, %v11396_v32   ;;  %v2941_v39 = vmul.f32 %v11752_v46, %v2913_v4 }
 0x9f7   : > { %v11784_v61 = vpop.permute.xlu1 %2643  ;;  %3085 = vrot.lane.b32.xlu0 %v3056_v41, %s9369_s19 }
 0x9f8   : > { %16520 = vst [vmem:[#allocation9_spill] sm:$0xff] %v11784_v61  ;;  %v11787_v20 = vpop.permute.xlu0 %4068  ;;  %v3051_v61 = vmul.f32 %v11657_v14, %v11790_v34 }
 0x9f9   : > { %16521 = vst [vmem:[#allocation52_spill] sm:$0xff] %v11787_v20 }
 0x9fa   : > { %9212 = vset.pattern.permute.xlu1 %v16414_v3 }
 0x9fb   : > { %4940 = vperm.xlu1 %9212, %v11676_v59   ;;  %v11794_v43 = vpop.permute.xlu1 %2647  ;;  %3772 = vrot.lane.b32.xlu0 %v3767_v30, %s9382_s30  ;;  %v16527_v30 = vld [vmem:[#allocation49_spill] sm:$0xff] }
 0x9fc   : > { %16522 = vst [vmem:[#allocation75_spill] sm:$0xff] %v11794_v43  ;;  %v11801_v41 = vpop.permute.xlu0 %3552  ;;  %v2916_v54 = vmul.f32 %v11799_v19, %v16527_v30 }
 0x9fd   : > { %16523 = vst [vmem:[#allocation60_spill] sm:$0xff] %v11801_v41 }
 0x9ff   : > { %4944 = vperm.xlu1 %9212, %v11634_v12   ;;  %v11808_v55 = vpop.permute.xlu1 %2651  ;;  %3075 = vrot.lane.b32.xlu0 %v3051_v61, %s9369_s19  ;;  %v2944_v61 = vmul.f32 %v11686_v62, %v2916_v54 }
 0xa00   : > { %16525 = vst [vmem:[#allocation19_spill] sm:$0xff] %v11808_v55  ;;  %v11811_v43 = vpop.permute.xlu0 %4272 }
 0xa01   : > { %16526 = vst [vmem:[#allocation68_spill] sm:$0xff] %v11811_v43  ;;  %v2940_v43 = vmul.f32 %v11752_v46, %v11743_v24 }
 0xa03   : > { %4274 = vrot.lane.b32.xlu1 %v11663_v29, %s9378_s16  ;;  %v11818_v16 = vpop.permute.xlu1 %3359  ;;  %2972 = vrot.lane.b32.xlu0 %v2941_v39, %s9376_s17  ;;  %s9383_s16 = smov 92  }
 0xa04   : > { %v11821_v2 = vpop.permute.xlu0 %4920  ;;  %9213 = vset.pattern.permute.xlu1 %v16448_v38 }
 0xa05   : > { %16528 = vst [vmem:[#allocation79_spill] sm:$0xff] %v11821_v2  ;;  %v11851_v2 = vsel %vm698_vm6, %v11703_v27, %v11655_v10 }
 0xa07   : > { %4306 = vperm.xlu1 %9213, %v11594_v44   ;;  %v11826_v55 = vpop.permute.xlu1 %3363  ;;  %2978 = vrot.lane.b32.xlu0 %v2944_v61, %s9376_s17 }
 0xa08   : > { %v11829_v4 = vpop.permute.xlu0 %4952 }
 0xa09   : > { %16529 = vst [vmem:[#allocation26_spill] sm:$0xff] %v11829_v4  ;;  %v16531_v4 = vld [vmem:[#allocation41_spill] sm:$0xff] }
 0xa0b   : > { %9214 = vset.pattern.permute.xlu1 %v16492_v13 }
 0xa0c   : > { %4443 = vperm.xlu1 %9214, %v16474_v50   ;;  %v11833_v29 = vpop.permute.xlu1 %3976  ;;  %v3149_v50 = vmul.f32 %v11694_v28, %v16531_v4 }
 0xa0d   : > { %v11835_v39 = vpop.permute.xlu0 %3132 }
 0xa0e   : > { %v3147_v51 = vmul.f32 %v11835_v39, %v16530_v6 }
 0xa10   : > { %9215 = vset.pattern.permute.xlu1 %v16459_v0  ;;  %v11840_v54 = vpop.permute.xlu1 %3219  ;;  %3163 = vrot.lane.b32.xlu0 %v3147_v51, %s9373_s22  ;;  %v3030_v51 = vmul.f32 %v11851_v2, %v16524_v26 }
 0xa11   : > { %4819 = vperm.xlu1 %9215, %v11604_v22   ;;  %v11844_v61 = vpop.permute.xlu0 %3144 }
 0xa12   : > { %v3058_v41 = vmul.f32 %v11710_v23, %v3030_v51 }
 0xa14   : > { %v11853_v49 = vpop.permute.xlu1 %3249  ;;  %3167 = vrot.lane.b32.xlu0 %v3149_v50, %s9373_s22 }
 0xa15   : > { %4823 = vperm.xlu1 %9215, %v11577_v48   ;;  %v11857_v0 = vpop.permute.xlu0 %4189 }
 0xa16   : > { %16532 = vst [vmem:[#allocation56_spill] sm:$0xff] %v11857_v0  ;;  %v4911_v0 = vrot.slane %v4901_v21, %v16484_v45 }
 0xa18   : > { %2970 = vrot.lane.b32.xlu0 %v2940_v43, %s9376_s17 }
 0xa19   : > { %9216 = vset.pattern.permute.xlu1 %v16504_v57  ;;  %v11867_v27 = vpop.permute.xlu1 %3456  ;;  %v11869_v50 = vpop.permute.xlu0 %4197 }
 0xa1a   : > { %16533 = vst [vmem:[#allocation21_spill] sm:$0xff] %v11869_v50  ;;  %4555 = vperm.xlu1 %9216, %v11443_v35  }
 0xa1c   : > { %3089 = vrot.lane.b32.xlu0 %v3058_v41, %s9369_s19 }
 0xa1d   : > { %v11875_v31 = vpop.permute.xlu1 %3460  ;;  %v11877_v1 = vpop.permute.xlu0 %5096 }
 0xa1e   : > { %16534 = vst [vmem:[#allocation82_spill] sm:$0xff] %v11877_v1  ;;  %4918 = vrot.lane.b32.xlu1 %v4911_v0, %s9379_s23 }
 0xa1f   : > { %9217 = vset.pattern.permute.xlu1 %v16414_v3 }
 0xa22   : > { %4948 = vperm.xlu1 %9217, %v11604_v22   ;;  %v11882_v43 = vpop.permute.xlu1 %3847  ;;  %v11884_v50 = vpop.permute.xlu0 %3253 }
 0xa26   : > { %9219 = vset.pattern.permute.xlu1 %v16425_v15  ;;  %v11887_v51 = vpop.permute.xlu0 %4298 }
 0xa27   : > { %16535 = vst [vmem:[#allocation64_spill] sm:$0xff] %v11887_v51  ;;  %5088 = vperm.xlu1 %9219, %v11676_v59   ;;  %v11890_v45 = vpop.permute.xlu1 %4089 }
 0xa2a   : > { %v11892_v21 = vpop.permute.xlu0 %4302 }
 0xa2b   : > { %16536 = vst [vmem:[#allocation65_spill] sm:$0xff] %v11892_v21  ;;  %5092 = vperm.xlu1 %9219, %v11634_v12   ;;  %v11895_v0 = vpop.permute.xlu1 %3337 }
 0xa2e   : > { %v11897_v41 = vpop.permute.xlu0 %5192 }
 0xa2f   : > { %16537 = vst [vmem:[#allocation20_spill] sm:$0xff] %v11897_v41  ;;  %9220 = vset.pattern.permute.xlu1 %v16492_v13  ;;  %v11900_v3 = vpop.permute.xlu1 %3339 }
 0xa30   : > { %4455 = vperm.xlu1 %9220, %v11594_v44  }
 0xa32   : > { %v11903_v1 = vpop.permute.xlu0 %5200 }
 0xa33   : > { %16538 = vst [vmem:[#allocation10_spill] sm:$0xff] %v11903_v1  ;;  %v11905_v51 = vpop.permute.xlu1 %3371 }
 0xa34   : > { %16539 = vst [vmem:[#allocation23_spill] sm:$0xff] %v11905_v51  ;;  %9221 = vset.pattern.permute.xlu1 %v16448_v38 }
 0xa35   : > { %5188 = vperm.xlu1 %9221, %v11676_v59  }
 0xa37   : > { %v11909_v21 = vpop.permute.xlu0 %3578 }
 0xa38   : > { %16540 = vst [vmem:[#allocation61_spill] sm:$0xff] %v11909_v21  ;;  %v11911_v20 = vpop.permute.xlu1 %3574 }
 0xa39   : > { %16541 = vst [vmem:[#allocation70_spill] sm:$0xff] %v11911_v20  ;;  %9222 = vset.pattern.permute.xlu1 %v16504_v57 }
 0xa3a   : > { %4559 = vperm.xlu1 %9222, %v11396_v32  }
 0xa3b   : > { %v11915_v41 = vpop.permute.xlu0 %3582 }
 0xa3c   : > { %16542 = vst [vmem:[#allocation69_spill] sm:$0xff] %v11915_v41  ;;  %v11917_v11 = vpop.permute.xlu1 %3950 }
 0xa3d   : > { %16543 = vst [vmem:[#allocation80_spill] sm:$0xff] %v11917_v11 }
 0xa3e   : > { %4563 = vperm.xlu1 %9222, %v11594_v44  }
 0xa3f   : > { %v11920_v1 = vpop.permute.xlu0 %4551 }
 0xa40   : > { %16544 = vst [vmem:[#allocation34_spill] sm:$0xff] %v11920_v1  ;;  %v11922_v51 = vpop.permute.xlu1 %3952 }
 0xa42   : > { %9224 = vset.pattern.permute.xlu1 %v16425_v15 }
 0xa43   : > { %5100 = vperm.xlu1 %9224, %v11577_v48   ;;  %v11926_v21 = vpop.permute.xlu0 %5436 }
 0xa44   : > { %16545 = vst [vmem:[#allocation33_spill] sm:$0xff] %v11926_v21  ;;  %v11928_v20 = vpop.permute.xlu1 %3984 }
 0xa45   : > { %16546 = vst [vmem:[#allocation31_spill] sm:$0xff] %v11928_v20 }
 0xa47   : > { %9225 = vset.pattern.permute.xlu1 %v16448_v38  ;;  %v3033_v38 = vmul.f32 %v11851_v2, %v16527_v30 }
 0xa48   : > { %5196 = vperm.xlu1 %9225, %v11604_v22   ;;  %v11932_v41 = vpop.permute.xlu0 %4447 }
 0xa49   : > { %16547 = vst [vmem:[#allocation85_spill] sm:$0xff] %v11932_v41  ;;  %v11934_v42 = vpop.permute.xlu1 %4185 }
 0xa4a   : > { %16548 = vst [vmem:[#allocation66_spill] sm:$0xff] %v11934_v42 }
 0xa4c   : > { %9227 = vset.pattern.permute.xlu1 %v16492_v13  ;;  %v11937_v44 = vpop.permute.xlu0 %4451 }
 0xa4d   : > { %16549 = vst [vmem:[#allocation58_spill] sm:$0xff] %v11937_v44  ;;  %5336 = vperm.xlu1 %9227, %v11676_v59   ;;  %v11960_v44 = vmul.f32 0.0, %v11714_v58 }
 0xa4e   : > { %v11940_v15 = vpop.permute.xlu1 %3464 }
 0xa4f   : > { %16550 = vst [vmem:[#allocation77_spill] sm:$0xff] %v11940_v15 }
 0xa50   : > { %v11942_v1 = vpop.permute.xlu0 %5348 }
 0xa51   : > { %16551 = vst [vmem:[#allocation32_spill] sm:$0xff] %v11942_v1  ;;  %5340 = vperm.xlu1 %9227, %v11634_v12   ;;  %v3228_v1 = vmul.f32 %v11840_v54, %v16530_v6 }
 0xa52   : > { %v11945_v21 = vpop.permute.xlu1 %3468 }
 0xa53   : > { %16552 = vst [vmem:[#allocation63_spill] sm:$0xff] %v11945_v21  ;;  %v3256_v15 = vmul.f32 %v11718_v9, %v3228_v1 }
 0xa55   : > { %9229 = vset.pattern.permute.xlu1 %v16504_v57  ;;  %v11950_v41 = vpop.permute.xlu0 %3048 }
 0xa56   : > { %v3061_v42 = vmul.f32 %v11950_v41, %v3033_v38  ;;  %5440 = vperm.xlu1 %9229, %v11634_v12   ;;  %v11954_v59 = vpop.permute.xlu1 %4070  ;;  %v11968_v38 = vsel %vm3223_vm14, %v11840_v54, %v11714_v58  ;;  %vm3637_vm14 = vcmask 490496  }
 0xa57   : > { %v3232_v20 = vmul.f32 %v11968_v38, %v16513_v47 }
 0xa58   : > { %3095 = vrot.lane.b32.xlu0 %v3061_v42, %s9369_s19  ;;  %v3258_v42 = vmul.f32 %v11718_v9, %v11960_v44 }
 0xa59   : > { %v3260_v58 = vmul.f32 %v11726_v53, %v3232_v20  ;;  %v11998_v20 = vpop.permute.xlu0 %4093 }
 0xa5a   : > { %9230 = vset.pattern.permute.xlu1 %v16492_v13  ;;  %v11963_v21 = vpop.permute.xlu1 %4101 }
 0xa5b   : > { %16553 = vst [vmem:[#allocation73_spill] sm:$0xff] %v11963_v21  ;;  %5344 = vperm.xlu1 %9230, %v11604_v22   ;;  %v16556_v21 = vmov 0  }
 0xa5c   : > { %3280 = vrot.lane.b32.xlu0 %v3256_v15, %s9383_s16  ;;  %v3851_v15 = vmul.f32 %v11665_v40, %v16530_v6 }
 0xa5f   : > { %9232 = vset.pattern.permute.xlu1 %v16504_v57  ;;  %v11977_v13 = vpop.permute.xlu1 %4294  ;;  %v2907_v57 = vmul.f32 %v11799_v19, %v16530_v6 }
 0xa60   : > { %16554 = vst [vmem:[#allocation89_spill] sm:$0xff] %v11977_v13  ;;  %5444 = vperm.xlu1 %9232, %v11604_v22   ;;  %3284 = vrot.lane.b32.xlu0 %v3258_v42, %s9383_s16 }
 0xa61   : > { %v2935_v22 = vmul.f32 %v11647_v25, %v2907_v57  ;;  %v3850_v57 = vmul.f32 0.0, %v11665_v40 }
 0xa64   : > { %5448 = vperm.xlu1 %9232, %v11577_v48   ;;  %v11983_v1 = vpop.permute.xlu1 %4811  ;;  %3288 = vrot.lane.b32.xlu0 %v3260_v58, %s9383_s16  ;;  %v3854_v48 = vmul.f32 %v11735_v5, %v16531_v4  ;;  %v2910_v58 = vmul.f32 %v11799_v19, %v16531_v4  ;;  %v2934_v19 = vmul.f32 %v11647_v25, %v11743_v24 }
 0xa65   : > { %16555 = vst [vmem:[#allocation76_spill] sm:$0xff] %v11983_v1  ;;  %v12014_v1 = vpop.permute.xlu0 %4097  ;;  %v3153_v25 = vmul.f32 %v11844_v61, %v16527_v30 }
 0xa68   : > { %9233 = vset.pattern.permute.xlu1 %v16556_v21  ;;  %v11991_v13 = vpop.permute.xlu1 %4815  ;;  %3876 = vrot.lane.b32.xlu0 %v3851_v15, %s9376_s17  ;;  %v3057_v15 = vmul.f32 %v11710_v23, %v11790_v34 }
 0xa69   : > { %16557 = vst [vmem:[#allocation13_spill] sm:$0xff] %v11991_v13  ;;  %3797 = vperm.xlu1 %9233, %v11443_v35   ;;  %v2938_v35 = vmul.f32 %v11740_v33, %v2910_v58  ;;  %v3151_v33 = vmul.f32 %v11749_v7, %v16524_v26  ;;  %v3024_v58 = vmul.f32 %v11851_v2, %v16530_v6 }
 0xa6c   : > { %v12000_v42 = vpop.permute.xlu1 %3554  ;;  %3882 = vrot.lane.b32.xlu0 %v3854_v48, %s9376_s17 }
 0xa6d   : > { %2960 = vrot.lane.b32.xlu1 %v2935_v22, %s9376_s17  ;;  %v2807_v22 = vmul.f32 %v11606_v18, %v16527_v30 }
 0xa70   : > { %v12009_v13 = vpop.permute.xlu1 %3586  ;;  %3087 = vrot.lane.b32.xlu0 %v3057_v15, %s9369_s19  ;;  %v12028_v15 = vpop.permute.xlu0 %2962 }
 0xa71   : > { %16558 = vst [vmem:[#allocation39_spill] sm:$0xff] %v12009_v13  ;;  %2966 = vrot.lane.b32.xlu1 %v2938_v35, %s9376_s17  ;;  %16560 = vst [vmem:[#allocation72_spill] sm:$0xff] %v12028_v15  ;;  %v12053_v13 = vsel %vm3341_vm15, %v11895_v0, %v11900_v3  ;;  %vm4035_vm15 = vcmask 982016  }
 0xa74   : > { %3874 = vrot.lane.b32.xlu0 %v3850_v57, %s9376_s17  ;;  %v3346_v57 = vmul.f32 %v11895_v0, %v16530_v6 }
 0xa75   : > { %v12019_v48 = vpop.permute.xlu1 %4193  ;;  %2958 = vrot.lane.b32.xlu1 %v2934_v19, %s9376_s17  ;;  %v3027_v19 = vmul.f32 %v11851_v2, %v16531_v4 }
 0xa76   : > { %16559 = vst [vmem:[#allocation51_spill] sm:$0xff] %v12019_v48  ;;  %v3052_v48 = vmul.f32 %v11657_v14, %v3024_v58  ;;  %v3350_v14 = vmul.f32 %v12053_v13, %v16513_v47 }
 0xa77   : > { %v3055_v2 = vmul.f32 %v11668_v17, %v3027_v19 }
 0xa78   : > { %3171 = vrot.lane.b32.xlu0 %v3151_v33, %s9373_s22  ;;  %v12044_v33 = vmul.f32 0.0, %v11900_v3  ;;  %v12067_v3 = vsel %vm3954_vm0, %v11917_v11, %v11922_v51 }
 0xa79   : > { %2841 = vrot.lane.b32.xlu1 %v2807_v22, %s9362_s12  ;;  %v12046_v22 = vpop.permute.xlu0 %2968  ;;  %16563 = vst [vmem:[#allocation74_spill] sm:$0xff] %v12067_v3  ;;  %v3960_v19 = vmul.f32 %v12067_v3, %v16530_v6 }
 0xa7a   : > { %v12034_v35 = vpop.permute.xlu1 %4940  ;;  %16562 = vst [vmem:[#allocation29_spill] sm:$0xff] %v12046_v22  ;;  %v3376_v58 = vmul.f32 %v11818_v16, %v12044_v33 }
 0xa7b   : > { %16561 = vst [vmem:[#allocation59_spill] sm:$0xff] %v12034_v35  ;;  %v3374_v35 = vmul.f32 %v11818_v16, %v3346_v57  ;;  %v3378_v57 = vmul.f32 %v11826_v55, %v3350_v14  ;;  %v3988_v22 = vmul.f32 %v11758_v8, %v3960_v19  ;;  %v12092_v14 = vmul.f32 0.0, %v11917_v11 }
 0xa7c   : > { %3175 = vrot.lane.b32.xlu0 %v3153_v25, %s9373_s22 }
 0xa7d   : > { %3077 = vrot.lane.b32.xlu1 %v3052_v48, %s9369_s19  ;;  %v12069_v25 = vpop.permute.xlu0 %2964 }
 0xa7e   : > { %v12048_v15 = vpop.permute.xlu1 %4944  ;;  %16564 = vst [vmem:[#allocation87_spill] sm:$0xff] %v12069_v25 }
 0xa80   : > { %3398 = vrot.lane.b32.xlu0 %v3374_v35, %s9384_s18 }
 0xa81   : > { %3083 = vrot.lane.b32.xlu1 %v3055_v2, %s9369_s19  ;;  %v12081_v2 = vpop.permute.xlu0 %2843 }
 0xa82   : > { %v12060_v48 = vpop.permute.xlu1 %4274  ;;  %16565 = vst [vmem:[#allocation35_spill] sm:$0xff] %v12081_v2 }
 0xa84   : > { %3402 = vrot.lane.b32.xlu0 %v3376_v58, %s9384_s18  ;;  %v3963_v58 = vmul.f32 %v12067_v3, %v16531_v4 }
 0xa85   : > { %3770 = vrot.lane.b32.xlu1 %v11540_v52, %s9382_s30  ;;  %v2806_v52 = vmul.f32 0.0, %v11606_v18  ;;  %v12097_v19 = vpop.permute.xlu0 %3079  ;;  %v16569_v18 = vld [vmem:[#allocation47_spill] sm:$0xff] }
 0xa86   : > { %v12074_v35 = vpop.permute.xlu1 %4306  ;;  %16567 = vst [vmem:[#allocation46_spill] sm:$0xff] %v12097_v19 }
 0xa88   : > { %3406 = vrot.lane.b32.xlu0 %v3378_v57, %s9384_s18  ;;  %v3054_v57 = vmul.f32 %v11668_v17, %v11790_v34 }
 0xa89   : > { %3802 = vperm.xlu1 %9233, %v11396_v32   ;;  %v3991_v32 = vmul.f32 %v11833_v29, %v3963_v58  ;;  %v3990_v58 = vmul.f32 %v11833_v29, %v12092_v14 }
 0xa8b   : > { %v12087_v25 = vpop.permute.xlu1 %4443 }
 0xa8c   : > { %16566 = vst [vmem:[#allocation7_spill] sm:$0xff] %v12087_v25  ;;  %4013 = vrot.lane.b32.xlu0 %v3988_v22, %s9385_s24  ;;  %v2914_v25 = vmul.f32 %v11680_v56, %v16569_v18  ;;  %v3235_v22 = vmul.f32 %v11968_v38, %v16569_v18 }
 0xa8d   : > { %2839 = vrot.lane.b32.xlu1 %v2806_v52, %s9362_s12  ;;  %s9386_s12 = smov 62  }
 0xa8e   : > { %v2942_v52 = vmul.f32 %v11752_v46, %v2914_v25  ;;  %v3263_v19 = vmul.f32 %v11853_v49, %v3235_v22 }
 0xa90   : > { %v12099_v2 = vpop.permute.xlu1 %4819  ;;  %4019 = vrot.lane.b32.xlu0 %v3991_v32, %s9385_s24  ;;  %v2917_v32 = vmul.f32 %v11680_v56, %v16458_v63  ;;  %v3148_v56 = vmul.f32 %v11835_v39, %v16511_v36  ;;  %v3472_v39 = vmul.f32 %v11867_v27, %v16511_v36 }
 0xa91   : > { %16568 = vst [vmem:[#allocation78_spill] sm:$0xff] %v12099_v2  ;;  %3081 = vrot.lane.b32.xlu1 %v3054_v57, %s9369_s19  ;;  %v12117_v57 = vpop.permute.xlu0 %3085  ;;  %v3237_v2 = vmul.f32 %v11840_v54, %v16527_v30 }
 0xa92   : > { %16570 = vst [vmem:[#allocation11_spill] sm:$0xff] %v12117_v57  ;;  %v2945_v11 = vmul.f32 %v11686_v62, %v2917_v32  ;;  %v2943_v32 = vmul.f32 %v11686_v62, %v11743_v24  ;;  %v3034_v62 = vmul.f32 %v11655_v10, %v16458_v63  ;;  %v3476_v24 = vmul.f32 0.0, %v11875_v31 }
 0xa93   : > { %v3265_v25 = vmul.f32 %v11884_v50, %v3237_v2  ;;  %v3852_v57 = vmul.f32 %v11665_v40, %v16511_v36  ;;  %v16584_v40 = vld [vmem:[#allocation52_spill] sm:$0xff] }
 0xa94   : > { %v12110_v17 = vpop.permute.xlu1 %4823  ;;  %4017 = vrot.lane.b32.xlu0 %v3990_v58, %s9385_s24 }
 0xa95   : > { %2974 = vrot.lane.b32.xlu1 %v2942_v52, %s9376_s17  ;;  %v12129_v58 = vpop.permute.xlu0 %3772  ;;  %v3150_v52 = vmul.f32 %v11694_v28, %v16513_v47  ;;  %v3031_v28 = vmul.f32 %v11655_v10, %v16569_v18 }
 0xa96   : > { %16571 = vst [vmem:[#allocation8_spill] sm:$0xff] %v12129_v58 }
 0xa98   : > { %3294 = vrot.lane.b32.xlu0 %v3263_v19, %s9383_s16  ;;  %v3267_v19 = vmul.f32 %v11884_v50, %v11960_v44 }
 0xa99   : > { %v12123_v46 = vpop.permute.xlu1 %4555  ;;  %2980 = vrot.lane.b32.xlu1 %v2945_v11, %s9376_s17  ;;  %v12145_v2 = vpop.permute.xlu0 %3075 }
 0xa9a   : > { %16572 = vst [vmem:[#allocation55_spill] sm:$0xff] %v12145_v2  ;;  %v3229_v2 = vmul.f32 %v11968_v38, %v16511_v36 }
 0xa9c   : > { %3298 = vrot.lane.b32.xlu0 %v3265_v25, %s9383_s16  ;;  %v3474_v25 = vmul.f32 %v11875_v31, %v16531_v4 }
 0xa9d   : > { %v12132_v22 = vpop.permute.xlu1 %4918  ;;  %3165 = vrot.lane.b32.xlu1 %v3148_v56, %s9373_s22 }
 0xaa0   : > { %3302 = vrot.lane.b32.xlu0 %v3267_v19, %s9383_s16  ;;  %v3059_v19 = vmul.f32 %v11710_v23, %v3031_v28  ;;  %v3858_v23 = vmul.f32 %v11721_v60, %v16569_v18 }
 0xaa1   : > { %v12140_v11 = vpop.permute.xlu1 %4948  ;;  %3169 = vrot.lane.b32.xlu1 %v3150_v52, %s9373_s22  ;;  %v12158_v52 = vpop.permute.xlu0 %2972 }
 0xaa2   : > { %16573 = vst [vmem:[#allocation57_spill] sm:$0xff] %v12158_v52 }
 0xaa4   : > { %3497 = vrot.lane.b32.xlu0 %v3472_v39, %s9386_s12 }
 0xaa5   : > { %2976 = vrot.lane.b32.xlu1 %v2943_v32, %s9376_s17  ;;  %v3062_v32 = vmul.f32 %v11950_v41, %v3034_v62  ;;  %v12174_v28 = vpop.permute.xlu0 %2978  ;;  %v3861_v62 = vmul.f32 %v11882_v43, %v16458_v63 }
 0xaa6   : > { %v12155_v56 = vpop.permute.xlu1 %5088  ;;  %16574 = vst [vmem:[#allocation42_spill] sm:$0xff] %v12174_v28 }
 0xaa8   : > { %3501 = vrot.lane.b32.xlu0 %v3474_v25, %s9386_s12  ;;  %v3257_v25 = vmul.f32 %v11718_v9, %v3229_v2  ;;  %v4081_v9 = vmul.f32 %v11954_v59, %v16513_v47 }
 0xaa9   : > { %3091 = vrot.lane.b32.xlu1 %v3059_v19, %s9369_s19  ;;  %v3231_v19 = vmul.f32 %v11840_v54, %v16531_v4  ;;  %v12188_v52 = vpop.permute.xlu0 %3163 }
 0xaaa   : > { %v12165_v39 = vpop.permute.xlu1 %5092  ;;  %16576 = vst [vmem:[#allocation24_spill] sm:$0xff] %v12188_v52 }
 0xaac   : > { %3505 = vrot.lane.b32.xlu0 %v3476_v24, %s9386_s12  ;;  %v4078_v24 = vmul.f32 %v11954_v59, %v16511_v36 }
 0xaad   : > { %3097 = vrot.lane.b32.xlu1 %v3062_v32, %s9369_s19  ;;  %v3259_v32 = vmul.f32 %v11726_v53, %v3231_v19 }
 0xaae   : > { %v4106_v2 = vmul.f32 %v11890_v45, %v4078_v24  ;;  %v16581_v24 = vld [vmem:[#allocation5_spill] sm:$0xff] }
 0xaaf   : > { %v12176_v10 = vpop.permute.xlu1 %4455 }
 0xab0   : > { %16575 = vst [vmem:[#allocation6_spill] sm:$0xff] %v12176_v10  ;;  %3890 = vrot.lane.b32.xlu0 %v3858_v23, %s9376_s17  ;;  %v3261_v23 = vmul.f32 %v11726_v53, %v11960_v44 }
 0xab1   : > { %3282 = vrot.lane.b32.xlu1 %v3257_v25, %s9383_s16  ;;  %v16578_v25 = vld [vmem:[#allocation27_spill] sm:$0xff] }
 0xab2   : > { %v4733_v19 = vrot.slane %v16578_v25, %v16509_v37  ;;  %v3855_v37 = vmul.f32 %v11735_v5, %v16513_v47 }
 0xab4   : > { %v12190_v58 = vpop.permute.xlu1 %5188  ;;  %3896 = vrot.lane.b32.xlu0 %v3861_v62, %s9376_s17  ;;  %v4109_v62 = vmul.f32 %v11998_v20, %v4081_v9  ;;  %v4743_v53 = vrot.slane %v4733_v19, %v16581_v24  ;;  %v3856_v9 = vmul.f32 0.0, %v11721_v60 }
 0xab5   : > { %16577 = vst [vmem:[#allocation90_spill] sm:$0xff] %v12190_v58  ;;  %3286 = vrot.lane.b32.xlu1 %v3259_v32, %s9383_s16  ;;  %v12206_v32 = vpop.permute.xlu0 %3167 }
 0xab6   : > { %16580 = vst [vmem:[#allocation91_spill] sm:$0xff] %v12206_v32  ;;  %v16590_v32 = vmov 6  }
 0xab8   : > { %4132 = vrot.lane.b32.xlu0 %v4106_v2, %s9384_s18 }
 0xab9   : > { %v12202_v28 = vpop.permute.xlu1 %4559  ;;  %3290 = vrot.lane.b32.xlu1 %v3261_v23, %s9383_s16  ;;  %v12217_v2 = vpop.permute.xlu0 %2970  ;;  %v12223_v23 = vmul.f32 0.0, %v16584_v40 }
 0xaba   : > { %16579 = vst [vmem:[#allocation27_spill] sm:$0xff] %v12202_v28  ;;  %16583 = vst [vmem:[#allocation92_spill] sm:$0xff] %v12217_v2 }
 0xabc   : > { %4138 = vrot.lane.b32.xlu0 %v4109_v62, %s9384_s18  ;;  %v3352_v62 = vmul.f32 %v11895_v0, %v16524_v26 }
 0xabd   : > { %v12212_v52 = vpop.permute.xlu1 %4563  ;;  %3878 = vrot.lane.b32.xlu1 %v3852_v57, %s9376_s17  ;;  %v4104_v57 = vmul.f32 %v11890_v45, %v12223_v23  ;;  %v12231_v19 = vpop.permute.xlu0 %3089 }
 0xabe   : > { %16582 = vst [vmem:[#allocation5_spill] sm:$0xff] %v12212_v52  ;;  %16586 = vst [vmem:[#allocation93_spill] sm:$0xff] %v12231_v19  ;;  %v3853_v19 = vmul.f32 0.0, %v11735_v5  ;;  %v16594_v5 = vld [vmem:[#allocation23_spill] sm:$0xff] }
 0xac0   : > { %4748 = vrot.lane.b32.xlu0 %v4743_v53, %s9385_s24  ;;  %v3060_v53 = vmul.f32 %v11950_v41, %v11790_v34  ;;  %v3356_v34 = vmul.f32 %v12053_v13, %v16458_v63 }
 0xac1   : > { %3884 = vrot.lane.b32.xlu1 %v3855_v37, %s9376_s17 }
 0xac2   : > { %v12225_v25 = vpop.permute.xlu1 %5100 }
 0xac3   : > { %16585 = vst [vmem:[#allocation52_spill] sm:$0xff] %v12225_v25 }
 0xac4   : > { %3886 = vrot.lane.b32.xlu0 %v3856_v9, %s9376_s17 }
 0xac5   : > { %4773 = vperm.xlu1 %9233, %v11634_v12   ;;  %v16589_v12 = vld [vmem:[#allocation40_spill] sm:$0xff] }
 0xac6   : > { %v3380_v2 = vmul.f32 %v16589_v12, %v3352_v62  ;;  %v3152_v62 = vmul.f32 %v11749_v7, %v16569_v18 }
 0xac7   : > { %v12237_v37 = vpop.permute.xlu1 %5196 }
 0xac8   : > { %16587 = vst [vmem:[#allocation94_spill] sm:$0xff] %v12237_v37  ;;  %4128 = vrot.lane.b32.xlu0 %v4104_v57, %s9384_s18  ;;  %v3382_v57 = vmul.f32 %v16589_v12, %v12044_v33 }
 0xac9   : > { %3093 = vrot.lane.b32.xlu1 %v3060_v53, %s9369_s19 }
 0xaca   : > { %v12241_v9 = vpop.permute.xlu0 %3095  ;;  %9234 = vset.pattern.permute.xlu1 %v16590_v32 }
 0xacb   : > { %16588 = vst [vmem:[#allocation95_spill] sm:$0xff] %v12241_v9  ;;  %v3154_v9 = vmul.f32 %v11844_v61, %v16458_v63 }
 0xacc   : > { %v12246_v25 = vpop.permute.xlu1 %5336  ;;  %3410 = vrot.lane.b32.xlu0 %v3380_v2, %s9384_s18  ;;  %v3384_v2 = vmul.f32 %v16594_v5, %v3356_v34 }
 0xacd   : > { %16591 = vst [vmem:[#allocation40_spill] sm:$0xff] %v12246_v25  ;;  %3880 = vrot.lane.b32.xlu1 %v3853_v19, %s9376_s17  ;;  %v16596_v25 = vld [vmem:[#allocation60_spill] sm:$0xff] }
 0xace   : > { %v12252_v41 = vpop.permute.xlu0 %3280  ;;  %v3561_v37 = vmul.f32 %v16596_v25, %v16530_v6  ;;  %v12284_v61 = vsel %vm3556_vm1, %v16596_v25, %v12000_v42 }
 0xacf   : > { %16592 = vst [vmem:[#allocation96_spill] sm:$0xff] %v12252_v41  ;;  %v3347_v41 = vmul.f32 %v12053_v13, %v16511_v36  ;;  %v3571_v58 = vmul.f32 %v12284_v61, %v16458_v63 }
 0xad0   : > { %v12258_v53 = vpop.permute.xlu1 %5340  ;;  %3414 = vrot.lane.b32.xlu0 %v3382_v57, %s9384_s18  ;;  %v16598_v57 = vld [vmem:[#allocation70_spill] sm:$0xff] }
 0xad1   : > { %16593 = vst [vmem:[#allocation97_spill] sm:$0xff] %v12258_v53  ;;  %3173 = vrot.lane.b32.xlu1 %v3152_v62, %s9373_s22  ;;  %v3589_v34 = vmul.f32 %v16598_v57, %v3561_v37  ;;  %v12277_v62 = vmul.f32 0.0, %v12000_v42  ;;  %v3375_v53 = vmul.f32 %v11818_v16, %v3347_v41  ;;  %v3565_v37 = vmul.f32 %v12284_v61, %v16513_v47  ;;  %v16603_v41 = vld [vmem:[#allocation61_spill] sm:$0xff] }
 0xad2   : > { %v12263_v19 = vpop.permute.xlu0 %3284 }
 0xad3   : > { %16595 = vst [vmem:[#allocation23_spill] sm:$0xff] %v12263_v19  ;;  %v3591_v42 = vmul.f32 %v16598_v57, %v12277_v62 }
 0xad4   : > { %3418 = vrot.lane.b32.xlu0 %v3384_v2, %s9384_s18  ;;  %v3349_v2 = vmul.f32 %v11895_v0, %v16531_v4 }
 0xad5   : > { %v12272_v7 = vpop.permute.xlu1 %5440  ;;  %3177 = vrot.lane.b32.xlu1 %v3154_v9, %s9373_s22 }
 0xad6   : > { %16597 = vst [vmem:[#allocation60_spill] sm:$0xff] %v12272_v7  ;;  %v12279_v19 = vpop.permute.xlu0 %3288  ;;  %v3377_v7 = vmul.f32 %v11826_v55, %v3349_v2 }
 0xad7   : > { %16599 = vst [vmem:[#allocation70_spill] sm:$0xff] %v12279_v19 }
 0xad8   : > { %3613 = vrot.lane.b32.xlu0 %v3589_v34, %s9382_s30  ;;  %v3966_v34 = vmul.f32 %v12067_v3, %v16524_v26 }
 0xad9   : > { %3400 = vrot.lane.b32.xlu1 %v3375_v53, %s9384_s18  ;;  %v3593_v53 = vmul.f32 %v16603_v41, %v3565_v37  ;;  %v16606_v37 = vld [vmem:[#allocation25_spill] sm:$0xff] }
 0xada   : > { %v12293_v9 = vpop.permute.xlu1 %5344  ;;  %v12295_v19 = vpop.permute.xlu0 %3876 }
 0xadb   : > { %16600 = vst [vmem:[#allocation98_spill] sm:$0xff] %v12293_v9  ;;  %16601 = vst [vmem:[#allocation99_spill] sm:$0xff] %v12295_v19  ;;  %v3379_v19 = vmul.f32 %v11826_v55, %v12044_v33  ;;  %v3961_v9 = vmul.f32 %v11922_v51, %v16511_v36  ;;  %v3964_v55 = vmul.f32 %v11922_v51, %v16513_v47 }
 0xadc   : > { %3617 = vrot.lane.b32.xlu0 %v3591_v42, %s9382_s30  ;;  %v3994_v42 = vmul.f32 %v16606_v37, %v3966_v34 }
 0xadd   : > { %3404 = vrot.lane.b32.xlu1 %v3377_v7, %s9384_s18  ;;  %v3969_v7 = vmul.f32 %v12067_v3, %v16527_v30  ;;  %v3992_v3 = vmul.f32 %v11833_v29, %v3964_v55  ;;  %v16614_v29 = vld [vmem:[#allocation56_spill] sm:$0xff] }
 0xade   : > { %v12302_v16 = vpop.permute.xlu0 %3882 }
 0xadf   : > { %16602 = vst [vmem:[#allocation100_spill] sm:$0xff] %v12302_v16  ;;  %v12307_v52 = vpop.permute.xlu1 %5444 }
 0xae0   : > { %16604 = vst [vmem:[#allocation61_spill] sm:$0xff] %v12307_v52  ;;  %3621 = vrot.lane.b32.xlu0 %v3593_v53, %s9382_s30  ;;  %v3989_v52 = vmul.f32 %v11758_v8, %v3961_v9  ;;  %v16608_v53 = vld [vmem:[#allocation31_spill] sm:$0xff]  ;;  %v16611_v9 = vld [vmem:[#allocation66_spill] sm:$0xff] }
 0xae1   : > { %3408 = vrot.lane.b32.xlu1 %v3379_v19, %s9384_s18  ;;  %v3997_v19 = vmul.f32 %v16608_v53, %v3969_v7  ;;  %v4200_v34 = vmul.f32 %v16611_v9, %v16530_v6  ;;  %v4202_v7 = vmul.f32 %v16614_v29, %v16531_v4 }
 0xae2   : > { %v12317_v2 = vpop.permute.xlu0 %3087 }
 0xae3   : > { %16605 = vst [vmem:[#allocation101_spill] sm:$0xff] %v12317_v2  ;;  %v12320_v16 = vpop.permute.xlu1 %5448 }
 0xae4   : > { %16607 = vst [vmem:[#allocation25_spill] sm:$0xff] %v12320_v16  ;;  %4025 = vrot.lane.b32.xlu0 %v3994_v42, %s9385_s24 }
 0xae5   : > { %4015 = vrot.lane.b32.xlu1 %v3989_v52, %s9385_s24  ;;  %v9321_v52 = vld [vmem:[%s15686_s1 + $0x68] sm:$0xff] }
 0xae6   : > { %v12328_v28 = vpop.permute.xlu0 %3874 }
 0xae7   : > { %16609 = vst [vmem:[#allocation31_spill] sm:$0xff] %v12328_v28 }
 0xae8   : > { %v12331_v2 = vpop.permute.xlu1 %3797  ;;  %4031 = vrot.lane.b32.xlu0 %v3997_v19, %s9385_s24 }
 0xae9   : > { %16610 = vst [vmem:[#allocation102_spill] sm:$0xff] %v12331_v2  ;;  %4021 = vrot.lane.b32.xlu1 %v3992_v3, %s9385_s24  ;;  %v3987_v3 = vmul.f32 %v11758_v8, %v12092_v14  ;;  %v16619_v8 = vld [vmem:[#allocation77_spill] sm:$0xff] }
 0xaea   : > { %v12337_v16 = vpop.permute.xlu0 %3171 }
 0xaeb   : > { %16612 = vst [vmem:[#allocation66_spill] sm:$0xff] %v12337_v16 }
 0xaec   : > { %v12339_v42 = vpop.permute.xlu1 %2960  ;;  %4216 = vrot.lane.b32.xlu0 %v4200_v34, %s9382_s30  ;;  %v3234_v34 = vmul.f32 %v11840_v54, %v16524_v26  ;;  %v3478_v54 = vmul.f32 %v16619_v8, %v16569_v18 }
 0xaed   : > { %16613 = vst [vmem:[#allocation103_spill] sm:$0xff] %v12339_v42  ;;  %4407 = vperm.xlu1 %9234, %v9321_v52   ;;  %v3996_v52 = vmul.f32 %v16608_v53, %v12092_v14 }
 0xaee   : > { %v12347_v55 = vpop.permute.xlu0 %3175  ;;  %v3262_v16 = vmul.f32 %v11853_v49, %v3234_v34  ;;  %v3238_v34 = vmul.f32 %v11968_v38, %v16458_v63  ;;  %v3471_v38 = vmul.f32 %v11867_v27, %v16530_v6 }
 0xaef   : > { %16615 = vst [vmem:[#allocation56_spill] sm:$0xff] %v12347_v55 }
 0xaf0   : > { %v12351_v19 = vpop.permute.xlu1 %2966  ;;  %4220 = vrot.lane.b32.xlu0 %v4202_v7, %s9382_s30 }
 0xaf1   : > { %16616 = vst [vmem:[#allocation104_spill] sm:$0xff] %v12351_v19  ;;  %4011 = vrot.lane.b32.xlu1 %v3987_v3, %s9385_s24  ;;  %v3264_v3 = vmul.f32 %v11853_v49, %v11960_v44 }
 0xaf2   : > { %v12359_v28 = vpop.permute.xlu0 %3398  ;;  %9235 = vset.pattern.permute.xlu1 %v16556_v21 }
 0xaf3   : > { %16617 = vst [vmem:[#allocation105_spill] sm:$0xff] %v12359_v28  ;;  %v3266_v28 = vmul.f32 %v11884_v50, %v3238_v34  ;;  %v3473_v34 = vmul.f32 0.0, %v11867_v27  ;;  %v3475_v27 = vmul.f32 %v11875_v31, %v16513_v47  ;;  %v12434_v31 = vsel %vm2982_vm3, %v16584_v40, %v11954_v59 }
 0xaf4   : > { %v12363_v2 = vpop.permute.xlu1 %2958  ;;  %4029 = vrot.lane.b32.xlu0 %v3996_v52, %s9385_s24  ;;  %v16622_v52 = vld [vmem:[#allocation63_spill] sm:$0xff] }
 0xaf5   : > { %16618 = vst [vmem:[#allocation106_spill] sm:$0xff] %v12363_v2  ;;  %3292 = vrot.lane.b32.xlu1 %v3262_v16, %s9383_s16  ;;  %v3480_v16 = vmul.f32 %v16622_v52, %v16527_v30  ;;  %v3482_v49 = vmul.f32 0.0, %v16622_v52 }
 0xaf6   : > { %v12369_v7 = vpop.permute.xlu0 %3402 }
 0xaf7   : > { %16620 = vst [vmem:[#allocation77_spill] sm:$0xff] %v12369_v7 }
 0xaf8   : > { %v12373_v55 = vpop.permute.xlu1 %2841  ;;  %3509 = vrot.lane.b32.xlu0 %v3478_v54, %s9386_s12  ;;  %v4084_v54 = vmul.f32 %v11954_v59, %v16569_v18 }
 0xaf9   : > { %16621 = vst [vmem:[#allocation107_spill] sm:$0xff] %v12373_v55  ;;  %3296 = vrot.lane.b32.xlu1 %v3264_v3, %s9383_s16 }
 0xafa   : > { %v12381_v2 = vpop.permute.xlu0 %3406  ;;  %v4112_v50 = vmul.f32 %v12014_v1, %v4084_v54 }
 0xafb   : > { %16623 = vst [vmem:[#allocation63_spill] sm:$0xff] %v12381_v2  ;;  %v4087_v2 = vmul.f32 %v11954_v59, %v16458_v63  ;;  %v4077_v59 = vmul.f32 %v12434_v31, %v16530_v6 }
 0xafc   : > { %v12384_v7 = vpop.permute.xlu1 %3077  ;;  %3513 = vrot.lane.b32.xlu0 %v3480_v16, %s9386_s12  ;;  %v16628_v16 = vld [vmem:[#allocation68_spill] sm:$0xff] }
 0xafd   : > { %16624 = vst [vmem:[#allocation108_spill] sm:$0xff] %v12384_v7  ;;  %3300 = vrot.lane.b32.xlu1 %v3266_v28, %s9383_s16 }
 0xafe   : > { %v12389_v44 = vpop.permute.xlu0 %4013 }
 0xaff   : > { %16625 = vst [vmem:[#allocation109_spill] sm:$0xff] %v12389_v44  ;;  %v12405_v44 = vsel %vm4276_vm2, %v16628_v16, %v12060_v48  ;;  %vm4357_vm2 = vcmask 457728  }
 0xb00   : > { %v12395_v3 = vpop.permute.xlu1 %3083  ;;  %3517 = vrot.lane.b32.xlu0 %v3482_v49, %s9386_s12  ;;  %v16630_v49 = vld [vmem:[#allocation73_spill] sm:$0xff]  ;;  %v4282_v54 = vmul.f32 %v12405_v44, %v16511_v36 }
 0xb01   : > { %16626 = vst [vmem:[#allocation110_spill] sm:$0xff] %v12395_v3  ;;  %3495 = vrot.lane.b32.xlu1 %v3471_v38, %s9386_s12  ;;  %v4115_v38 = vmul.f32 %v16630_v49, %v4087_v2  ;;  %v3857_v2 = vmul.f32 %v11721_v60, %v16524_v26 }
 0xb02   : > { %v12400_v28 = vpop.permute.xlu0 %4019 }
 0xb03   : > { %16627 = vst [vmem:[#allocation111_spill] sm:$0xff] %v12400_v28 }
 0xb04   : > { %v12409_v55 = vpop.permute.xlu1 %3770  ;;  %4144 = vrot.lane.b32.xlu0 %v4112_v50, %s9384_s18 }
 0xb05   : > { %16629 = vst [vmem:[#allocation68_spill] sm:$0xff] %v12409_v55  ;;  %3499 = vrot.lane.b32.xlu1 %v3473_v34, %s9386_s12  ;;  %v16634_v34 = vld [vmem:[#allocation89_spill] sm:$0xff] }
 0xb06   : > { %v12416_v28 = vpop.permute.xlu0 %4017  ;;  %v4310_v55 = vmul.f32 %v16634_v34, %v4282_v54 }
 0xb07   : > { %16631 = vst [vmem:[#allocation73_spill] sm:$0xff] %v12416_v28  ;;  %v4284_v28 = vmul.f32 %v16628_v16, %v16531_v4 }
 0xb08   : > { %v12420_v3 = vpop.permute.xlu1 %3802  ;;  %4150 = vrot.lane.b32.xlu0 %v4115_v38, %s9384_s18  ;;  %v16636_v38 = vld [vmem:[#allocation64_spill] sm:$0xff] }
 0xb09   : > { %16632 = vst [vmem:[#allocation112_spill] sm:$0xff] %v12420_v3  ;;  %3503 = vrot.lane.b32.xlu1 %v3475_v27, %s9386_s12  ;;  %v4312_v54 = vmul.f32 %v16636_v38, %v4284_v28  ;;  %v12442_v27 = vmul.f32 0.0, %v12060_v48  ;;  %v4080_v28 = vmul.f32 %v12434_v31, %v16531_v4 }
 0xb0a   : > { %v12424_v50 = vpop.permute.xlu0 %3294 }
 0xb0b   : > { %16633 = vst [vmem:[#allocation113_spill] sm:$0xff] %v12424_v50  ;;  %v3860_v50 = vmul.f32 %v11882_v43, %v16527_v30  ;;  %v4314_v48 = vmul.f32 %v16636_v38, %v12442_v27  ;;  %v4108_v7 = vmul.f32 %v11998_v20, %v4080_v28 }
 0xb0c   : > { %v12436_v3 = vpop.permute.xlu1 %2839  ;;  %4335 = vrot.lane.b32.xlu0 %v4310_v55, %s9387_s25 }
 0xb0d   : > { %16635 = vst [vmem:[#allocation89_spill] sm:$0xff] %v12436_v3  ;;  %3888 = vrot.lane.b32.xlu1 %v3857_v2, %s9376_s17  ;;  %v4105_v2 = vmul.f32 %v11890_v45, %v4077_v59 }
 0xb0e   : > { %v12444_v60 = vpop.permute.xlu0 %3298 }
 0xb0f   : > { %16637 = vst [vmem:[#allocation64_spill] sm:$0xff] %v12444_v60 }
 0xb10   : > { %v12450_v40 = vpop.permute.xlu1 %3081  ;;  %4339 = vrot.lane.b32.xlu0 %v4312_v54, %s9387_s25 }
 0xb11   : > { %16638 = vst [vmem:[#allocation114_spill] sm:$0xff] %v12450_v40  ;;  %3894 = vrot.lane.b32.xlu1 %v3860_v50, %s9376_s17  ;;  %v9322_v50 = vld [vmem:[%s15691_s6 + $0xc] sm:$0xf] }
 0xb12   : > { %v12454_v55 = vpop.permute.xlu0 %3302  ;;  %v4729_v54 = vrot.slane %v9322_v50, %v16581_v24 }
 0xb13   : > { %16639 = vst [vmem:[#allocation115_spill] sm:$0xff] %v12454_v55  ;;  %v16641_v55 = vld [vmem:[#allocation76_spill] sm:$0xff] }
 0xb14   : > { %v12461_v60 = vpop.permute.xlu1 %2974  ;;  %4343 = vrot.lane.b32.xlu0 %v4314_v48, %s9387_s25  ;;  %v4827_v3 = vmul.f32 %v16641_v55, %v16530_v6  ;;  %v4739_v59 = vrot.slane %v4729_v54, %v16581_v24  ;;  %v16644_v48 = vld [vmem:[#allocation13_spill] sm:$0xff]  ;;  %v12500_v24 = vld [vmem:[%s15686_s1 + $0x90] sm:$0xff] }
 0xb15   : > { %16640 = vst [vmem:[#allocation116_spill] sm:$0xff] %v12461_v60  ;;  %4130 = vrot.lane.b32.xlu1 %v4105_v2, %s9384_s18  ;;  %v4829_v2 = vmul.f32 %v16644_v48, %v16531_v4 }
 0xb16   : > { %v12471_v40 = vpop.permute.xlu0 %3497 }
 0xb17   : > { %16642 = vst [vmem:[#allocation76_spill] sm:$0xff] %v12471_v40 }
 0xb18   : > { %v12474_v45 = vpop.permute.xlu1 %2980  ;;  %4844 = vrot.lane.b32.xlu0 %v4827_v3, %s9385_s24 }
 0xb19   : > { %16643 = vst [vmem:[#allocation117_spill] sm:$0xff] %v12474_v45  ;;  %4136 = vrot.lane.b32.xlu1 %v4108_v7, %s9384_s18  ;;  %v12494_v7 = vld [vmem:[%s15686_s1 + $0x98] sm:$0xff]  ;;  %v12533_v45 = vld [vmem:[%s15686_s1 + $0x88] sm:$0xff] }
 0xb1a   : > { %v12481_v60 = vpop.permute.xlu0 %3501  ;;  %16654 = vst [vmem:[#allocation125_spill] sm:$0xff] %v12533_v45 }
 0xb1b   : > { %16645 = vst [vmem:[#allocation13_spill] sm:$0xff] %v12481_v60 }
 0xb1c   : > { %v12483_v50 = vpop.permute.xlu1 %3165  ;;  %4848 = vrot.lane.b32.xlu0 %v4829_v2, %s9385_s24  ;;  %v12512_v2 = vld [vmem:[%s15686_s1 + $0x60] sm:$0xff] }
 0xb1d   : > { %16646 = vst [vmem:[#allocation118_spill] sm:$0xff] %v12483_v50  ;;  %4746 = vrot.lane.b32.xlu1 %v4739_v59, %s9385_s24  ;;  %v16651_v59 = vmov 3  }
 0xb1e   : > { %v12487_v28 = vpop.permute.xlu0 %3505 }
 0xb1f   : > { %16647 = vst [vmem:[#allocation119_spill] sm:$0xff] %v12487_v28  ;;  %v12518_v28 = vld [vmem:[%s15686_s1 + $0x80] sm:$0xff] }
 0xb20   : > { %v12489_v40 = vpop.permute.xlu1 %3169  ;;  %5060 = vperm.xlu0 %9231, %v12494_v7  }
 0xb21   : > { %16648 = vst [vmem:[#allocation120_spill] sm:$0xff] %v12489_v40  ;;  %4778 = vperm.xlu1 %9235, %v12500_v24   ;;  %v9327_v40 = vld [vmem:[%s15686_s1 + $0x70] sm:$0xff] }
 0xb22   : > { %v12503_v3 = vpop.permute.xlu0 %3890 }
 0xb23   : > { %16649 = vst [vmem:[#allocation121_spill] sm:$0xff] %v12503_v3 }
 0xb24   : > { %v12505_v54 = vpop.permute.xlu1 %2976  ;;  %9239 = vset.pattern.permute.xlu0 %v16590_v32 }
 0xb25   : > { %16650 = vst [vmem:[#allocation122_spill] sm:$0xff] %v12505_v54  ;;  %9236 = vset.pattern.permute.xlu1 %v16651_v59  ;;  %4403 = vperm.xlu0 %9239, %v12512_v2   ;;  %v3567_v54 = vmul.f32 %v16596_v25, %v16524_v26 }
 0xb26   : > { %5048 = vperm.xlu1 %9236, %v12518_v28   ;;  %v12521_v3 = vpop.permute.xlu0 %3896 }
 0xb27   : > { %16652 = vst [vmem:[#allocation123_spill] sm:$0xff] %v12521_v3  ;;  %v16656_v3 = vld [vmem:[#allocation69_spill] sm:$0xff] }
 0xb28   : > { %v12523_v60 = vpop.permute.xlu1 %3091  ;;  %v3595_v19 = vmul.f32 %v16656_v3, %v3567_v54  ;;  %v3353_v54 = vmul.f32 %v12053_v13, %v16569_v18  ;;  %v3355_v13 = vmul.f32 %v11895_v0, %v16527_v30 }
 0xb29   : > { %16653 = vst [vmem:[#allocation124_spill] sm:$0xff] %v12523_v60  ;;  %4411 = vperm.xlu0 %9239, %v9327_v40   ;;  %v3859_v60 = vmul.f32 0.0, %v11882_v43  ;;  %v4107_v43 = vmul.f32 %v11998_v20, %v12223_v23 }
 0xb2a   : > { %5052 = vperm.xlu1 %9236, %v12533_v45   ;;  %v12536_v50 = vpop.permute.xlu0 %4132  ;;  %v3597_v45 = vmul.f32 %v16656_v3, %v12277_v62  ;;  %v3381_v10 = vmul.f32 %v16589_v12, %v3353_v54  ;;  %v16667_v12 = vld [vmem:[#allocation21_spill] sm:$0xff]  ;;  %v3562_v54 = vmul.f32 %v12284_v61, %v16511_v36 }
 0xb2b   : > { %16655 = vst [vmem:[#allocation126_spill] sm:$0xff] %v12536_v50  ;;  %v4206_v0 = vmul.f32 %v16667_v12, %v16527_v30 }
 0xb2c   : > { %v12540_v42 = vpop.permute.xlu1 %3097 }
 0xb2d   : > { %16657 = vst [vmem:[#allocation69_spill] sm:$0xff] %v12540_v42  ;;  %3625 = vrot.lane.b32.xlu0 %v3595_v19, %s9382_s30 }
 0xb2e   : > { %3892 = vrot.lane.b32.xlu1 %v3859_v60, %s9376_s17  ;;  %v12544_v40 = vpop.permute.xlu0 %4138  ;;  %v16661_v60 = vld [vmem:[#allocation39_spill] sm:$0xff] }
 0xb2f   : > { %16658 = vst [vmem:[#allocation127_spill] sm:$0xff] %v12544_v40  ;;  %9237 = vset.pattern.permute.xlu1 %v16590_v32  ;;  %v3599_v40 = vmul.f32 %v16661_v60, %v3571_v58 }
 0xb30   : > { %v12555_v50 = vpop.permute.xlu1 %3282 }
 0xb31   : > { %16659 = vst [vmem:[#allocation128_spill] sm:$0xff] %v12555_v50  ;;  %3629 = vrot.lane.b32.xlu0 %v3597_v45, %s9382_s30  ;;  %v16664_v45 = vld [vmem:[#allocation51_spill] sm:$0xff] }
 0xb32   : > { %4134 = vrot.lane.b32.xlu1 %v4107_v43, %s9384_s18  ;;  %v12559_v19 = vpop.permute.xlu0 %4748  ;;  %v4204_v43 = vmul.f32 %v16664_v45, %v16524_v26 }
 0xb33   : > { %16660 = vst [vmem:[#allocation129_spill] sm:$0xff] %v12559_v19  ;;  %v3383_v19 = vmul.f32 %v16594_v5, %v3355_v13 }
 0xb34   : > { %v12562_v42 = vpop.permute.xlu1 %3286 }
 0xb35   : > { %16662 = vst [vmem:[#allocation39_spill] sm:$0xff] %v12562_v42  ;;  %3633 = vrot.lane.b32.xlu0 %v3599_v40, %s9382_s30  ;;  %v3385_v40 = vmul.f32 %v16594_v5, %v12044_v33  ;;  %v3590_v5 = vmul.f32 %v16598_v57, %v3562_v54 }
 0xb36   : > { %3412 = vrot.lane.b32.xlu1 %v3381_v10, %s9384_s18  ;;  %v12569_v20 = vpop.permute.xlu0 %3886  ;;  %v12583_v10 = vmul.f32 0.0, %v12132_v22 }
 0xb37   : > { %16663 = vst [vmem:[#allocation130_spill] sm:$0xff] %v12569_v20  ;;  %v16671_v20 = vld [vmem:[#allocation79_spill] sm:$0xff] }
 0xb38   : > { %v12574_v50 = vpop.permute.xlu1 %3290 }
 0xb39   : > { %16665 = vst [vmem:[#allocation51_spill] sm:$0xff] %v12574_v50  ;;  %4224 = vrot.lane.b32.xlu0 %v4204_v43, %s9382_s30  ;;  %v16670_v43 = vld [vmem:[#allocation59_spill] sm:$0xff]  ;;  %v12600_v50 = vsel %vm4922_vm5, %v12132_v22, %v16671_v20 }
 0xb3a   : > { %3416 = vrot.lane.b32.xlu1 %v3383_v19, %s9384_s18  ;;  %v12578_v58 = vpop.permute.xlu0 %4128  ;;  %v4931_v42 = vmul.f32 %v12600_v50, %v16531_v4 }
 0xb3b   : > { %16666 = vst [vmem:[#allocation131_spill] sm:$0xff] %v12578_v58  ;;  %v4955_v58 = vmul.f32 %v16670_v43, %v12583_v10 }
 0xb3c   : > { %v12589_v13 = vpop.permute.xlu1 %3878  ;;  %v4959_v54 = vmul.f32 %v12048_v15, %v4931_v42 }
 0xb3d   : > { %16668 = vst [vmem:[#allocation21_spill] sm:$0xff] %v12589_v13  ;;  %4228 = vrot.lane.b32.xlu0 %v4206_v0, %s9382_s30  ;;  %v4929_v13 = vmul.f32 %v16671_v20, %v16511_v36  ;;  %v3564_v0 = vmul.f32 %v16596_v25, %v16531_v4 }
 0xb3e   : > { %3420 = vrot.lane.b32.xlu1 %v3385_v40, %s9384_s18  ;;  %v12593_v19 = vpop.permute.xlu0 %3410 }
 0xb3f   : > { %16669 = vst [vmem:[#allocation132_spill] sm:$0xff] %v12593_v19  ;;  %v4957_v19 = vmul.f32 %v16670_v43, %v4929_v13  ;;  %v3594_v13 = vmul.f32 %v16603_v41, %v12277_v62 }
 0xb40   : > { %v12602_v33 = vpop.permute.xlu1 %3884 }
 0xb41   : > { %16672 = vst [vmem:[#allocation59_spill] sm:$0xff] %v12602_v33  ;;  %4979 = vrot.lane.b32.xlu0 %v4955_v58, %s9363_s15  ;;  %v3592_v33 = vmul.f32 %v16603_v41, %v3564_v0  ;;  %v3970_v41 = vmul.f32 %v11922_v51, %v16458_v63 }
 0xb42   : > { %3615 = vrot.lane.b32.xlu1 %v3590_v5, %s9382_s30  ;;  %v12611_v40 = vpop.permute.xlu0 %3414 }
 0xb43   : > { %16673 = vst [vmem:[#allocation79_spill] sm:$0xff] %v12611_v40  ;;  %v3967_v40 = vmul.f32 %v11922_v51, %v16569_v18 }
 0xb44   : > { %v12617_v57 = vpop.permute.xlu1 %4773 }
 0xb45   : > { %16674 = vst [vmem:[#allocation133_spill] sm:$0xff] %v12617_v57  ;;  %4983 = vrot.lane.b32.xlu0 %v4957_v19, %s9363_s15  ;;  %v4288_v19 = vmul.f32 %v12405_v44, %v16569_v18  ;;  %v3995_v42 = vmul.f32 %v16606_v37, %v3967_v40 }
 0xb46   : > { %3619 = vrot.lane.b32.xlu1 %v3592_v33, %s9382_s30  ;;  %v12621_v58 = vpop.permute.xlu0 %3418 }
 0xb47   : > { %16675 = vst [vmem:[#allocation134_spill] sm:$0xff] %v12621_v58  ;;  %v3998_v58 = vmul.f32 %v16608_v53, %v3970_v41 }
 0xb48   : > { %v12624_v5 = vpop.permute.xlu1 %3093 }
 0xb49   : > { %16676 = vst [vmem:[#allocation135_spill] sm:$0xff] %v12624_v5  ;;  %4987 = vrot.lane.b32.xlu0 %v4959_v54, %s9363_s15  ;;  %v16680_v54 = vld [vmem:[#allocation65_spill] sm:$0xff] }
 0xb4a   : > { %3623 = vrot.lane.b32.xlu1 %v3594_v13, %s9382_s30  ;;  %v12632_v0 = vpop.permute.xlu0 %3613  ;;  %v4316_v13 = vmul.f32 %v16680_v54, %v4288_v19  ;;  %v4320_v19 = vmul.f32 %v12074_v35, %v12442_v27 }
 0xb4b   : > { %16677 = vst [vmem:[#allocation136_spill] sm:$0xff] %v12632_v0 }
 0xb4c   : > { %v12636_v33 = vpop.permute.xlu1 %3880 }
 0xb4d   : > { %16678 = vst [vmem:[#allocation137_spill] sm:$0xff] %v12636_v33  ;;  %5296 = vperm.xlu0 %9239, %v12518_v28   ;;  %v4290_v33 = vmul.f32 %v16628_v16, %v16527_v30 }
 0xb4e   : > { %4027 = vrot.lane.b32.xlu1 %v3995_v42, %s9385_s24  ;;  %v12643_v57 = vpop.permute.xlu0 %3617  ;;  %v4201_v42 = vmul.f32 %v16611_v9, %v16511_v36 }
 0xb4f   : > { %16679 = vst [vmem:[#allocation138_spill] sm:$0xff] %v12643_v57  ;;  %v4318_v5 = vmul.f32 %v12074_v35, %v4290_v33  ;;  %v16686_v33 = vld [vmem:[#allocation7_spill] sm:$0xff] }
 0xb50   : > { %v12647_v0 = vpop.permute.xlu1 %3173 }
 0xb51   : > { %16681 = vst [vmem:[#allocation65_spill] sm:$0xff] %v12647_v0  ;;  %4347 = vrot.lane.b32.xlu0 %v4316_v13, %s9387_s25  ;;  %v3993_v0 = vmul.f32 %v16606_v37, %v12092_v14  ;;  %v4833_v37 = vmul.f32 %v12110_v17, %v16527_v30 }
 0xb52   : > { %4033 = vrot.lane.b32.xlu1 %v3998_v58, %s9385_s24  ;;  %v12653_v40 = vpop.permute.xlu0 %3621  ;;  %v4203_v58 = vmul.f32 %v16614_v29, %v16513_v47 }
 0xb53   : > { %16682 = vst [vmem:[#allocation139_spill] sm:$0xff] %v12653_v40 }
 0xb54   : > { %v12658_v57 = vpop.permute.xlu1 %3177 }
 0xb55   : > { %16683 = vst [vmem:[#allocation140_spill] sm:$0xff] %v12658_v57  ;;  %4351 = vrot.lane.b32.xlu0 %v4318_v5, %s9387_s25  ;;  %v4460_v5 = vmul.f32 0.0, %v16686_v33 }
 0xb56   : > { %4218 = vrot.lane.b32.xlu1 %v4201_v42, %s9382_s30  ;;  %v12662_v53 = vpop.permute.xlu0 %4025  ;;  %v12681_v42 = vld [vmem:[%s15686_s1 + $0x78] sm:$0xff] }
 0xb57   : > { %16684 = vst [vmem:[#allocation141_spill] sm:$0xff] %v12662_v53 }
 0xb58   : > { %v12668_v41 = vpop.permute.xlu1 %3400 }
 0xb59   : > { %4355 = vrot.lane.b32.xlu0 %v4320_v19, %s9387_s25  ;;  %v16688_v19 = vld [vmem:[#allocation85_spill] sm:$0xff] }
 0xb5a   : > { %4222 = vrot.lane.b32.xlu1 %v4203_v58, %s9382_s30  ;;  %v12672_v9 = vpop.permute.xlu0 %4031  ;;  %v4463_v53 = vmul.f32 0.0, %v16688_v19 }
 0xb5b   : > { %16685 = vst [vmem:[#allocation142_spill] sm:$0xff] %v12672_v9  ;;  %v16691_v9 = vld [vmem:[#allocation78_spill] sm:$0xff] }
 0xb5c   : > { %v12675_v13 = vpop.permute.xlu1 %3404  ;;  %v4831_v40 = vmul.f32 %v16691_v9, %v16524_v26 }
 0xb5d   : > { %4486 = vrot.lane.b32.xlu0 %v4460_v5, %s9376_s17 }
 0xb5e   : > { %4415 = vperm.xlu1 %9237, %v12681_v42   ;;  %v12684_v29 = vpop.permute.xlu0 %4216 }
 0xb5f   : > { %16687 = vst [vmem:[#allocation7_spill] sm:$0xff] %v12684_v29  ;;  %v3477_v29 = vmul.f32 %v16619_v8, %v16524_v26 }
 0xb60   : > { %v12687_v58 = vpop.permute.xlu1 %3408 }
 0xb61   : > { %16689 = vst [vmem:[#allocation85_spill] sm:$0xff] %v12687_v58  ;;  %4492 = vrot.lane.b32.xlu0 %v4463_v53, %s9376_s17 }
 0xb62   : > { %4023 = vrot.lane.b32.xlu1 %v3993_v0, %s9385_s24  ;;  %v12693_v5 = vpop.permute.xlu0 %4220  ;;  %v3479_v0 = vmul.f32 0.0, %v16619_v8  ;;  %v4083_v8 = vmul.f32 %v12434_v31, %v16524_v26 }
 0xb63   : > { %16690 = vst [vmem:[#allocation143_spill] sm:$0xff] %v12693_v5  ;;  %9238 = vset.pattern.permute.xlu1 %v16651_v59 }
 0xb64   : > { %v12700_v57 = vpop.permute.xlu1 %4015  ;;  %v4111_v58 = vmul.f32 %v12014_v1, %v4083_v8 }
 0xb65   : > { %16692 = vst [vmem:[#allocation78_spill] sm:$0xff] %v12700_v57  ;;  %4852 = vrot.lane.b32.xlu0 %v4831_v40, %s9385_s24  ;;  %v4461_v40 = vmul.f32 %v16688_v19, %v16531_v4  ;;  %v3481_v57 = vmul.f32 %v16622_v52, %v16458_v63 }
 0xb66   : > { %3507 = vrot.lane.b32.xlu1 %v3477_v29, %s9386_s12  ;;  %v12704_v14 = vpop.permute.xlu0 %4029  ;;  %v12718_v29 = vmul.f32 0.0, %v11922_v51  ;;  %v4086_v51 = vmul.f32 %v12434_v31, %v16527_v30  ;;  %v4281_v31 = vmul.f32 %v16628_v16, %v16530_v6 }
 0xb67   : > { %16693 = vst [vmem:[#allocation144_spill] sm:$0xff] %v12704_v14 }
 0xb68   : > { %v12709_v53 = vpop.permute.xlu1 %4021  ;;  %v4114_v5 = vmul.f32 %v16630_v49, %v4086_v51  ;;  %v4309_v8 = vmul.f32 %v16634_v34, %v4281_v31  ;;  %v16703_v51 = vld [vmem:[#allocation26_spill] sm:$0xff] }
 0xb69   : > { %16694 = vst [vmem:[#allocation145_spill] sm:$0xff] %v12709_v53  ;;  %4856 = vrot.lane.b32.xlu0 %v4833_v37, %s9385_s24 }
 0xb6a   : > { %3511 = vrot.lane.b32.xlu1 %v3479_v0, %s9386_s12  ;;  %v12713_v59 = vpop.permute.xlu0 %3509  ;;  %v16697_v0 = vld [vmem:[#allocation34_spill] sm:$0xff] }
 0xb6b   : > { %16695 = vst [vmem:[#allocation146_spill] sm:$0xff] %v12713_v59  ;;  %v4568_v59 = vmul.f32 %v16697_v0, %v12718_v29 }
 0xb6c   : > { %v12722_v14 = vpop.permute.xlu1 %4407 }
 0xb6d   : > { %16696 = vst [vmem:[#allocation147_spill] sm:$0xff] %v12722_v14  ;;  %4488 = vrot.lane.b32.xlu0 %v4461_v40, %s9376_s17  ;;  %v4934_v14 = vmul.f32 %v12600_v50, %v16524_v26 }
 0xb6e   : > { %3515 = vrot.lane.b32.xlu1 %v3481_v57, %s9386_s12  ;;  %v12728_v37 = vpop.permute.xlu0 %3513  ;;  %v4571_v57 = vmul.f32 %v12123_v46, %v12718_v29 }
 0xb70   : > { %v12735_v52 = vpop.permute.xlu1 %4011 }
 0xb71   : > { %16698 = vst [vmem:[#allocation34_spill] sm:$0xff] %v12735_v52  ;;  %4594 = vrot.lane.b32.xlu0 %v4568_v59, %s9385_s24  ;;  %v4962_v59 = vmul.f32 %v12140_v11, %v4934_v14  ;;  %v4938_v14 = vmul.f32 %v16671_v20, %v16458_v63 }
 0xb72   : > { %4142 = vrot.lane.b32.xlu1 %v4111_v58, %s9384_s18  ;;  %v12739_v40 = vpop.permute.xlu0 %3517 }
 0xb73   : > { %16699 = vst [vmem:[#allocation148_spill] sm:$0xff] %v12739_v40  ;;  %v4285_v40 = vmul.f32 %v12405_v44, %v16513_v47 }
 0xb74   : > { %v12746_v53 = vpop.permute.xlu1 %3292 }
 0xb75   : > { %16700 = vst [vmem:[#allocation149_spill] sm:$0xff] %v12746_v53  ;;  %4600 = vrot.lane.b32.xlu0 %v4571_v57, %s9385_s24  ;;  %v4964_v57 = vmul.f32 %v16703_v51, %v12583_v10 }
 0xb76   : > { %4148 = vrot.lane.b32.xlu1 %v4114_v5, %s9384_s18  ;;  %v12753_v58 = vpop.permute.xlu0 %4144  ;;  %v4311_v5 = vmul.f32 %v16634_v34, %v12442_v27  ;;  %v5104_v34 = vmul.f32 %v12155_v56, %v16511_v36 }
 0xb77   : > { %16701 = vst [vmem:[#allocation150_spill] sm:$0xff] %v12753_v58  ;;  %v4313_v58 = vmul.f32 %v16636_v38, %v4285_v40  ;;  %v5106_v38 = vmul.f32 %v12165_v39, %v16513_v47  ;;  %v4828_v40 = vmul.f32 0.0, %v16644_v48 }
 0xb78   : > { %v12756_v52 = vpop.permute.xlu1 %3296 }
 0xb79   : > { %16702 = vst [vmem:[#allocation151_spill] sm:$0xff] %v12756_v52  ;;  %4993 = vrot.lane.b32.xlu0 %v4962_v59, %s9363_s15  ;;  %v4966_v59 = vmul.f32 %v16703_v51, %v4938_v14 }
 0xb7a   : > { %4333 = vrot.lane.b32.xlu1 %v4309_v8, %s9387_s25  ;;  %v12770_v31 = vpop.permute.xlu0 %4150 }
 0xb7b   : > { %16704 = vst [vmem:[#allocation26_spill] sm:$0xff] %v12770_v31  ;;  %v4826_v31 = vmul.f32 0.0, %v16641_v55 }
 0xb7c   : > { %v12764_v53 = vpop.permute.xlu1 %3300 }
 0xb7d   : > { %4997 = vrot.lane.b32.xlu0 %v4964_v57, %s9363_s15 }
 0xb7e   : > { %4337 = vrot.lane.b32.xlu1 %v4311_v5, %s9387_s25  ;;  %v12782_v52 = vpop.permute.xlu0 %4335 }
 0xb7f   : > { %16706 = vst [vmem:[#allocation153_spill] sm:$0xff] %v12782_v52 }
 0xb80   : > { %v12775_v8 = vpop.permute.xlu1 %3495 }
 0xb81   : > { %16705 = vst [vmem:[#allocation152_spill] sm:$0xff] %v12775_v8  ;;  %5001 = vrot.lane.b32.xlu0 %v4966_v59, %s9363_s15  ;;  %v9330_v59 = vld [vmem:[%s15686_s1 + $0x40] sm:$0xff] }
 0xb82   : > { %4341 = vrot.lane.b32.xlu1 %v4313_v58, %s9387_s25  ;;  %v12794_v58 = vpop.permute.xlu0 %4339 }
 0xb83   : > { %16708 = vst [vmem:[#allocation155_spill] sm:$0xff] %v12794_v58  ;;  %v16813_v58 = vld [vmem:[#allocation110_spill] sm:$0xff] }
 0xb84   : > { %v12785_v57 = vpop.permute.xlu1 %3499 }
 0xb85   : > { %16707 = vst [vmem:[#allocation154_spill] sm:$0xff] %v12785_v57  ;;  %5121 = vrot.lane.b32.xlu0 %v5104_v34, %s9385_s24  ;;  %v4113_v34 = vmul.f32 %v16630_v49, %v12223_v23  ;;  %v13177_v57 = vld [vmem:[%s15688_s3 + $0x30] sm:$0xff] }
 0xb86   : > { %4842 = vrot.lane.b32.xlu1 %v4826_v31, %s9385_s24  ;;  %v12802_v14 = vpop.permute.xlu0 %4343  ;;  %v4110_v31 = vmul.f32 %v12014_v1, %v12223_v23  ;;  %v3570_v23 = vmul.f32 %v16596_v25, %v16527_v30  ;;  %16798 = vst [vmem:[#allocation199_spill] sm:$0xff] %v13177_v57 }
 0xb87   : > { %16710 = vst [vmem:[#allocation157_spill] sm:$0xff] %v12802_v14 }
 0xb88   : > { %v12792_v5 = vpop.permute.xlu1 %3503  ;;  %v3598_v49 = vmul.f32 %v16661_v60, %v3570_v23 }
 0xb89   : > { %5125 = vrot.lane.b32.xlu0 %v5106_v38, %s9385_s24  ;;  %v3568_v38 = vmul.f32 %v12284_v61, %v16569_v18 }
 0xb8a   : > { %4846 = vrot.lane.b32.xlu1 %v4828_v40, %s9385_s24  ;;  %v12820_v40 = vpop.permute.xlu0 %4844 }
 0xb8b   : > { %16713 = vst [vmem:[#allocation160_spill] sm:$0xff] %v12820_v40 }
 0xb8c   : > { %v12798_v55 = vpop.permute.xlu1 %3888 }
 0xb8d   : > { %16709 = vst [vmem:[#allocation156_spill] sm:$0xff] %v12798_v55  ;;  %5308 = vperm.xlu0 %9239, %v12494_v7   ;;  %v12901_v55 = vmul.f32 0.0, %v16671_v20 }
 0xb8e   : > { %5056 = vperm.xlu1 %9238, %v12500_v24   ;;  %v12833_v61 = vpop.permute.xlu0 %4848 }
 0xb8f   : > { %16714 = vst [vmem:[#allocation161_spill] sm:$0xff] %v12833_v61 }
 0xb90   : > { %v12806_v48 = vpop.permute.xlu1 %3894 }
 0xb91   : > { %16711 = vst [vmem:[#allocation158_spill] sm:$0xff] %v12806_v48  ;;  %9241 = vset.pattern.permute.xlu0 %v16556_v21 }
 0xb92   : > { %4140 = vrot.lane.b32.xlu1 %v4110_v31, %s9384_s18  ;;  %2739 = vperm.xlu0 %9241, %v9330_v59   ;;  %v9331_v31 = vld [vmem:[%s15686_s1 + $0x58] sm:$0xff] }
 0xb93   : > { %9240 = vset.pattern.permute.xlu1 %v16590_v32  ;;  %v3596_v32 = vmul.f32 %v16656_v3, %v3568_v38  ;;  %v3600_v3 = vmul.f32 %v16661_v60, %v12277_v62  ;;  %v4207_v62 = vmul.f32 %v16667_v12, %v16458_v63 }
 0xb94   : > { %v12818_v1 = vpop.permute.xlu1 %4130 }
 0xb95   : > { %16712 = vst [vmem:[#allocation159_spill] sm:$0xff] %v12818_v1 }
 0xb96   : > { %4146 = vrot.lane.b32.xlu1 %v4113_v34, %s9384_s18  ;;  %2754 = vperm.xlu0 %9241, %v9331_v31  }
 0xb98   : > { %v12826_v59 = vpop.permute.xlu1 %4136 }
 0xb9a   : > { %3627 = vrot.lane.b32.xlu1 %v3596_v32, %s9382_s30  ;;  %3792 = vperm.xlu0 %9241, %v12512_v2   ;;  %v4205_v2 = vmul.f32 %v16664_v45, %v16569_v18  ;;  %v4928_v45 = vmul.f32 %v12600_v50, %v16530_v6 }
 0xb9c   : > { %v12836_v34 = vpop.permute.xlu1 %4746 }
 0xb9d   : > { %16715 = vst [vmem:[#allocation162_spill] sm:$0xff] %v12836_v34 }
 0xb9e   : > { %3631 = vrot.lane.b32.xlu1 %v3598_v49, %s9382_s30  ;;  %3807 = vperm.xlu0 %9241, %v12681_v42   ;;  %v16720_v42 = vld [vmem:[#allocation80_spill] sm:$0xff] }
 0xb9f   : > { %v12840_v31 = vpop.permute.xlu0 %5060  ;;  %v4541_v23 = vmul.f32 %v16720_v42, %v16531_v4 }
 0xba0   : > { %16716 = vst [vmem:[#allocation163_spill] sm:$0xff] %v12840_v31  ;;  %v12844_v25 = vpop.permute.xlu1 %4778 }
 0xba1   : > { %16717 = vst [vmem:[#allocation164_spill] sm:$0xff] %v12844_v25  ;;  %v4569_v60 = vmul.f32 %v12123_v46, %v4541_v23  ;;  %v16726_v23 = vld [vmem:[#allocation6_spill] sm:$0xff]  ;;  %v5178_v25 = vmul.f32 %v12132_v22, %v16531_v4 }
 0xba2   : > { %3635 = vrot.lane.b32.xlu1 %v3600_v3, %s9382_s30  ;;  %4768 = vperm.xlu0 %9241, %v12518_v28   ;;  %v16723_v3 = vld [vmem:[#allocation58_spill] sm:$0xff]  ;;  %v4469_v40 = vmul.f32 0.0, %v16726_v23 }
 0xba4   : > { %v12850_v38 = vpop.permute.xlu0 %4403 }
 0xba5   : > { %16718 = vst [vmem:[#allocation165_spill] sm:$0xff] %v12850_v38  ;;  %v12852_v32 = vpop.permute.xlu1 %5048  ;;  %v16732_v38 = vld [vmem:[#allocation125_spill] sm:$0xff] }
 0xba6   : > { %16719 = vst [vmem:[#allocation166_spill] sm:$0xff] %v12852_v32  ;;  %4226 = vrot.lane.b32.xlu1 %v4205_v2, %s9382_s30  ;;  %4783 = vperm.xlu0 %9241, %v12494_v7   ;;  %v4466_v2 = vmul.f32 0.0, %v16723_v3  ;;  %v4956_v7 = vmul.f32 %v16670_v43, %v4928_v45  ;;  %v5176_v43 = vmul.f32 %v12600_v50, %v16511_v36 }
 0xba8   : > { %v12861_v28 = vpop.permute.xlu0 %4411 }
 0xba9   : > { %16721 = vst [vmem:[#allocation80_spill] sm:$0xff] %v12861_v28  ;;  %v12865_v49 = vpop.permute.xlu1 %5052 }
 0xbaa   : > { %16722 = vst [vmem:[#allocation167_spill] sm:$0xff] %v12865_v49  ;;  %4230 = vrot.lane.b32.xlu1 %v4207_v62, %s9382_s30  ;;  %4596 = vrot.lane.b32.xlu0 %v4569_v60, %s9385_s24  ;;  %v4958_v62 = vmul.f32 %v12048_v15, %v12583_v10  ;;  %v4932_v49 = vmul.f32 %v16671_v20, %v16513_v47  ;;  %s15662_s30 = scalar_lea.vmem %s15695_s10, %s17263_s21 }
 0xbac   : > { %v12870_v32 = vpop.permute.xlu0 %3625  ;;  %v4960_v45 = vmul.f32 %v12048_v15, %v4932_v49 }
 0xbad   : > { %16724 = vst [vmem:[#allocation58_spill] sm:$0xff] %v12870_v32  ;;  %v12873_v12 = vpop.permute.xlu1 %3892 }
 0xbae   : > { %16725 = vst [vmem:[#allocation168_spill] sm:$0xff] %v12873_v12  ;;  %4981 = vrot.lane.b32.xlu1 %v4956_v7, %s9363_s15  ;;  %4498 = vrot.lane.b32.xlu0 %v4466_v2, %s9376_s17  ;;  %v16728_v2 = vld [vmem:[#allocation90_spill] sm:$0xff] }
 0xbaf   : > { %v5204_v7 = vmul.f32 %v16728_v2, %v5176_v43  ;;  %v4287_v43 = vmul.f32 %v16628_v16, %v16524_v26  ;;  %v4291_v16 = vmul.f32 %v12405_v44, %v16458_v63 }
 0xbb0   : > { %v12878_v31 = vpop.permute.xlu0 %3629 }
 0xbb1   : > { %16727 = vst [vmem:[#allocation6_spill] sm:$0xff] %v12878_v31  ;;  %v12882_v60 = vpop.permute.xlu1 %4134 }
 0xbb2   : > { %4985 = vrot.lane.b32.xlu1 %v4958_v62, %s9363_s15  ;;  %4504 = vrot.lane.b32.xlu0 %v4469_v40, %s9376_s17  ;;  %v16731_v40 = vld [vmem:[#allocation20_spill] sm:$0xff] }
 0xbb3   : > { %v5206_v15 = vmul.f32 %v16731_v40, %v5178_v25  ;;  %v4467_v25 = vmul.f32 %v16726_v23, %v16527_v30 }
 0xbb4   : > { %v12892_v28 = vpop.permute.xlu0 %3633 }
 0xbb5   : > { %v12896_v61 = vpop.permute.xlu1 %3412 }
 0xbb6   : > { %16729 = vst [vmem:[#allocation90_spill] sm:$0xff] %v12896_v61  ;;  %4989 = vrot.lane.b32.xlu1 %v4960_v45, %s9363_s15  ;;  %5229 = vrot.lane.b32.xlu0 %v5204_v7, %s9363_s15  ;;  %v4315_v45 = vmul.f32 %v16680_v54, %v4287_v43  ;;  %v5208_v7 = vmul.f32 %v16731_v40, %v12901_v55 }
 0xbb8   : > { %v12903_v62 = vpop.permute.xlu0 %4224 }
 0xbb9   : > { %16730 = vst [vmem:[#allocation169_spill] sm:$0xff] %v12903_v62  ;;  %v12906_v49 = vpop.permute.xlu1 %3416 }
 0xbba   : > { %5300 = vperm.xlu1 %9240, %v16732_v38   ;;  %5233 = vrot.lane.b32.xlu0 %v5206_v15, %s9363_s15  ;;  %v4317_v15 = vmul.f32 %v16680_v54, %v12442_v27  ;;  %v4459_v27 = vmul.f32 %v16686_v33, %v16511_v36  ;;  %v16738_v54 = vld [vmem:[#allocation5_spill] sm:$0xff] }
 0xbbc   : > { %v12915_v34 = vpop.permute.xlu0 %4228 }
 0xbbd   : > { %16733 = vst [vmem:[#allocation20_spill] sm:$0xff] %v12915_v34  ;;  %v12917_v14 = vpop.permute.xlu1 %3420 }
 0xbbe   : > { %16734 = vst [vmem:[#allocation125_spill] sm:$0xff] %v12917_v14  ;;  %4345 = vrot.lane.b32.xlu1 %v4315_v45, %s9387_s25  ;;  %5237 = vrot.lane.b32.xlu0 %v5208_v7, %s9363_s15  ;;  %v4319_v45 = vmul.f32 %v12074_v35, %v4291_v16  ;;  %v16736_v7 = vld [vmem:[#allocation27_spill] sm:$0xff]  ;;  %v16741_v16 = vld [vmem:[#allocation82_spill] sm:$0xff] }
 0xbbf   : > { %v4574_v62 = vmul.f32 %v16736_v7, %v12718_v29 }
 0xbc0   : > { %v12925_v38 = vpop.permute.xlu0 %4979 }
 0xbc1   : > { %16735 = vst [vmem:[#allocation170_spill] sm:$0xff] %v12925_v38  ;;  %v12929_v43 = vpop.permute.xlu1 %3615  ;;  %v5108_v38 = vmul.f32 %v16741_v16, %v16569_v18 }
 0xbc2   : > { %4349 = vrot.lane.b32.xlu1 %v4317_v15, %s9387_s25  ;;  %4500 = vrot.lane.b32.xlu0 %v4467_v25, %s9376_s17  ;;  %v4577_v15 = vmul.f32 %v16738_v54, %v12718_v29  ;;  %v4830_v29 = vmul.f32 0.0, %v16691_v9 }
 0xbc4   : > { %v12936_v44 = vpop.permute.xlu0 %4983 }
 0xbc5   : > { %16737 = vst [vmem:[#allocation27_spill] sm:$0xff] %v12936_v44  ;;  %v12938_v52 = vpop.permute.xlu1 %3619 }
 0xbc6   : > { %4353 = vrot.lane.b32.xlu1 %v4319_v45, %s9387_s25  ;;  %4606 = vrot.lane.b32.xlu0 %v4574_v62, %s9385_s24  ;;  %v4462_v62 = vmul.f32 %v16688_v19, %v16513_v47  ;;  %v4547_v19 = vmul.f32 %v16720_v42, %v16527_v30 }
 0xbc8   : > { %v12946_v25 = vpop.permute.xlu0 %4987 }
 0xbc9   : > { %16739 = vst [vmem:[#allocation5_spill] sm:$0xff] %v12946_v25  ;;  %v12948_v35 = vpop.permute.xlu1 %3623 }
 0xbca   : > { %16740 = vst [vmem:[#allocation171_spill] sm:$0xff] %v12948_v35  ;;  %4484 = vrot.lane.b32.xlu1 %v4459_v27, %s9376_s17  ;;  %4612 = vrot.lane.b32.xlu0 %v4577_v15, %s9385_s24  ;;  %v16744_v27 = vld [vmem:[#allocation52_spill] sm:$0xff] }
 0xbcb   : > { %v5110_v25 = vmul.f32 %v16744_v27, %v16458_v63 }
 0xbcc   : > { %v12956_v45 = vpop.permute.xlu0 %5296 }
 0xbcd   : > { %16742 = vst [vmem:[#allocation82_spill] sm:$0xff] %v12956_v45  ;;  %v12958_v44 = vpop.permute.xlu1 %4027 }
 0xbce   : > { %16743 = vst [vmem:[#allocation172_spill] sm:$0xff] %v12958_v44  ;;  %4490 = vrot.lane.b32.xlu1 %v4462_v62, %s9376_s17  ;;  %5129 = vrot.lane.b32.xlu0 %v5108_v38, %s9385_s24  ;;  %v4832_v62 = vmul.f32 0.0, %v12110_v17  ;;  %v4575_v38 = vmul.f32 %v16738_v54, %v4547_v19  ;;  %v16749_v44 = vld [vmem:[#allocation94_spill] sm:$0xff] }
 0xbcf   : > { %v16751_v17 = vld [vmem:[#allocation74_spill] sm:$0xff] }
 0xbd0   : > { %v12965_v15 = vpop.permute.xlu0 %4347  ;;  %v4539_v19 = vmul.f32 %v16751_v17, %v16511_v36 }
 0xbd1   : > { %16745 = vst [vmem:[#allocation52_spill] sm:$0xff] %v12965_v15  ;;  %v12967_v1 = vpop.permute.xlu1 %4033  ;;  %v5182_v15 = vmul.f32 %v12600_v50, %v16569_v18 }
 0xbd2   : > { %16746 = vst [vmem:[#allocation173_spill] sm:$0xff] %v12967_v1  ;;  %4850 = vrot.lane.b32.xlu1 %v4830_v29, %s9385_s24  ;;  %5133 = vrot.lane.b32.xlu0 %v5110_v25, %s9385_s24  ;;  %v4458_v29 = vmul.f32 %v16686_v33, %v16530_v6  ;;  %v4567_v33 = vmul.f32 %v16697_v0, %v4539_v19  ;;  %v16758_v19 = vld [vmem:[#allocation40_spill] sm:$0xff] }
 0xbd3   : > { %v5210_v25 = vmul.f32 %v16749_v44, %v5182_v15 }
 0xbd4   : > { %v12975_v45 = vpop.permute.xlu0 %4351 }
 0xbd5   : > { %16747 = vst [vmem:[#allocation174_spill] sm:$0xff] %v12975_v45  ;;  %v12977_v9 = vpop.permute.xlu1 %4218 }
 0xbd6   : > { %16748 = vst [vmem:[#allocation175_spill] sm:$0xff] %v12977_v9  ;;  %4854 = vrot.lane.b32.xlu1 %v4832_v62, %s9385_s24  ;;  %4608 = vrot.lane.b32.xlu0 %v4575_v38, %s9385_s24  ;;  %v5184_v9 = vmul.f32 %v12132_v22, %v16527_v30  ;;  %v16754_v38 = vld [vmem:[#allocation10_spill] sm:$0xff] }
 0xbd8   : > { %v12986_v31 = vpop.permute.xlu0 %4355  ;;  %v5212_v15 = vmul.f32 %v16754_v38, %v5184_v9  ;;  %v4961_v9 = vmul.f32 %v12140_v11, %v12583_v10 }
 0xbd9   : > { %16750 = vst [vmem:[#allocation94_spill] sm:$0xff] %v12986_v31  ;;  %v12992_v14 = vpop.permute.xlu1 %4222  ;;  %v4542_v31 = vmul.f32 %v16751_v17, %v16513_v47 }
 0xbda   : > { %16752 = vst [vmem:[#allocation74_spill] sm:$0xff] %v12992_v14  ;;  %4482 = vrot.lane.b32.xlu1 %v4458_v29, %s9376_s17  ;;  %5241 = vrot.lane.b32.xlu0 %v5210_v25, %s9363_s15  ;;  %v5214_v29 = vmul.f32 %v16754_v38, %v12901_v55 }
 0xbdb   : > { %v4570_v25 = vmul.f32 %v12123_v46, %v4542_v31  ;;  %v4935_v46 = vmul.f32 %v16671_v20, %v16569_v18 }
 0xbdc   : > { %v12996_v62 = vpop.permute.xlu0 %4486 }
 0xbdd   : > { %16753 = vst [vmem:[#allocation176_spill] sm:$0xff] %v12996_v62  ;;  %v13000_v32 = vpop.permute.xlu1 %4415  ;;  %v4963_v31 = vmul.f32 %v12140_v11, %v4935_v46 }
 0xbde   : > { %16755 = vst [vmem:[#allocation10_spill] sm:$0xff] %v13000_v32  ;;  %4592 = vrot.lane.b32.xlu1 %v4567_v33, %s9385_s24  ;;  %5245 = vrot.lane.b32.xlu0 %v5212_v15, %s9363_s15  ;;  %v5352_v33 = vmul.f32 0.0, %v16758_v19 }
 0xbe0   : > { %v13009_v61 = vpop.permute.xlu0 %4492 }
 0xbe1   : > { %16756 = vst [vmem:[#allocation177_spill] sm:$0xff] %v13009_v61  ;;  %v13011_v62 = vpop.permute.xlu1 %4023  ;;  %v16810_v61 = vld [vmem:[#allocation54_spill] sm:$0xff] }
 0xbe2   : > { %16757 = vst [vmem:[#allocation178_spill] sm:$0xff] %v13011_v62  ;;  %4598 = vrot.lane.b32.xlu1 %v4570_v25, %s9385_s24  ;;  %5249 = vrot.lane.b32.xlu0 %v5214_v29, %s9363_s15  ;;  %v16761_v25 = vld [vmem:[#allocation97_spill] sm:$0xff]  ;;  %v13029_v62 = vmul.f32 0.0, %v12600_v50 }
 0xbe3   : > { %v5354_v29 = vmul.f32 0.0, %v16761_v25 }
 0xbe4   : > { %v13018_v32 = vpop.permute.xlu0 %4852 }
 0xbe5   : > { %16759 = vst [vmem:[#allocation40_spill] sm:$0xff] %v13018_v32  ;;  %v13020_v15 = vpop.permute.xlu1 %3507  ;;  %v4937_v32 = vmul.f32 %v12600_v50, %v16527_v30 }
 0xbe6   : > { %16760 = vst [vmem:[#allocation179_spill] sm:$0xff] %v13020_v15  ;;  %4991 = vrot.lane.b32.xlu1 %v4961_v9, %s9363_s15  ;;  %5369 = vrot.lane.b32.xlu0 %v5352_v33, %s9385_s24  ;;  %v16765_v9 = vld [vmem:[#allocation33_spill] sm:$0xff] }
 0xbe7   : > { %v4965_v11 = vmul.f32 %v16703_v51, %v4937_v32  ;;  %v5452_v33 = vmul.f32 %v16765_v9, %v13029_v62  ;;  %v5105_v32 = vmul.f32 %v12165_v39, %v16531_v4 }
 0xbe8   : > { %v13031_v10 = vpop.permute.xlu0 %4856 }
 0xbe9   : > { %16762 = vst [vmem:[#allocation97_spill] sm:$0xff] %v13031_v10  ;;  %v13035_v15 = vpop.permute.xlu1 %3511  ;;  %v5426_v10 = vmul.f32 %v12132_v22, %v16513_v47 }
 0xbea   : > { %16763 = vst [vmem:[#allocation180_spill] sm:$0xff] %v13035_v15  ;;  %4995 = vrot.lane.b32.xlu1 %v4963_v31, %s9363_s15  ;;  %5373 = vrot.lane.b32.xlu0 %v5354_v29, %s9385_s24  ;;  %v5103_v31 = vmul.f32 %v12155_v56, %v16530_v6  ;;  %v16766_v29 = vld [vmem:[#allocation60_spill] sm:$0xff]  ;;  %v4538_v56 = vmul.f32 %v16720_v42, %v16530_v6 }
 0xbeb   : > { %v5454_v15 = vmul.f32 %v16766_v29, %v5426_v10  ;;  %v16771_v10 = vld [vmem:[#allocation98_spill] sm:$0xff] }
 0xbec   : > { %v13039_v20 = vpop.permute.xlu0 %4488  ;;  %v4566_v39 = vmul.f32 %v16697_v0, %v4538_v56  ;;  %v5432_v56 = vmul.f32 %v12132_v22, %v16458_v63 }
 0xbed   : > { %16764 = vst [vmem:[#allocation181_spill] sm:$0xff] %v13039_v20  ;;  %v13044_v46 = vpop.permute.xlu1 %3515 }
 0xbee   : > { %4999 = vrot.lane.b32.xlu1 %v4965_v11, %s9363_s15  ;;  %5477 = vrot.lane.b32.xlu0 %v5452_v33, %s9363_s15  ;;  %v5456_v11 = vmul.f32 %v16766_v29, %v12901_v55 }
 0xbf0   : > { %v13053_v45 = vpop.permute.xlu0 %4594 }
 0xbf1   : > { %16767 = vst [vmem:[#allocation33_spill] sm:$0xff] %v13053_v45  ;;  %v13055_v51 = vpop.permute.xlu1 %4142  ;;  %v16774_v45 = vld [vmem:[#allocation32_spill] sm:$0xff] }
 0xbf2   : > { %16768 = vst [vmem:[#allocation60_spill] sm:$0xff] %v13055_v51  ;;  %5119 = vrot.lane.b32.xlu1 %v5103_v31, %s9385_s24  ;;  %5481 = vrot.lane.b32.xlu0 %v5454_v15, %s9363_s15  ;;  %v5356_v31 = vmul.f32 0.0, %v16771_v10 }
 0xbf4   : > { %v13063_v33 = vpop.permute.xlu0 %4600 }
 0xbf5   : > { %16769 = vst [vmem:[#allocation182_spill] sm:$0xff] %v13063_v33  ;;  %v13065_v34 = vpop.permute.xlu1 %4148  ;;  %v16809_v33 = vld [vmem:[#allocation108_spill] sm:$0xff] }
 0xbf6   : > { %16770 = vst [vmem:[#allocation183_spill] sm:$0xff] %v13065_v34  ;;  %5123 = vrot.lane.b32.xlu1 %v5105_v32, %s9385_s24  ;;  %5485 = vrot.lane.b32.xlu0 %v5456_v11, %s9363_s15  ;;  %v5358_v34 = vmul.f32 0.0, %v16774_v45 }
 0xbf8   : > { %v13072_v15 = vpop.permute.xlu0 %4993 }
 0xbf9   : > { %16772 = vst [vmem:[#allocation98_spill] sm:$0xff] %v13072_v15  ;;  %v13074_v51 = vpop.permute.xlu1 %4333  ;;  %v4465_v15 = vmul.f32 %v16723_v3, %v16569_v18 }
 0xbfa   : > { %16773 = vst [vmem:[#allocation184_spill] sm:$0xff] %v13074_v51  ;;  %5304 = vperm.xlu1 %9240, %v12500_v24   ;;  %5377 = vrot.lane.b32.xlu0 %v5356_v31, %s9385_s24  ;;  %v16777_v24 = vld [vmem:[#allocation61_spill] sm:$0xff] }
 0xbfb   : > { %v5458_v31 = vmul.f32 %v16777_v24, %v13029_v62 }
 0xbfc   : > { %v13080_v32 = vpop.permute.xlu0 %4997 }
 0xbfd   : > { %16775 = vst [vmem:[#allocation32_spill] sm:$0xff] %v13080_v32  ;;  %v13082_v11 = vpop.permute.xlu1 %4337 }
 0xbfe   : > { %16776 = vst [vmem:[#allocation185_spill] sm:$0xff] %v13082_v11  ;;  %4590 = vrot.lane.b32.xlu1 %v4566_v39, %s9385_s24  ;;  %5381 = vrot.lane.b32.xlu0 %v5358_v34, %s9385_s24  ;;  %v4468_v34 = vmul.f32 %v16726_v23, %v16458_v63  ;;  %v16780_v39 = vld [vmem:[#allocation25_spill] sm:$0xff] }
 0xbff   : > { %9242 = vset.pattern.permute.xlu1 %v16556_v21  ;;  %v5460_v32 = vmul.f32 %v16780_v39, %v5432_v56  ;;  %v13122_v56 = vld [vmem:[%s15688_s3 + $0x8] sm:$0xff] }
 0xc00   : > { %v13091_v51 = vpop.permute.xlu0 %5001  ;;  %16785 = vst [vmem:[#allocation191_spill] sm:$0xff] %v13122_v56 }
 0xc01   : > { %16778 = vst [vmem:[#allocation61_spill] sm:$0xff] %v13091_v51  ;;  %v13093_v0 = vpop.permute.xlu1 %4341  ;;  %v5175_v51 = vmul.f32 %v12132_v22, %v16530_v6 }
 0xc02   : > { %16779 = vst [vmem:[#allocation186_spill] sm:$0xff] %v13093_v0  ;;  %4496 = vrot.lane.b32.xlu1 %v4465_v15, %s9376_s17  ;;  %5489 = vrot.lane.b32.xlu0 %v5458_v31, %s9363_s15  ;;  %v5462_v31 = vmul.f32 %v16780_v39, %v12901_v55  ;;  %v16814_v0 = vld [vmem:[#allocation114_spill] sm:$0xff] }
 0xc03   : > { %v5203_v15 = vmul.f32 %v16728_v2, %v5175_v51 }
 0xc04   : > { %v13102_v11 = vpop.permute.xlu0 %5121 }
 0xc05   : > { %16781 = vst [vmem:[#allocation187_spill] sm:$0xff] %v13102_v11  ;;  %v13104_v1 = vpop.permute.xlu1 %4842  ;;  %v16787_v11 = vld [vmem:[#allocation81_spill] sm:$0xff] }
 0xc06   : > { %16782 = vst [vmem:[#allocation188_spill] sm:$0xff] %v13104_v1  ;;  %4502 = vrot.lane.b32.xlu1 %v4468_v34, %s9376_s17  ;;  %5493 = vrot.lane.b32.xlu0 %v5460_v32, %s9363_s15  ;;  %v5205_v32 = vmul.f32 %v16728_v2, %v12901_v55  ;;  %v5179_v34 = vmul.f32 %v12600_v50, %v16513_v47  ;;  %v16788_v1 = vld [vmem:[#allocation15_spill] sm:$0xff] }
 0xc08   : > { %v13113_v35 = vpop.permute.xlu0 %5125  ;;  %v5207_v2 = vmul.f32 %v16731_v40, %v5179_v34  ;;  %v13159_v40 = vld [vmem:[%s15688_s3 + $0x28] sm:$0xff]  ;;  %v16795_v34 = vld [vmem:[#allocation18_spill] sm:$0xff] }
 0xc09   : > { %16783 = vst [vmem:[#allocation189_spill] sm:$0xff] %v13113_v35  ;;  %v13115_v23 = vpop.permute.xlu1 %4846  ;;  %v13133_v35 = vsel %vm1354_vm11, %v16788_v1, %v16787_v11  ;;  %16794 = vst [vmem:[#allocation197_spill] sm:$0xff] %v13159_v40 }
 0xc0a   : > { %16784 = vst [vmem:[#allocation190_spill] sm:$0xff] %v13115_v23  ;;  %5227 = vrot.lane.b32.xlu1 %v5203_v15, %s9363_s15  ;;  %5497 = vrot.lane.b32.xlu0 %v5462_v31, %s9363_s15  ;;  %16789 = vst [vmem:[#allocation15_spill] sm:$0xff] %v13133_v35  ;;  %v2726_v31 = vmul.f32 %v13133_v35, %v16530_v6  ;;  %v16796_v6 = vld [vmem:[#allocation14_spill] sm:$0xff] }
 0xc0c   : > { %v13126_v51 = vpop.permute.xlu0 %5308 }
 0xc0d   : > { %16786 = vst [vmem:[#allocation192_spill] sm:$0xff] %v13126_v51  ;;  %v13135_v15 = vpop.permute.xlu1 %5056  ;;  %v13145_v51 = vld [vmem:[%s15688_s3 + $0x10] sm:$0xff] }
 0xc0e   : > { %16790 = vst [vmem:[#allocation193_spill] sm:$0xff] %v13135_v15  ;;  %5231 = vrot.lane.b32.xlu1 %v5205_v32, %s9363_s15  ;;  %5646 = vperm.xlu0 %9241, %v13122_v56   ;;  %16791 = vst [vmem:[#allocation194_spill] sm:$0xff] %v13145_v51  ;;  %v4464_v32 = vmul.f32 %v16723_v3, %v16524_v26  ;;  %v13171_v3 = vmul.f32 0.0, %v16788_v1  ;;  %v4548_v1 = vmul.f32 %v16751_v17, %v16458_v63  ;;  %v16804_v56 = vld [vmem:[#allocation22_spill] sm:$0xff] }
 0xc11   : > { %v13147_v23 = vpop.permute.xlu1 %4140  ;;  %v13149_v12 = vpop.permute.xlu0 %2739 }
 0xc12   : > { %16792 = vst [vmem:[#allocation195_spill] sm:$0xff] %v13147_v23  ;;  %16793 = vst [vmem:[#allocation196_spill] sm:$0xff] %v13149_v12  ;;  %v2758_v15 = vmul.f32 %v13149_v12, %v2726_v31  ;;  %5235 = vrot.lane.b32.xlu1 %v5207_v2, %s9363_s15  ;;  %5651 = vperm.xlu0 %9241, %v13145_v51   ;;  %v2846_v23 = vsel %vm698_vm6, %v16796_v6, %v16795_v34  ;;  %v16799_v6 = vld [vmem:[#allocation72_spill] sm:$0xff] }
 0xc13   : > { %v4545_v31 = vmul.f32 %v16751_v17, %v16569_v18  ;;  %v4576_v12 = vmul.f32 %v16738_v54, %v4548_v1  ;;  %v16806_v17 = vld [vmem:[#allocation104_spill] sm:$0xff]  ;;  %v16812_v1 = vld [vmem:[#allocation107_spill] sm:$0xff] }
 0xc14   : > { %v2866_v2 = vadd.f32 %v2846_v23, %v2758_v15  ;;  %v2735_v15 = vmul.f32 %v13133_v35, %v16527_v30 }
 0xc15   : > { %v13164_v48 = vpop.permute.xlu1 %4146  ;;  %v4573_v51 = vmul.f32 %v16736_v7, %v4545_v31  ;;  %v13182_v34 = vpop.permute.xlu0 %2754  ;;  %v2729_v31 = vmul.f32 %v13133_v35, %v16531_v4 }
 0xc16   : > { %16797 = vst [vmem:[#allocation198_spill] sm:$0xff] %v13164_v48  ;;  %4494 = vrot.lane.b32.xlu1 %v4464_v32, %s9376_s17  ;;  %5666 = vperm.xlu0 %9241, %v13159_v40   ;;  %v16800_v48 = vld [vmem:[#allocation103_spill] sm:$0xff]  ;;  %16801 = vst [vmem:[#allocation200_spill] sm:$0xff] %v13182_v34  ;;  %v16803_v40 = vld [vmem:[#allocation36_spill] sm:$0xff]  ;;  %v2767_v11 = vmul.f32 %v13182_v34, %v2735_v15 }
 0xc17   : > { %v2984_v21 = vsel %vm2982_vm3, %v16800_v48, %v16799_v6  ;;  %v2847_v48 = vsel %vm698_vm6, %v16804_v56, %v16803_v40  ;;  %v16811_v15 = vld [vmem:[#allocation35_spill] sm:$0xff] }
 0xc18   : > { %v3004_v32 = vadd.f32 %v2984_v21, %v2866_v2  ;;  %v16807_v21 = vld [vmem:[#allocation87_spill] sm:$0xff]  ;;  %v16808_v2 = vld [vmem:[#allocation46_spill] sm:$0xff] }
 0xc19   : > { %v13184_v23 = vpop.permute.xlu1 %3627  ;;  %v3100_v35 = vsel %vm1139_vm9, %v16809_v33, %v16808_v2  ;;  %v3101_v33 = vsel %vm1139_vm9, %v16814_v0, %v16813_v58  ;;  %v4544_v0 = vmul.f32 %v16720_v42, %v16524_v26 }
 0xc1a   : > { %16802 = vst [vmem:[#allocation201_spill] sm:$0xff] %v13184_v23  ;;  %4604 = vrot.lane.b32.xlu1 %v4573_v51, %s9385_s24  ;;  %5671 = vperm.xlu0 %9241, %v13177_v57   ;;  %v16805_v23 = vld [vmem:[#allocation83_spill] sm:$0xff]  ;;  %v2985_v51 = vsel %vm2982_vm3, %v16807_v21, %v16806_v17  ;;  %v2848_v57 = vsel %vm698_vm6, %v16803_v40, %v16810_v61  ;;  %v16816_v61 = vld [vmem:[#allocation118_spill] sm:$0xff] }
 0xc1b   : > { %v2760_v6 = vmul.f32 %v16805_v23, %v13171_v3  ;;  %v3120_v39 = vadd.f32 %v3100_v35, %v3004_v32  ;;  %v2761_v54 = vmul.f32 %v16805_v23, %v2729_v31  ;;  %v2852_v21 = vsel %vm698_vm6, %v16812_v1, %v16811_v15  ;;  %v16817_v23 = vld [vmem:[#allocation24_spill] sm:$0xff] }
 0xc1c   : > { %v2766_v40 = vmul.f32 %v13182_v34, %v13171_v3  ;;  %v2875_v35 = vadd.f32 %v2852_v21, %v2767_v11  ;;  %v3179_v15 = vsel %vm1354_vm11, %v16817_v23, %v16816_v61  ;;  %v16819_v11 = vld [vmem:[#allocation11_spill] sm:$0xff]  ;;  %v16821_v21 = vld [vmem:[#allocation117_spill] sm:$0xff] }
 0xc1d   : > { %v13207_v20 = vpop.permute.xlu1 %3631  ;;  %v2868_v56 = vadd.f32 %v2847_v48, %v2760_v6  ;;  %v5107_v6 = vmul.f32 %v16741_v16, %v16524_v26  ;;  %v2869_v32 = vadd.f32 %v2848_v57, %v2761_v54  ;;  %v5109_v57 = vmul.f32 %v16744_v27, %v16527_v30  ;;  %v16825_v34 = vld [vmem:[#allocation91_spill] sm:$0xff] }
 0xc1e   : > { %4610 = vrot.lane.b32.xlu1 %v4576_v12, %s9385_s24  ;;  %v16815_v12 = vld [vmem:[#allocation29_spill] sm:$0xff]  ;;  %v4572_v27 = vmul.f32 %v16736_v7, %v4544_v0  ;;  %v16829_v7 = vld [vmem:[#allocation122_spill] sm:$0xff] }
 0xc1f   : > { %v3006_v48 = vadd.f32 %v2985_v51, %v2868_v56  ;;  %v2986_v31 = vsel %vm2982_vm3, %v16806_v17, %v16815_v12  ;;  %v3196_v51 = vadd.f32 %v3179_v15, %v3120_v39  ;;  %v3102_v17 = vsel %vm1139_vm9, %v16813_v58, %v16819_v11  ;;  %v16820_v56 = vld [vmem:[#allocation89_spill] sm:$0xff]  ;;  %v16824_v58 = vld [vmem:[#allocation120_spill] sm:$0xff] }
 0xc20   : > { %v2851_v54 = vsel %vm698_vm6, %v16820_v56, %v16812_v1  ;;  %v3180_v23 = vsel %vm1354_vm11, %v16825_v34, %v16824_v58  ;;  %v16826_v1 = vld [vmem:[#allocation128_spill] sm:$0xff]  ;;  %v16830_v0 = vld [vmem:[#allocation69_spill] sm:$0xff] }
 0xc21   : > { %v13230_v2 = vpop.permute.xlu1 %3635  ;;  %v3122_v16 = vadd.f32 %v3101_v33, %v3006_v48  ;;  %v3007_v33 = vadd.f32 %v2986_v31, %v2869_v32  ;;  %v2874_v39 = vadd.f32 %v2851_v54, %v2766_v40  ;;  %v5181_v48 = vmul.f32 %v12132_v22, %v16524_v26  ;;  %v16827_v56 = vld [vmem:[#allocation96_spill] sm:$0xff]  ;;  %v16831_v54 = vld [vmem:[#allocation95_spill] sm:$0xff] }
 0xc22   : > { %16818 = vst [vmem:[#allocation36_spill] sm:$0xff] %v13230_v2  ;;  %5127 = vrot.lane.b32.xlu1 %v5107_v6, %s9385_s24  ;;  %v16822_v2 = vld [vmem:[#allocation42_spill] sm:$0xff]  ;;  %v13246_v6 = vpop.permute.xlu0 %3792  ;;  %v3305_v30 = vsel %vm3304_vm8, %v16827_v56, %v16826_v1  ;;  %v16833_v26 = vld [vmem:[#allocation39_spill] sm:$0xff] }
 0xc23   : > { %v2990_v42 = vsel %vm2982_vm3, %v16822_v2, %v16821_v21  ;;  %16823 = vst [vmem:[#allocation22_spill] sm:$0xff] %v13246_v6  ;;  %v3123_v32 = vadd.f32 %v3102_v17, %v3007_v33  ;;  %v3198_v40 = vadd.f32 %v16825_v34, %v3122_v16  ;;  %v2989_v31 = vsel %vm2982_vm3, %v16829_v7, %v16822_v2  ;;  %v16832_v6 = vld [vmem:[#allocation70_spill] sm:$0xff]  ;;  %v16834_v17 = vld [vmem:[#allocation105_spill] sm:$0xff]  ;;  %v16835_v33 = vld [vmem:[#allocation63_spill] sm:$0xff] }
 0xc24   : > { %v3013_v15 = vadd.f32 %v2990_v42, %v2875_v35  ;;  %v3326_v35 = vadd.f32 %v3305_v30, %v3196_v51  ;;  %v3106_v42 = vsel %vm1139_vm9, %v16831_v54, %v16830_v0  ;;  %v3307_v56 = vsel %vm3304_vm8, %v16833_v26, %v16832_v6  ;;  %v16836_v7 = vld [vmem:[#allocation76_spill] sm:$0xff] }
 0xc25   : > { %v13257_v21 = vpop.permute.xlu1 %4226  ;;  %v3423_v34 = vsel %vm3422_vm10, %v16834_v17, %v12668_v41  ;;  %v3199_v16 = vadd.f32 %v3180_v23, %v3123_v32  ;;  %v3012_v30 = vadd.f32 %v2989_v31, %v2874_v39  ;;  %v3425_v2 = vsel %vm3422_vm10, %v12675_v13, %v16835_v33  ;;  %v16841_v31 = vld [vmem:[#allocation56_spill] sm:$0xff] }
 0xc26   : > { %16828 = vst [vmem:[#allocation104_spill] sm:$0xff] %v13257_v21  ;;  %5131 = vrot.lane.b32.xlu1 %v5109_v57, %s9385_s24  ;;  %v3129_v51 = vadd.f32 %v3106_v42, %v3013_v15  ;;  %v3444_v57 = vadd.f32 %v3423_v34, %v3326_v35  ;;  %v3520_v21 = vsel %vm3519_vm13, %v12775_v8, %v16836_v7  ;;  %v13283_v23 = vpop.permute.xlu0 %3807  ;;  %v16839_v15 = vld [vmem:[#allocation135_spill] sm:$0xff]  ;;  %v16840_v35 = vld [vmem:[#allocation140_spill] sm:$0xff]  ;;  %v16842_v34 = vld [vmem:[#allocation13_spill] sm:$0xff] }
 0xc27   : > { %v5209_v58 = vmul.f32 %v16749_v44, %v5181_v48  ;;  %v3328_v6 = vadd.f32 %v16833_v26, %v3198_v40  ;;  %v3329_v17 = vadd.f32 %v3307_v56, %v3199_v16  ;;  %16838 = vst [vmem:[#allocation107_spill] sm:$0xff] %v13283_v23  ;;  %v3105_v32 = vsel %vm1139_vm9, %v16839_v15, %v16831_v54  ;;  %v16843_v26 = vld [vmem:[#allocation136_spill] sm:$0xff] }
 0xc28   : > { %v3541_v39 = vadd.f32 %v3520_v21, %v3444_v57  ;;  %v3182_v42 = vsel %vm1354_vm11, %v16841_v31, %v16840_v35  ;;  %v3522_v48 = vsel %vm3519_vm13, %v16842_v34, %v12792_v5  ;;  %v3638_v56 = vsel %vm3637_vm14, %v16843_v26, %v12929_v43  ;;  %v16844_v57 = vld [vmem:[#allocation139_spill] sm:$0xff] }
 0xc29   : > { %v13279_v0 = vpop.permute.xlu1 %4230  ;;  %v3447_v40 = vadd.f32 %v3425_v2, %v3329_v17  ;;  %v3128_v21 = vadd.f32 %v3105_v32, %v3012_v30  ;;  %v3205_v16 = vadd.f32 %v3182_v42, %v3129_v51  ;;  %v3640_v54 = vsel %vm3637_vm14, %v12938_v52, %v16844_v57  ;;  %v16849_v42 = vld [vmem:[#allocation134_spill] sm:$0xff] }
 0xc2a   : > { %16837 = vst [vmem:[#allocation87_spill] sm:$0xff] %v13279_v0  ;;  %4602 = vrot.lane.b32.xlu1 %v4572_v27, %s9385_s24  ;;  %v3659_v27 = vadd.f32 %v3638_v56, %v3541_v39  ;;  %v3446_v35 = vadd.f32 %v12675_v13, %v3328_v6  ;;  %v16846_v0 = vld [vmem:[#allocation64_spill] sm:$0xff]  ;;  %v5185_v30 = vmul.f32 %v12600_v50, %v16458_v63  ;;  %v13314_v13 = vpop.permute.xlu0 %4768 }
 0xc2b   : > { %v3544_v8 = vadd.f32 %v3522_v48, %v3447_v40  ;;  %v3311_v17 = vsel %vm3304_vm8, %v16846_v0, %v12764_v53  ;;  %v5211_v51 = vmul.f32 %v16749_v44, %v12901_v55  ;;  %v3204_v39 = vadd.f32 %v16841_v31, %v3128_v21  ;;  %16847 = vst [vmem:[#allocation114_spill] sm:$0xff] %v13314_v13 }
 0xc2c   : > { %3684 = vrot.lane.b32.xlu0 %v3659_v27, %s9377_s26  ;;  %v3335_v32 = vadd.f32 %v3311_v17, %v3205_v16  ;;  %v3429_v50 = vsel %vm3422_vm10, %v12906_v49, %v16849_v42  ;;  %v5213_v48 = vmul.f32 %v16754_v38, %v5185_v30  ;;  %v5351_v38 = vmul.f32 %v16758_v19, %v16511_v36 }
 0xc2d   : > { %v13301_v15 = vpop.permute.xlu1 %4981  ;;  %v3662_v2 = vadd.f32 %v3640_v54, %v3544_v8  ;;  %v3334_v8 = vadd.f32 %v16846_v0, %v3204_v39  ;;  %v3644_v16 = vsel %vm3637_vm14, %v13207_v20, %v12892_v28  ;;  %v5353_v27 = vmul.f32 %v16761_v25, %v16513_v47 }
 0xc2e   : > { %16845 = vst [vmem:[#allocation110_spill] sm:$0xff] %v13301_v15  ;;  %5239 = vrot.lane.b32.xlu1 %v5209_v58, %s9363_s15  ;;  %v3543_v58 = vadd.f32 %v16842_v34, %v3446_v35  ;;  %v3453_v31 = vadd.f32 %v3429_v50, %v3335_v32  ;;  %v13329_v40 = vpop.permute.xlu0 %4783  ;;  %v3526_v35 = vsel %vm3519_vm13, %v12728_v37, %v13044_v46 }
 0xc2f   : > { %16851 = vst [vmem:[#allocation11_spill] sm:$0xff] %v13329_v40  ;;  %v3452_v0 = vadd.f32 %v12906_v49, %v3334_v8  ;;  %v5423_v49 = vmul.f32 %v12132_v22, %v16511_v36  ;;  %v5453_v32 = vmul.f32 %v16765_v9, %v12901_v55  ;;  %v16859_v8 = vld [vmem:[#allocation8_spill] sm:$0xff] }
 0xc30   : > { %3690 = vrot.lane.b32.xlu0 %v3662_v2, %s9377_s26  ;;  %v3661_v44 = vadd.f32 %v12938_v52, %v3543_v58  ;;  %v13339_v52 = vld [vmem:[%s15688_s3 + $0x48] sm:$0xff]  ;;  %v3550_v34 = vadd.f32 %v3526_v35, %v3453_v31  ;;  %v16860_v31 = vld [vmem:[#allocation68_spill] sm:$0xff]  ;;  %v5355_v35 = vmul.f32 %v16771_v10, %v16569_v18 }
 0xc31   : > { %v13316_v6 = vpop.permute.xlu1 %4985  ;;  %v3549_v54 = vadd.f32 %v12728_v37, %v3452_v0  ;;  %v5451_v2 = vmul.f32 %v16765_v9, %v5423_v49  ;;  %v13373_v37 = vld [vmem:[%s15688_s3 + $0x58] sm:$0xff]  ;;  %v13394_v9 = vmul.f32 0.0, %v16860_v31  ;;  %v16861_v0 = vld [vmem:[#allocation100_spill] sm:$0xff]  ;;  %v5357_v49 = vmul.f32 %v16774_v45, %v16458_v63 }
 0xc32   : > { %16848 = vst [vmem:[#allocation29_spill] sm:$0xff] %v13316_v6  ;;  %5243 = vrot.lane.b32.xlu1 %v5211_v51, %s9363_s15  ;;  %v3668_v17 = vadd.f32 %v3644_v16, %v3550_v34  ;;  %v13354_v19 = vpop.permute.xlu0 %4596  ;;  %16856 = vst [vmem:[#allocation122_spill] sm:$0xff] %v13373_v37  ;;  %v16862_v34 = vld [vmem:[#allocation137_spill] sm:$0xff] }
 0xc33   : > { %v3667_v51 = vadd.f32 %v13207_v20, %v3549_v54  ;;  %v5455_v20 = vmul.f32 %v16766_v29, %v13029_v62  ;;  %v3900_v16 = vsel %vm2982_vm3, %v16862_v34, %v16861_v0  ;;  %v16864_v54 = vld [vmem:[#allocation102_spill] sm:$0xff]  ;;  %v5429_v34 = vmul.f32 %v12132_v22, %v16569_v18 }
 0xc34   : > { %3688 = vrot.lane.b32.xlu0 %v3661_v44, %s9377_s26  ;;  %v4154_v22 = vsel %vm3422_vm10, %v12882_v60, %v12826_v59 }
 0xc35   : > { %v13327_v56 = vpop.permute.xlu1 %4989  ;;  %v5457_v15 = vmul.f32 %v16777_v24, %v5429_v34 }
 0xc36   : > { %16850 = vst [vmem:[#allocation118_spill] sm:$0xff] %v13327_v56  ;;  %5247 = vrot.lane.b32.xlu1 %v5213_v48, %s9363_s15  ;;  %v13366_v25 = vpop.permute.xlu0 %4498  ;;  %v13390_v48 = vsel %vm3637_vm14, %v16860_v31, %v16859_v8 }
 0xc37   : > { %16855 = vst [vmem:[#allocation128_spill] sm:$0xff] %v13366_v25  ;;  %v3782_v29 = vmul.f32 %v13390_v48, %v16531_v4 }
 0xc38   : > { %5686 = vperm.xlu0 %9241, %v13339_v52  }
 0xc39   : > { %v13344_v21 = vpop.permute.xlu1 %5300 }
 0xc3a   : > { %16852 = vst [vmem:[#allocation89_spill] sm:$0xff] %v13344_v21  ;;  %5367 = vrot.lane.b32.xlu1 %v5351_v38, %s9385_s24  ;;  %v13383_v50 = vpop.permute.xlu0 %4504  ;;  %v16874_v21 = vld [vmem:[#allocation186_spill] sm:$0xff] }
 0xc3c   : > { %3702 = vrot.lane.b32.xlu0 %v3668_v17, %s9377_s26  ;;  %v3813_v17 = vmul.f32 %v16864_v54, %v13394_v9 }
 0xc3d   : > { %v13358_v30 = vpop.permute.xlu1 %4345 }
 0xc3e   : > { %16853 = vst [vmem:[#allocation42_spill] sm:$0xff] %v13358_v30  ;;  %5371 = vrot.lane.b32.xlu1 %v5353_v27, %s9385_s24  ;;  %v13403_v27 = vpop.permute.xlu0 %5229 }
 0xc3f   : > { %16863 = vst [vmem:[#allocation63_spill] sm:$0xff] %v13403_v27  ;;  %v16868_v27 = vld [vmem:[#allocation111_spill] sm:$0xff] }
 0xc40   : > { %3700 = vrot.lane.b32.xlu0 %v3667_v51, %s9377_s26  ;;  %v16865_v51 = vld [vmem:[#allocation59_spill] sm:$0xff] }
 0xc41   : > { %v13364_v39 = vpop.permute.xlu1 %4349  ;;  %v3901_v10 = vsel %vm2982_vm3, %v16861_v0, %v16865_v51  ;;  %v16869_v0 = vld [vmem:[#allocation73_spill] sm:$0xff] }
 0xc42   : > { %16854 = vst [vmem:[#allocation91_spill] sm:$0xff] %v13364_v39  ;;  %5475 = vrot.lane.b32.xlu1 %v5451_v2, %s9363_s15  ;;  %v3814_v2 = vmul.f32 %v16864_v54, %v3782_v29  ;;  %v4038_v13 = vsel %vm4035_vm15, %v16869_v0, %v16868_v27  ;;  %v16870_v29 = vld [vmem:[#allocation127_spill] sm:$0xff]  ;;  %v5459_v0 = vmul.f32 %v16777_v24, %v12901_v55 }
 0xc43   : > { %v16879_v24 = vld [vmem:[#allocation147_spill] sm:$0xff] }
 0xc44   : > { %5696 = vperm.xlu0 %9241, %v13373_v37   ;;  %v3922_v45 = vadd.f32 %v3901_v10, %v3814_v2  ;;  %v16873_v10 = vld [vmem:[#allocation143_spill] sm:$0xff] }
 0xc45   : > { %v13377_v58 = vpop.permute.xlu1 %4353  ;;  %v4233_v2 = vsel %vm3637_vm14, %v16873_v10, %v12992_v14  ;;  %v16965_v14 = vld [vmem:[#allocation113_spill] sm:$0xff] }
 0xc46   : > { %16857 = vst [vmem:[#allocation95_spill] sm:$0xff] %v13377_v58  ;;  %5479 = vrot.lane.b32.xlu1 %v5453_v32, %s9363_s15  ;;  %v3921_v32 = vadd.f32 %v3900_v16, %v3813_v17  ;;  %v4155_v16 = vsel %vm3422_vm10, %v12826_v59, %v16870_v29  ;;  %v13432_v17 = vpop.permute.xlu0 %5233  ;;  %v16875_v59 = vld [vmem:[#allocation155_spill] sm:$0xff] }
 0xc47   : > { %16871 = vst [vmem:[#allocation135_spill] sm:$0xff] %v13432_v17  ;;  %v4360_v60 = vsel %vm4357_vm2, %v16875_v59, %v16874_v21  ;;  %v16914_v17 = vld [vmem:[#allocation77_spill] sm:$0xff] }
 0xc48   : > { %v4059_v25 = vadd.f32 %v4038_v13, %v3921_v32 }
 0xc49   : > { %v13385_v44 = vpop.permute.xlu1 %4484 }
 0xc4a   : > { %16858 = vst [vmem:[#allocation39_spill] sm:$0xff] %v13385_v44  ;;  %5483 = vrot.lane.b32.xlu1 %v5455_v20, %s9363_s15  ;;  %v4175_v34 = vadd.f32 %v4154_v22, %v4059_v25  ;;  %v13447_v32 = vpop.permute.xlu0 %5237 }
 0xc4b   : > { %16877 = vst [vmem:[#allocation136_spill] sm:$0xff] %v13447_v32 }
 0xc4c   : > { %v4251_v25 = vadd.f32 %v16873_v10, %v4175_v34  ;;  %v5623_v10 = vld [vmem:[%s15688_s3] sm:$0xff] }
 0xc4d   : > { %v4491_v38 = vpop.permute.xlu1 %4490 }
 0xc4e   : > { %5375 = vrot.lane.b32.xlu1 %v5355_v35, %s9385_s24  ;;  %v16867_v35 = vld [vmem:[#allocation145_spill] sm:$0xff]  ;;  %v4381_v32 = vadd.f32 %v16875_v59, %v4251_v25 }
 0xc4f   : > { %v4039_v56 = vsel %vm4035_vm15, %v16868_v27, %v16867_v35 }
 0xc51   : > { %v13414_v20 = vpop.permute.xlu1 %4850 }
 0xc52   : > { %16866 = vst [vmem:[#allocation76_spill] sm:$0xff] %v13414_v20  ;;  %5379 = vrot.lane.b32.xlu1 %v5357_v49, %s9385_s24  ;;  %v4060_v20 = vadd.f32 %v4039_v56, %v3922_v45  ;;  %v16878_v45 = vld [vmem:[#allocation25_spill] sm:$0xff] }
 0xc53   : > { %v5461_v55 = vmul.f32 %v16878_v45, %v13029_v62  ;;  %v13467_v62 = vpop.permute.xlu0 %4500 }
 0xc54   : > { %v4176_v27 = vadd.f32 %v4155_v16, %v4060_v20 }
 0xc55   : > { %v13434_v49 = vpop.permute.xlu1 %4854 }
 0xc56   : > { %16872 = vst [vmem:[#allocation56_spill] sm:$0xff] %v13434_v49  ;;  %5487 = vrot.lane.b32.xlu1 %v5457_v15, %s9363_s15  ;;  %v4252_v56 = vadd.f32 %v4233_v2, %v4176_v27  ;;  %v4394_v15 = vmul.f32 %v13390_v48, %v16513_v47  ;;  %v16881_v2 = vld [vmem:[#allocation177_spill] sm:$0xff] }
 0xc57   : > { %v4509_v27 = vsel %vm2982_vm3, %v4491_v38, %v16881_v2 }
 0xc58   : > { %v4382_v20 = vadd.f32 %v4360_v60, %v4252_v56  ;;  %v4422_v16 = vmul.f32 %v16879_v24, %v4394_v15  ;;  %v16882_v15 = vld [vmem:[#allocation181_spill] sm:$0xff] }
 0xc59   : > { %v13445_v13 = vpop.permute.xlu1 %4482  ;;  %v4508_v45 = vsel %vm2982_vm3, %v16882_v15, %v4491_v38  ;;  %v16887_v38 = vld [vmem:[#allocation81_spill] sm:$0xff] }
 0xc5a   : > { %16876 = vst [vmem:[#allocation13_spill] sm:$0xff] %v13445_v13  ;;  %5491 = vrot.lane.b32.xlu1 %v5459_v0, %s9363_s15  ;;  %v4393_v0 = vmul.f32 %v16860_v31, %v16531_v4  ;;  %v4434_v49 = vadd.f32 %v4422_v16, %v4382_v20  ;;  %v2727_v15 = vmul.f32 %v16887_v38, %v16511_v36  ;;  %v16909_v13 = vld [vmem:[#allocation23_spill] sm:$0xff] }
 0xc5c   : > { %v4421_v34 = vmul.f32 %v16879_v24, %v4393_v0  ;;  %v4530_v60 = vadd.f32 %v4509_v27, %v4434_v49  ;;  %v13479_v0 = vpop.permute.xlu0 %4606  ;;  %v16886_v49 = vmov 1   ;;  %v16951_v24 = vld [vmem:[#allocation124_spill] sm:$0xff] }
 0xc5d   : > { %v13456_v22 = vpop.permute.xlu1 %4592  ;;  %16885 = vst [vmem:[#allocation134_spill] sm:$0xff] %v13479_v0 }
 0xc5e   : > { %16880 = vst [vmem:[#allocation139_spill] sm:$0xff] %v13456_v22  ;;  %5495 = vrot.lane.b32.xlu1 %v5461_v55, %s9363_s15  ;;  %v16883_v55 = vld [vmem:[#allocation182_spill] sm:$0xff]  ;;  %v4433_v40 = vadd.f32 %v4421_v34, %v4381_v32  ;;  %v16891_v32 = vld [vmem:[#allocation191_spill] sm:$0xff] }
 0xc5f   : > { %v16939_v22 = vld [vmem:[#allocation30_spill] sm:$0xff] }
 0xc60   : > { %v4529_v20 = vadd.f32 %v4508_v45, %v4433_v40  ;;  %v13491_v40 = vld [vmem:[%s15688_s3 + $0x68] sm:$0xff]  ;;  %v13494_v34 = vpop.permute.xlu0 %4612 }
 0xc61   : > { %v4599_v56 = vpop.permute.xlu1 %4598  ;;  %16890 = vst [vmem:[#allocation68_spill] sm:$0xff] %v13491_v40  ;;  %16892 = vst [vmem:[#allocation100_spill] sm:$0xff] %v13494_v34 }
 0xc62   : > { %v4617_v37 = vsel %vm4035_vm15, %v4599_v56, %v16883_v55  ;;  %5641 = vperm.xlu1 %9242, %v5623_v10   ;;  %v4616_v25 = vsel %vm4035_vm15, %v13354_v19, %v4599_v56  ;;  %v16894_v56 = vld [vmem:[#allocation18_spill] sm:$0xff] }
 0xc63   : > { %v4638_v59 = vadd.f32 %v4617_v37, %v4530_v60  ;;  %v4637_v27 = vadd.f32 %v4616_v25, %v4529_v20  ;;  %v16889_v37 = vld [vmem:[#allocation196_spill] sm:$0xff] }
 0xc64   : > { %v2759_v19 = vmul.f32 %v16889_v37, %v2727_v15  ;;  %v16897_v20 = vld [vmem:[#allocation72_spill] sm:$0xff]  ;;  %v13507_v15 = vpop.permute.xlu0 %5129 }
 0xc65   : > { %v13476_v16 = vpop.permute.xlu1 %4991  ;;  %4666 = vrot.lane.b32.xlu0 %v4638_v59, %s9381_s29  ;;  %v16895_v59 = vmov 0   ;;  %16898 = vst [vmem:[#allocation59_spill] sm:$0xff] %v13507_v15 }
 0xc66   : > { %16884 = vst [vmem:[#allocation64_spill] sm:$0xff] %v13476_v16  ;;  %9243 = vset.pattern.permute.xlu1 %v16886_v49  ;;  %v2867_v45 = vadd.f32 %v16894_v56, %v2759_v19  ;;  %v2757_v16 = vmul.f32 %v16889_v37, %v13171_v3  ;;  %v13518_v19 = vld [vmem:[%s15688_s3 + $0x20] sm:$0xff] }
 0xc67   : > { %5752 = vperm.xlu1 %9243, %v5623_v10   ;;  %v5626_v10 = vld [vmem:[%s15688_s3 + $0x18] sm:$0xff]  ;;  %16901 = vst [vmem:[#allocation111_spill] sm:$0xff] %v13518_v19 }
 0xc68   : > { %v13520_v56 = vpop.permute.xlu0 %5133 }
 0xc69   : > { %v13484_v39 = vpop.permute.xlu1 %4995  ;;  %4664 = vrot.lane.b32.xlu0 %v4637_v27, %s9381_s29  ;;  %v3005_v27 = vadd.f32 %v16897_v20, %v2867_v45  ;;  %16902 = vst [vmem:[#allocation73_spill] sm:$0xff] %v13520_v56  ;;  %v16903_v45 = vld [vmem:[#allocation14_spill] sm:$0xff]  ;;  %v16904_v20 = vld [vmem:[#allocation16_spill] sm:$0xff] }
 0xc6a   : > { %16888 = vst [vmem:[#allocation8_spill] sm:$0xff] %v13484_v39  ;;  %v16907_v39 = vld [vmem:[#allocation103_spill] sm:$0xff]  ;;  %v16908_v56 = vld [vmem:[#allocation106_spill] sm:$0xff] }
 0xc6b   : > { %5756 = vperm.xlu1 %9243, %v16891_v32   ;;  %v2983_v30 = vsel %vm2982_vm3, %v16908_v56, %v16907_v39  ;;  %v16913_v39 = vld [vmem:[#allocation55_spill] sm:$0xff] }
 0xc6d   : > { %v13496_v60 = vpop.permute.xlu1 %4999  ;;  %5706 = vperm.xlu0 %9241, %v13491_v40   ;;  %v16900_v40 = vld [vmem:[#allocation46_spill] sm:$0xff] }
 0xc6e   : > { %16893 = vst [vmem:[#allocation137_spill] sm:$0xff] %v13496_v60  ;;  %v3121_v0 = vadd.f32 %v16900_v40, %v3005_v27  ;;  %v2730_v40 = vmul.f32 %v16887_v38, %v16513_v47  ;;  %v16906_v27 = vld [vmem:[#allocation83_spill] sm:$0xff] }
 0xc6f   : > { %9244 = vset.pattern.permute.xlu1 %v16895_v59 }
 0xc70   : > { %5656 = vperm.xlu1 %9244, %v5626_v10   ;;  %v3197_v37 = vadd.f32 %v16816_v61, %v3121_v0  ;;  %v2762_v60 = vmul.f32 %v16906_v27, %v2730_v40  ;;  %v16911_v0 = vld [vmem:[#allocation54_spill] sm:$0xff]  ;;  %v16912_v27 = vld [vmem:[#allocation108_spill] sm:$0xff] }
 0xc71   : > { %v13504_v25 = vpop.permute.xlu1 %5119  ;;  %v3099_v56 = vsel %vm1139_vm9, %v16913_v39, %v16912_v27  ;;  %v16920_v39 = vld [vmem:[#allocation120_spill] sm:$0xff] }
 0xc72   : > { %16896 = vst [vmem:[#allocation102_spill] sm:$0xff] %v13504_v25  ;;  %v2845_v25 = vsel %vm698_vm6, %v16904_v20, %v16903_v45  ;;  %v3306_v45 = vsel %vm3304_vm8, %v16826_v1, %v16909_v13  ;;  %v3424_v1 = vsel %vm3422_vm10, %v12668_v41, %v16914_v17  ;;  %v16921_v41 = vld [vmem:[#allocation154_spill] sm:$0xff] }
 0xc73   : > { %v2865_v15 = vadd.f32 %v2845_v25, %v2757_v16  ;;  %v13541_v25 = vpop.permute.xlu0 %4608  ;;  %v3327_v61 = vadd.f32 %v3306_v45, %v3197_v37  ;;  %v16916_v45 = vld [vmem:[#allocation197_spill] sm:$0xff]  ;;  %v3521_v17 = vsel %vm3519_vm13, %v16836_v7, %v16921_v41  ;;  %v3819_v41 = vmul.f32 %v13283_v23, %v13394_v9 }
 0xc74   : > { %9245 = vset.pattern.permute.xlu1 %v16886_v49 }
 0xc75   : > { %5764 = vperm.xlu1 %9245, %v5626_v10   ;;  %v13510_v32 = vpop.permute.xlu1 %5123  ;;  %v3003_v16 = vadd.f32 %v2983_v30, %v2865_v15  ;;  %v3445_v15 = vadd.f32 %v3424_v1, %v3327_v61 }
 0xc76   : > { %16899 = vst [vmem:[#allocation145_spill] sm:$0xff] %v13510_v32  ;;  %v2733_v32 = vmul.f32 %v16887_v38, %v16569_v18 }
 0xc77   : > { %v3119_v13 = vadd.f32 %v3099_v56, %v3003_v16  ;;  %v13562_v27 = vpop.permute.xlu0 %5241  ;;  %v16922_v16 = vld [vmem:[#allocation49_spill] sm:$0xff] }
 0xc78   : > { %16919 = vst [vmem:[#allocation155_spill] sm:$0xff] %v13562_v27  ;;  %v16923_v56 = vld [vmem:[#allocation85_spill] sm:$0xff] }
 0xc79   : > { %9246 = vset.pattern.permute.xlu1 %v16895_v59  ;;  %v13526_v10 = vpop.permute.xlu1 %5304  ;;  %v3426_v1 = vsel %vm3422_vm10, %v16835_v33, %v16923_v56 }
 0xc7a   : > { %16905 = vst [vmem:[#allocation127_spill] sm:$0xff] %v13526_v10  ;;  %5661 = vperm.xlu1 %9246, %v13518_v19   ;;  %v2870_v10 = vadd.f32 %v16911_v0, %v2762_v60  ;;  %v16917_v60 = vld [vmem:[#allocation51_spill] sm:$0xff]  ;;  %v16918_v0 = vld [vmem:[#allocation70_spill] sm:$0xff] }
 0xc7c   : > { %v3008_v40 = vadd.f32 %v16815_v12, %v2870_v10  ;;  %v3308_v12 = vsel %vm3304_vm8, %v16918_v0, %v16917_v60  ;;  %v2736_v10 = vmul.f32 %v16887_v38, %v16458_v63  ;;  %v16925_v60 = vld [vmem:[#allocation200_spill] sm:$0xff] }
 0xc7d   : > { %v13539_v20 = vpop.permute.xlu1 %4590 }
 0xc7e   : > { %16910 = vst [vmem:[#allocation143_spill] sm:$0xff] %v13539_v20  ;;  %9247 = vset.pattern.permute.xlu1 %v16886_v49  ;;  %v3124_v37 = vadd.f32 %v16819_v11, %v3008_v40  ;;  %v3788_v11 = vmul.f32 %v13390_v48, %v16922_v16  ;;  %v13575_v40 = vld [vmem:[%s15688_s3 + $0x38] sm:$0xff]  ;;  %v2768_v0 = vmul.f32 %v16925_v60, %v2736_v10  ;;  %v13606_v60 = vpop.permute.xlu0 %5245 }
 0xc7f   : > { %5768 = vperm.xlu1 %9247, %v13518_v19   ;;  %v16927_v20 = vld [vmem:[#allocation15_spill] sm:$0xff]  ;;  %16935 = vst [vmem:[#allocation181_spill] sm:$0xff] %v13606_v60 }
 0xc80   : > { %v3200_v19 = vadd.f32 %v16920_v39, %v3124_v37  ;;  %v3542_v39 = vadd.f32 %v3521_v17, %v3445_v15  ;;  %v3820_v27 = vmul.f32 %v13283_v23, %v3788_v11  ;;  %v16929_v15 = vld [vmem:[#allocation123_spill] sm:$0xff]  ;;  %v16931_v17 = vld [vmem:[#allocation138_spill] sm:$0xff] }
 0xc81   : > { %v13553_v30 = vpop.permute.xlu1 %4496  ;;  %v3639_v11 = vsel %vm3637_vm14, %v12929_v43, %v16931_v17  ;;  %v16937_v23 = vld [vmem:[#allocation171_spill] sm:$0xff]  ;;  %v16938_v43 = vld [vmem:[#allocation84_spill] sm:$0xff] }
 0xc82   : > { %16915 = vst [vmem:[#allocation186_spill] sm:$0xff] %v13553_v30  ;;  %v3330_v7 = vadd.f32 %v3308_v12, %v3200_v19  ;;  %v16926_v30 = vld [vmem:[#allocation45_spill] sm:$0xff]  ;;  %v16930_v12 = vld [vmem:[#allocation158_spill] sm:$0xff]  ;;  %v2763_v17 = vmul.f32 %v16938_v43, %v13171_v3 }
 0xc83   : > { %5772 = vperm.xlu1 %9247, %v16916_v45   ;;  %v16924_v45 = vld [vmem:[#allocation24_spill] sm:$0xff]  ;;  %v2732_v55 = vmul.f32 %v16927_v20, %v16926_v30  ;;  %v3905_v10 = vsel %vm2982_vm3, %v16930_v12, %v16929_v15  ;;  %v3641_v15 = vsel %vm3637_vm14, %v16844_v57, %v16937_v23  ;;  %v16944_v3 = vld [vmem:[#allocation142_spill] sm:$0xff] }
 0xc84   : > { %v3195_v37 = vadd.f32 %v16924_v45, %v3119_v13  ;;  %v3448_v33 = vadd.f32 %v3426_v1, %v3330_v7  ;;  %v16928_v13 = vld [vmem:[#allocation119_spill] sm:$0xff]  ;;  %v16933_v20 = vld [vmem:[#allocation168_spill] sm:$0xff]  ;;  %v3660_v7 = vadd.f32 %v3639_v11, %v3542_v39  ;;  %v3928_v6 = vadd.f32 %v3905_v10, %v3820_v27  ;;  %v16943_v27 = vld [vmem:[#allocation57_spill] sm:$0xff] }
 0xc85   : > { %v13570_v61 = vpop.permute.xlu1 %4502  ;;  %v3523_v19 = vsel %vm3519_vm13, %v12792_v5, %v16928_v13  ;;  %v3904_v38 = vsel %vm2982_vm3, %v16933_v20, %v16930_v12  ;;  %v16934_v45 = vld [vmem:[#allocation35_spill] sm:$0xff]  ;;  %v16936_v5 = vld [vmem:[#allocation96_spill] sm:$0xff]  ;;  %v16940_v12 = vld [vmem:[#allocation86_spill] sm:$0xff]  ;;  %v2764_v23 = vmul.f32 %v16938_v43, %v2732_v55 }
 0xc86   : > { %v2876_v1 = vadd.f32 %v16934_v45, %v2768_v0  ;;  %v3325_v13 = vadd.f32 %v16936_v5, %v3195_v37  ;;  %v3927_v2 = vadd.f32 %v3904_v38, %v3819_v41  ;;  %v2850_v0 = vsel %vm698_vm6, %v16940_v12, %v16939_v22  ;;  %v16941_v37 = vld [vmem:[#allocation28_spill] sm:$0xff]  ;;  %v16948_v45 = vld [vmem:[#allocation117_spill] sm:$0xff] }
 0xc87   : > { %9248 = vset.pattern.permute.xlu1 %v16895_v59  ;;  %v3545_v20 = vadd.f32 %v3523_v19, %v3448_v33  ;;  %v2849_v39 = vsel %vm698_vm6, %v16941_v37, %v16940_v12  ;;  %v16942_v57 = vld [vmem:[#allocation116_spill] sm:$0xff]  ;;  %v16947_v19 = vld [vmem:[#allocation173_spill] sm:$0xff]  ;;  %vm7602_vm6 = vcmask 130112  }
 0xc88   : > { %5676 = vperm.xlu1 %9248, %v13575_v40   ;;  %v2988_v41 = vsel %vm2982_vm3, %v16943_v27, %v16942_v57  ;;  %v16945_v10 = vld [vmem:[#allocation144_spill] sm:$0xff]  ;;  %v4043_v38 = vsel %vm4035_vm15, %v16944_v3, %v16947_v19  ;;  %v16949_v55 = vld [vmem:[#allocation105_spill] sm:$0xff]  ;;  %v2871_v4 = vadd.f32 %v2849_v39, %v2763_v17  ;;  %v16956_v17 = vld [vmem:[#allocation26_spill] sm:$0xff] }
 0xc89   : > { %v13600_v56 = vpop.permute.xlu1 %5227  ;;  %v3663_v33 = vadd.f32 %v3641_v15, %v3545_v20  ;;  %v3443_v5 = vadd.f32 %v16949_v55, %v3325_v13  ;;  %v4066_v60 = vadd.f32 %v4043_v38, %v3928_v6  ;;  %v16952_v15 = vld [vmem:[#allocation93_spill] sm:$0xff]  ;;  %v16963_v55 = vld [vmem:[#allocation152_spill] sm:$0xff] }
 0xc8a   : > { %16932 = vst [vmem:[#allocation25_spill] sm:$0xff] %v13600_v56  ;;  %v2765_v56 = vmul.f32 %v16938_v43, %v2733_v32  ;;  %v4042_v32 = vsel %vm4035_vm15, %v16945_v10, %v16944_v3  ;;  %v2872_v43 = vadd.f32 %v2850_v0, %v2764_v23  ;;  %v16950_v10 = vld [vmem:[#allocation92_spill] sm:$0xff]  ;;  %v3104_v20 = vsel %vm1139_vm9, %v16952_v15, %v16951_v24  ;;  %v16954_v6 = vld [vmem:[#allocation65_spill] sm:$0xff]  ;;  %v16957_v0 = vld [vmem:[#allocation183_spill] sm:$0xff] }
 0xc8b   : > { %v4065_v37 = vadd.f32 %v4042_v32, %v3927_v2  ;;  %v3780_v3 = vmul.f32 %v16859_v8, %v16511_v36  ;;  %v16955_v2 = vld [vmem:[#allocation66_spill] sm:$0xff]  ;;  %v4159_v39 = vsel %vm3422_vm10, %v16957_v0, %v16956_v17  ;;  %v16960_v38 = vld [vmem:[#allocation69_spill] sm:$0xff] }
 0xc8c   : > { %3686 = vrot.lane.b32.xlu1 %v3660_v7, %s9377_s26  ;;  %v3014_v7 = vadd.f32 %v16948_v45, %v2876_v1  ;;  %v2873_v12 = vadd.f32 %v16939_v22, %v2765_v56  ;;  %v13646_v1 = vpop.permute.xlu0 %5249  ;;  %v3010_v13 = vadd.f32 %v2988_v41, %v2872_v43  ;;  %v3181_v56 = vsel %vm1354_vm11, %v16955_v2, %v16954_v6  ;;  %v16962_v41 = vld [vmem:[#allocation20_spill] sm:$0xff]  ;;  %v16964_v17 = vld [vmem:[#allocation101_spill] sm:$0xff] }
 0xc8d   : > { %v13629_v11 = vpop.permute.xlu1 %5231  ;;  %9249 = vset.pattern.permute.xlu1 %v16886_v49  ;;  %16953 = vst [vmem:[#allocation196_spill] sm:$0xff] %v13646_v1  ;;  %v3540_v43 = vadd.f32 %v16963_v55, %v3443_v5  ;;  %v4182_v19 = vadd.f32 %v4159_v39, %v4066_v60  ;;  %v4400_v5 = vmul.f32 %v13390_v48, %v16458_v63  ;;  %vm7751_vm11 = vcmask 1041409  }
 0xc8e   : > { %16946 = vst [vmem:[#allocation81_spill] sm:$0xff] %v13629_v11  ;;  %v2987_v11 = vsel %vm2982_vm3, %v16950_v10, %v16943_v27  ;;  %v3011_v22 = vadd.f32 %v16942_v57, %v2873_v12  ;;  %v16959_v27 = vld [vmem:[#allocation198_spill] sm:$0xff]  ;;  %v3130_v45 = vadd.f32 %v16960_v38, %v3014_v7  ;;  %v3126_v10 = vadd.f32 %v3104_v20, %v3010_v13  ;;  %v16971_v13 = vld [vmem:[#allocation132_spill] sm:$0xff] }
 0xc8f   : > { %v4158_v32 = vsel %vm3422_vm10, %v16959_v27, %v16957_v0  ;;  %v3009_v12 = vadd.f32 %v2987_v11, %v2871_v4  ;;  %v16966_v0 = vld [vmem:[#allocation149_spill] sm:$0xff]  ;;  %v16967_v27 = vld [vmem:[#allocation174_spill] sm:$0xff]  ;;  %v16968_v11 = vld [vmem:[#allocation151_spill] sm:$0xff] }
 0xc90   : > { %3692 = vrot.lane.b32.xlu1 %v3663_v33, %s9377_s26  ;;  %v16961_v33 = vld [vmem:[#allocation87_spill] sm:$0xff]  ;;  %v4181_v1 = vadd.f32 %v4158_v32, %v4065_v37  ;;  %v3127_v44 = vadd.f32 %v16951_v24, %v3011_v22  ;;  %v3309_v7 = vsel %vm3304_vm8, %v16966_v0, %v16965_v14  ;;  %v4364_v38 = vsel %vm4357_vm2, %v16967_v27, %v13377_v58  ;;  %v16970_v20 = vld [vmem:[#allocation90_spill] sm:$0xff] }
 0xc91   : > { %v13656_v23 = vpop.permute.xlu1 %5235  ;;  %v4235_v57 = vsel %vm3637_vm14, %v16962_v41, %v16961_v33  ;;  %v3202_v4 = vadd.f32 %v3181_v56, %v3126_v10  ;;  %v3310_v60 = vsel %vm3304_vm8, %v16965_v14, %v16968_v11  ;;  %v3427_v22 = vsel %vm3422_vm10, %v16971_v13, %v16970_v20  ;;  %v16974_v14 = vld [vmem:[#allocation37_spill] sm:$0xff]  ;;  %v16975_v11 = vld [vmem:[#allocation115_spill] sm:$0xff] }
 0xc92   : > { %16958 = vst [vmem:[#allocation191_spill] sm:$0xff] %v13656_v23  ;;  %v3103_v23 = vsel %vm1139_vm9, %v16964_v17, %v16952_v15  ;;  %v4258_v37 = vadd.f32 %v4235_v57, %v4182_v19  ;;  %v3203_v15 = vadd.f32 %v16954_v6, %v3127_v44  ;;  %v16972_v17 = vld [vmem:[#allocation140_spill] sm:$0xff]  ;;  %v3658_v56 = vadd.f32 %v16843_v26, %v3540_v43  ;;  %v16978_v26 = vld [vmem:[#allocation79_spill] sm:$0xff] }
 0xc93   : > { %v3206_v39 = vadd.f32 %v16972_v17, %v3130_v45  ;;  %v3332_v32 = vadd.f32 %v3309_v7, %v3202_v4  ;;  %v3779_v55 = vmul.f32 %v13390_v48, %v16974_v14  ;;  %v4257_v19 = vadd.f32 %v16962_v41, %v4181_v1  ;;  %v16976_v45 = vld [vmem:[#allocation146_spill] sm:$0xff]  ;;  %v16977_v17 = vld [vmem:[#allocation179_spill] sm:$0xff] }
 0xc94   : > { %5780 = vperm.xlu1 %9249, %v13575_v40   ;;  %v13689_v40 = vpop.permute.xlu0 %5369  ;;  %v4388_v10 = vadd.f32 %v4364_v38, %v4258_v37  ;;  %v3333_v57 = vadd.f32 %v3310_v60, %v3203_v15  ;;  %v3312_v44 = vsel %vm3304_vm8, %v12764_v53, %v16975_v11  ;;  %v4399_v6 = vmul.f32 %v16860_v31, %v16922_v16  ;;  %v16979_v1 = vld [vmem:[#allocation10_spill] sm:$0xff]  ;;  %v13715_v53 = vld [vmem:[%s15688_s3 + $0x40] sm:$0xff]  ;;  %v16983_v37 = vld [vmem:[#allocation201_spill] sm:$0xff] }
 0xc95   : > { %v13682_v24 = vpop.permute.xlu1 %4494  ;;  %16973 = vst [vmem:[#allocation72_spill] sm:$0xff] %v13689_v40  ;;  %v3524_v40 = vsel %vm3519_vm13, %v16977_v17, %v16976_v45  ;;  %v3428_v43 = vsel %vm3422_vm10, %v16970_v20, %v16978_v26  ;;  %v3450_v7 = vadd.f32 %v3427_v22, %v3332_v32  ;;  %v4428_v41 = vmul.f32 %v16979_v1, %v4400_v5  ;;  %v16980_v38 = vld [vmem:[#allocation22_spill] sm:$0xff]  ;;  %v16987_v16 = vld [vmem:[#allocation125_spill] sm:$0xff] }
 0xc96   : > { %16969 = vst [vmem:[#allocation18_spill] sm:$0xff] %v13682_v24  ;;  %v3811_v4 = vmul.f32 %v16980_v38, %v3779_v55  ;;  %16982 = vst [vmem:[#allocation14_spill] sm:$0xff] %v13715_v53  ;;  %v16984_v15 = vld [vmem:[#allocation58_spill] sm:$0xff]  ;;  %v3812_v20 = vmul.f32 %v16980_v38, %v3780_v3  ;;  %v3336_v22 = vadd.f32 %v3312_v44, %v3206_v39  ;;  %v16985_v24 = vld [vmem:[#allocation21_spill] sm:$0xff]  ;;  %vm7616_vm9 = vcmask 261312  }
 0xc97   : > { %v4513_v5 = vsel %vm2982_vm3, %v13570_v61, %v13383_v50  ;;  %v3125_v32 = vadd.f32 %v3103_v23, %v3009_v12  ;;  %v3547_v55 = vadd.f32 %v3524_v40, %v3450_v7  ;;  %v4387_v11 = vadd.f32 %v16967_v27, %v4257_v19  ;;  %v16989_v23 = vld [vmem:[#allocation180_spill] sm:$0xff] }
 0xc98   : > { %3682 = vrot.lane.b32.xlu1 %v3658_v56, %s9377_s26  ;;  %v3642_v56 = vsel %vm3637_vm14, %v16984_v15, %v16983_v37  ;;  %v4440_v26 = vadd.f32 %v4428_v41, %v4388_v10  ;;  %v3451_v58 = vadd.f32 %v3428_v43, %v3333_v57  ;;  %v4427_v3 = vmul.f32 %v16979_v1, %v4399_v6  ;;  %v13732_v39 = vpop.permute.xlu0 %5373  ;;  %v16990_v6 = vld [vmem:[#allocation6_spill] sm:$0xff] }
 0xc99   : > { %v13709_v60 = vpop.permute.xlu1 %4604  ;;  %9250 = vset.pattern.permute.xlu1 %v16895_v59  ;;  %v3430_v59 = vsel %vm3422_vm10, %v16849_v42, %v16987_v16  ;;  %16988 = vst [vmem:[#allocation16_spill] sm:$0xff] %v13732_v39  ;;  %v3525_v12 = vsel %vm3519_vm13, %v16976_v45, %v16989_v23  ;;  %v3665_v27 = vadd.f32 %v3642_v56, %v3547_v55  ;;  %vm7759_vm8 = vcmask 1045509  }
 0xc9a   : > { %16981 = vst [vmem:[#allocation46_spill] sm:$0xff] %v13709_v60  ;;  %v16986_v60 = vld [vmem:[#allocation99_spill] sm:$0xff]  ;;  %v4536_v10 = vadd.f32 %v4513_v5, %v4440_v26  ;;  %v3920_v57 = vadd.f32 %v16985_v24, %v3812_v20  ;;  %v3454_v44 = vadd.f32 %v3430_v59, %v3336_v22  ;;  %v4512_v42 = vsel %vm2982_vm3, %v13467_v62, %v13570_v61  ;;  %v16991_v59 = vld [vmem:[#allocation78_spill] sm:$0xff]  ;;  %v16993_v61 = vld [vmem:[#allocation148_spill] sm:$0xff] }
 0xc9b   : > { %v3899_v33 = vsel %vm2982_vm3, %v16986_v60, %v16985_v24  ;;  %v3643_v43 = vsel %vm3637_vm14, %v16983_v37, %v16990_v6  ;;  %v4439_v7 = vadd.f32 %v4427_v3, %v4387_v11  ;;  %v3548_v41 = vadd.f32 %v3525_v12, %v3451_v58  ;;  %v16996_v26 = vld [vmem:[#allocation126_spill] sm:$0xff]  ;;  %v16997_v3 = vld [vmem:[#allocation159_spill] sm:$0xff]  ;;  %v16998_v12 = vld [vmem:[#allocation36_spill] sm:$0xff] }
 0xc9c   : > { %5681 = vperm.xlu1 %9250, %v13715_v53   ;;  %v3919_v40 = vadd.f32 %v3899_v33, %v3811_v4  ;;  %v3201_v33 = vadd.f32 %v16955_v2, %v3125_v32  ;;  %v16992_v4 = vld [vmem:[#allocation109_spill] sm:$0xff]  ;;  %v3527_v56 = vsel %vm3519_vm13, %v13044_v46, %v16993_v61  ;;  %v13762_v5 = vpop.permute.xlu0 %5477  ;;  %v3783_v32 = vmul.f32 %v16859_v8, %v16513_v47  ;;  %v17002_v6 = vld [vmem:[#allocation7_spill] sm:$0xff] }
 0xc9d   : > { %v4611_v19 = vpop.permute.xlu1 %4610  ;;  %v4037_v62 = vsel %vm4035_vm15, %v16992_v4, %v16991_v59  ;;  %v4535_v20 = vadd.f32 %v4512_v42, %v4439_v7  ;;  %v3666_v58 = vadd.f32 %v3643_v43, %v3548_v41  ;;  %v3551_v22 = vadd.f32 %v3527_v56, %v3454_v44  ;;  %16995 = vst [vmem:[#allocation103_spill] sm:$0xff] %v13762_v5 }
 0xc9e   : > { %v4621_v16 = vsel %vm4035_vm15, %v4611_v19, %v13494_v34  ;;  %v4620_v24 = vsel %vm4035_vm15, %v13541_v25, %v4611_v19  ;;  %v4057_v2 = vadd.f32 %v4037_v62, %v3919_v40  ;;  %v4058_v25 = vadd.f32 %v16991_v59, %v3920_v57 }
 0xc9f   : > { %v4644_v45 = vadd.f32 %v4621_v16, %v4536_v10  ;;  %v3331_v55 = vadd.f32 %v16966_v0, %v3201_v33  ;;  %v4643_v46 = vadd.f32 %v4620_v24, %v4535_v20  ;;  %v3815_v11 = vmul.f32 %v16864_v54, %v3783_v32  ;;  %v13782_v54 = vld [vmem:[%s15688_s3 + $0x78] sm:$0xff]  ;;  %v17005_v20 = vld [vmem:[#allocation153_spill] sm:$0xff] }
 0xca0   : > { %3696 = vrot.lane.b32.xlu1 %v3665_v27, %s9377_s26  ;;  %v4153_v23 = vsel %vm3422_vm10, %v16997_v3, %v16996_v26  ;;  %v3645_v27 = vsel %vm3637_vm14, %v12892_v28, %v16998_v12  ;;  %v4174_v0 = vadd.f32 %v16996_v26, %v4058_v25  ;;  %17000 = vst [vmem:[#allocation23_spill] sm:$0xff] %v13782_v54  ;;  %v13786_v42 = vpop.permute.xlu0 %5481  ;;  %v17001_v16 = vld [vmem:[#allocation175_spill] sm:$0xff]  ;;  %v17009_v32 = vld [vmem:[#allocation157_spill] sm:$0xff]  ;;  %v17012_v26 = vld [vmem:[#allocation112_spill] sm:$0xff]  ;;  %vm7763_vm13 = vcmask 1047559  }
 0xca1   : > { %v13757_v37 = vpop.permute.xlu1 %5127  ;;  %4678 = vrot.lane.b32.xlu0 %v4644_v45, %s9381_s29  ;;  %9251 = vset.pattern.permute.xlu1 %v16886_v49  ;;  %v4173_v10 = vadd.f32 %v4153_v23, %v4057_v2  ;;  %v3669_v19 = vadd.f32 %v3645_v27, %v3551_v22  ;;  %v3923_v57 = vadd.f32 %v16865_v51, %v3815_v11  ;;  %v17007_v2 = vld [vmem:[#allocation185_spill] sm:$0xff] }
 0xca2   : > { %16994 = vst [vmem:[#allocation83_spill] sm:$0xff] %v13757_v37  ;;  %v3449_v44 = vadd.f32 %v16971_v13, %v3331_v55  ;;  %v4232_v43 = vsel %vm3637_vm14, %v17002_v6, %v17001_v16  ;;  %v3810_v51 = vmul.f32 %v16980_v38, %v13394_v9  ;;  %v4250_v13 = vadd.f32 %v17001_v16, %v4174_v0 }
 0xca3   : > { %v4061_v28 = vadd.f32 %v16867_v35, %v3923_v57  ;;  %v4249_v33 = vadd.f32 %v4232_v43, %v4173_v10  ;;  %v3786_v41 = vmul.f32 %v16859_v8, %v16569_v18  ;;  %v13803_v35 = vmul.f32 0.0, %v16859_v8  ;;  %v17014_v10 = vld [vmem:[#allocation74_spill] sm:$0xff] }
 0xca4   : > { %3698 = vrot.lane.b32.xlu1 %v3666_v58, %s9377_s26  ;;  %v3546_v7 = vadd.f32 %v16977_v17, %v3449_v44  ;;  %v13807_v24 = vmul.f32 %v16859_v8, %v16458_v63  ;;  %v17004_v17 = vld [vmem:[#allocation31_spill] sm:$0xff]  ;;  %v3785_v38 = vmul.f32 %v13390_v48, %v16926_v30  ;;  %v13816_v62 = vmul.f32 %v16860_v31, %v16974_v14  ;;  %v17006_v58 = vld [vmem:[#allocation184_spill] sm:$0xff]  ;;  %v17016_v57 = vld [vmem:[#allocation162_spill] sm:$0xff] }
 0xca5   : > { %v13775_v40 = vpop.permute.xlu1 %5131  ;;  %4676 = vrot.lane.b32.xlu0 %v4643_v46, %s9381_s29  ;;  %v3898_v59 = vsel %vm2982_vm3, %v17004_v17, %v16986_v60  ;;  %v4391_v61 = vmul.f32 %v13390_v48, %v16511_v36  ;;  %v4177_v56 = vadd.f32 %v16870_v29, %v4061_v28  ;;  %v4358_v60 = vsel %vm4357_vm2, %v17006_v58, %v17005_v20  ;;  %v13835_v46 = vpop.permute.xlu0 %5485  ;;  %v17017_v28 = vld [vmem:[#allocation165_spill] sm:$0xff] }
 0xca6   : > { %16999 = vst [vmem:[#allocation106_spill] sm:$0xff] %v13775_v40  ;;  %v3664_v8 = vadd.f32 %v16984_v15, %v3546_v7  ;;  %v4359_v25 = vsel %vm4357_vm2, %v17005_v20, %v17007_v2  ;;  %v3918_v55 = vadd.f32 %v3898_v59, %v3810_v51  ;;  %v4379_v29 = vadd.f32 %v4358_v60, %v4249_v33  ;;  %v17011_v15 = vld [vmem:[#allocation194_spill] sm:$0xff]  ;;  %v17019_v51 = vld [vmem:[#allocation176_spill] sm:$0xff]  ;;  %v17024_v20 = vld [vmem:[#allocation199_spill] sm:$0xff] }
 0xca7   : > { %17010 = vst [vmem:[#allocation55_spill] sm:$0xff] %v13835_v46  ;;  %v4380_v11 = vadd.f32 %v4359_v25, %v4250_v13  ;;  %v3816_v23 = vmul.f32 %v17012_v26, %v13394_v9  ;;  %v13842_v12 = vmul.f32 %v16860_v31, %v16926_v30  ;;  %v13846_v27 = vmul.f32 %v13390_v48, %v16569_v18  ;;  %v17018_v48 = vld [vmem:[#allocation34_spill] sm:$0xff]  ;;  %v17020_v13 = vld [vmem:[#allocation39_spill] sm:$0xff]  ;;  %v17026_v25 = vld [vmem:[#allocation41_spill] sm:$0xff] }
 0xca8   : > { %3704 = vrot.lane.b32.xlu1 %v3669_v19, %s9377_s26  ;;  %v3818_v0 = vmul.f32 %v17012_v26, %v3786_v41  ;;  %v17015_v19 = vld [vmem:[#allocation129_spill] sm:$0xff]  ;;  %v4419_v16 = vmul.f32 %v17017_v28, %v4391_v61  ;;  %v4420_v9 = vmul.f32 %v17017_v28, %v13803_v35  ;;  %v3817_v31 = vmul.f32 %v17012_v26, %v3785_v38  ;;  %v13872_v59 = vld [vmem:[%s15688_s3 + $0x50] sm:$0xff]  ;;  %v17025_v60 = vld [vmem:[#allocation147_spill] sm:$0xff] }
 0xca9   : > { %v13794_v45 = vpop.permute.xlu1 %4602  ;;  %5716 = vperm.xlu0 %9241, %v13782_v54   ;;  %17013 = vst [vmem:[#allocation77_spill] sm:$0xff] %v13842_v12  ;;  %v13853_v44 = vsel %vm4035_vm15, %v17016_v57, %v17015_v19  ;;  %v4036_v43 = vsel %vm4035_vm15, %v17018_v48, %v16992_v4  ;;  %v4507_v33 = vsel %vm2982_vm3, %v17020_v13, %v17019_v51  ;;  %v17021_v17 = vmov 0   ;;  %17022 = vst [vmem:[#allocation197_spill] sm:$0xff] %v13872_v59  ;;  %v17023_v61 = vld [vmem:[#allocation121_spill] sm:$0xff]  ;;  %v17028_v26 = vld [vmem:[#allocation139_spill] sm:$0xff] }
 0xcaa   : > { %17003 = vst [vmem:[#allocation54_spill] sm:$0xff] %v13794_v45  ;;  %v3926_v38 = vadd.f32 %v17023_v61, %v3818_v0  ;;  %v4432_v4 = vadd.f32 %v4420_v9, %v4380_v11  ;;  %v4423_v2 = vmul.f32 %v17025_v60, %v13803_v35  ;;  %v13898_v11 = vmul.f32 %v17015_v19, %v16513_v47  ;;  %v13900_v0 = vpop.permute.xlu0 %5377  ;;  %v17033_v9 = vld [vmem:[#allocation130_spill] sm:$0xff]  ;;  %v17045_v45 = vld [vmem:[#allocation177_spill] sm:$0xff]  ;;  %v17046_v12 = vld [vmem:[#allocation107_spill] sm:$0xff] }
 0xcab   : > { %17031 = vst [vmem:[#allocation120_spill] sm:$0xff] %v13900_v0  ;;  %v13920_v5 = vmul.f32 0.0, %v17016_v57  ;;  %v17070_v40 = vld [vmem:[#allocation91_spill] sm:$0xff] }
 0xcac   : > { %5788 = vperm.xlu1 %9251, %v13339_v52   ;;  %v4361_v52 = vsel %vm4357_vm2, %v16874_v21, %v17009_v32  ;;  %v4253_v21 = vadd.f32 %v17014_v10, %v4177_v56  ;;  %v4056_v56 = vadd.f32 %v4036_v43, %v3918_v55  ;;  %v13880_v32 = vmul.f32 %v17015_v19, %v17026_v25 }
 0xcad   : > { %v13829_v22 = vpop.permute.xlu1 %5239  ;;  %9257 = vset.pattern.permute.xlu0 %v16886_v49  ;;  %v13890_v55 = vmul.f32 %v17015_v19, %v16458_v63  ;;  %17030 = vst [vmem:[#allocation70_spill] sm:$0xff] %v13898_v11 }
 0xcae   : > { %17008 = vst [vmem:[#allocation108_spill] sm:$0xff] %v13829_v22  ;;  %5760 = vperm.xlu0 %9257, %v17011_v15   ;;  %v4383_v7 = vadd.f32 %v4361_v52, %v4253_v21  ;;  %v13883_v52 = vmul.f32 0.0, %v13853_v44  ;;  %v17027_v15 = vld [vmem:[#allocation33_spill] sm:$0xff] }
 0xcaf   : > { %v4615_v10 = vsel %vm4035_vm15, %v17028_v26, %v17027_v15 }
 0xcb0   : > { %3694 = vrot.lane.b32.xlu1 %v3664_v8, %s9377_s26  ;;  %v4431_v8 = vadd.f32 %v4419_v16, %v4379_v29  ;;  %v13894_v29 = vmul.f32 %v17015_v19, %v16511_v36  ;;  %v17032_v16 = vld [vmem:[#allocation156_spill] sm:$0xff]  ;;  %v4435_v63 = vadd.f32 %v4423_v2, %v4383_v7  ;;  %v13928_v2 = vmul.f32 %v17015_v19, %v16569_v18 }
 0xcb1   : > { %v13866_v41 = vpop.permute.xlu1 %5243  ;;  %9252 = vset.pattern.permute.xlu1 %v17021_v17  ;;  %v3902_v48 = vsel %vm2982_vm3, %v17033_v9, %v17032_v16  ;;  %v3903_v43 = vsel %vm2982_vm3, %v17032_v16, %v17023_v61  ;;  %v4528_v9 = vadd.f32 %v17019_v51, %v4432_v4  ;;  %v4762_v61 = vmul.f32 %v17015_v19, %v16926_v30  ;;  %v17039_v51 = vld [vmem:[#allocation49_spill] sm:$0xff]  ;;  %v17042_v18 = vld [vmem:[#allocation172_spill] sm:$0xff] }
 0xcb2   : > { %5776 = vperm.xlu0 %9257, %v17024_v20   ;;  %17029 = vst [vmem:[#allocation51_spill] sm:$0xff] %v13894_v29  ;;  %v4527_v21 = vadd.f32 %v4507_v33, %v4431_v8  ;;  %v17034_v20 = vld [vmem:[#allocation131_spill] sm:$0xff]  ;;  %v17036_v33 = vld [vmem:[#allocation161_spill] sm:$0xff]  ;;  %v17037_v8 = vld [vmem:[#allocation190_spill] sm:$0xff]  ;;  %v13930_v16 = vadd.f32 %v3902_v48, %v3816_v23  ;;  %v4765_v4 = vmul.f32 %v17015_v19, %v17039_v51 }
 0xcb3   : > { %v4152_v60 = vsel %vm3422_vm10, %v17034_v20, %v16997_v3  ;;  %v4859_v22 = vsel %vm4035_vm15, %v17037_v8, %v17036_v33  ;;  %v17038_v3 = vld [vmem:[#allocation133_spill] sm:$0xff]  ;;  %v4531_v0 = vadd.f32 %v17045_v45, %v4435_v63  ;;  %v17048_v51 = vld [vmem:[#allocation164_spill] sm:$0xff]  ;;  %v5286_v63 = vmul.f32 %v17016_v57, %v17026_v25  ;;  %v17061_v57 = vld [vmem:[#allocation191_spill] sm:$0xff] }
 0xcb4   : > { %5691 = vperm.xlu1 %9252, %v13872_v59   ;;  %v4172_v37 = vadd.f32 %v4152_v60, %v4056_v56  ;;  %v4635_v46 = vadd.f32 %v4615_v10, %v4527_v21  ;;  %v4790_v7 = vmul.f32 %v17038_v3, %v13883_v52  ;;  %v13934_v56 = vmul.f32 %v17015_v19, %v16974_v14  ;;  %v17040_v10 = vld [vmem:[#allocation5_spill] sm:$0xff]  ;;  %v13966_v45 = vld [vmem:[%s15688_s3 + $0x60] sm:$0xff] }
 0xcb5   : > { %v13912_v54 = vpop.permute.xlu1 %5247  ;;  %v17041_v21 = vld [vmem:[#allocation29_spill] sm:$0xff]  ;;  %v3925_v60 = vadd.f32 %v3903_v43, %v3817_v31  ;;  %v13954_v31 = vpop.permute.xlu0 %5381  ;;  %v4636_v43 = vadd.f32 %v17027_v15, %v4528_v9  ;;  %v4794_v36 = vmul.f32 %v17048_v51, %v4762_v61  ;;  %17049 = vst [vmem:[#allocation200_spill] sm:$0xff] %v13966_v45  ;;  %v5287_v15 = vmul.f32 %v13853_v44, %v16513_v47 }
 0xcb6   : > { %17035 = vst [vmem:[#allocation154_spill] sm:$0xff] %v13912_v54  ;;  %5784 = vperm.xlu0 %9257, %v13715_v53   ;;  %v5005_v20 = vsel %vm815_vm7, %v17041_v21, %v17040_v10  ;;  %v5039_v53 = vmul.f32 %v13853_v44, %v17026_v25  ;;  %v17043_v23 = vld [vmem:[#allocation141_spill] sm:$0xff]  ;;  %v4878_v30 = vadd.f32 %v4859_v22, %v4790_v7  ;;  %17047 = vst [vmem:[#allocation24_spill] sm:$0xff] %v13954_v31  ;;  %v17053_v25 = vld [vmem:[#allocation60_spill] sm:$0xff] }
 0xcb7   : > { %v4041_v48 = vsel %vm4035_vm15, %v17043_v23, %v17042_v18  ;;  %v3821_v10 = vmul.f32 %v17046_v12, %v13807_v24  ;;  %v4789_v22 = vmul.f32 %v17038_v3, %v13920_v5  ;;  %v4064_v12 = vadd.f32 %v17042_v18, %v3926_v38  ;;  %v17055_v38 = vld [vmem:[#allocation189_spill] sm:$0xff] }
 0xcb8   : > { %4660 = vrot.lane.b32.xlu1 %v4635_v46, %s9381_s29  ;;  %v4248_v46 = vadd.f32 %v17002_v6, %v4172_v37  ;;  %v5027_v7 = vadd.f32 %v5005_v20, %v4878_v30  ;;  %v4418_v37 = vmul.f32 %v17017_v28, %v13816_v62  ;;  %v17050_v6 = vld [vmem:[#allocation80_spill] sm:$0xff]  ;;  %v17051_v30 = vld [vmem:[#allocation167_spill] sm:$0xff]  ;;  %v4063_v61 = vadd.f32 %v4041_v48, %v3925_v60  ;;  %v17052_v20 = vld [vmem:[#allocation150_spill] sm:$0xff] }
 0xcb9   : > { %v13947_v11 = vpop.permute.xlu1 %5367  ;;  %9253 = vset.pattern.permute.xlu1 %v16886_v49  ;;  %v4425_v24 = vmul.f32 %v17050_v6, %v13846_v27  ;;  %v5067_v9 = vmul.f32 %v17051_v30, %v5039_v53  ;;  %v4877_v51 = vadd.f32 %v17037_v8, %v4789_v22  ;;  %v17054_v28 = vld [vmem:[#allocation123_spill] sm:$0xff]  ;;  %v17057_v53 = vld [vmem:[#allocation182_spill] sm:$0xff]  ;;  %v4426_v48 = vmul.f32 %v17050_v6, %v13803_v35  ;;  %v17059_v31 = vld [vmem:[#allocation169_spill] sm:$0xff] }
 0xcba   : > { %17044 = vst [vmem:[#allocation85_spill] sm:$0xff] %v13947_v11  ;;  %5792 = vperm.xlu0 %9257, %v13872_v59   ;;  %v4157_v59 = vsel %vm3422_vm10, %v17053_v25, %v17052_v20  ;;  %v3929_v27 = vadd.f32 %v17054_v28, %v3821_v10  ;;  %v4378_v18 = vadd.f32 %v17006_v58, %v4248_v46  ;;  %v17056_v11 = vld [vmem:[#allocation145_spill] sm:$0xff]  ;;  %v17063_v6 = vld [vmem:[#allocation178_spill] sm:$0xff] }
 0xcbb   : > { %v5136_v47 = vsel %vm4035_vm15, %v17056_v11, %v17055_v38  ;;  %v4639_v60 = vadd.f32 %v17057_v53, %v4531_v0  ;;  %v5026_v22 = vadd.f32 %v17041_v21, %v4877_v51  ;;  %v5079_v10 = vadd.f32 %v5067_v9, %v5027_v7  ;;  %v13999_v38 = vpop.permute.xlu0 %5489  ;;  %v17062_v0 = vld [vmem:[#allocation135_spill] sm:$0xff]  ;;  %v17064_v51 = vld [vmem:[#allocation40_spill] sm:$0xff]  ;;  %v17065_v7 = vld [vmem:[#allocation13_spill] sm:$0xff] }
 0xcbc   : > { %4662 = vrot.lane.b32.xlu1 %v4636_v43, %s9381_s29  ;;  %v17058_v43 = vld [vmem:[#allocation104_spill] sm:$0xff]  ;;  %v5066_v58 = vmul.f32 %v17051_v30, %v13920_v5  ;;  %v4179_v46 = vadd.f32 %v4157_v59, %v4063_v61  ;;  %v4180_v28 = vadd.f32 %v17052_v20, %v4064_v12  ;;  %17060 = vst [vmem:[#allocation15_spill] sm:$0xff] %v13999_v38  ;;  %v17067_v20 = vld [vmem:[#allocation173_spill] sm:$0xff] }
 0xcbd   : > { %v13981_v62 = vpop.permute.xlu1 %5371  ;;  %v4234_v8 = vsel %vm3637_vm14, %v17059_v31, %v17058_v43  ;;  %v5253_v53 = vsel %vm815_vm7, %v17062_v0, %v17061_v57  ;;  %v4040_v34 = vsel %vm4035_vm15, %v17063_v6, %v17043_v23  ;;  %v4882_v21 = vadd.f32 %v17064_v51, %v4794_v36  ;;  %v17068_v38 = vld [vmem:[#allocation52_spill] sm:$0xff]  ;;  %v17069_v57 = vld [vmem:[#allocation42_spill] sm:$0xff]  ;;  %v17071_v6 = vld [vmem:[#allocation143_spill] sm:$0xff] }
 0xcbe   : > { %5800 = vperm.xlu0 %9257, %v13966_v45   ;;  %v4506_v59 = vsel %vm2982_vm3, %v17065_v7, %v17020_v13  ;;  %v5155_v9 = vadd.f32 %v5136_v47, %v5079_v10  ;;  %v4255_v61 = vadd.f32 %v4234_v8, %v4179_v46  ;;  %v4067_v30 = vadd.f32 %v17067_v20, %v3929_v27  ;;  %v17072_v8 = vld [vmem:[#allocation11_spill] sm:$0xff]  ;;  %v17073_v7 = vld [vmem:[#allocation8_spill] sm:$0xff]  ;;  %v17074_v20 = vld [vmem:[#allocation98_spill] sm:$0xff] }
 0xcbf   : > { %v4430_v29 = vadd.f32 %v4418_v37, %v4378_v18  ;;  %v4363_v23 = vsel %vm4357_vm2, %v17068_v38, %v17070_v40  ;;  %v5078_v36 = vadd.f32 %v5066_v58, %v5026_v22  ;;  %v4614_v13 = vsel %vm4035_vm15, %v17071_v6, %v17028_v26  ;;  %v17075_v37 = vld [vmem:[#allocation122_spill] sm:$0xff]  ;;  %v17076_v18 = vld [vmem:[#allocation193_spill] sm:$0xff] }
 0xcc0   : > { %4668 = vrot.lane.b32.xlu1 %v4639_v60, %s9381_s29  ;;  %v4362_v60 = vsel %vm4357_vm2, %v17069_v57, %v17068_v38  ;;  %v5275_v47 = vadd.f32 %v5253_v53, %v5155_v9  ;;  %v4256_v10 = vadd.f32 %v17058_v43, %v4180_v28  ;;  %v4797_v46 = vmul.f32 %v17072_v8, %v4765_v4  ;;  %v17077_v38 = vld [vmem:[#allocation89_spill] sm:$0xff]  ;;  %v17078_v43 = vld [vmem:[#allocation26_spill] sm:$0xff] }
 0xcc1   : > { %v14012_v12 = vpop.permute.xlu1 %5475  ;;  %v4526_v27 = vadd.f32 %v4506_v59, %v4430_v29  ;;  %v5071_v40 = vmul.f32 %v17076_v18, %v13928_v2  ;;  %v5315_v22 = vmul.f32 %v17077_v38, %v5287_v15  ;;  %v4385_v58 = vadd.f32 %v4362_v60, %v4255_v61  ;;  %v14037_v59 = vpop.permute.xlu0 %5493  ;;  %v17079_v6 = vld [vmem:[#allocation94_spill] sm:$0xff]  ;;  %v17081_v60 = vld [vmem:[#allocation87_spill] sm:$0xff] }
 0xcc2   : > { %17066 = vst [vmem:[#allocation119_spill] sm:$0xff] %v14012_v12  ;;  %v5008_v12 = vsel %vm815_vm7, %v17074_v20, %v17073_v7  ;;  %v5154_v26 = vadd.f32 %v17056_v11, %v5078_v36  ;;  %v4183_v28 = vadd.f32 %v17078_v43, %v4067_v30  ;;  %v4386_v4 = vadd.f32 %v4363_v23, %v4256_v10  ;;  %v17080_v7 = vld [vmem:[#allocation95_spill] sm:$0xff]  ;;  %v17082_v23 = vld [vmem:[#allocation97_spill] sm:$0xff] }
 0xcc3   : > { %v4634_v29 = vadd.f32 %v4614_v13, %v4526_v27  ;;  %v5384_v9 = vsel %vm4035_vm15, %v13981_v62, %v13732_v39  ;;  %v4365_v2 = vsel %vm4357_vm2, %v17080_v7, %v17079_v6  ;;  %v4795_v15 = vmul.f32 %v17072_v8, %v13920_v5  ;;  %v17083_v10 = vld [vmem:[#allocation61_spill] sm:$0xff]  ;;  %v17085_v7 = vld [vmem:[#allocation128_spill] sm:$0xff]  ;;  %v17086_v39 = vld [vmem:[#allocation186_spill] sm:$0xff] }
 0xcc4   : > { %5796 = vperm.xlu1 %9253, %v17075_v37   ;;  %v5031_v11 = vadd.f32 %v5008_v12, %v4882_v21  ;;  %v5327_v61 = vadd.f32 %v5315_v22, %v5275_v47  ;;  %v4259_v36 = vadd.f32 %v17081_v60, %v4183_v28  ;;  %v5314_v30 = vmul.f32 %v17077_v38, %v5286_v63  ;;  %v17084_v27 = vld [vmem:[#allocation137_spill] sm:$0xff]  ;;  %v17087_v22 = vld [vmem:[#allocation56_spill] sm:$0xff] }
 0xcc5   : > { %v14034_v53 = vpop.permute.xlu1 %5479  ;;  %v4885_v13 = vadd.f32 %v17082_v23, %v4797_v46  ;;  %v5010_v37 = vsel %vm815_vm7, %v17084_v27, %v17083_v10  ;;  %v5274_v43 = vadd.f32 %v17062_v0, %v5154_v26  ;;  %v4437_v6 = vadd.f32 %v4425_v24, %v4385_v58  ;;  %v17088_v24 = vld [vmem:[#allocation134_spill] sm:$0xff] }
 0xcc6   : > { %v4511_v21 = vsel %vm2982_vm3, %v17086_v39, %v17085_v7  ;;  %v5403_v12 = vadd.f32 %v5384_v9, %v5327_v61  ;;  %v4438_v63 = vadd.f32 %v4426_v48, %v4386_v4  ;;  %v4389_v46 = vadd.f32 %v4365_v2, %v4259_v36  ;;  %v17089_v58 = vld [vmem:[#allocation46_spill] sm:$0xff]  ;;  %v17090_v61 = vld [vmem:[#allocation163_spill] sm:$0xff] }
 0xcc7   : > { %v4883_v28 = vadd.f32 %v17087_v22, %v4795_v15  ;;  %v5083_v60 = vadd.f32 %v5071_v40, %v5031_v11  ;;  %v5034_v0 = vadd.f32 %v5010_v37, %v4885_v13  ;;  %v4619_v26 = vsel %vm4035_vm15, %v17089_v58, %v17088_v24  ;;  %v14074_v15 = vpop.permute.xlu0 %5497  ;;  %v17091_v11 = vld [vmem:[#allocation195_spill] sm:$0xff]  ;;  %v17092_v13 = vld [vmem:[#allocation114_spill] sm:$0xff] }
 0xcc8   : > { %4658 = vrot.lane.b32.xlu1 %v4634_v29, %s9381_s29  ;;  %v4791_v9 = vmul.f32 %v17038_v3, %v13880_v32  ;;  %v5074_v48 = vmul.f32 %v17090_v61, %v13890_v55  ;;  %v4429_v4 = vmul.f32 %v16979_v1, %v13803_v35  ;;  %v4533_v2 = vadd.f32 %v4511_v21, %v4437_v6  ;;  %v17094_v6 = vld [vmem:[#allocation155_spill] sm:$0xff] }
 0xcc9   : > { %v14058_v47 = vpop.permute.xlu1 %5483  ;;  %9254 = vset.pattern.permute.xlu1 %v17021_v17  ;;  %v4062_v40 = vadd.f32 %v4040_v34, %v13930_v16  ;;  %v4156_v36 = vsel %vm3422_vm10, %v17091_v11, %v17053_v25  ;;  %v4788_v32 = vmul.f32 %v17092_v13, %v13934_v56  ;;  %v5326_v3 = vadd.f32 %v5314_v30, %v5274_v43  ;;  %v14093_v25 = vld [vmem:[%s15688_s3 + $0x70] sm:$0xff]  ;;  %v17095_v16 = vld [vmem:[#allocation32_spill] sm:$0xff]  ;;  %v17096_v43 = vld [vmem:[#allocation59_spill] sm:$0xff] }
 0xcca   : > { %v5501_v29 = vsel %vm815_vm7, %v13786_v42, %v14058_v47  ;;  %v4441_v1 = vadd.f32 %v4429_v4, %v4389_v46  ;;  %v4534_v35 = vadd.f32 %v17085_v7, %v4438_v63  ;;  %v4641_v55 = vadd.f32 %v4619_v26, %v4533_v2  ;;  %v17097_v63 = vld [vmem:[#allocation160_spill] sm:$0xff]  ;;  %v17101_v2 = vld [vmem:[#allocation170_spill] sm:$0xff] }
 0xccb   : > { %v5523_v10 = vadd.f32 %v5501_v29, %v5403_v12  ;;  %v5256_v34 = vsel %vm815_vm7, %v17094_v6, %v13866_v41  ;;  %v5032_v56 = vadd.f32 %v17095_v16, %v4883_v28  ;;  %v5086_v30 = vadd.f32 %v5074_v48, %v5034_v0  ;;  %v17098_v46 = vld [vmem:[#allocation188_spill] sm:$0xff]  ;;  %v17099_v0 = vld [vmem:[#allocation27_spill] sm:$0xff] }
 0xccc   : > { %5701 = vperm.xlu1 %9254, %v13966_v45   ;;  %v5159_v21 = vadd.f32 %v17096_v43, %v5083_v60  ;;  %v5402_v12 = vadd.f32 %v13981_v62, %v5326_v3  ;;  %v5072_v7 = vmul.f32 %v17090_v61, %v13920_v5  ;;  %v4858_v29 = vsel %vm4035_vm15, %v17098_v46, %v17097_v63  ;;  %v17100_v62 = vld [vmem:[#allocation110_spill] sm:$0xff]  ;;  %v17126_v43 = vld [vmem:[#allocation63_spill] sm:$0xff] }
 0xccd   : > { %v14083_v37 = vpop.permute.xlu1 %5375  ;;  %5551 = vrot.lane.b32.xlu0 %v5523_v10, %s9379_s23  ;;  %v4178_v41 = vadd.f32 %v4156_v36, %v4062_v40  ;;  %v4787_v26 = vmul.f32 %v17092_v13, %v13883_v52  ;;  %v14107_v28 = vmul.f32 0.0, %v17015_v19  ;;  %v4876_v60 = vadd.f32 %v17097_v63, %v4788_v32  ;;  %v14122_v36 = vpop.permute.xlu0 %5646  ;;  %v17102_v32 = vld [vmem:[#allocation196_spill] sm:$0xff]  ;;  %v17104_v63 = vld [vmem:[#allocation73_spill] sm:$0xff] }
 0xcce   : > { %17093 = vst [vmem:[#allocation158_spill] sm:$0xff] %v14083_v37  ;;  %v5004_v10 = vsel %vm815_vm7, %v17100_v62, %v17099_v0  ;;  %v5279_v48 = vadd.f32 %v5256_v34, %v5159_v21  ;;  %v5003_v40 = vsel %vm815_vm7, %v17101_v2, %v17100_v62  ;;  %v4642_v19 = vadd.f32 %v17088_v24, %v4534_v35 }
 0xccf   : > { %v4537_v11 = vadd.f32 %v13383_v50, %v4441_v1  ;;  %v5258_v3 = vsel %vm815_vm7, %v13912_v54, %v17102_v32  ;;  %v5084_v21 = vadd.f32 %v5072_v7, %v5032_v56  ;;  %v5162_v0 = vadd.f32 %v17104_v63, %v5086_v30  ;;  %v17105_v32 = vld [vmem:[#allocation106_spill] sm:$0xff]  ;;  %v17124_v63 = vld [vmem:[#allocation120_spill] sm:$0xff] }
 0xcd0   : > { %4672 = vrot.lane.b32.xlu1 %v4641_v55, %s9381_s29  ;;  %v17103_v55 = vld [vmem:[#allocation127_spill] sm:$0xff]  ;;  %v5522_v37 = vadd.f32 %v13786_v42, %v5402_v12  ;;  %v4879_v62 = vadd.f32 %v17036_v33, %v4791_v9  ;;  %v4254_v24 = vadd.f32 %v17059_v31, %v4178_v41  ;;  %v4875_v35 = vadd.f32 %v4858_v29, %v4787_v26  ;;  %v17108_v30 = vld [vmem:[#allocation166_spill] sm:$0xff]  ;;  %v17109_v12 = vld [vmem:[#allocation100_spill] sm:$0xff] }
 0xcd1   : > { %v14113_v4 = vpop.permute.xlu1 %5379  ;;  %5808 = vperm.xlu0 %9257, %v14093_v25   ;;  %9255 = vset.pattern.permute.xlu1 %v16886_v49  ;;  %v5319_v34 = vmul.f32 %v17103_v55, %v14107_v28  ;;  %v5025_v50 = vadd.f32 %v5004_v10, %v4876_v60  ;;  %v5036_v1 = vmul.f32 %v13853_v44, %v16974_v14  ;;  %v17107_v42 = vld [vmem:[#allocation51_spill] sm:$0xff]  ;;  %v17110_v29 = vmov 2   ;;  %v17111_v41 = vld [vmem:[#allocation44_spill] sm:$0xff]  ;;  %v17112_v60 = vld [vmem:[#allocation49_spill] sm:$0xff] }
 0xcd2   : > { %v5160_v45 = vadd.f32 %v17105_v32, %v5084_v21  ;;  %v5282_v55 = vadd.f32 %v5258_v3, %v5162_v0  ;;  %v5065_v33 = vmul.f32 %v17108_v30, %v17107_v42  ;;  %v5024_v9 = vadd.f32 %v5003_v40, %v4875_v35  ;;  %v17113_v10 = vld [vmem:[#allocation162_spill] sm:$0xff]  ;;  %v17118_v0 = vld [vmem:[#allocation80_spill] sm:$0xff]  ;;  %v17119_v35 = vld [vmem:[#allocation187_spill] sm:$0xff] }
 0xcd3   : > { %v5331_v54 = vadd.f32 %v5319_v34, %v5279_v48  ;;  %v4384_v31 = vadd.f32 %v17069_v57, %v4254_v24  ;;  %v4645_v7 = vadd.f32 %v17109_v12, %v4537_v11  ;;  %v5284_v26 = vmul.f32 %v13853_v44, %v17111_v41  ;;  %v17116_v34 = vld [vmem:[#allocation5_spill] sm:$0xff]  ;;  %v17120_v42 = vld [vmem:[#allocation102_spill] sm:$0xff]  ;;  %v14160_v41 = vpop.permute.xlu0 %5651 }
 0xcd4   : > { %4674 = vrot.lane.b32.xlu1 %v4642_v19, %s9381_s29  ;;  %v5292_v48 = vmul.f32 %v17113_v10, %v17112_v60  ;;  %v17114_v19 = vld [vmem:[#allocation192_spill] sm:$0xff]  ;;  %v5064_v40 = vmul.f32 %v17108_v30, %v5036_v1  ;;  %v17117_v57 = vld [vmem:[#allocation77_spill] sm:$0xff]  ;;  %v5077_v24 = vadd.f32 %v5065_v33, %v5025_v50  ;;  %v5135_v12 = vsel %vm4035_vm15, %v17120_v42, %v17119_v35 }
 0xcd5   : > { %v14137_v56 = vpop.permute.xlu1 %5487  ;;  %5549 = vrot.lane.b32.xlu0 %v5522_v37, %s9379_s23  ;;  %v5322_v3 = vmul.f32 %v17114_v19, %v14107_v28  ;;  %v17115_v37 = vld [vmem:[#allocation118_spill] sm:$0xff]  ;;  %v4424_v11 = vmul.f32 %v17118_v0, %v17117_v57  ;;  %17121 = vst [vmem:[#allocation168_spill] sm:$0xff] %v14160_v41  ;;  %v17123_v32 = vld [vmem:[#allocation181_spill] sm:$0xff]  ;;  %v5407_v61 = vadd.f32 %v17124_v63, %v5331_v54  ;;  %v17125_v0 = vld [vmem:[#allocation15_spill] sm:$0xff]  ;;  %vm7761_vm10 = vcmask 1046534  }
 0xcd6   : > { %17106 = vst [vmem:[#allocation138_spill] sm:$0xff] %v14137_v56  ;;  %9260 = vset.pattern.permute.xlu0 %v17110_v29  ;;  %v5006_v21 = vsel %vm815_vm7, %v17116_v34, %v17115_v37  ;;  %v17122_v29 = vld [vmem:[#allocation18_spill] sm:$0xff]  ;;  %v5280_v37 = vadd.f32 %v17123_v32, %v5160_v45  ;;  %v5076_v50 = vadd.f32 %v5064_v40, %v5024_v9  ;;  %v17132_v40 = vld [vmem:[#allocation81_spill] sm:$0xff] }
 0xcd7   : > { %v4510_v56 = vsel %vm2982_vm3, %v17122_v29, %v17086_v39  ;;  %v5334_v34 = vadd.f32 %v5322_v3, %v5282_v55  ;;  %v5028_v57 = vadd.f32 %v5006_v21, %v4879_v62  ;;  %v4436_v33 = vadd.f32 %v4424_v11, %v4384_v31  ;;  %v17128_v39 = vld [vmem:[#allocation54_spill] sm:$0xff]  ;;  %v17130_v3 = vld [vmem:[#allocation167_spill] sm:$0xff]  ;;  %v17131_v21 = vld [vmem:[#allocation68_spill] sm:$0xff] }
 0xcd8   : > { %4680 = vrot.lane.b32.xlu1 %v4645_v7, %s9381_s29  ;;  %v5320_v41 = vmul.f32 %v17114_v19, %v5292_v48  ;;  %v17127_v7 = vld [vmem:[#allocation25_spill] sm:$0xff]  ;;  %v4618_v45 = vsel %vm4035_vm15, %v17128_v39, %v17089_v58  ;;  %v17129_v29 = vld [vmem:[#allocation70_spill] sm:$0xff]  ;;  %v4786_v62 = vmul.f32 %v17092_v13, %v13920_v5  ;;  %v5152_v9 = vadd.f32 %v5135_v12, %v5076_v50  ;;  %v17133_v58 = vld [vmem:[#allocation24_spill] sm:$0xff]  ;;  %v14190_v13 = vpop.permute.xlu0 %5666 }
 0xcd9   : > { %v5492_v1 = vpop.permute.xlu1 %5491  ;;  %v5251_v42 = vsel %vm815_vm7, %v17127_v7, %v17126_v43  ;;  %v5068_v54 = vmul.f32 %v17130_v3, %v17129_v29  ;;  %v4532_v31 = vadd.f32 %v4510_v56, %v4436_v33  ;;  %v5153_v48 = vadd.f32 %v17119_v35, %v5077_v24  ;;  %v17134_v35 = vld [vmem:[#allocation67_spill] sm:$0xff]  ;;  %v17135_v12 = vld [vmem:[#allocation53_spill] sm:$0xff] }
 0xcda   : > { %v5504_v6 = vsel %vm815_vm7, %v17125_v0, %v5492_v1  ;;  %v5252_v11 = vsel %vm815_vm7, %v17126_v43, %v17132_v40  ;;  %v5332_v1 = vadd.f32 %v5320_v41, %v5280_v37  ;;  %v5272_v39 = vadd.f32 %v5251_v42, %v5152_v9  ;;  %v17136_v41 = vld [vmem:[#allocation71_spill] sm:$0xff]  ;;  %v17138_v42 = vld [vmem:[#allocation88_spill] sm:$0xff] }
 0xcdb   : > { %v5527_v55 = vadd.f32 %v5504_v6, %v5407_v61  ;;  %v5410_v61 = vadd.f32 %v17133_v58, %v5334_v34  ;;  %v5080_v6 = vadd.f32 %v5068_v54, %v5028_v57  ;;  %v4640_v56 = vadd.f32 %v4618_v45, %v4532_v31  ;;  %v17137_v57 = vld [vmem:[#allocation38_spill] sm:$0xff]  ;;  %v17139_v45 = vld [vmem:[#allocation12_spill] sm:$0xff]  ;;  %v17142_v31 = vld [vmem:[#allocation191_spill] sm:$0xff] }
 0xcdc   : > { %5804 = vperm.xlu1 %9255, %v17131_v21   ;;  %v2653_v43 = vsel %vm1273_vm4, %v17135_v12, %v17134_v35  ;;  %v2654_v37 = vsel %vm1273_vm4, %v17134_v35, %v17136_v41  ;;  %v5408_v34 = vadd.f32 %v14113_v4, %v5332_v1  ;;  %v2655_v33 = vsel %vm1273_vm4, %v17138_v42, %v17137_v57  ;;  %v17141_v9 = vld [vmem:[#allocation136_spill] sm:$0xff]  ;;  %v17144_v1 = vld [vmem:[#allocation85_spill] sm:$0xff] }
 0xcdd   : > { %v14186_v19 = vpop.permute.xlu1 %5495  ;;  %5559 = vrot.lane.b32.xlu0 %v5527_v55, %s9379_s23  ;;  %v2656_v55 = vsel %vm1273_vm4, %v17137_v57, %v17139_v45  ;;  %v5273_v3 = vadd.f32 %v5252_v11, %v5153_v48  ;;  %v14212_v54 = vmul.f32 %v17113_v10, %v16974_v14  ;;  %v5254_v21 = vsel %vm815_vm7, %v17142_v31, %v17141_v9  ;;  %v17143_v40 = vld [vmem:[#allocation72_spill] sm:$0xff]  ;;  %v17145_v11 = vld [vmem:[#allocation189_spill] sm:$0xff]  ;;  %v17148_v45 = vld [vmem:[#allocation103_spill] sm:$0xff] }
 0xcde   : > { %v5506_v24 = vsel %vm815_vm7, %v14186_v19, %v14074_v15  ;;  %v17140_v15 = vld [vmem:[#allocation82_spill] sm:$0xff]  ;;  %v4874_v48 = vadd.f32 %v17098_v46, %v4786_v62  ;;  %v17146_v12 = vld [vmem:[#allocation45_spill] sm:$0xff]  ;;  %v17147_v57 = vld [vmem:[#allocation76_spill] sm:$0xff]  ;;  %v5528_v31 = vadd.f32 %v14037_v59, %v5408_v34  ;;  %vm7757_vm3 = vcmask 1044484  }
 0xcdf   : > { %v5530_v50 = vadd.f32 %v5506_v24, %v5410_v61  ;;  %v5312_v29 = vmul.f32 %v17140_v15, %v5284_v26  ;;  %v5383_v61 = vsel %vm4035_vm15, %v17144_v1, %v17143_v40  ;;  %v5313_v26 = vmul.f32 %v17140_v15, %v14107_v28  ;;  %v17149_v9 = vld [vmem:[#allocation119_spill] sm:$0xff]  ;;  %v17150_v14 = vld [vmem:[#allocation164_spill] sm:$0xff] }
 0xce0   : > { %4670 = vrot.lane.b32.xlu1 %v4640_v56, %s9381_s29  ;;  %v5156_v56 = vadd.f32 %v17145_v11, %v5080_v6  ;;  %v5042_v41 = vmul.f32 %v13853_v44, %v17146_v12  ;;  %v4860_v42 = vsel %vm4035_vm15, %v17147_v57, %v17064_v51  ;;  %v14237_v6 = vpop.permute.xlu0 %5671  ;;  %v5063_v51 = vmul.f32 %v17108_v30, %v13920_v5 }
 0xce1   : > { %v5642_v24 = vpop.permute.xlu1 %5641  ;;  %5565 = vrot.lane.b32.xlu0 %v5530_v50, %s9379_s23  ;;  %9256 = vset.pattern.permute.xlu1 %v17021_v17  ;;  %v5324_v35 = vadd.f32 %v5312_v29, %v5272_v39  ;;  %v5499_v50 = vsel %vm815_vm7, %v17149_v9, %v17148_v45  ;;  %v4793_v17 = vmul.f32 %v17150_v14, %v13883_v52 }
 0xce2   : > { %v5325_v46 = vadd.f32 %v5313_v26, %v5273_v3  ;;  %v5276_v62 = vadd.f32 %v5254_v21, %v5156_v56  ;;  %v5045_v29 = vmul.f32 %v13853_v44, %v17112_v60  ;;  %v5070_v11 = vmul.f32 %v17076_v18, %v5042_v41 }
 0xce3   : > { %v5400_v39 = vadd.f32 %v5383_v61, %v5324_v35  ;;  %v4792_v34 = vmul.f32 %v17150_v14, %v13920_v5  ;;  %v5316_v3 = vmul.f32 %v17077_v38, %v14107_v28  ;;  %v4881_v21 = vadd.f32 %v4860_v42, %v4793_v17  ;;  %v17151_v35 = vld [vmem:[#allocation64_spill] sm:$0xff] }
 0xce4   : > { %5711 = vperm.xlu1 %9256, %v14093_v25   ;;  %v5023_v61 = vadd.f32 %v17101_v2, %v4874_v48  ;;  %v5007_v60 = vsel %vm815_vm7, %v17151_v35, %v17074_v20  ;;  %v5500_v30 = vsel %vm815_vm7, %v17148_v45, %v14034_v53  ;;  %v5719_v41 = vmul.f32 %v5642_v24, %v2653_v43  ;;  %v17152_v53 = vld [vmem:[#allocation111_spill] sm:$0xff] }
 0xce5   : > { %5561 = vrot.lane.b32.xlu0 %v5528_v31, %s9379_s23  ;;  %v5520_v26 = vadd.f32 %v5499_v50, %v5400_v39  ;;  %v5720_v14 = vmul.f32 %v5642_v24, %v2654_v37  ;;  %v4861_v31 = vsel %vm4035_vm15, %v17087_v22, %v17082_v23  ;;  %v5721_v17 = vmul.f32 %v14122_v36, %v2655_v33  ;;  %v14268_v22 = vpop.permute.xlu0 %3684  ;;  %v17154_v50 = vld [vmem:[#allocation102_spill] sm:$0xff] }
 0xce6   : > { %v5753_v56 = vpop.permute.xlu1 %5752  ;;  %v5328_v38 = vadd.f32 %v5316_v3, %v5276_v62  ;;  %v5401_v28 = vadd.f32 %v17143_v40, %v5325_v46  ;;  %v5722_v2 = vmul.f32 %v14122_v36, %v2656_v55  ;;  %v4796_v43 = vmul.f32 %v17072_v8, %v13883_v52  ;;  %v17153_v36 = vld [vmem:[#allocation55_spill] sm:$0xff]  ;;  %v17157_v62 = vld [vmem:[#allocation16_spill] sm:$0xff] }
 0xce7   : > { %v5815_v20 = vadd.f32 %v5753_v56, %v5719_v41  ;;  %v5816_v48 = vadd.f32 %v5753_v56, %v5720_v14  ;;  %v5030_v37 = vadd.f32 %v5007_v60, %v4881_v21  ;;  %v5075_v23 = vadd.f32 %v5063_v51, %v5023_v61  ;;  %v17155_v52 = vld [vmem:[#allocation59_spill] sm:$0xff] }
 0xce8   : > { %5545 = vrot.lane.b32.xlu1 %v5520_v26, %s9379_s23  ;;  %v5521_v33 = vadd.f32 %v5500_v30, %v5401_v28  ;;  %v5009_v40 = vsel %vm815_vm7, %v17095_v16, %v17084_v27  ;;  %v5502_v55 = vsel %vm815_vm7, %v14058_v47, %v17153_v36  ;;  %v4884_v45 = vadd.f32 %v4861_v31, %v4796_v43  ;;  %v17156_v8 = vld [vmem:[#allocation83_spill] sm:$0xff]  ;;  %v9332_v30 = vld [vmem:[%s15688_s3 + $0x20] sm:$0xff] }
 0xce9   : > { %9258 = vset.pattern.permute.xlu1 %v16886_v49  ;;  %6089 = vperm.xlu0 %9260, %v17152_v53   ;;  %v5151_v46 = vadd.f32 %v17154_v50, %v5075_v23  ;;  %v5137_v60 = vsel %vm4035_vm15, %v17156_v8, %v17155_v52  ;;  %v5404_v39 = vadd.f32 %v17157_v62, %v5328_v38  ;;  %v5847_v51 = vmax.f32 %v5815_v20, 0.0  ;;  %v17159_v14 = vld [vmem:[#allocation155_spill] sm:$0xff]  ;;  %v17160_v31 = vld [vmem:[#allocation108_spill] sm:$0xff]  ;;  %v14296_v53 = vpop.permute.xlu0 %3690  ;;  %v17164_v23 = vld [vmem:[#allocation106_spill] sm:$0xff] }
 0xcea   : > { %v5757_v24 = vpop.permute.xlu1 %5756  ;;  %v5848_v3 = vmax.f32 %v5816_v48, 0.0  ;;  %v17158_v21 = vmov 3   ;;  %v5033_v47 = vadd.f32 %v5009_v40, %v4884_v45  ;;  %v5082_v26 = vadd.f32 %v5070_v11, %v5030_v37  ;;  %v17161_v20 = vld [vmem:[#allocation163_spill] sm:$0xff]  ;;  %v17163_v37 = vld [vmem:[#allocation73_spill] sm:$0xff]  ;;  %v17166_v36 = vld [vmem:[#allocation200_spill] sm:$0xff] }
 0xceb   : > { %v5817_v49 = vadd.f32 %v5757_v24, %v5721_v17  ;;  %v5818_v42 = vadd.f32 %v5757_v24, %v5722_v2  ;;  %v5271_v61 = vadd.f32 %v17127_v7, %v5151_v46  ;;  %v5524_v56 = vadd.f32 %v5502_v55, %v5404_v39  ;;  %v17167_v55 = vld [vmem:[#allocation127_spill] sm:$0xff]  ;;  %v17169_v52 = vld [vmem:[#allocation48_spill] sm:$0xff]  ;;  %v17170_v62 = vld [vmem:[#allocation158_spill] sm:$0xff] }
 0xcec   : > { %5547 = vrot.lane.b32.xlu1 %v5521_v33, %s9379_s23  ;;  %v4880_v41 = vadd.f32 %v17147_v57, %v4792_v34  ;;  %v5255_v17 = vsel %vm815_vm7, %v17160_v31, %v17159_v14  ;;  %v5073_v48 = vmul.f32 %v17161_v20, %v5045_v29  ;;  %v5311_v7 = vmul.f32 %v17140_v15, %v14212_v54  ;;  %v17162_v34 = vld [vmem:[#allocation47_spill] sm:$0xff]  ;;  %v17165_v15 = vld [vmem:[#allocation154_spill] sm:$0xff] }
 0xced   : > { %v5849_v27 = vmax.f32 %v5817_v49, 0.0  ;;  %v5850_v16 = vmax.f32 %v5818_v42, 0.0  ;;  %9263 = vset.pattern.permute.xlu0 %v17158_v21  ;;  %v5158_v11 = vadd.f32 %v5137_v60, %v5082_v26  ;;  %v5290_v43 = vmul.f32 %v13853_v44, %v17162_v34  ;;  %v17168_v46 = vld [vmem:[#allocation23_spill] sm:$0xff] }
 0xcee   : > { %6185 = vperm.xlu0 %9263, %v9332_v30   ;;  %v5029_v57 = vadd.f32 %v17151_v35, %v4880_v41  ;;  %v5138_v33 = vsel %vm4035_vm15, %v17164_v23, %v17163_v37  ;;  %v5085_v29 = vadd.f32 %v5073_v48, %v5033_v47  ;;  %v5323_v40 = vadd.f32 %v5311_v7, %v5271_v61  ;;  %v9337_v37 = vld [vmem:[%s15688_s3] sm:$0xff]  ;;  %v14388_v23 = vld [vmem:[%s15688_s3 + $0x48] sm:$0xff] }
 0xcef   : > { %v5895_v38 = vpack.c.bf16 %v5849_v27, %v5847_v51  ;;  %v14291_v28 = vpop.permute.xlu1 %5656  ;;  %v5896_v2 = vpack.c.bf16 %v5850_v16, %v5848_v3  ;;  %v5278_v24 = vadd.f32 %v5255_v17, %v5158_v11  ;;  %v5257_v54 = vsel %vm815_vm7, %v17123_v32, %v17165_v15  ;;  %v14321_v51 = vpop.permute.xlu0 %3688  ;;  %v14330_v16 = vld [vmem:[%s15688_s3 + $0x10] sm:$0xff]  ;;  %v14375_v11 = vld [vmem:[%s15688_s3 + $0x28] sm:$0xff] }
 0xcf0   : > { %5553 = vrot.lane.b32.xlu1 %v5524_v56, %s9379_s23  ;;  %v5069_v35 = vmul.f32 %v17076_v18, %v13920_v5  ;;  %v5318_v49 = vmul.f32 %v17167_v55, %v5290_v43  ;;  %v5161_v42 = vadd.f32 %v5138_v33, %v5085_v29  ;;  %v5399_v45 = vadd.f32 %v17144_v1, %v5323_v40  ;;  %v17171_v1 = vld [vmem:[#allocation138_spill] sm:$0xff] }
 0xcf1   : > { %5959 = vmatprep.subr.bf16.mxu0 %v5896_v2  ;;  %9041 = vmatprep.subr.bf16.mxu1 %v5896_v2  ;;  %v5293_v60 = vmul.f32 %v13853_v44, %v17169_v52  ;;  %v5385_v32 = vsel %vm4035_vm15, %v17170_v62, %v17124_v63  ;;  %v5503_v27 = vsel %vm815_vm7, %v17171_v1, %v17125_v0  ;;  %v17172_v44 = vld [vmem:[#allocation192_spill] sm:$0xff]  ;;  %v17173_v0 = vmov 2  }
 0xcf2   : > { %5960 = vmatpush1.bf16.msra.mxu0 %v5895_v38  ;;  %9049 = vmatpush1.bf16.msra.mxu1 %v5895_v38  ;;  %v5081_v39 = vadd.f32 %v5069_v35, %v5029_v57  ;;  %v5281_v5 = vadd.f32 %v5257_v54, %v5161_v42  ;;  %v5519_v18 = vadd.f32 %v17149_v9, %v5399_v45  ;;  %v17174_v54 = vld [vmem:[#allocation197_spill] sm:$0xff]  ;;  %v17175_v35 = vld [vmem:[#allocation14_spill] sm:$0xff] }
 0xcf3   : > { %6217 = vperm.xlu0 %9263, %v17166_v36   ;;  %v5330_v3 = vadd.f32 %v5318_v49, %v5278_v24  ;;  %v5321_v63 = vmul.f32 %v17172_v44, %v5293_v60  ;;  %v5386_v9 = vsel %vm4035_vm15, %v14113_v4, %v17133_v58  ;;  %v5289_v56 = vmul.f32 %v17113_v10, %v17146_v12  ;;  %v14345_v41 = vpop.permute.xlu0 %5686  ;;  %v14353_v4 = vld [vmem:[%s15688_s3 + $0x18] sm:$0xff]  ;;  %v14397_v24 = vld [vmem:[%s15688_s3 + $0x30] sm:$0xff] }
 0xcf4   : > { %v14313_v50 = vpop.permute.xlu1 %5764  ;;  %5812 = vperm.xlu1 %9258, %v17168_v46   ;;  %v5157_v47 = vadd.f32 %v17156_v8, %v5081_v39  ;;  %v5505_v17 = vsel %vm815_vm7, %v14037_v59, %v14186_v19  ;;  %v9335_v59 = vld [vmem:[%s15688_s3 + $0x38] sm:$0xff]  ;;  %vm7609_vm7 = vcmask 195712  }
 0xcf5   : > { %v5406_v61 = vadd.f32 %v5385_v32, %v5330_v3  ;;  %v5333_v14 = vadd.f32 %v5321_v63, %v5281_v5  ;;  %v5317_v58 = vmul.f32 %v17167_v55, %v5289_v56  ;;  %v17176_v3 = vld [vmem:[#allocation50_spill] sm:$0xff] }
 0xcf6   : > { %v5277_v30 = vadd.f32 %v17160_v31, %v5157_v47  ;;  %v17178_v47 = vld [vmem:[#allocation19_spill] sm:$0xff] }
 0xcf7   : > { %6177 = vperm.xlu0 %9263, %v14330_v16   ;;  %v5526_v8 = vadd.f32 %v5503_v27, %v5406_v61  ;;  %v5409_v10 = vadd.f32 %v5386_v9, %v5333_v14  ;;  %v14363_v19 = vpop.permute.xlu0 %3702  ;;  %v2660_v61 = vsel %vm1273_vm4, %v17176_v3, %v17178_v47 }
 0xcf8   : > { %5543 = vrot.lane.b32.xlu1 %v5519_v18, %s9379_s23  ;;  %v5329_v31 = vadd.f32 %v5317_v58, %v5277_v30  ;;  %v5726_v14 = vmul.f32 %v14291_v28, %v2660_v61  ;;  %v17180_v58 = vld [vmem:[#allocation62_spill] sm:$0xff] }
 0xcf9   : > { %v14339_v26 = vpop.permute.xlu1 %5661  ;;  %9259 = vset.pattern.permute.xlu1 %v17173_v0  ;;  %v5529_v38 = vadd.f32 %v5505_v17, %v5409_v10  ;;  %v17179_v17 = vld [vmem:[#allocation9_spill] sm:$0xff] }
 0xcfa   : > { %v5405_v20 = vadd.f32 %v17170_v62, %v5329_v31  ;;  %v2657_v10 = vsel %vm1273_vm4, %v17180_v58, %v17179_v17  ;;  %v17181_v31 = vld [vmem:[#allocation17_spill] sm:$0xff] }
 0xcfb   : > { %6181 = vperm.xlu0 %9263, %v14353_v4   ;;  %v14378_v57 = vpop.permute.xlu0 %3700 }
 0xcfc   : > { %5557 = vrot.lane.b32.xlu1 %v5526_v8, %s9379_s23  ;;  %v5525_v48 = vadd.f32 %v17171_v1, %v5405_v20  ;;  %v17177_v1 = vld [vmem:[#allocation75_spill] sm:$0xff]  ;;  %v3712_v47 = vsel %vm3556_vm1, %v14378_v57, %v14363_v19 }
 0xcfd   : > { %v2659_v27 = vsel %vm1273_vm4, %v17177_v1, %v17176_v3 }
 0xcfe   : > { %v14358_v2 = vpop.permute.xlu1 %5768  ;;  %v5725_v9 = vmul.f32 %v14291_v28, %v2659_v27  ;;  %v5822_v28 = vadd.f32 %v14313_v50, %v5726_v14 }
 0xcff   : > { %6197 = vperm.xlu0 %9263, %v9335_v59   ;;  %v14391_v29 = vpop.permute.xlu0 %5696 }
 0xd00   : > { %5563 = vrot.lane.b32.xlu1 %v5529_v38, %s9379_s23  ;;  %v2658_v38 = vsel %vm1273_vm4, %v17179_v17, %v17181_v31  ;;  %vm7462_vm4 = vcmask 171008  }
 0xd02   : > { %v14368_v7 = vpop.permute.xlu1 %5772 }
 0xd03   : > { %9276 = vset.pattern.permute.xlu0 %v17173_v0  ;;  %v14400_v15 = vpop.permute.xlu0 %4666 }
 0xd04   : > { %5555 = vrot.lane.b32.xlu1 %v5525_v48, %s9379_s23  ;;  %6093 = vperm.xlu0 %9276, %v14375_v11  }
 0xd07   : > { %v14380_v43 = vpop.permute.xlu1 %5676  ;;  %v14407_v49 = vpop.permute.xlu0 %4664 }
 0xd08   : > { %6073 = vperm.xlu1 %9259, %v9337_v37   ;;  %6109 = vperm.xlu0 %9276, %v14388_v23   ;;  %v5733_v58 = vmul.f32 %v14380_v43, %v3712_v47 }
 0xd0b   : > { %v3687_v33 = vpop.permute.xlu1 %3686  ;;  %v14411_v45 = vpop.permute.xlu0 %5706 }
 0xd0c   : > { %9261 = vset.pattern.permute.xlu1 %v17158_v21  ;;  %6097 = vperm.xlu0 %9276, %v14397_v24   ;;  %v3707_v18 = vsel %vm3556_vm1, %v14268_v22, %v3687_v33 }
 0xd0d   : > { %6169 = vperm.xlu1 %9261, %v9337_v37   ;;  %v5728_v8 = vmul.f32 %v14339_v26, %v3707_v18  ;;  %v5854_v18 = vmax.f32 %v5822_v28, 0.0  ;;  %v9341_v28 = vld [vmem:[%s15688_s3 + $0x68] sm:$0xff] }
 0xd0f   : > { %v3693_v40 = vpop.permute.xlu1 %3692 }
 0xd10   : > { %6113 = vperm.xlu0 %9276, %v17174_v54   ;;  %v3709_v39 = vsel %vm3556_vm1, %v14296_v53, %v3693_v40  ;;  %v17182_v40 = vld [vmem:[#allocation168_spill] sm:$0xff] }
 0xd11   : > { %9262 = vset.pattern.permute.xlu1 %v17173_v0  ;;  %v5730_v44 = vmul.f32 %v14190_v13, %v3709_v39  ;;  %v5723_v54 = vmul.f32 %v17182_v40, %v2657_v10 }
 0xd12   : > { %6105 = vperm.xlu1 %9262, %v17175_v35  }
 0xd13   : > { %v14405_v55 = vpop.permute.xlu1 %5780  ;;  %v14418_v62 = vpop.permute.xlu0 %4678  ;;  %v5826_v20 = vadd.f32 %v14368_v7, %v5730_v44 }
 0xd14   : > { %6101 = vperm.xlu0 %9276, %v9335_v59   ;;  %v5821_v59 = vadd.f32 %v14313_v50, %v5725_v9 }
 0xd15   : > { %v5858_v3 = vmax.f32 %v5826_v20, 0.0 }
 0xd16   : > { %6121 = vperm.xlu1 %9262, %v17166_v36   ;;  %v9340_v36 = vld [vmem:[%s15688_s3 + $0x8] sm:$0xff]  ;;  %v5853_v39 = vmax.f32 %v5821_v59, 0.0 }
 0xd17   : > { %v3683_v42 = vpop.permute.xlu1 %3682  ;;  %v14426_v5 = vpop.permute.xlu0 %4676 }
 0xd18   : > { %6133 = vperm.xlu0 %9276, %v17168_v46   ;;  %v3706_v56 = vsel %vm3556_vm1, %v3683_v42, %v14268_v22  ;;  %v3708_v22 = vsel %vm3556_vm1, %v14321_v51, %v14296_v53  ;;  %v5824_v53 = vadd.f32 %v14358_v2, %v5728_v8 }
 0xd19   : > { %v5727_v48 = vmul.f32 %v14339_v26, %v3706_v56  ;;  %v5729_v50 = vmul.f32 %v14190_v13, %v3708_v22 }
 0xd1a   : > { %9264 = vset.pattern.permute.xlu1 %v17158_v21  ;;  %v5856_v9 = vmax.f32 %v5824_v53, 0.0 }
 0xd1b   : > { %v14414_v60 = vpop.permute.xlu1 %5681  ;;  %6201 = vperm.xlu1 %9264, %v17175_v35   ;;  %v5724_v35 = vmul.f32 %v17182_v40, %v2658_v38  ;;  %v5823_v1 = vadd.f32 %v14358_v2, %v5727_v48  ;;  %v5825_v61 = vadd.f32 %v14368_v7, %v5729_v50 }
 0xd1c   : > { %9278 = vset.pattern.permute.xlu0 %v17158_v21  ;;  %v5900_v7 = vpack.c.bf16 %v5858_v3, %v5856_v9 }
 0xd1d   : > { %v5855_v10 = vmax.f32 %v5823_v1, 0.0  ;;  %v5857_v57 = vmax.f32 %v5825_v61, 0.0 }
 0xd1f   : > { %v3697_v32 = vpop.permute.xlu1 %3696  ;;  %9265 = vset.pattern.permute.xlu1 %v17173_v0  ;;  %v5899_v22 = vpack.c.bf16 %v5857_v57, %v5855_v10 }
 0xd20   : > { %6077 = vperm.xlu1 %9265, %v9340_v36  }
 0xd23   : > { %v3699_v46 = vpop.permute.xlu1 %3698 }
 0xd24   : > { %9266 = vset.pattern.permute.xlu1 %v17158_v21  ;;  %v3711_v51 = vsel %vm3556_vm1, %v3697_v32, %v3699_v46 }
 0xd25   : > { %6173 = vperm.xlu1 %9266, %v9340_v36   ;;  %v5732_v44 = vmul.f32 %v14237_v6, %v3711_v51 }
 0xd27   : > { %v3705_v63 = vpop.permute.xlu1 %3704 }
 0xd28   : > { %v14441_v30 = vpop.permute.xlu0 %5716  ;;  %v3713_v37 = vsel %vm3556_vm1, %v14363_v19, %v3705_v63 }
 0xd29   : > { %9267 = vset.pattern.permute.xlu1 %v17173_v0  ;;  %v5734_v42 = vmul.f32 %v14380_v43, %v3713_v37 }
 0xd2a   : > { %6081 = vperm.xlu1 %9267, %v14330_v16  }
 0xd2b   : > { %v14462_v33 = vpop.permute.xlu1 %5788  ;;  %v5830_v2 = vadd.f32 %v14405_v55, %v5734_v42 }
 0xd2d   : > { %v5761_v16 = vpop.permute.xlu0 %5760  ;;  %v5862_v38 = vmax.f32 %v5830_v2, 0.0 }
 0xd2e   : > { %v5819_v36 = vadd.f32 %v5761_v16, %v5723_v54  ;;  %v5820_v26 = vadd.f32 %v5761_v16, %v5724_v35  ;;  %9268 = vset.pattern.permute.xlu1 %v17158_v21 }
 0xd2f   : > { %v3695_v27 = vpop.permute.xlu1 %3694  ;;  %6189 = vperm.xlu1 %9268, %v14375_v11  }
 0xd30   : > { %v5851_v46 = vmax.f32 %v5819_v36, 0.0  ;;  %v5852_v63 = vmax.f32 %v5820_v26, 0.0  ;;  %v3710_v13 = vsel %vm3556_vm1, %v3695_v27, %v3697_v32  ;;  %vm7755_vm1 = vcmask 1043459  }
 0xd31   : > { %v5731_v56 = vmul.f32 %v14237_v6, %v3710_v13  ;;  %v5777_v14 = vpop.permute.xlu0 %5776  ;;  %v5829_v6 = vadd.f32 %v14405_v55, %v5733_v58  ;;  %v4688_v58 = vsel %vm3954_vm0, %v14426_v5, %v14418_v62 }
 0xd32   : > { %v5897_v8 = vpack.c.bf16 %v5853_v39, %v5851_v46  ;;  %v5828_v11 = vadd.f32 %v5777_v14, %v5732_v44  ;;  %v5898_v17 = vpack.c.bf16 %v5854_v18, %v5852_v63 }
 0xd33   : > { %v5827_v31 = vadd.f32 %v5777_v14, %v5731_v56  ;;  %v14482_v32 = vpop.permute.xlu1 %5691  ;;  %9269 = vset.pattern.permute.xlu1 %v17173_v0  ;;  %v5861_v48 = vmax.f32 %v5829_v6, 0.0 }
 0xd34   : > { %v5860_v19 = vmax.f32 %v5828_v11, 0.0  ;;  %5961 = vmatprep.subr.bf16.mxu0 %v5898_v17  ;;  %9042 = vmatprep.subr.bf16.mxu1 %v5898_v17 }
 0xd35   : > { %5962 = vmatpush1.bf16.msra.mxu0 %v5897_v8  ;;  %9050 = vmatpush1.bf16.msra.mxu1 %v5897_v8  ;;  %v5859_v43 = vmax.f32 %v5827_v31, 0.0  ;;  %v5785_v53 = vpop.permute.xlu0 %5784  ;;  %v9343_v8 = vld [vmem:[%s15688_s3 + $0x58] sm:$0xff] }
 0xd36   : > { %5963 = vmatprep.subr.bf16.mxu0 %v5900_v7  ;;  %9043 = vmatprep.subr.bf16.mxu1 %v5900_v7  ;;  %v5902_v20 = vpack.c.bf16 %v5862_v38, %v5860_v19 }
 0xd37   : > { %v4661_v59 = vpop.permute.xlu1 %4660  ;;  %6125 = vperm.xlu1 %9269, %v9341_v28   ;;  %v5901_v55 = vpack.c.bf16 %v5861_v48, %v5859_v43 }
 0xd39   : > { %5964 = vmatpush1.bf16.msra.mxu0 %v5899_v22  ;;  %9051 = vmatpush1.bf16.msra.mxu1 %v5899_v22  ;;  %v5793_v61 = vpop.permute.xlu0 %5792 }
 0xd3a   : > { %5965 = vmatprep.subr.bf16.mxu0 %v5902_v20  ;;  %9044 = vmatprep.subr.bf16.mxu1 %v5902_v20 }
 0xd3b   : > { %v4663_v37 = vpop.permute.xlu1 %4662  ;;  %9270 = vset.pattern.permute.xlu1 %v17158_v21 }
 0xd3c   : > { %v4683_v40 = vsel %vm3954_vm0, %v4661_v59, %v4663_v37  ;;  %6205 = vperm.xlu1 %9270, %v14388_v23   ;;  %v4684_v23 = vsel %vm3954_vm0, %v14407_v49, %v14400_v15 }
 0xd3d   : > { %v5736_v54 = vmul.f32 %v14414_v60, %v4683_v40  ;;  %5966 = vmatpush1.bf16.msra.mxu0 %v5901_v55  ;;  %9052 = vmatpush1.bf16.msra.mxu1 %v5901_v55  ;;  %v5737_v18 = vmul.f32 %v14345_v41, %v4684_v23  ;;  %v5801_v10 = vpop.permute.xlu0 %5800 }
 0xd3f   : > { %v4669_v35 = vpop.permute.xlu1 %4668  ;;  %v5832_v16 = vadd.f32 %v5785_v53, %v5736_v54 }
 0xd40   : > { %v4685_v51 = vsel %vm3954_vm0, %v14400_v15, %v4669_v35  ;;  %9271 = vset.pattern.permute.xlu1 %v17173_v0 }
 0xd41   : > { %v5738_v50 = vmul.f32 %v14345_v41, %v4685_v51  ;;  %6085 = vperm.xlu1 %9271, %v14353_v4   ;;  %v5864_v26 = vmax.f32 %v5832_v16, 0.0  ;;  %v5833_v4 = vadd.f32 %v14462_v33, %v5737_v18 }
 0xd43   : > { %v5834_v42 = vadd.f32 %v14462_v33, %v5738_v50  ;;  %v5797_v36 = vpop.permute.xlu1 %5796  ;;  %v5865_v46 = vmax.f32 %v5833_v4, 0.0  ;;  %v9342_v33 = vld [vmem:[%s15688_s3 + $0x50] sm:$0xff] }
 0xd45   : > { %v5866_v39 = vmax.f32 %v5834_v42, 0.0  ;;  %9272 = vset.pattern.permute.xlu1 %v17158_v21 }
 0xd46   : > { %6193 = vperm.xlu1 %9272, %v14397_v24  }
 0xd47   : > { %v4659_v3 = vpop.permute.xlu1 %4658  ;;  %v5904_v1 = vpack.c.bf16 %v5866_v39, %v5864_v26 }
 0xd48   : > { %v4682_v27 = vsel %vm3954_vm0, %v4659_v3, %v4661_v59 }
 0xd49   : > { %v5735_v44 = vmul.f32 %v14414_v60, %v4682_v27  ;;  %5967 = vmatprep.subr.bf16.mxu0 %v5904_v1  ;;  %9045 = vmatprep.subr.bf16.mxu1 %v5904_v1 }
 0xd4a   : > { %6221 = vperm.xlu1 %9272, %v9341_v28  }
 0xd4b   : > { %v5831_v15 = vadd.f32 %v5785_v53, %v5735_v44  ;;  %v14508_v49 = vpop.permute.xlu1 %5701 }
 0xd4d   : > { %v5863_v63 = vmax.f32 %v5831_v15, 0.0 }
 0xd4e   : > { %9273 = vset.pattern.permute.xlu1 %v17173_v0 }
 0xd4f   : > { %v5903_v24 = vpack.c.bf16 %v5865_v46, %v5863_v63  ;;  %v4673_v41 = vpop.permute.xlu1 %4672  ;;  %6129 = vperm.xlu1 %9273, %v14093_v25  }
 0xd51   : > { %5968 = vmatpush1.bf16.msra.mxu0 %v5903_v24  ;;  %9053 = vmatpush1.bf16.msra.mxu1 %v5903_v24 }
 0xd53   : > { %v4675_v13 = vpop.permute.xlu1 %4674  ;;  %9274 = vset.pattern.permute.xlu1 %v17158_v21 }
 0xd54   : > { %v4687_v60 = vsel %vm3954_vm0, %v4673_v41, %v4675_v13  ;;  %6209 = vperm.xlu1 %9274, %v9342_v33  }
 0xd55   : > { %v5740_v47 = vmul.f32 %v14482_v32, %v4687_v60 }
 0xd57   : > { %v4681_v9 = vpop.permute.xlu1 %4680  ;;  %v5836_v14 = vadd.f32 %v5793_v61, %v5740_v47 }
 0xd58   : > { %v4689_v56 = vsel %vm3954_vm0, %v14418_v62, %v4681_v9  ;;  %9275 = vset.pattern.permute.xlu1 %v17173_v0  ;;  %v5741_v0 = vmul.f32 %v14391_v29, %v4688_v58  ;;  %v5552_v62 = vpop.permute.xlu0 %5551 }
 0xd59   : > { %v5742_v2 = vmul.f32 %v14391_v29, %v4689_v56  ;;  %6117 = vperm.xlu1 %9275, %v9343_v8   ;;  %v5868_v31 = vmax.f32 %v5836_v14, 0.0 }
 0xd5a   : > { %v5837_v38 = vadd.f32 %v5797_v36, %v5741_v0 }
 0xd5b   : > { %v5838_v11 = vadd.f32 %v5797_v36, %v5742_v2  ;;  %v5805_v17 = vpop.permute.xlu1 %5804 }
 0xd5c   : > { %v5869_v59 = vmax.f32 %v5837_v38, 0.0  ;;  %v9283_v38 = vld [vmem:[%s15690_s5 + $0x8] sm:$0xff]  }
 0xd5d   : > { %v5870_v19 = vmax.f32 %v5838_v11, 0.0  ;;  %9277 = vset.pattern.permute.xlu1 %v17158_v21  ;;  %v5809_v21 = vpop.permute.xlu0 %5808 }
 0xd5e   : > { %6225 = vperm.xlu1 %9277, %v14093_v25   ;;  %v9344_v25 = vld [vmem:[%s15688_s3 + $0x78] sm:$0xff] }
 0xd5f   : > { %v4671_v7 = vpop.permute.xlu1 %4670  ;;  %v5906_v57 = vpack.c.bf16 %v5870_v19, %v5868_v31 }
 0xd60   : > { %v4686_v6 = vsel %vm3954_vm0, %v4671_v7, %v4673_v41  ;;  %vm7753_vm0 = vcmask 1042434  }
 0xd61   : > { %v5739_v22 = vmul.f32 %v14482_v32, %v4686_v6  ;;  %5969 = vmatprep.subr.bf16.mxu0 %v5906_v57  ;;  %9046 = vmatprep.subr.bf16.mxu1 %v5906_v57  ;;  %v5550_v55 = vpop.permute.xlu0 %5549  ;;  %v9282_v57 = vld [vmem:[%s15690_s5 + $0x20] sm:$0xff]   ;;  %v17183_v6 = vmov 0  }
 0xd62   : > { %6213 = vperm.xlu1 %9277, %v9343_v8   ;;  %v5569_v42 = vsel %vm4922_vm5, %v5550_v55, %v5552_v62 }
 0xd63   : > { %v5835_v5 = vadd.f32 %v5793_v61, %v5739_v22  ;;  %v5712_v43 = vpop.permute.xlu1 %5711  ;;  %v5745_v26 = vmul.f32 %v14411_v45, %v5569_v42  ;;  %v9284_v22 = vld [vmem:[%s15690_s5 + $0x28] sm:$0xff]  }
 0xd65   : > { %v5867_v28 = vmax.f32 %v5835_v5, 0.0  ;;  %v5560_v51 = vpop.permute.xlu0 %5559  ;;  %v5841_v1 = vadd.f32 %v5805_v17, %v5745_v26  ;;  %v9286_v5 = vld [vmem:[%s15690_s5 + $0x30] sm:$0xff]  }
 0xd66   : > { %6229 = vperm.xlu1 %9277, %v9344_v25   ;;  %v6353_v25 = vld [vmem:[%s15692_s7 + $0x88] sm:$0xff] }
 0xd67   : > { %v5905_v29 = vpack.c.bf16 %v5869_v59, %v5867_v28  ;;  %v5546_v20 = vpop.permute.xlu1 %5545  ;;  %v5873_v63 = vmax.f32 %v5841_v1, 0.0  ;;  %v9288_v59 = vld [vmem:[%s15690_s5 + $0x38] sm:$0xff]   ;;  %v6352_v28 = vld [vmem:[%s15692_s7 + $0x80] sm:$0xff] }
 0xd69   : > { %5970 = vmatpush1.bf16.msra.mxu0 %v5905_v29  ;;  %9054 = vmatpush1.bf16.msra.mxu1 %v5905_v29  ;;  %v5566_v27 = vpop.permute.xlu0 %5565  ;;  %v6420_v29 = vand.u32 4294901760, %v6353_v25 }
 0xd6b   : > { %v5548_v48 = vpop.permute.xlu1 %5547 }
 0xd6c   : > { %v5568_v32 = vsel %vm4922_vm5, %v5546_v20, %v5548_v48  ;;  %v6337_v48 = vld [vmem:[%s15692_s7 + $0x8] sm:$0xff] }
 0xd6d   : > { %v5744_v37 = vmul.f32 %v14508_v49, %v5568_v32  ;;  %v5562_v13 = vpop.permute.xlu0 %5561  ;;  %v6354_v32 = vld [vmem:[%s15692_s7 + $0x90] sm:$0xff] }
 0xd6f   : > { %v5554_v40 = vpop.permute.xlu1 %5553  ;;  %v5840_v35 = vadd.f32 %v5801_v10, %v5744_v37  ;;  %v6372_v37 = vand.u32 4294901760, %v6337_v48 }
 0xd70   : > { %v5570_v54 = vsel %vm4922_vm5, %v5552_v62, %v5554_v40  ;;  %v9285_v62 = vld [vmem:[%s15690_s5 + $0x10] sm:$0xff]   ;;  %v6355_v40 = vld [vmem:[%s15692_s7 + $0x98] sm:$0xff] }
 0xd71   : > { %v5746_v53 = vmul.f32 %v14411_v45, %v5570_v54  ;;  %v5872_v36 = vmax.f32 %v5840_v35, 0.0  ;;  %v6423_v54 = vand.u32 4294901760, %v6354_v32  ;;  %v6338_v35 = vld [vmem:[%s15692_s7 + $0x10] sm:$0xff] }
 0xd72   : > { %v6375_v42 = vand.u32 4294901760, %v6338_v35 }
 0xd73   : > { %v5842_v16 = vadd.f32 %v5805_v17, %v5746_v53  ;;  %v5813_v50 = vpop.permute.xlu1 %5812  ;;  %v6339_v53 = vld [vmem:[%s15692_s7 + $0x18] sm:$0xff]  ;;  %v14612_v26 = vsub.f32 %v6354_v32, %v6423_v54 }
 0xd74   : > { %v14618_v1 = vsub.f32 %v6338_v35, %v6375_v42 }
 0xd75   : > { %v5874_v23 = vmax.f32 %v5842_v16, 0.0  ;;  %v14606_v16 = vsub.f32 %v6353_v25, %v6420_v29  ;;  %v6360_v25 = vld [vmem:[%s15692_s7 + $0xc0] sm:$0xff] }
 0xd77   : > { %v5544_v39 = vpop.permute.xlu1 %5543  ;;  %v5908_v18 = vpack.c.bf16 %v5874_v23, %v5872_v36  ;;  %v14610_v23 = vsub.f32 %v6337_v48, %v6372_v37  ;;  %v6441_v48 = vand.u32 4294901760, %v6360_v25 }
 0xd78   : > { %v5567_v3 = vsel %vm4922_vm5, %v5544_v39, %v5546_v20  ;;  %v6336_v20 = vld [vmem:[%s15692_s7] sm:$0xff]  ;;  %v6378_v39 = vand.u32 4294901760, %v6339_v53 }
 0xd79   : > { %v5743_v4 = vmul.f32 %v14508_v49, %v5567_v3  ;;  %5971 = vmatprep.subr.bf16.mxu0 %v5908_v18  ;;  %9047 = vmatprep.subr.bf16.mxu1 %v5908_v18  ;;  %v6369_v55 = vand.u32 4294901760, %v6336_v20 }
 0xd7b   : > { %v5839_v44 = vadd.f32 %v5801_v10, %v5743_v4  ;;  %v5558_v15 = vpop.permute.xlu1 %5557  ;;  %v14608_v36 = vsub.f32 %v6336_v20, %v6369_v55  ;;  %v14622_v4 = vsub.f32 %v6339_v53, %v6378_v39 }
 0xd7c   : > { %v5572_v46 = vsel %vm4922_vm5, %v5558_v15, %v5560_v51 }
 0xd7d   : > { %v5871_v24 = vmax.f32 %v5839_v44, 0.0  ;;  %v5748_v41 = vmul.f32 %v5712_v43, %v5572_v46  ;;  %v14628_v46 = vpack.c.bf16 %v6372_v37, %v6369_v55  ;;  %v6344_v55 = vld [vmem:[%s15692_s7 + $0x40] sm:$0xff]  ;;  %v6345_v37 = vld [vmem:[%s15692_s7 + $0x48] sm:$0xff] }
 0xd7e   : > { %v6396_v35 = vand.u32 4294901760, %v6345_v37 }
 0xd7f   : > { %v5907_v60 = vpack.c.bf16 %v5873_v63, %v5871_v24  ;;  %v5564_v45 = vpop.permute.xlu1 %5563  ;;  %v5844_v61 = vadd.f32 %v5809_v21, %v5748_v41  ;;  %17185 = vst [vmem:[#allocation96_spill] sm:$0xff] %v14628_v46  ;;  %v8919_v63 = vpack.c.bf16 %v14622_v4, %v14618_v1  ;;  %v6356_v24 = vld [vmem:[%s15692_s7 + $0xa0] sm:$0xff]  ;;  %v6357_v41 = vld [vmem:[%s15692_s7 + $0xa8] sm:$0xff] }
 0xd80   : > { %v5573_v33 = vsel %vm4922_vm5, %v5562_v13, %v5564_v45  ;;  %v5574_v47 = vsel %vm4922_vm5, %v5564_v45, %v5566_v27  ;;  %v8915_v27 = vpack.c.bf16 %v14610_v23, %v14608_v36  ;;  %v6429_v13 = vand.u32 4294901760, %v6356_v24  ;;  %v6340_v45 = vld [vmem:[%s15692_s7 + $0x20] sm:$0xff] }
 0xd81   : > { %v5749_v9 = vmul.f32 %v14441_v30, %v5573_v33  ;;  %v5750_v49 = vmul.f32 %v14441_v30, %v5574_v47  ;;  %5972 = vmatpush1.bf16.msra.mxu0 %v5907_v60  ;;  %9055 = vmatpush1.bf16.msra.mxu1 %v5907_v60  ;;  %v5876_v8 = vmax.f32 %v5844_v61, 0.0  ;;  %v9281_v30 = vld [vmem:[%s15690_s5] sm:$0xff]   ;;  %v6432_v60 = vand.u32 4294901760, %v6357_v41  ;;  %v6341_v33 = vld [vmem:[%s15692_s7 + $0x28] sm:$0xff] }
 0xd82   : > { %v14648_v61 = vpack.c.bf16 %v6378_v39, %v6375_v42  ;;  %v6363_v42 = vld [vmem:[%s15692_s7 + $0xd8] sm:$0xff]  ;;  %v6346_v39 = vld [vmem:[%s15692_s7 + $0x50] sm:$0xff] }
 0xd83   : > { %v5846_v56 = vadd.f32 %v5813_v50, %v5750_v49  ;;  %v5556_v14 = vpop.permute.xlu1 %5555  ;;  %v5845_v11 = vadd.f32 %v5813_v50, %v5749_v9  ;;  %v6426_v50 = vand.u32 4294901760, %v6355_v40  ;;  %v6358_v9 = vld [vmem:[%s15692_s7 + $0xb0] sm:$0xff]  ;;  %v6381_v49 = vand.u32 4294901760, %v6340_v45 }
 0xd84   : > { %v5571_v2 = vsel %vm4922_vm5, %v5556_v14, %v5558_v15  ;;  %17187 = vst [vmem:[#allocation84_spill] sm:$0xff] %v14648_v61  ;;  %v6359_v14 = vld [vmem:[%s15692_s7 + $0xb8] sm:$0xff] }
 0xd85   : > { %v5878_v17 = vmax.f32 %v5846_v56, 0.0  ;;  %v5747_v58 = vmul.f32 %v5712_v43, %v5571_v2  ;;  %v5877_v19 = vmax.f32 %v5845_v11, 0.0  ;;  %v9287_v43 = vld [vmem:[%s15690_s5 + $0x18] sm:$0xff]   ;;  %v14616_v3 = vsub.f32 %v6355_v40, %v6426_v50  ;;  %v6362_v40 = vld [vmem:[%s15692_s7 + $0xd0] sm:$0xff] }
 0xd86   : > { %v14646_v47 = vpack.c.bf16 %v6426_v50, %v6423_v54  ;;  %v6384_v56 = vand.u32 4294901760, %v6341_v33  ;;  %v6435_v2 = vand.u32 4294901760, %v6358_v9  ;;  %v6343_v11 = vld [vmem:[%s15692_s7 + $0x38] sm:$0xff]  ;;  %v6393_v54 = vand.u32 4294901760, %v6344_v55 }
 0xd87   : > { %v5843_v10 = vadd.f32 %v5809_v21, %v5747_v58  ;;  %v5910_v31 = vpack.c.bf16 %v5878_v17, %v5876_v8  ;;  %v6417_v21 = vand.u32 4294901760, %v6352_v28  ;;  %v8917_v15 = vpack.c.bf16 %v14616_v3, %v14612_v26  ;;  %v6342_v8 = vld [vmem:[%s15692_s7 + $0x30] sm:$0xff] }
 0xd88   : > { %17186 = vst [vmem:[#allocation171_spill] sm:$0xff] %v14646_v47  ;;  %v14662_v17 = vsub.f32 %v6356_v24, %v6429_v13  ;;  %v14664_v58 = vsub.f32 %v6357_v41, %v6432_v60  ;;  %v14700_v20 = vpack.c.bf16 %v6384_v56, %v6381_v49  ;;  %v6450_v24 = vand.u32 4294901760, %v6363_v42 }
 0xd89   : > { %v5875_v0 = vmax.f32 %v5843_v10, 0.0  ;;  %5973 = vmatprep.subr.bf16.mxu0 %v5910_v31  ;;  %9048 = vmatprep.subr.bf16.mxu1 %v5910_v31  ;;  %v14604_v51 = vsub.f32 %v6352_v28, %v6417_v21  ;;  %v14624_v44 = vpack.c.bf16 %v6420_v29, %v6417_v21  ;;  %v6438_v10 = vand.u32 4294901760, %v6359_v14  ;;  %v6361_v21 = vld [vmem:[%s15692_s7 + $0xc8] sm:$0xff] }
 0xd8a   : > { %v6387_v31 = vand.u32 4294901760, %v6342_v8  ;;  %v14698_v29 = vpack.c.bf16 %v6432_v60, %v6429_v13  ;;  %17189 = vst [vmem:[#allocation86_spill] sm:$0xff] %v14700_v20  ;;  %v6444_v32 = vand.u32 4294901760, %v6361_v21  ;;  %v14730_v41 = vsub.f32 %v6344_v55, %v6393_v54 }
 0xd8b   : > { %v5909_v7 = vpack.c.bf16 %v5877_v19, %v5875_v0  ;;  %v8913_v18 = vpack.c.bf16 %v14606_v16, %v14604_v51  ;;  %17184 = vst [vmem:[#allocation35_spill] sm:$0xff] %v14624_v44  ;;  %v14667_v19 = vsub.f32 %v6340_v45, %v6381_v49  ;;  %v14669_v0 = vsub.f32 %v6341_v33, %v6384_v56 }
 0xd8c   : > { %17188 = vst [vmem:[#allocation30_spill] sm:$0xff] %v14698_v29  ;;  %v14711_v53 = vpack.c.bf16 %v6438_v10, %v6435_v2  ;;  %v14732_v13 = vsub.f32 %v6345_v37, %v6396_v35  ;;  %v6399_v60 = vand.u32 4294901760, %v6346_v39  ;;  %v14741_v56 = vsub.f32 %v6363_v42, %v6450_v24 }
 0xd8d   : > { %5974 = vmatpush1.bf16.msra.mxu0 %v5909_v7  ;;  %9056 = vmatpush1.bf16.msra.mxu1 %v5909_v7  ;;  %v14671_v7 = vsub.f32 %v6358_v9, %v6435_v2  ;;  %v6364_v2 = vld [vmem:[%s15692_s7 + $0xe0] sm:$0xff]  ;;  %v14774_v55 = vpack.c.bf16 %v6396_v35, %v6393_v54 }
 0xd8e   : > { %8914 = vmatprep.subr.bf16.mxu1 %v8913_v18  ;;  %8850 = vmatprep.subr.bf16.mxu0 %v14624_v44  ;;  %17190 = vst [vmem:[#allocation28_spill] sm:$0xff] %v14711_v53  ;;  %v6347_v18 = vld [vmem:[%s15692_s7 + $0x58] sm:$0xff] }
 0xd8f   : > { %v6402_v45 = vand.u32 4294901760, %v6347_v18  ;;  %17193 = vst [vmem:[#allocation142_spill] sm:$0xff] %v14774_v55 }
 0xd90   : > { %5992 = vmatmul.mubr.bf16.vlgmr.msra.gmra.mrb[8].mxu0 %v9281_v30  ;;  %6032 = vmatmul.mubr.bf16.vlgmr.msra.gmra.mrb[0].mxu1 %v9282_v57  ;;  %v6390_v30 = vand.u32 4294901760, %v6343_v11  ;;  %v8921_v57 = vpack.c.bf16 %v14664_v58, %v14662_v17 }
 0xd91   : > { %6001 = vmatprep.mubr.bf16.mxu0 %v17183_v6  ;;  %6041 = vmatprep.mubr.bf16.mxu1 %v17183_v6  ;;  %v14791_v35 = vpack.c.bf16 %v6402_v45, %v6399_v60 }
 0xd92   : > { %8916 = vmatpush3.bf16.msra.mxu1 %v8915_v27  ;;  %8852 = vmatpush3.bf16.msra.mxu0 %v14628_v46  ;;  %v14713_v50 = vpack.c.bf16 %v6390_v30, %v6387_v31  ;;  %v14725_v27 = vsub.f32 %v6360_v25, %v6441_v48 }
 0xd93   : > { %8918 = vmatprep.subr.bf16.mxu1 %v8917_v15  ;;  %8854 = vmatprep.subr.bf16.mxu0 %v14646_v47  ;;  %v14727_v15 = vsub.f32 %v6361_v21, %v6444_v32  ;;  %17195 = vst [vmem:[#allocation117_spill] sm:$0xff] %v14791_v35  ;;  %v6668_v47 = vand.u32 4294901760, %v14662_v17 }
 0xd94   : > { %17191 = vst [vmem:[#allocation116_spill] sm:$0xff] %v14713_v50 }
 0xd95   : > { %v8929_v9 = vpack.c.bf16 %v14727_v15, %v14725_v27 }
 0xd96   : > { %8920 = vmatpush3.bf16.msra.mxu1 %v8919_v63  ;;  %8856 = vmatpush3.bf16.msra.mxu0 %v14648_v61  ;;  %v6447_v63 = vand.u32 4294901760, %v6362_v40  ;;  %v6542_v61 = vand.u32 4294901760, %v14618_v1 }
 0xd97   : > { %8922 = vmatprep.subr.bf16.mxu1 %v8921_v57  ;;  %8858 = vmatprep.subr.bf16.mxu0 %v14698_v29  ;;  %v6349_v57 = vld [vmem:[%s15692_s7 + $0x68] sm:$0xff]  ;;  %v6661_v29 = vand.u32 4294901760, %v14616_v3 }
 0xd98   : > { %6002 = vmatmul.mubr.bf16.gmra.mrb[12].mxu0 %v9283_v38  ;;  %6042 = vmatmul.mubr.bf16.gmra.mrb[4].mxu1 %v9284_v22  ;;  %v14678_v38 = vsub.f32 %v6342_v8, %v6387_v31  ;;  %v8923_v22 = vpack.c.bf16 %v14669_v0, %v14667_v19  ;;  %v14739_v49 = vsub.f32 %v6362_v40, %v6447_v63  ;;  %v6365_v8 = vld [vmem:[%s15692_s7 + $0xe8] sm:$0xff]  ;;  %v6408_v37 = vand.u32 4294901760, %v6349_v57 }
 0xd99   : > { %6011 = vmatprep.mubr.bf16.mxu0 %v17183_v6  ;;  %6051 = vmatprep.mubr.bf16.mxu1 %v17183_v6  ;;  %v14755_v31 = vsub.f32 %v6347_v18, %v6402_v45  ;;  %v6456_v25 = vand.u32 4294901760, %v6365_v8  ;;  %v14776_v40 = vpack.c.bf16 %v6450_v24, %v6447_v63  ;;  %v6640_v45 = vand.u32 4294901760, %v14604_v51 }
 0xd9a   : > { %8924 = vmatpush3.bf16.msra.mxu1 %v8923_v22  ;;  %8860 = vmatpush3.bf16.msra.mxu0 %v14700_v20  ;;  %v6366_v22 = vld [vmem:[%s15692_s7 + $0xf0] sm:$0xff] }
 0xd9b   : > { %8862 = vmatprep.subr.bf16.mxu0 %v14711_v53  ;;  %17194 = vst [vmem:[#allocation144_spill] sm:$0xff] %v14776_v40 }
 0xd9e   : > { %8864 = vmatpush3.bf16.msra.mxu0 %v14713_v50 }
 0xda0   : > { %6012 = vmatmul.mubr.bf16.gmra.mrb[16].mxu0 %v9285_v62  ;;  %6052 = vmatmul.mubr.bf16.gmra.mrb[8].mxu1 %v9286_v5  ;;  %v14682_v62 = vsub.f32 %v6343_v11, %v6390_v30  ;;  %v8931_v11 = vpack.c.bf16 %v14732_v13, %v14730_v41  ;;  %v6348_v30 = vld [vmem:[%s15692_s7 + $0x60] sm:$0xff] }
 0xda1   : > { %6021 = vmatprep.mubr.bf16.mxu0 %v17183_v6  ;;  %6061 = vmatprep.mubr.bf16.mxu1 %v17183_v6  ;;  %v14676_v6 = vsub.f32 %v6359_v14, %v6438_v10  ;;  %v14743_v14 = vpack.c.bf16 %v6444_v32, %v6441_v48  ;;  %v14753_v10 = vsub.f32 %v6346_v39, %v6399_v60  ;;  %v6405_v21 = vand.u32 4294901760, %v6348_v30  ;;  %v6367_v48 = vld [vmem:[%s15692_s7 + $0xf8] sm:$0xff] }
 0xda2   : > { %v14781_v39 = vsub.f32 %v6365_v8, %v6456_v25  ;;  %v6462_v50 = vand.u32 4294901760, %v6367_v48  ;;  %v6350_v8 = vld [vmem:[%s15692_s7 + $0x70] sm:$0xff] }
 0xda3   : > { %v8925_v5 = vpack.c.bf16 %v14676_v6, %v14671_v7  ;;  %17192 = vst [vmem:[#allocation57_spill] sm:$0xff] %v14743_v14  ;;  %v8935_v32 = vpack.c.bf16 %v14755_v31, %v14753_v10  ;;  %8866 = vmatprep.subr.bf16.mxu0 %v14743_v14  ;;  %v14783_v18 = vsub.f32 %v6348_v30, %v6405_v21  ;;  %v6351_v30 = vld [vmem:[%s15692_s7 + $0x78] sm:$0xff]  ;;  %v6535_v14 = vand.u32 4294901760, %v14610_v23 }
 0xda4   : > { %8868 = vmatpush3.bf16.msra.mxu0 %v14774_v55  ;;  %v6528_v55 = vand.u32 4294901760, %v14608_v36 }
 0xda5   : > { %8926 = vmatprep.subr.bf16.mxu1 %v8925_v5  ;;  %v8933_v5 = vpack.c.bf16 %v14741_v56, %v14739_v49  ;;  %8870 = vmatprep.subr.bf16.mxu0 %v14776_v40 }
 0xda8   : > { %6022 = vmatmul.mubr.bf16.gmra.mrb[20].mxu0 %v9287_v43  ;;  %6062 = vmatmul.mubr.bf16.gmra.mrb[12].mxu1 %v9288_v59  ;;  %v14686_v43 = vpop.permute.xlu1 %6073  ;;  %v8927_v59 = vpack.c.bf16 %v14682_v62, %v14678_v38 }
 0xda9   : > { %8872 = vmatpush3.bf16.msra.mxu0 %v14791_v35  ;;  %v6536_v35 = vsub.f32 %v14610_v23, %v6535_v14 }
 0xdaa   : > { %8928 = vmatpush3.bf16.msra.mxu1 %v8927_v59  ;;  %v6453_v59 = vand.u32 4294901760, %v6364_v2 }
 0xdab   : > { %8930 = vmatprep.subr.bf16.mxu1 %v8929_v9  ;;  %v6459_v9 = vand.u32 4294901760, %v6366_v22 }
 0xdac   : > { %v14690_v28 = vpop.permute.xlu1 %6169  ;;  %v14779_v42 = vsub.f32 %v6364_v2, %v6453_v59  ;;  %v14798_v2 = vsub.f32 %v6367_v48, %v6462_v50  ;;  %v14806_v60 = vpack.c.bf16 %v6456_v25, %v6453_v59  ;;  %v6647_v48 = vand.u32 4294901760, %v14606_v16 }
 0xdad   : > { %v14793_v63 = vsub.f32 %v6366_v22, %v6459_v9  ;;  %v6414_v22 = vand.u32 4294901760, %v6351_v30  ;;  %v14817_v59 = vpack.c.bf16 %v6462_v50, %v6459_v9 }
 0xdae   : > { %8932 = vmatpush3.bf16.msra.mxu1 %v8931_v11  ;;  %v14785_v11 = vsub.f32 %v6349_v57, %v6408_v37  ;;  %v8937_v54 = vpack.c.bf16 %v14781_v39, %v14779_v42  ;;  %17196 = vst [vmem:[#allocation105_spill] sm:$0xff] %v14806_v60  ;;  %v6411_v57 = vand.u32 4294901760, %v6350_v8  ;;  %v8977_v40 = vpack.c.bf16 %v6647_v48, %v6640_v45 }
 0xdaf   : > { %8934 = vmatprep.subr.bf16.mxu1 %v8933_v5  ;;  %v14810_v5 = vpack.c.bf16 %v6408_v37, %v6405_v21  ;;  %17198 = vst [vmem:[#allocation124_spill] sm:$0xff] %v14817_v59  ;;  %v14826_v21 = vpack.c.bf16 %v6535_v14, %v6528_v55  ;;  %v6654_v37 = vand.u32 4294901760, %v14612_v26  ;;  %8874 = vmatprep.subr.bf16.mxu0 %v14806_v60  ;;  %v6675_v60 = vand.u32 4294901760, %v14664_v58 }
 0xdb0   : > { %v14734_v33 = vpop.permute.xlu1 %6105  ;;  %v8939_v24 = vpack.c.bf16 %v14785_v11, %v14783_v18  ;;  %v14819_v25 = vsub.f32 %v6350_v8, %v6411_v57  ;;  %v14823_v20 = vpack.c.bf16 %v6414_v22, %v6411_v57  ;;  %v6641_v8 = vsub.f32 %v14604_v51, %v6640_v45 }
 0xdb1   : > { %17197 = vst [vmem:[#allocation92_spill] sm:$0xff] %v14810_v5  ;;  %v14839_v57 = vpack.c.bf16 %v6661_v29, %v6654_v37  ;;  %8876 = vmatpush3.bf16.msra.mxu0 %v14810_v5  ;;  %v6537_v45 = vand.u32 4294901760, %v6536_v35  ;;  %v14851_v23 = vpack.c.bf16 %v6675_v60, %v6668_v47  ;;  %v6655_v14 = vsub.f32 %v14612_v26, %v6654_v37 }
 0xdb2   : > { %8936 = vmatpush3.bf16.msra.mxu1 %v8935_v32  ;;  %v8941_v32 = vpack.c.bf16 %v14798_v2, %v14793_v63  ;;  %17199 = vst [vmem:[#allocation93_spill] sm:$0xff] %v14823_v20  ;;  %v6642_v46 = vand.u32 4294901760, %v6641_v8  ;;  %8878 = vmatprep.subr.bf16.mxu0 %v14817_v59  ;;  %v6662_v35 = vsub.f32 %v14616_v3, %v6661_v29 }
 0xdb3   : > { %8938 = vmatprep.subr.bf16.mxu1 %v8937_v54  ;;  %v14821_v54 = vsub.f32 %v6351_v30, %v6414_v22  ;;  %v6648_v30 = vsub.f32 %v14606_v16, %v6647_v48  ;;  %v6529_v22 = vsub.f32 %v14608_v36, %v6528_v55  ;;  %v6556_v16 = vand.u32 4294901760, %v14667_v19 }
 0xdb4   : > { %v14787_v53 = vpop.permute.xlu1 %6121  ;;  %v6563_v48 = vand.u32 4294901760, %v14669_v0  ;;  %v6682_v55 = vand.u32 4294901760, %v14671_v7  ;;  %v6663_v26 = vand.u32 4294901760, %v6662_v35 }
 0xdb5   : > { %v8943_v9 = vpack.c.bf16 %v14821_v54, %v14819_v25  ;;  %v6649_v44 = vand.u32 4294901760, %v6648_v30  ;;  %v6530_v51 = vand.u32 4294901760, %v6529_v22  ;;  %v6543_v30 = vsub.f32 %v14618_v1, %v6542_v61  ;;  %8880 = vmatpush3.bf16.msra.mxu0 %v14823_v20 }
 0xdb6   : > { %8940 = vmatpush3.bf16.msra.mxu1 %v8939_v24  ;;  %v6549_v24 = vand.u32 4294901760, %v14622_v4  ;;  %v6564_v35 = vsub.f32 %v14669_v0, %v6563_v48 }
 0xdb7   : > { %8942 = vmatprep.subr.bf16.mxu1 %v8941_v32  ;;  %v8881_v36 = vpack.c.bf16 %v6649_v44, %v6642_v46  ;;  %v14855_v8 = vpack.c.bf16 %v6537_v45, %v6530_v51  ;;  %v6689_v44 = vand.u32 4294901760, %v14676_v6  ;;  %v6570_v46 = vand.u32 4294901760, %v14678_v38 }
 0xdb8   : > { %v14831_v50 = vpop.permute.xlu1 %6201  ;;  %v14844_v32 = vpack.c.bf16 %v6549_v24, %v6542_v61  ;;  %v6550_v59 = vsub.f32 %v14622_v4, %v6549_v24  ;;  %v6544_v37 = vand.u32 4294901760, %v6543_v30  ;;  %v6577_v51 = vand.u32 4294901760, %v14682_v62 }
 0xdb9   : > { %v6669_v45 = vsub.f32 %v14662_v17, %v6668_v47  ;;  %8882 = vmatprep.subr.bf16.mxu0 %v8881_v36  ;;  %v14869_v1 = vpack.c.bf16 %v6689_v44, %v6682_v55  ;;  %v6676_v61 = vsub.f32 %v14664_v58, %v6675_v60  ;;  %v6557_v4 = vsub.f32 %v14667_v19, %v6556_v16 }
 0xdba   : > { %8944 = vmatpush3.bf16.msra.mxu1 %v8943_v9  ;;  %v14857_v9 = vpack.c.bf16 %v6563_v48, %v6556_v16  ;;  %v6551_v3 = vand.u32 4294901760, %v6550_v59  ;;  %v14875_v24 = vpack.c.bf16 %v6577_v51, %v6570_v46  ;;  %v6696_v47 = vand.u32 4294901760, %v14725_v27 }
 0xdbb   : > { %8978 = vmatprep.subr.bf16.mxu1 %v8977_v40  ;;  %v6656_v40 = vand.u32 4294901760, %v6655_v14  ;;  %v6670_v14 = vand.u32 4294901760, %v6669_v45  ;;  %v6677_v20 = vand.u32 4294901760, %v6676_v61  ;;  %v6558_v5 = vand.u32 4294901760, %v6557_v4 }
 0xdbc   : > { %v14861_v22 = vpop.permute.xlu1 %6077  ;;  %v14878_v30 = vpack.c.bf16 %v6551_v3, %v6544_v37  ;;  %v6565_v17 = vand.u32 4294901760, %v6564_v35  ;;  %v6703_v59 = vand.u32 4294901760, %v14727_v15  ;;  %v6584_v58 = vand.u32 4294901760, %v14730_v41 }
 0xdbd   : > { %v14873_v29 = vpack.c.bf16 %v6663_v26, %v6656_v40  ;;  %v6591_v19 = vand.u32 4294901760, %v14732_v13  ;;  %v14886_v16 = vpack.c.bf16 %v6677_v20, %v6670_v14  ;;  %v6683_v36 = vsub.f32 %v14671_v7, %v6682_v55 }
 0xdbe   : > { %v6690_v0 = vsub.f32 %v14676_v6, %v6689_v44  ;;  %v6571_v48 = vsub.f32 %v14678_v38, %v6570_v46  ;;  %v14891_v40 = vpack.c.bf16 %v6565_v17, %v6558_v5  ;;  %v14893_v26 = vpack.c.bf16 %v6703_v59, %v6696_v47 }
 0xdbf   : > { %v14895_v37 = vpack.c.bf16 %v6591_v19, %v6584_v58  ;;  %v6578_v45 = vsub.f32 %v14682_v62, %v6577_v51  ;;  %v6684_v3 = vand.u32 4294901760, %v6683_v36  ;;  %v6710_v20 = vand.u32 4294901760, %v14739_v49 }
 0xdc0   : > { %v14884_v60 = vpop.permute.xlu1 %6173  ;;  %17200 = vst [vmem:[#allocation65_spill] sm:$0xff] %v14891_v40  ;;  %17201 = vst [vmem:[#allocation66_spill] sm:$0xff] %v14893_v26  ;;  %v6691_v61 = vand.u32 4294901760, %v6690_v0  ;;  %v6572_v4 = vand.u32 4294901760, %v6571_v48  ;;  %v6717_v7 = vand.u32 4294901760, %v14741_v56  ;;  %v6598_v6 = vand.u32 4294901760, %v14753_v10 }
 0xdc1   : > { %17202 = vst [vmem:[#allocation183_spill] sm:$0xff] %v14895_v37  ;;  %v6579_v14 = vand.u32 4294901760, %v6578_v45  ;;  %v6605_v38 = vand.u32 4294901760, %v14755_v31  ;;  %v6697_v55 = vsub.f32 %v14725_v27, %v6696_v47  ;;  %v6704_v44 = vsub.f32 %v14727_v15, %v6703_v59 }
 0xdc2   : > { %v14902_v5 = vpack.c.bf16 %v6691_v61, %v6684_v3  ;;  %v6585_v62 = vsub.f32 %v14730_v41, %v6584_v58  ;;  %v14909_v51 = vpack.c.bf16 %v6717_v7, %v6710_v20  ;;  %v6592_v17 = vsub.f32 %v14732_v13, %v6591_v19 }
 0xdc3   : > { %v14907_v46 = vpack.c.bf16 %v6579_v14, %v6572_v4  ;;  %v14911_v35 = vpack.c.bf16 %v6605_v38, %v6598_v6  ;;  %v6698_v0 = vand.u32 4294901760, %v6697_v55  ;;  %v6705_v48 = vand.u32 4294901760, %v6704_v44 }
 0xdc4   : > { %17203 = vst [vmem:[#allocation198_spill] sm:$0xff] %v14902_v5  ;;  %17205 = vst [vmem:[#allocation20_spill] sm:$0xff] %v14909_v51  ;;  %v14914_v36 = vpop.permute.xlu1 %6081  ;;  %v6586_v45 = vand.u32 4294901760, %v6585_v62  ;;  %v6724_v3 = vand.u32 4294901760, %v14779_v42  ;;  %v6593_v27 = vand.u32 4294901760, %v6592_v17  ;;  %v6731_v15 = vand.u32 4294901760, %v14781_v39 }
 0xdc5   : > { %17204 = vst [vmem:[#allocation69_spill] sm:$0xff] %v14907_v46  ;;  %17206 = vst [vmem:[#allocation152_spill] sm:$0xff] %v14911_v35  ;;  %v6612_v41 = vand.u32 4294901760, %v14783_v18  ;;  %v6619_v47 = vand.u32 4294901760, %v14785_v11  ;;  %v14920_v59 = vpack.c.bf16 %v6705_v48, %v6698_v0  ;;  %v6711_v58 = vsub.f32 %v14739_v49, %v6710_v20 }
 0xdc6   : > { %v6718_v13 = vsub.f32 %v14741_v56, %v6717_v7  ;;  %v6599_v19 = vsub.f32 %v14753_v10, %v6598_v6  ;;  %v14925_v61 = vpack.c.bf16 %v6593_v27, %v6586_v45  ;;  %v14927_v4 = vpack.c.bf16 %v6731_v15, %v6724_v3 }
 0xdc7   : > { %17207 = vst [vmem:[#allocation101_spill] sm:$0xff] %v14920_v59  ;;  %v14929_v14 = vpack.c.bf16 %v6619_v47, %v6612_v41  ;;  %v6606_v55 = vsub.f32 %v14755_v31, %v6605_v38  ;;  %v6712_v44 = vand.u32 4294901760, %v6711_v58  ;;  %v6738_v0 = vand.u32 4294901760, %v14793_v63 }
 0xdc8   : > { %17208 = vst [vmem:[#allocation113_spill] sm:$0xff] %v14925_v61  ;;  %17209 = vst [vmem:[#allocation149_spill] sm:$0xff] %v14927_v4  ;;  %v6719_v62 = vand.u32 4294901760, %v6718_v13  ;;  %v6600_v17 = vand.u32 4294901760, %v6599_v19  ;;  %v6745_v49 = vand.u32 4294901760, %v14798_v2  ;;  %v6626_v56 = vand.u32 4294901760, %v14819_v25  ;;  %v14936_v20 = vpop.permute.xlu1 %6189 }
 0xdc9   : > { %17210 = vst [vmem:[#allocation174_spill] sm:$0xff] %v14929_v14  ;;  %v6607_v48 = vand.u32 4294901760, %v6606_v55  ;;  %v6633_v10 = vand.u32 4294901760, %v14821_v54  ;;  %v6725_v6 = vsub.f32 %v14779_v42, %v6724_v3  ;;  %v6732_v31 = vsub.f32 %v14781_v39, %v6731_v15 }
 0xdca   : > { %v14938_v7 = vpack.c.bf16 %v6719_v62, %v6712_v44  ;;  %v6613_v38 = vsub.f32 %v14783_v18, %v6612_v41  ;;  %v14945_v27 = vpack.c.bf16 %v6745_v49, %v6738_v0  ;;  %v6620_v13 = vsub.f32 %v14785_v11, %v6619_v47  ;;  %v14958_v47 = vpop.permute.xlu0 %6089 }
 0xdcb   : > { %v14943_v45 = vpack.c.bf16 %v6607_v48, %v6600_v17  ;;  %v14947_v58 = vpack.c.bf16 %v6633_v10, %v6626_v56  ;;  %v6726_v19 = vand.u32 4294901760, %v6725_v6  ;;  %v6733_v55 = vand.u32 4294901760, %v6732_v31 }
 0xdcc   : > { %17211 = vst [vmem:[#allocation151_spill] sm:$0xff] %v14938_v7  ;;  %17213 = vst [vmem:[#allocation132_spill] sm:$0xff] %v14945_v27  ;;  %v6614_v14 = vand.u32 4294901760, %v6613_v38  ;;  %v6739_v44 = vsub.f32 %v14793_v63, %v6738_v0  ;;  %v6621_v62 = vand.u32 4294901760, %v6620_v13  ;;  %v6746_v42 = vsub.f32 %v14798_v2, %v6745_v49  ;;  %v14960_v6 = vpop.permute.xlu1 %6125 }
 0xdcd   : > { %17212 = vst [vmem:[#allocation90_spill] sm:$0xff] %v14943_v45  ;;  %17214 = vst [vmem:[#allocation140_spill] sm:$0xff] %v14947_v58  ;;  %v6627_v39 = vsub.f32 %v14819_v25, %v6626_v56  ;;  %v6634_v18 = vsub.f32 %v14821_v54, %v6633_v10  ;;  %v14954_v3 = vpack.c.bf16 %v6733_v55, %v6726_v19 }
 0xdce   : > { %v6740_v15 = vand.u32 4294901760, %v6739_v44  ;;  %v14956_v41 = vpack.c.bf16 %v6621_v62, %v6614_v14  ;;  %v6747_v17 = vand.u32 4294901760, %v6746_v42  ;;  %v14966_v2 = vpop.permute.xlu0 %6185 }
 0xdcf   : > { %17215 = vst [vmem:[#allocation115_spill] sm:$0xff] %v14954_v3  ;;  %v6628_v48 = vand.u32 4294901760, %v6627_v39  ;;  %v6635_v11 = vand.u32 4294901760, %v6634_v18 }
 0xdd0   : > { %17216 = vst [vmem:[#allocation146_spill] sm:$0xff] %v14956_v41  ;;  %v14962_v63 = vpack.c.bf16 %v6747_v17, %v6740_v15  ;;  %v6206_v25 = vpop.permute.xlu1 %6205 }
 0xdd1   : > { %v14964_v0 = vpack.c.bf16 %v6635_v11, %v6628_v48 }
 0xdd2   : > { %17217 = vst [vmem:[#allocation179_spill] sm:$0xff] %v14962_v63  ;;  %v14968_v54 = vpop.permute.xlu0 %6217 }
 0xdd3   : > { %17218 = vst [vmem:[#allocation79_spill] sm:$0xff] %v14964_v0 }
 0xdd4   : > { %v6086_v49 = vpop.permute.xlu1 %6085 }
 0xdd6   : > { %v6178_v56 = vpop.permute.xlu0 %6177 }
 0xdd8   : > { %v14970_v14 = vpop.permute.xlu1 %6193 }
 0xdda   : > { %v14972_v10 = vpop.permute.xlu0 %6181 }
 0xddc   : > { %v14974_v31 = vpop.permute.xlu1 %6221 }
 0xdde   : > { %v14976_v38 = vpop.permute.xlu0 %6197 }
 0xde0   : > { %v14978_v13 = vpop.permute.xlu1 %6129 }
 0xde2   : > { %v14980_v19 = vpop.permute.xlu0 %6093 }
 0xde4   : > { %v6210_v55 = vpop.permute.xlu1 %6209 }
 0xde6   : > { %v6110_v44 = vpop.permute.xlu0 %6109 }
 0xde8   : > { %v6118_v62 = vpop.permute.xlu1 %6117 }
 0xdea   : > { %v14982_v42 = vpop.permute.xlu0 %6097 }
 0xdec   : > { %v14984_v39 = vpop.permute.xlu1 %6225 }
 0xe63   : > { %v5993_v18 = vpop.f32.mrb[8].mxu0  ;;  %v6033_v15 = vpop.f32.mrb[0].mxu1 }
 0xe64   : > { %v6136_v17 = vmul.f32 %v14686_v43, %v5993_v18  ;;  %v6152_v48 = vmul.f32 %v14734_v33, %v6033_v15  ;;  %v5995_v11 = vpop.f32.mrb[9].mxu0  ;;  %v6035_v0 = vpop.f32.mrb[1].mxu1 }
 0xe65   : > { %v6137_v63 = vmul.f32 %v14686_v43, %v5995_v11  ;;  %v5997_v41 = vpop.f32.mrb[10].mxu0  ;;  %v6037_v58 = vpop.f32.mrb[2].mxu1  ;;  %v6153_v3 = vmul.f32 %v14734_v33, %v6035_v0 }
 0xe66   : > { %v6138_v45 = vmul.f32 %v14861_v22, %v5997_v41  ;;  %v5999_v27 = vpop.f32.mrb[11].mxu0  ;;  %v6039_v7 = vpop.f32.mrb[3].mxu1  ;;  %v6232_v61 = vadd.f32 %v14690_v28, %v6136_v17  ;;  %v14993_v4 = vadd.f32 %v14831_v50, %v6152_v48  ;;  %v6154_v15 = vmul.f32 %v6110_v44, %v6037_v58 }
 0xe67   : > { %v6139_v18 = vmul.f32 %v14861_v22, %v5999_v27  ;;  %v6233_v35 = vadd.f32 %v14690_v28, %v6137_v63  ;;  %v6155_v59 = vmul.f32 %v6110_v44, %v6039_v7  ;;  %v6114_v33 = vpop.permute.xlu0 %6113  ;;  %v6214_v0 = vpop.permute.xlu1 %6213  ;;  %v15001_v17 = vadd.f32 %v14831_v50, %v6153_v3 }
 0xe68   : > { %v6234_v43 = vadd.f32 %v14884_v60, %v6138_v45  ;;  %v6264_v41 = vmax.f32 %v6232_v61, 0.0  ;;  %v15003_v48 = vadd.f32 %v6206_v25, %v6154_v15 }
 0xe69   : > { %v6235_v11 = vadd.f32 %v14884_v60, %v6139_v18  ;;  %v6265_v27 = vmax.f32 %v6233_v35, 0.0  ;;  %v15005_v58 = vadd.f32 %v6206_v25, %v6155_v59 }
 0xe6a   : > { %v6266_v63 = vmax.f32 %v6234_v43, 0.0  ;;  %v6281_v43 = vmax.f32 %v15001_v17, 0.0 }
 0xe6b   : > { %v6003_v51 = vpop.f32.mrb[12].mxu0  ;;  %v6043_v22 = vpop.f32.mrb[4].mxu1  ;;  %v6267_v44 = vmax.f32 %v6235_v11, 0.0 }
 0xe6c   : > { %v6140_v28 = vmul.f32 %v14914_v36, %v6003_v51  ;;  %v6005_v7 = vpop.f32.mrb[13].mxu0  ;;  %v6045_v45 = vpop.f32.mrb[5].mxu1  ;;  %v6156_v60 = vmul.f32 %v6114_v33, %v6043_v22 }
 0xe6d   : > { %v6141_v61 = vmul.f32 %v14914_v36, %v6005_v7  ;;  %v6007_v18 = vpop.f32.mrb[14].mxu0  ;;  %v6047_v46 = vpop.f32.mrb[6].mxu1  ;;  %v6157_v50 = vmul.f32 %v6114_v33, %v6045_v45  ;;  %v17219_v33 = vld [vmem:[#allocation37_spill] sm:$0xff]  ;;  %v6282_v7 = vmax.f32 %v15003_v48, 0.0 }
 0xe6e   : > { %v6236_v3 = vadd.f32 %v6178_v56, %v6140_v28  ;;  %v6142_v15 = vmul.f32 %v6086_v49, %v6007_v18  ;;  %v6009_v37 = vpop.f32.mrb[15].mxu0  ;;  %v6158_v5 = vmul.f32 %v6118_v62, %v6047_v46  ;;  %v6049_v26 = vpop.f32.mrb[7].mxu1  ;;  %v15009_v35 = vadd.f32 %v6210_v55, %v6156_v60  ;;  %v17220_v60 = vld [vmem:[#allocation44_spill] sm:$0xff] }
 0xe6f   : > { %v6237_v59 = vadd.f32 %v6178_v56, %v6141_v61  ;;  %v6143_v25 = vmul.f32 %v6086_v49, %v6009_v37  ;;  %v6159_v51 = vmul.f32 %v6118_v62, %v6049_v26  ;;  %v15011_v40 = vadd.f32 %v6210_v55, %v6157_v50  ;;  %v17221_v37 = vld [vmem:[#allocation41_spill] sm:$0xff]  ;;  %v17222_v49 = vld [vmem:[#allocation43_spill] sm:$0xff] }
 0xe70   : > { %v6268_v11 = vmax.f32 %v6236_v3, 0.0  ;;  %v6238_v36 = vadd.f32 %v14972_v10, %v6142_v15  ;;  %v15015_v22 = vadd.f32 %v6214_v0, %v6158_v5  ;;  %v6304_v28 = vadd.f32 %v6264_v41, %v17219_v33 }
 0xe71   : > { %v6269_v46 = vmax.f32 %v6237_v59, 0.0  ;;  %v6239_v45 = vadd.f32 %v14972_v10, %v6143_v25  ;;  %v6305_v56 = vadd.f32 %v6265_v27, %v17220_v60  ;;  %v6306_v26 = vadd.f32 %v6266_v63, %v17221_v37 }
 0xe72   : > { %v6307_v55 = vadd.f32 %v6267_v44, %v17222_v49  ;;  %v6283_v62 = vmax.f32 %v15005_v58, 0.0  ;;  %v15025_v61 = vadd.f32 %v6268_v11, %v17146_v12  ;;  %v6284_v5 = vmax.f32 %v15009_v35, 0.0 }
 0xe73   : > { %v6285_v41 = vmax.f32 %v15011_v40, 0.0  ;;  %v15029_v18 = vadd.f32 %v6214_v0, %v6159_v51  ;;  %v6013_v50 = vpop.f32.mrb[16].mxu0  ;;  %v6053_v3 = vpop.f32.mrb[8].mxu1  ;;  %v6270_v10 = vmax.f32 %v6238_v36, 0.0  ;;  %v15035_v12 = vadd.f32 %v6269_v46, %v17162_v34 }
 0xe74   : > { %v6144_v63 = vmul.f32 %v14958_v47, %v6013_v50  ;;  %v6160_v44 = vmul.f32 %v14787_v53, %v6053_v3  ;;  %v6015_v15 = vpop.f32.mrb[17].mxu0  ;;  %v6055_v59 = vpop.f32.mrb[9].mxu1  ;;  %v6271_v25 = vmax.f32 %v6239_v45, 0.0  ;;  %v17223_v45 = vld [vmem:[#allocation49_spill] sm:$0xff] }
 0xe75   : > { %v6145_v11 = vmul.f32 %v14958_v47, %v6015_v15  ;;  %v6161_v0 = vmul.f32 %v14787_v53, %v6055_v59  ;;  %v6017_v51 = vpop.f32.mrb[18].mxu0  ;;  %v6057_v33 = vpop.f32.mrb[10].mxu1  ;;  %v6310_v15 = vadd.f32 %v6270_v10, %v17223_v45 }
 0xe76   : > { %v6240_v36 = vadd.f32 %v14966_v2, %v6144_v63  ;;  %v6256_v60 = vadd.f32 %v14968_v54, %v6160_v44  ;;  %v6146_v37 = vmul.f32 %v14980_v19, %v6017_v51  ;;  %v6162_v49 = vmul.f32 %v14960_v6, %v6057_v33  ;;  %v6019_v50 = vpop.f32.mrb[19].mxu0  ;;  %v6059_v3 = vpop.f32.mrb[11].mxu1 }
 0xe77   : > { %v6241_v34 = vadd.f32 %v14966_v2, %v6145_v11  ;;  %v6257_v46 = vadd.f32 %v14968_v54, %v6161_v0  ;;  %v6147_v47 = vmul.f32 %v14980_v19, %v6019_v50  ;;  %v6163_v53 = vmul.f32 %v14960_v6, %v6059_v3  ;;  %v6102_v6 = vpop.permute.xlu0 %6101 }
 0xe78   : > { %v6272_v59 = vmax.f32 %v6240_v36, 0.0  ;;  %v6242_v63 = vadd.f32 %v14936_v20, %v6146_v37  ;;  %v6258_v44 = vadd.f32 %v14974_v31, %v6162_v49  ;;  %v15051_v51 = vadd.f32 %v6271_v25, %v17169_v52 }
 0xe79   : > { %v6273_v33 = vmax.f32 %v6241_v34, 0.0  ;;  %v6243_v27 = vadd.f32 %v14936_v20, %v6147_v47  ;;  %v6259_v2 = vadd.f32 %v14974_v31, %v6163_v53  ;;  %v6288_v11 = vmax.f32 %v6256_v60, 0.0 }
 0xe7a   : > { %v6312_v54 = vadd.f32 %v6304_v28, %v6272_v59  ;;  %v6289_v19 = vmax.f32 %v6257_v46, 0.0  ;;  %v6274_v0 = vmax.f32 %v6242_v63, 0.0  ;;  %v6290_v10 = vmax.f32 %v6258_v44, 0.0 }
 0xe7b   : > { %v6313_v50 = vadd.f32 %v6305_v56, %v6273_v33  ;;  %v6275_v36 = vmax.f32 %v6243_v27, 0.0  ;;  %v6291_v3 = vmax.f32 %v6259_v2, 0.0  ;;  %v6023_v37 = vpop.f32.mrb[20].mxu0  ;;  %v6063_v45 = vpop.f32.mrb[12].mxu1  ;;  %v17224_v49 = vmax.f32 %v14993_v4, 0.0 }
 0xe7c   : > { %v6314_v25 = vadd.f32 %v6306_v26, %v6274_v0  ;;  %v6148_v34 = vmul.f32 %v14982_v42, %v6023_v37  ;;  %v6025_v20 = vpop.f32.mrb[21].mxu0  ;;  %v6164_v31 = vmul.f32 %v14978_v13, %v6063_v45  ;;  %v6065_v28 = vpop.f32.mrb[13].mxu1 }
 0xe7d   : > { %v6320_v52 = vadd.f32 %v6312_v54, %v17224_v49  ;;  %v6321_v60 = vadd.f32 %v6313_v50, %v6281_v43  ;;  %v6315_v46 = vadd.f32 %v6307_v55, %v6275_v36  ;;  %v6149_v56 = vmul.f32 %v14982_v42, %v6025_v20  ;;  %v6027_v27 = vpop.f32.mrb[22].mxu0  ;;  %v6067_v53 = vpop.f32.mrb[14].mxu1 }
 0xe7e   : > { %v6165_v47 = vmul.f32 %v14978_v13, %v6065_v28  ;;  %v6322_v4 = vadd.f32 %v6314_v25, %v6282_v7  ;;  %v6244_v26 = vadd.f32 %v14970_v14, %v6148_v34  ;;  %v6150_v63 = vmul.f32 %v6102_v6, %v6027_v27  ;;  %v6029_v44 = vpop.f32.mrb[23].mxu0  ;;  %v6069_v33 = vpop.f32.mrb[15].mxu1 }
 0xe7f   : > { %v15063_v59 = vadd.f32 %v6320_v52, %v6288_v11  ;;  %v15068_v2 = vadd.f32 %v6321_v60, %v6289_v19  ;;  %v6323_v17 = vadd.f32 %v6315_v46, %v6283_v62  ;;  %v6245_v42 = vadd.f32 %v14970_v14, %v6149_v56  ;;  %v6134_v62 = vpop.permute.xlu0 %6133  ;;  %v6230_v49 = vpop.permute.xlu1 %6229 }
 0xe80   : > { %v6260_v13 = vadd.f32 %v14984_v39, %v6164_v31  ;;  %v15077_v55 = vadd.f32 %v6322_v4, %v6290_v10  ;;  %v6276_v48 = vmax.f32 %v6244_v26, 0.0  ;;  %v6246_v7 = vadd.f32 %v14976_v38, %v6150_v63 }
 0xe81   : > { %v15075_v43 = vand.u32 4294901760, %v15063_v59  ;;  %v15081_v54 = vand.u32 4294901760, %v15068_v2  ;;  %v15083_v11 = vadd.f32 %v6323_v17, %v6291_v3  ;;  %v6277_v19 = vmax.f32 %v6245_v42, 0.0 }
 0xe82   : > { %v6292_v58 = vmax.f32 %v6260_v13, 0.0  ;;  %v15090_v0 = vand.u32 4294901760, %v15077_v55  ;;  %v6316_v50 = vadd.f32 %v15025_v61, %v6276_v48  ;;  %v6278_v10 = vmax.f32 %v6246_v7, 0.0 }
 0xe83   : > { %v15087_v14 = vsub.f32 %v15063_v59, %v15075_v43  ;;  %v15094_v36 = vand.u32 4294901760, %v15083_v11  ;;  %v6317_v37 = vadd.f32 %v15035_v12, %v6277_v19  ;;  %v6151_v3 = vmul.f32 %v6102_v6, %v6029_v44 }
 0xe84   : > { %v6261_v45 = vadd.f32 %v14984_v39, %v6165_v47  ;;  %v6318_v25 = vadd.f32 %v6310_v15, %v6278_v10  ;;  %v6324_v34 = vadd.f32 %v6316_v50, %v6284_v5  ;;  %v6166_v20 = vmul.f32 %v6134_v62, %v6067_v53 }
 0xe85   : > { %v6472_v52 = vand.u32 4294901760, %v15087_v14  ;;  %v6247_v31 = vadd.f32 %v14976_v38, %v6151_v3  ;;  %v6325_v28 = vadd.f32 %v6317_v37, %v6285_v41  ;;  %v6167_v60 = vmul.f32 %v6134_v62, %v6069_v33 }
 0xe86   : > { %v6293_v61 = vmax.f32 %v6261_v45, 0.0  ;;  %v15104_v46 = vadd.f32 %v6324_v34, %v6292_v58  ;;  %v6262_v12 = vadd.f32 %v6230_v49, %v6166_v20  ;;  %v17225_v39 = vmax.f32 %v15015_v22, 0.0 }
 0xe87   : > { %v15110_v15 = vsub.f32 %v15068_v2, %v15081_v54  ;;  %v6279_v35 = vmax.f32 %v6247_v31, 0.0  ;;  %v6263_v56 = vadd.f32 %v6230_v49, %v6167_v60  ;;  %v15116_v38 = vsub.f32 %v15083_v11, %v15094_v36  ;;  %v17229_v60 = vld [vmem:[#allocation183_spill] sm:$0xff] }
 0xe88   : > { %v6326_v6 = vadd.f32 %v6318_v25, %v17225_v39  ;;  %v15112_v5 = vadd.f32 %v6325_v28, %v6293_v61  ;;  %v15119_v40 = vand.u32 4294901760, %v15104_v46  ;;  %v6294_v41 = vmax.f32 %v6262_v12, 0.0  ;;  %v17228_v61 = vld [vmem:[#allocation198_spill] sm:$0xff]  ;;  %v17230_v12 = vld [vmem:[#allocation20_spill] sm:$0xff] }
 0xe89   : > { %6908 = vmatprep.mubr.f32.mxu1 %v15110_v15  ;;  %v15124_v22 = vsub.f32 %v15077_v55, %v15090_v0  ;;  %v6466_v27 = vand.u32 4294901760, %v15110_v15  ;;  %v6287_v47 = vmax.f32 %v15029_v18, 0.0  ;;  %v6319_v53 = vadd.f32 %v15051_v51, %v6279_v35  ;;  %v17233_v39 = vld [vmem:[#allocation152_spill] sm:$0xff]  ;;  %v17235_v35 = vld [vmem:[#allocation113_spill] sm:$0xff] }
 0xe8a   : > { %v15130_v4 = vand.u32 4294901760, %v15112_v5  ;;  %6911 = vmatmul.mubr.f32.vlgmr.msra.gmra.mrb[16].mxu1 %v15087_v14  ;;  %v6473_v26 = vsub.f32 %v15087_v14, %v6472_v52  ;;  %v15136_v63 = vadd.f32 %v6326_v6, %v6294_v41  ;;  %v6481_v51 = vand.u32 4294901760, %v15116_v38  ;;  %v17234_v6 = vld [vmem:[#allocation149_spill] sm:$0xff]  ;;  %v17237_v41 = vld [vmem:[#allocation174_spill] sm:$0xff] }
 0xe8b   : > { %8980 = vmatpush3.bf16.msra.mxu1 %v14826_v21  ;;  %6917 = vmatprep.mubr.f32.mxu1 %v15116_v38  ;;  %v6467_v18 = vsub.f32 %v15110_v15, %v6466_v27  ;;  %v15146_v44 = vsub.f32 %v15104_v46, %v15119_v40  ;;  %v6295_v33 = vmax.f32 %v6263_v56, 0.0  ;;  %v6327_v17 = vadd.f32 %v6319_v53, %v6287_v47  ;;  %v17236_v56 = vld [vmem:[#allocation151_spill] sm:$0xff]  ;;  %v17238_v47 = vld [vmem:[#allocation132_spill] sm:$0xff]  ;;  %v17239_v53 = vld [vmem:[#allocation90_spill] sm:$0xff] }
 0xe8c   : > { %8982 = vmatprep.subr.bf16.mxu1 %v14839_v57  ;;  %v15151_v42 = vsub.f32 %v15112_v5, %v15130_v4  ;;  %v6487_v21 = vand.u32 4294901760, %v15124_v22  ;;  %v15155_v13 = vand.u32 4294901760, %v15136_v63  ;;  %v6482_v7 = vsub.f32 %v15116_v38, %v6481_v51 }
 0xe8d   : > { %v6468_v48 = vand.u32 4294901760, %v6467_v18  ;;  %v6502_v19 = vand.u32 4294901760, %v15146_v44  ;;  %v15161_v58 = vadd.f32 %v6327_v17, %v6295_v33  ;;  %v6474_v57 = vand.u32 4294901760, %v6473_v26  ;;  %v17240_v26 = vld [vmem:[#allocation115_spill] sm:$0xff]  ;;  %v17241_v18 = vld [vmem:[#allocation140_spill] sm:$0xff]  ;;  %v17242_v33 = vld [vmem:[#allocation146_spill] sm:$0xff] }
 0xe8e   : > { %6920 = vmatmul.mubr.f32.gmra.mrb[18].mxu1 %v15124_v22  ;;  %v6488_v62 = vsub.f32 %v15124_v22, %v6487_v21  ;;  %v6496_v50 = vand.u32 4294901760, %v15151_v42  ;;  %v6483_v10 = vand.u32 4294901760, %v6482_v7  ;;  %v15171_v37 = vsub.f32 %v15136_v63, %v15155_v13  ;;  %v17243_v17 = vld [vmem:[#allocation179_spill] sm:$0xff] }
 0xe8f   : > { %8984 = vmatpush3.bf16.msra.mxu1 %v14844_v32  ;;  %6469 = vmatprep.mubr.f32.mxu0 %v6468_v48  ;;  %v15174_v3 = vand.u32 4294901760, %v15161_v58  ;;  %v6503_v32 = vsub.f32 %v15146_v44, %v6502_v19  ;;  %v17244_v48 = vld [vmem:[#allocation79_spill] sm:$0xff] }
 0xe90   : > { %6475 = vmatmul.mubr.f32.vlgmr.msra.gmra.mrb[24].mxu0 %v6474_v57  ;;  %6926 = vmatprep.mubr.f32.mxu1 %v15151_v42  ;;  %v6497_v45 = vsub.f32 %v15151_v42, %v6496_v50  ;;  %v6489_v25 = vand.u32 4294901760, %v6488_v62  ;;  %v6517_v20 = vand.u32 4294901760, %v15171_v37  ;;  %v17245_v7 = vld [vmem:[#allocation35_spill] sm:$0xff]  ;;  %v17246_v57 = vld [vmem:[#allocation96_spill] sm:$0xff] }
 0xe91   : > { %8884 = vmatpush3.bf16.msra.mxu0 %v14855_v8  ;;  %6484 = vmatprep.mubr.f32.mxu0 %v6483_v10  ;;  %v15188_v49 = vsub.f32 %v15161_v58, %v15174_v3  ;;  %v17247_v62 = vld [vmem:[#allocation171_spill] sm:$0xff]  ;;  %v17248_v10 = vld [vmem:[#allocation84_spill] sm:$0xff] }
 0xe92   : > { %8986 = vmatprep.subr.bf16.mxu1 %v14851_v23  ;;  %6929 = vmatmul.mubr.f32.gmra.mrb[20].mxu1 %v15146_v44  ;;  %v6498_v34 = vand.u32 4294901760, %v6497_v45  ;;  %v6504_v23 = vand.u32 4294901760, %v6503_v32  ;;  %v17249_v45 = vld [vmem:[#allocation30_spill] sm:$0xff] }
 0xe93   : > { %8988 = vmatpush3.bf16.msra.mxu1 %v14857_v9  ;;  %8886 = vmatprep.subr.bf16.mxu0 %v14873_v29  ;;  %v6511_v8 = vand.u32 4294901760, %v15188_v49  ;;  %v6518_v9 = vsub.f32 %v15171_v37, %v6517_v20  ;;  %v17226_v29 = vld [vmem:[#allocation65_spill] sm:$0xff]  ;;  %v17250_v32 = vld [vmem:[#allocation86_spill] sm:$0xff] }
 0xe94   : > { %6935 = vmatprep.mubr.f32.mxu1 %v15188_v49  ;;  %6490 = vmatmul.mubr.f32.gmra.mrb[26].mxu0 %v6489_v25  ;;  %v17251_v25 = vld [vmem:[#allocation28_spill] sm:$0xff] }
 0xe95   : > { %8888 = vmatpush3.bf16.msra.mxu0 %v14878_v30  ;;  %8990 = vmatprep.subr.bf16.mxu1 %v14869_v1  ;;  %v6512_v31 = vsub.f32 %v15188_v49, %v6511_v8  ;;  %v17227_v30 = vld [vmem:[#allocation66_spill] sm:$0xff]  ;;  %v6519_v28 = vand.u32 4294901760, %v6518_v9  ;;  %v17255_v9 = vld [vmem:[#allocation144_spill] sm:$0xff] }
 0xe96   : > { %6938 = vmatmul.mubr.f32.gmra.mrb[22].mxu1 %v15171_v37  ;;  %6499 = vmatprep.mubr.f32.mxu0 %v6498_v34  ;;  %v17252_v34 = vld [vmem:[#allocation116_spill] sm:$0xff] }
 0xe97   : > { %8992 = vmatpush3.bf16.msra.mxu1 %v14875_v24  ;;  %8890 = vmatprep.subr.bf16.mxu0 %v14886_v16  ;;  %v6513_v1 = vand.u32 4294901760, %v6512_v31  ;;  %v17231_v24 = vld [vmem:[#allocation69_spill] sm:$0xff]  ;;  %v17254_v31 = vld [vmem:[#allocation142_spill] sm:$0xff] }
 0xe98   : > { %7245 = vmatprep.mubr.f32.mxu1 %v15081_v54  ;;  %6505 = vmatmul.mubr.f32.gmra.mrb[28].mxu0 %v6504_v23  ;;  %v17232_v16 = vld [vmem:[#allocation101_spill] sm:$0xff] }
 0xe99   : > { %8892 = vmatpush3.bf16.msra.mxu0 %v17226_v29  ;;  %8994 = vmatprep.subr.bf16.mxu1 %v17227_v30  ;;  %v17253_v23 = vld [vmem:[#allocation57_spill] sm:$0xff]  ;;  %v17258_v30 = vld [vmem:[#allocation92_spill] sm:$0xff] }
 0xe9a   : > { %6514 = vmatprep.mubr.f32.mxu0 %v6513_v1  ;;  %8894 = vmatprep.subr.bf16.mxu0 %v17228_v61  ;;  %v17256_v1 = vld [vmem:[#allocation117_spill] sm:$0xff]  ;;  %v17259_v61 = vld [vmem:[#allocation124_spill] sm:$0xff] }
 0xe9b   : > { %8996 = vmatpush3.bf16.msra.mxu1 %v17229_v60  ;;  %v17257_v29 = vld [vmem:[#allocation105_spill] sm:$0xff] }
 0xe9c   : > { %6520 = vmatmul.mubr.f32.gmra.mrb[30].mxu0 %v6519_v28  ;;  %8998 = vmatprep.subr.bf16.mxu1 %v17230_v12  ;;  %v17260_v28 = vld [vmem:[#allocation93_spill] sm:$0xff] }
 0xe9d   : > { %8896 = vmatpush3.bf16.msra.mxu0 %v17231_v24  ;;  %6750 = vmatprep.mubr.f32.mxu0 %v15081_v54 }
 0xe9e   : > { %8898 = vmatprep.subr.bf16.mxu0 %v17232_v16 }
 0xe9f   : > { %9000 = vmatpush3.bf16.msra.mxu1 %v17233_v39 }
 0xea0   : > { %9002 = vmatprep.subr.bf16.mxu1 %v17234_v6 }
 0xea1   : > { %8900 = vmatpush3.bf16.msra.mxu0 %v17235_v35 }
 0xea2   : > { %8902 = vmatprep.subr.bf16.mxu0 %v17236_v56 }
 0xea3   : > { %9004 = vmatpush3.bf16.msra.mxu1 %v17237_v41 }
 0xea4   : > { %9006 = vmatprep.subr.bf16.mxu1 %v17238_v47 }
 0xea5   : > { %8904 = vmatpush3.bf16.msra.mxu0 %v17239_v53 }
 0xea6   : > { %8906 = vmatprep.subr.bf16.mxu0 %v17240_v26 }
 0xea7   : > { %9008 = vmatpush3.bf16.msra.mxu1 %v17241_v18 }
 0xea9   : > { %8908 = vmatpush3.bf16.msra.mxu0 %v17242_v33 }
 0xeaa   : > { %7247 = vmatmul.mubr.f32.vlgmr.msra.gmra.mrb[24].mxu1 %v15075_v43  ;;  %8910 = vmatprep.subr.bf16.mxu0 %v17243_v17 }
 0xeab   : > { %7252 = vmatprep.mubr.f32.mxu1 %v15094_v36 }
 0xead   : > { %8912 = vmatpush3.bf16.msra.mxu0 %v17244_v48 }
 0xeae   : > { %7254 = vmatmul.mubr.f32.gmra.mrb[26].mxu1 %v15090_v0  ;;  %8946 = vmatprep.subr.bf16.mxu0 %v17245_v7 }
 0xeaf   : > { %7259 = vmatprep.mubr.f32.mxu1 %v15130_v4 }
 0xeb0   : > { %6752 = vmatmul.mubr.f32.vlgmr.msra.gmra.mrb[32].mxu0 %v15075_v43 }
 0xeb1   : > { %6757 = vmatprep.mubr.f32.mxu0 %v15094_v36  ;;  %8948 = vmatpush3.bf16.msra.mxu0 %v17246_v57 }
 0xeb2   : > { %7261 = vmatmul.mubr.f32.gmra.mrb[28].mxu1 %v15119_v40  ;;  %8950 = vmatprep.subr.bf16.mxu0 %v17247_v62 }
 0xeb3   : > { %7266 = vmatprep.mubr.f32.mxu1 %v15174_v3 }
 0xeb4   : > { %6759 = vmatmul.mubr.f32.gmra.mrb[34].mxu0 %v15090_v0 }
 0xeb5   : > { %6764 = vmatprep.mubr.f32.mxu0 %v15130_v4  ;;  %8952 = vmatpush3.bf16.msra.mxu0 %v17248_v10 }
 0xeb6   : > { %7268 = vmatmul.mubr.f32.gmra.mrb[30].mxu1 %v15155_v13  ;;  %8954 = vmatprep.subr.bf16.mxu0 %v17249_v45 }
 0xeb8   : > { %6766 = vmatmul.mubr.f32.gmra.mrb[36].mxu0 %v15119_v40 }
 0xeb9   : > { %6771 = vmatprep.mubr.f32.mxu0 %v15174_v3  ;;  %8956 = vmatpush3.bf16.msra.mxu0 %v17250_v32 }
 0xeba   : > { %8958 = vmatprep.subr.bf16.mxu0 %v17251_v25 }
 0xebc   : > { %6773 = vmatmul.mubr.f32.gmra.mrb[38].mxu0 %v15155_v13 }
 0xebd   : > { %8960 = vmatpush3.bf16.msra.mxu0 %v17252_v34  ;;  %7042 = vmatprep.mubr.f32.mxu0 %v6466_v27 }
 0xebe   : > { %8962 = vmatprep.subr.bf16.mxu0 %v17253_v23 }
 0xec1   : > { %8964 = vmatpush3.bf16.msra.mxu0 %v17254_v31 }
 0xec2   : > { %8966 = vmatprep.subr.bf16.mxu0 %v17255_v9 }
 0xec5   : > { %8968 = vmatpush3.bf16.msra.mxu0 %v17256_v1 }
 0xec6   : > { %8970 = vmatprep.subr.bf16.mxu0 %v17257_v29 }
 0xec9   : > { %8972 = vmatpush3.bf16.msra.mxu0 %v17258_v30 }
 0xeca   : > { %8974 = vmatprep.subr.bf16.mxu0 %v17259_v61 }
 0xecd   : > { %8976 = vmatpush3.bf16.msra.mxu0 %v17260_v28 }
 0xece   : > { %9010 = vmatprep.subr.bf16.mxu0 %v17245_v7 }
 0xed0   : > { %7046 = vmatmul.mubr.f32.vlgmr.msra.gmra.mrb[40].mxu0 %v6472_v52 }
 0xed1   : > { %7053 = vmatprep.mubr.f32.mxu0 %v6481_v51  ;;  %9012 = vmatpush3.bf16.msra.mxu0 %v17246_v57 }
 0xed2   : > { %9014 = vmatprep.subr.bf16.mxu0 %v17247_v62 }
 0xed4   : > { %7057 = vmatmul.mubr.f32.gmra.mrb[42].mxu0 %v6487_v21 }
 0xed5   : > { %7064 = vmatprep.mubr.f32.mxu0 %v6496_v50  ;;  %9016 = vmatpush3.bf16.msra.mxu0 %v17248_v10 }
 0xed6   : > { %9018 = vmatprep.subr.bf16.mxu0 %v17249_v45 }
 0xed8   : > { %7068 = vmatmul.mubr.f32.gmra.mrb[44].mxu0 %v6502_v19 }
 0xed9   : > { %7075 = vmatprep.mubr.f32.mxu0 %v6511_v8  ;;  %9020 = vmatpush3.bf16.msra.mxu0 %v17250_v32 }
 0xeda   : > { %9022 = vmatprep.subr.bf16.mxu0 %v17251_v25 }
 0xedc   : > { %7079 = vmatmul.mubr.f32.gmra.mrb[46].mxu0 %v6517_v20 }
 0xedd   : > { %9024 = vmatpush3.bf16.msra.mxu0 %v17252_v34  ;;  %7370 = vmatprep.mubr.f32.mxu0 %v15081_v54 }
 0xede   : > { %9026 = vmatprep.subr.bf16.mxu0 %v17253_v23 }
 0xee1   : > { %9028 = vmatpush3.bf16.msra.mxu0 %v17254_v31 }
 0xee2   : > { %9030 = vmatprep.subr.bf16.mxu0 %v17255_v9 }
 0xee5   : > { %9032 = vmatpush3.bf16.msra.mxu0 %v17256_v1 }
 0xee6   : > { %9034 = vmatprep.subr.bf16.mxu0 %v17257_v29 }
 0xee9   : > { %9036 = vmatpush3.bf16.msra.mxu0 %v17258_v30 }
 0xeea   : > { %9038 = vmatprep.subr.bf16.mxu0 %v17259_v61 }
 0xeed   : > { %9040 = vmatpush3.bf16.msra.mxu0 %v17260_v28 }
 0xef0   : > { %7372 = vmatmul.mubr.f32.vlgmr.msra.gmra.mrb[48].mxu0 %v15075_v43 }
 0xef1   : > { %7377 = vmatprep.mubr.f32.mxu0 %v15094_v36 }
 0xef4   : > { %7379 = vmatmul.mubr.f32.gmra.mrb[50].mxu0 %v15090_v0 }
 0xef5   : > { %7384 = vmatprep.mubr.f32.mxu0 %v15130_v4 }
 0xef8   : > { %7386 = vmatmul.mubr.f32.gmra.mrb[52].mxu0 %v15119_v40 }
 0xef9   : > { %7391 = vmatprep.mubr.f32.mxu0 %v15174_v3 }
 0xefc   : > { %7393 = vmatmul.mubr.f32.gmra.mrb[54].mxu0 %v15155_v13 }
 0xf5d   : > { %v8705_v54 = vpop.f32.mrb[16].mxu1 }
 0xf5e   : > { %v8706_v14 = vpop.f32.mrb[17].mxu1 }
 0xf5f   : > { %v8707_v52 = vadd.f32 %v8706_v14, %v8705_v54 }
 0xf61   : > { %v8708_v15 = vpop.f32.mrb[18].mxu1 }
 0xf62   : > { %v8709_v38 = vpop.f32.mrb[19].mxu1 }
 0xf63   : > { %v8710_v22 = vadd.f32 %v8709_v38, %v8708_v15  ;;  %v8617_v27 = vpop.f32.mrb[24].mxu0 }
 0xf64   : > { %v8618_v43 = vpop.f32.mrb[25].mxu0 }
 0xf65   : > { %v8619_v51 = vadd.f32 %v8618_v43, %v8617_v27  ;;  %v8711_v36 = vpop.f32.mrb[20].mxu1 }
 0xf66   : > { %v8712_v44 = vpop.f32.mrb[21].mxu1 }
 0xf67   : > { %v8713_v0 = vadd.f32 %v8712_v44, %v8711_v36  ;;  %v8620_v42 = vpop.f32.mrb[26].mxu0 }
 0xf68   : > { %v8621_v4 = vpop.f32.mrb[27].mxu0 }
 0xf69   : > { %v8622_v21 = vadd.f32 %v8621_v4, %v8620_v42  ;;  %v8714_v40 = vpop.f32.mrb[22].mxu1 }
 0xf6a   : > { %v8715_v19 = vpop.f32.mrb[23].mxu1 }
 0xf6b   : > { %v8716_v50 = vadd.f32 %v8715_v19, %v8714_v40  ;;  %v8623_v37 = vpop.f32.mrb[28].mxu0 }
 0xf6c   : > { %v8624_v13 = vpop.f32.mrb[29].mxu0 }
 0xf6d   : > { %v8625_v3 = vadd.f32 %v8624_v13, %v8623_v37 }
 0xf6f   : > { %v8626_v49 = vpop.f32.mrb[30].mxu0 }
 0xf70   : > { %v8627_v20 = vpop.f32.mrb[31].mxu0 }
 0xf71   : > { %v8628_v8 = vadd.f32 %v8627_v20, %v8626_v49 }
 0xf7d   : > { %v8793_v60 = vpop.f32.mrb[24].mxu1 }
 0xf7e   : > { %v8794_v12 = vpop.f32.mrb[25].mxu1 }
 0xf7f   : > { %v8795_v24 = vadd.f32 %v8794_v12, %v8793_v60 }
 0xf81   : > { %v8796_v16 = vpop.f32.mrb[26].mxu1 }
 0xf82   : > { %v8797_v39 = vpop.f32.mrb[27].mxu1 }
 0xf83   : > { %v8798_v6 = vadd.f32 %v8797_v39, %v8796_v16  ;;  %v8661_v35 = vpop.f32.mrb[32].mxu0  ;;  %v7402_v16 = vld [vmem:[%s15693_s8 + $0x20] sm:$0xff] }
 0xf84   : > { %v8662_v56 = vpop.f32.mrb[33].mxu0 }
 0xf85   : > { %v8663_v41 = vadd.f32 %v8662_v56, %v8661_v35  ;;  %v8799_v47 = vpop.f32.mrb[28].mxu1  ;;  %v7399_v35 = vld [vmem:[%s15693_s8 + $0x8] sm:$0xff] }
 0xf86   : > { %v8800_v53 = vpop.f32.mrb[29].mxu1 }
 0xf87   : > { %v6754_v26 = vadd.f32 %v8663_v41, %v8619_v51  ;;  %v8801_v18 = vadd.f32 %v8800_v53, %v8799_v47  ;;  %v8664_v33 = vpop.f32.mrb[34].mxu0 }
 0xf88   : > { %v8665_v17 = vpop.f32.mrb[35].mxu0 }
 0xf89   : > { %v8666_v48 = vadd.f32 %v8665_v17, %v8664_v33  ;;  %v8802_v7 = vpop.f32.mrb[30].mxu1  ;;  %v6913_v57 = vadd.f32 %v8707_v52, %v6754_v26 }
 0xf8a   : > { %v8803_v62 = vpop.f32.mrb[31].mxu1 }
 0xf8b   : > { %v6761_v10 = vadd.f32 %v8666_v48, %v8622_v21  ;;  %v8804_v45 = vadd.f32 %v8803_v62, %v8802_v7  ;;  %v8667_v32 = vpop.f32.mrb[36].mxu0  ;;  %v7400_v48 = vld [vmem:[%s15693_s8 + $0x10] sm:$0xff] }
 0xf8c   : > { %v8668_v25 = vpop.f32.mrb[37].mxu0 }
 0xf8d   : > { %v8669_v34 = vadd.f32 %v8668_v25, %v8667_v32  ;;  %v6922_v23 = vadd.f32 %v8710_v22, %v6761_v10  ;;  %v7406_v32 = vld [vmem:[%s15693_s8 + $0x40] sm:$0xff] }
 0xf8f   : > { %v6768_v31 = vadd.f32 %v8669_v34, %v8625_v3  ;;  %v8670_v9 = vpop.f32.mrb[38].mxu0  ;;  %v7404_v34 = vld [vmem:[%s15693_s8 + $0x30] sm:$0xff] }
 0xf90   : > { %v8671_v1 = vpop.f32.mrb[39].mxu0 }
 0xf91   : > { %v8672_v29 = vadd.f32 %v8671_v1, %v8670_v9  ;;  %v6931_v30 = vadd.f32 %v8713_v0, %v6768_v31 }
 0xf93   : > { %v6775_v61 = vadd.f32 %v8672_v29, %v8628_v8  ;;  %v7398_v8 = vld [vmem:[%s15693_s8] sm:$0xff] }
 0xf95   : > { %v6940_v28 = vadd.f32 %v8716_v50, %v6775_v61 }
 0xfa3   : > { %v8749_v54 = vpop.f32.mrb[40].mxu0 }
 0xfa4   : > { %v8750_v14 = vpop.f32.mrb[41].mxu0 }
 0xfa5   : > { %v8751_v15 = vadd.f32 %v8750_v14, %v8749_v54  ;;  %v7401_v54 = vld [vmem:[%s15693_s8 + $0x18] sm:$0xff] }
 0xfa7   : > { %v7048_v38 = vadd.f32 %v8751_v15, %v6913_v57  ;;  %v8752_v27 = vpop.f32.mrb[42].mxu0  ;;  %v7429_v15 = vld [vmem:[%s15693_s8 + $0xf8] sm:$0xff] }
 0xfa8   : > { %v8753_v52 = vpop.f32.mrb[43].mxu0 }
 0xfa9   : > { %v8754_v43 = vadd.f32 %v8753_v52, %v8752_v27  ;;  %v7249_v51 = vadd.f32 %v8795_v24, %v7048_v38 }
 0xfab   : > { %v7059_v36 = vadd.f32 %v8754_v43, %v6922_v23  ;;  %v8755_v44 = vpop.f32.mrb[44].mxu0  ;;  %v7405_v43 = vld [vmem:[%s15693_s8 + $0x38] sm:$0xff] }
 0xfac   : > { %v8756_v42 = vpop.f32.mrb[45].mxu0 }
 0xfad   : > { %v8757_v4 = vadd.f32 %v8756_v42, %v8755_v44  ;;  %v7256_v22 = vadd.f32 %v8798_v6, %v7059_v36 }
 0xfaf   : > { %v7070_v21 = vadd.f32 %v8757_v4, %v6931_v30  ;;  %v8758_v40 = vpop.f32.mrb[46].mxu0 }
 0xfb0   : > { %v8759_v19 = vpop.f32.mrb[47].mxu0 }
 0xfb1   : > { %v8760_v37 = vadd.f32 %v8759_v19, %v8758_v40  ;;  %v7263_v0 = vadd.f32 %v8801_v18, %v7070_v21  ;;  %v7403_v18 = vld [vmem:[%s15693_s8 + $0x28] sm:$0xff]  ;;  %v7410_v40 = vld [vmem:[%s15693_s8 + $0x60] sm:$0xff] }
 0xfb2   : > { %v7411_v19 = vld [vmem:[%s15693_s8 + $0x68] sm:$0xff] }
 0xfb3   : > { %v7081_v13 = vadd.f32 %v8760_v37, %v6940_v28  ;;  %v7407_v28 = vld [vmem:[%s15693_s8 + $0x48] sm:$0xff] }
 0xfb5   : > { %v7270_v50 = vadd.f32 %v8804_v45, %v7081_v13 }
 0xfc3   : > { %v8837_v3 = vpop.f32.mrb[48].mxu0 }
 0xfc4   : > { %v8838_v49 = vpop.f32.mrb[49].mxu0 }
 0xfc5   : > { %v8839_v20 = vadd.f32 %v8838_v49, %v8837_v3  ;;  %v7409_v3 = vld [vmem:[%s15693_s8 + $0x58] sm:$0xff]  ;;  %v7412_v49 = vld [vmem:[%s15693_s8 + $0x70] sm:$0xff] }
 0xfc7   : > { %v15300_v60 = vadd.f32 %v8839_v20, %v7249_v51  ;;  %v8840_v12 = vpop.f32.mrb[50].mxu0  ;;  %v7408_v51 = vld [vmem:[%s15693_s8 + $0x50] sm:$0xff] }
 0xfc8   : > { %v8841_v24 = vpop.f32.mrb[51].mxu0 }
 0xfc9   : > { %v8842_v39 = vadd.f32 %v8841_v24, %v8840_v12  ;;  %v7430_v6 = vmul.f32 %v7398_v8, %v15300_v60  ;;  %v7434_v53 = vmul.f32 %v7402_v16, %v15300_v60  ;;  %v7438_v9 = vmul.f32 %v7406_v32, %v15300_v60  ;;  %v7414_v16 = vld [vmem:[%s15693_s8 + $0x80] sm:$0xff] }
 0xfca   : > { %v7442_v13 = vmul.f32 %v7410_v40, %v15300_v60 }
 0xfcb   : > { %v15309_v56 = vadd.f32 %v8842_v39, %v7256_v22  ;;  %v8843_v41 = vpop.f32.mrb[52].mxu0  ;;  %v7463_v47 = vsel %vm7462_vm4, %v7430_v6, 0.0  ;;  %v7475_v10 = vsel %vm7462_vm4, %v7434_v53, 0.0  ;;  %v7487_v38 = vsel %vm7462_vm4, %v7438_v9, 0.0  ;;  %v7415_v39 = vld [vmem:[%s15693_s8 + $0x88] sm:$0xff]  ;;  %v7413_v53 = vld [vmem:[%s15693_s8 + $0x78] sm:$0xff] }
 0xfcc   : > { %v8844_v26 = vpop.f32.mrb[53].mxu0  ;;  %7464 = vadd.xlane.f32.xlu0 %v7463_v47  ;;  %v7499_v20 = vsel %vm7462_vm4, %v7442_v13, 0.0  ;;  %v7428_v13 = vld [vmem:[%s15693_s8 + $0xf0] sm:$0xff] }
 0xfcd   : > { %v8845_v33 = vadd.f32 %v8844_v26, %v8843_v41  ;;  %v7431_v17 = vmul.f32 %v7399_v35, %v15309_v56  ;;  %v7435_v45 = vmul.f32 %v7403_v18, %v15309_v56  ;;  %v7439_v14 = vmul.f32 %v7407_v28, %v15309_v56  ;;  %v7416_v26 = vld [vmem:[%s15693_s8 + $0x90] sm:$0xff]  ;;  %v7423_v28 = vld [vmem:[%s15693_s8 + $0xc8] sm:$0xff] }
 0xfce   : > { %v7446_v41 = vmul.f32 %v7414_v16, %v15300_v60  ;;  %v7447_v47 = vmul.f32 %v7415_v39, %v15309_v56 }
 0xfcf   : > { %v15320_v7 = vadd.f32 %v8845_v33, %v7263_v0  ;;  %v8846_v57 = vpop.f32.mrb[54].mxu0  ;;  %v7466_v62 = vsel %vm7462_vm4, %v7431_v17, 0.0  ;;  %v7478_v30 = vsel %vm7462_vm4, %v7435_v45, 0.0  ;;  %v7490_v44 = vsel %vm7462_vm4, %v7439_v14, 0.0 }
 0xfd0   : > { %v8847_v25 = vpop.f32.mrb[55].mxu0  ;;  %7467 = vadd.xlane.f32.xlu1 %v7466_v62  ;;  %7476 = vadd.xlane.f32.xlu0 %v7475_v10  ;;  %v7511_v18 = vsel %vm7462_vm4, %v7446_v41, 0.0  ;;  %v7514_v33 = vsel %vm7462_vm4, %v7447_v47, 0.0  ;;  %v7419_v62 = vld [vmem:[%s15693_s8 + $0xa8] sm:$0xff] }
 0xfd1   : > { %v8848_v23 = vadd.f32 %v8847_v25, %v8846_v57  ;;  %v7432_v31 = vmul.f32 %v7400_v48, %v15320_v7  ;;  %v7436_v61 = vmul.f32 %v7404_v34, %v15320_v7  ;;  %v7440_v22 = vmul.f32 %v7408_v51, %v15320_v7  ;;  %v7418_v57 = vld [vmem:[%s15693_s8 + $0xa0] sm:$0xff]  ;;  %v7417_v34 = vld [vmem:[%s15693_s8 + $0x98] sm:$0xff] }
 0xfd2   : > { %v7444_v24 = vmul.f32 %v7412_v49, %v15320_v7  ;;  %v7448_v48 = vmul.f32 %v7416_v26, %v15320_v7  ;;  %v7450_v32 = vmul.f32 %v7418_v57, %v15300_v60  ;;  %v7451_v25 = vmul.f32 %v7419_v62, %v15309_v56 }
 0xfd3   : > { %v15333_v1 = vadd.f32 %v8848_v23, %v7270_v50  ;;  %v7469_v29 = vsel %vm7462_vm4, %v7432_v31, 0.0  ;;  %v7481_v27 = vsel %vm7462_vm4, %v7436_v61, 0.0  ;;  %v7493_v0 = vsel %vm7462_vm4, %v7440_v22, 0.0  ;;  %v7420_v23 = vld [vmem:[%s15693_s8 + $0xb0] sm:$0xff]  ;;  %v7422_v61 = vld [vmem:[%s15693_s8 + $0xc0] sm:$0xff] }
 0xfd4   : > { %7470 = vadd.xlane.f32.xlu1 %v7469_v29  ;;  %7479 = vadd.xlane.f32.xlu0 %v7478_v30  ;;  %v7443_v50 = vmul.f32 %v7411_v19, %v15309_v56  ;;  %v7505_v35 = vsel %vm7462_vm4, %v7444_v24, 0.0  ;;  %v7517_v45 = vsel %vm7462_vm4, %v7448_v48, 0.0  ;;  %v7523_v31 = vsel %vm7462_vm4, %v7450_v32, 0.0 }
 0xfd5   : > { %v7433_v52 = vmul.f32 %v7401_v54, %v15333_v1  ;;  %v7461_v36 = vmul.f32 %v7429_v15, %v15333_v1  ;;  %v7437_v4 = vmul.f32 %v7405_v43, %v15333_v1  ;;  %v7441_v12 = vmul.f32 %v7409_v3, %v15333_v1 }
 0xfd6   : > { %v7502_v8 = vsel %vm7462_vm4, %v7443_v50, 0.0  ;;  %v7445_v17 = vmul.f32 %v7413_v53, %v15333_v1  ;;  %v7526_v9 = vsel %vm7462_vm4, %v7451_v25, 0.0  ;;  %v7449_v29 = vmul.f32 %v7417_v34, %v15333_v1 }
 0xfd7   : > { %v7472_v42 = vsel %vm7462_vm4, %v7433_v52, 0.0  ;;  %v15363_v21 = vsel %vm7462_vm4, %v7461_v36, 0.0  ;;  %v7484_v37 = vsel %vm7462_vm4, %v7437_v4, 0.0  ;;  %v7496_v6 = vsel %vm7462_vm4, %v7441_v12, 0.0  ;;  %v7424_v52 = vld [vmem:[%s15693_s8 + $0xd0] sm:$0xff]  ;;  %v7427_v4 = vld [vmem:[%s15693_s8 + $0xe8] sm:$0xff] }
 0xfd8   : > { %7488 = vadd.xlane.f32.xlu1 %v7487_v38  ;;  %7482 = vadd.xlane.f32.xlu0 %v7481_v27  ;;  %v7508_v10 = vsel %vm7462_vm4, %v7445_v17, 0.0  ;;  %v7452_v30 = vmul.f32 %v7420_v23, %v15320_v7  ;;  %v7520_v54 = vsel %vm7462_vm4, %v7449_v29, 0.0  ;;  %v7454_v15 = vmul.f32 %v7422_v61, %v15300_v60  ;;  %v7421_v27 = vld [vmem:[%s15693_s8 + $0xb8] sm:$0xff] }
 0xfd9   : > { %v7455_v38 = vmul.f32 %v7423_v28, %v15309_v56  ;;  %v7453_v36 = vmul.f32 %v7421_v27, %v15333_v1  ;;  %v17261_v62 = vlaneseq }
 0xfda   : > { %v7529_v14 = vsel %vm7462_vm4, %v7452_v30, 0.0  ;;  %v7535_v43 = vsel %vm7462_vm4, %v7454_v15, 0.0 }
 0xfdb   : > { %v7538_v51 = vsel %vm7462_vm4, %v7455_v38, 0.0  ;;  %v7532_v22 = vsel %vm7462_vm4, %v7453_v36, 0.0 }
 0xfdc   : > { %7491 = vadd.xlane.f32.xlu0 %v7490_v44  ;;  %7473 = vadd.xlane.f32.xlu1 %v7472_v42  ;;  %v7456_v44 = vmul.f32 %v7424_v52, %v15320_v7  ;;  %v7426_v42 = vld [vmem:[%s15693_s8 + $0xe0] sm:$0xff] }
 0xfdd   : > { %v7458_v19 = vmul.f32 %v7426_v42, %v15300_v60  ;;  %v7460_v60 = vmul.f32 %v7428_v13, %v15320_v7 }
 0xfde   : > { %v7541_v40 = vsel %vm7462_vm4, %v7456_v44, 0.0 }
 0xfdf   : > { %v7547_v50 = vsel %vm7462_vm4, %v7458_v19, 0.0 }
 0xfe0   : > { %7485 = vadd.xlane.f32.xlu0 %v7484_v37  ;;  %7494 = vadd.xlane.f32.xlu1 %v7493_v0  ;;  %v7459_v37 = vmul.f32 %v7427_v4, %v15309_v56  ;;  %v7425_v0 = vld [vmem:[%s15693_s8 + $0xd8] sm:$0xff] }
 0xfe1   : > { %v7457_v49 = vmul.f32 %v7425_v0, %v15333_v1 }
 0xfe2   : > { %v7550_v3 = vsel %vm7462_vm4, %v7459_v37, 0.0 }
 0xfe3   : > { %v7544_v56 = vsel %vm7462_vm4, %v7457_v49, 0.0 }
 0xfe4   : > { %7500 = vadd.xlane.f32.xlu0 %v7499_v20  ;;  %7503 = vadd.xlane.f32.xlu1 %v7502_v8  ;;  %v7553_v20 = vsel %vm7462_vm4, %v7460_v60, 0.0 }
 0xfe8   : > { %7497 = vadd.xlane.f32.xlu0 %v7496_v6  ;;  %7506 = vadd.xlane.f32.xlu1 %v7505_v35 }
 0xfec   : > { %7512 = vadd.xlane.f32.xlu0 %v7511_v18  ;;  %7515 = vadd.xlane.f32.xlu1 %v7514_v33 }
 0xff0   : > { %7509 = vadd.xlane.f32.xlu0 %v7508_v10  ;;  %7518 = vadd.xlane.f32.xlu1 %v7517_v45  ;;  %v7592_v10 = vand.u32 127, %v17261_v62 }
 0xff2   : > { %v7597_v45 = vadd.s32 4294967288, %v7592_v10  ;;  %v7604_v34 = vadd.s32 4294967280, %v7592_v10  ;;  %v7611_v23 = vadd.s32 4294967272, %v7592_v10 }
 0xff4   : > { %7524 = vadd.xlane.f32.xlu0 %v7523_v31  ;;  %7527 = vadd.xlane.f32.xlu1 %v7526_v9  ;;  %v17262_v31 = vld [vmem:[#allocation4_spill] sm:$0xff] }
 0xff5   : > { %v15486_v9 = vsub.s32 %v7597_v45, %v17262_v31  ;;  %v15493_v61 = vsub.s32 %v7592_v10, %v17262_v31  ;;  %v15496_v28 = vsub.s32 %v7604_v34, %v17262_v31 }
 0xff8   : > { %7521 = vadd.xlane.f32.xlu0 %v7520_v54  ;;  %7530 = vadd.xlane.f32.xlu1 %v7529_v14  ;;  %v15499_v54 = vsub.s32 %v7611_v23, %v17262_v31 }
 0xffc   : > { %7536 = vadd.xlane.f32.xlu0 %v7535_v43  ;;  %7539 = vadd.xlane.f32.xlu1 %v7538_v51 }
0x1000   : > { %7533 = vadd.xlane.f32.xlu0 %v7532_v22  ;;  %7542 = vadd.xlane.f32.xlu1 %v7541_v40 }
0x1004   : > { %7548 = vadd.xlane.f32.xlu0 %v7547_v50  ;;  %7551 = vadd.xlane.f32.xlu1 %v7550_v3 }
0x1008   : > { %7545 = vadd.xlane.f32.xlu0 %v7544_v56  ;;  %7554 = vadd.xlane.f32.xlu1 %v7553_v20 }
0x100c   : > { %7557 = vadd.xlane.f32.xlu0 %v15363_v21 }
0x1059   : > { %v7465_v8 = vpop.xlane.xlu0 %7464 }
0x105a   : > { %v7596_v52 = vrot.slane %v7465_v8, %v15493_v61 }
0x105d   : > { %v7468_v12 = vpop.xlane.xlu1 %7467  ;;  %v7477_v24 = vpop.xlane.xlu0 %7476 }
0x105e   : > { %v7601_v14 = vrot.slane %v7468_v12, %v15486_v9  ;;  %v7621_v44 = vrot.slane %v7477_v24, %v15493_v61 }
0x1060   : > { %v7603_v4 = vsel %vm7602_vm6, %v7601_v14, %v7596_v52 }
0x1061   : > { %v7471_v16 = vpop.xlane.xlu1 %7470  ;;  %v7480_v39 = vpop.xlane.xlu0 %7479 }
0x1062   : > { %v7625_v27 = vrot.slane %v7480_v39, %v15486_v9  ;;  %v7608_v43 = vrot.slane %v7471_v16, %v15496_v28 }
0x1064   : > { %v7626_v0 = vsel %vm7602_vm6, %v7625_v27, %v7621_v44  ;;  %v7610_v49 = vsel %vm7609_vm7, %v7608_v43, %v7603_v4 }
0x1065   : > { %v7489_v6 = vpop.xlane.xlu1 %7488  ;;  %v7483_v35 = vpop.xlane.xlu0 %7482 }
0x1066   : > { %v7630_v51 = vrot.slane %v7483_v35, %v15496_v28  ;;  %v7640_v22 = vrot.slane %v7489_v6, %v15493_v61 }
0x1068   : > { %v7631_v60 = vsel %vm7609_vm7, %v7630_v51, %v7626_v0 }
0x1069   : > { %v7492_v1 = vpop.xlane.xlu0 %7491  ;;  %v7474_v41 = vpop.xlane.xlu1 %7473 }
0x106a   : > { %v7644_v36 = vrot.slane %v7492_v1, %v15486_v9  ;;  %v7615_v42 = vrot.slane %v7474_v41, %v15499_v54 }
0x106c   : > { %v7645_v56 = vsel %vm7602_vm6, %v7644_v36, %v7640_v22  ;;  %v7617_v20 = vsel %vm7616_vm9, %v7615_v42, %v7610_v49 }
0x106d   : > { %v7486_v7 = vpop.xlane.xlu0 %7485  ;;  %v7495_v47 = vpop.xlane.xlu1 %7494 }
0x106e   : > { %v7635_v40 = vrot.slane %v7486_v7, %v15499_v54  ;;  %v7649_v13 = vrot.slane %v7495_v47, %v15496_v28 }
0x1070   : > { %v7636_v16 = vsel %vm7616_vm9, %v7635_v40, %v7631_v60  ;;  %v7650_v7 = vsel %vm7609_vm7, %v7649_v13, %v7645_v56  ;;  %v7770_v56 = vld [vmem:[%s15694_s9] sm:$0xff] }
0x1071   : > { %v7501_v53 = vpop.xlane.xlu0 %7500  ;;  %v7504_v26 = vpop.xlane.xlu1 %7503  ;;  %v7752_v45 = vsel %vm7751_vm11, %v7636_v16, %v7617_v20 }
0x1072   : > { %v7659_v50 = vrot.slane %v7501_v53, %v15493_v61  ;;  %v7663_v3 = vrot.slane %v7504_v26, %v15486_v9 }
0x1074   : > { %v7664_v47 = vsel %vm7602_vm6, %v7663_v3, %v7659_v50  ;;  %v9388_v3 = vmov 0.0  }
0x1075   : > { %v15468_v18 = vpop.xlane.xlu0 %7497  ;;  %v15470_v33 = vpop.xlane.xlu1 %7506  ;;  %7885 = vmatprep.mubr.f32.mxu1 %v9388_v3  ;;  %7852 = vmatprep.mubr.f32.mxu0 %v9388_v3 }
0x1076   : > { %v7668_v8 = vrot.slane %v15470_v33, %v15496_v28  ;;  %v7654_v39 = vrot.slane %v15468_v18, %v15499_v54 }
0x1079   : > { %v15472_v17 = vpop.xlane.xlu0 %7512  ;;  %v15474_v21 = vpop.xlane.xlu1 %7515 }
0x107a   : > { %v7678_v12 = vrot.slane %v15472_v17, %v15493_v61  ;;  %v7682_v24 = vrot.slane %v15474_v21, %v15486_v9 }
0x107d   : > { %v15476_v48 = vpop.xlane.xlu0 %7509  ;;  %v15478_v57 = vpop.xlane.xlu1 %7518 }
0x107e   : > { %v7673_v6 = vrot.slane %v15476_v48, %v15499_v54  ;;  %v7687_v35 = vrot.slane %v15478_v57, %v15496_v28  ;;  %v7669_v48 = vsel %vm7609_vm7, %v7668_v8, %v7664_v47  ;;  %v7683_v57 = vsel %vm7602_vm6, %v7682_v24, %v7678_v12  ;;  %v7771_v12 = vld [vmem:[%s15694_s9 + $0x8] sm:$0xff] }
0x107f   : > { %v7775_v8 = vsel %vm4922_vm5, %v7770_v56, 0 }
0x1080   : > { %v7688_v34 = vsel %vm7609_vm7, %v7687_v35, %v7683_v57  ;;  %v15596_v24 = vand.u32 4294901760, %v7775_v8 }
0x1081   : > { %v15481_v32 = vpop.xlane.xlu0 %7524  ;;  %v15483_v25 = vpop.xlane.xlu1 %7527 }
0x1082   : > { %v7697_v53 = vrot.slane %v15481_v32, %v15493_v61  ;;  %v7701_v26 = vrot.slane %v15483_v25, %v15486_v9  ;;  %v7655_v32 = vsel %vm7616_vm9, %v7654_v39, %v7650_v7  ;;  %v7674_v25 = vsel %vm7616_vm9, %v7673_v6, %v7669_v48 }
0x1083   : > { %v7754_v51 = vsel %vm7753_vm0, %v7655_v32, %v7752_v45  ;;  %v7778_v39 = vsel %vm4922_vm5, %v7771_v12, 0  ;;  %v7854_v6 = vsub.f32 %v7775_v8, %v15596_v24 }
0x1084   : > { %v15601_v35 = vand.u32 4294901760, %v7778_v39 }
0x1085   : > { %v15488_v29 = vpop.xlane.xlu0 %7521  ;;  %v15490_v30 = vpop.xlane.xlu1 %7530 }
0x1086   : > { %v7692_v18 = vrot.slane %v15488_v29, %v15499_v54  ;;  %v7706_v33 = vrot.slane %v15490_v30, %v15496_v28  ;;  %v7702_v29 = vsel %vm7602_vm6, %v7701_v26, %v7697_v53  ;;  %v7865_v47 = vsub.f32 %v7778_v39, %v15601_v35 }
0x1088   : > { %v7707_v27 = vsel %vm7609_vm7, %v7706_v33, %v7702_v29 }
0x1089   : > { %v15502_v15 = vpop.xlane.xlu0 %7536  ;;  %v15504_v38 = vpop.xlane.xlu1 %7539 }
0x108a   : > { %v7716_v17 = vrot.slane %v15502_v15, %v15493_v61  ;;  %v7720_v21 = vrot.slane %v15504_v38, %v15486_v9  ;;  %v7693_v38 = vsel %vm7616_vm9, %v7692_v18, %v7688_v34 }
0x108c   : > { %v7721_v52 = vsel %vm7602_vm6, %v7720_v21, %v7716_v17  ;;  %v7866_v17 = vand.u32 4294901760, %v7865_v47 }
0x108d   : > { %v7534_v19 = vpop.xlane.xlu0 %7533  ;;  %v7543_v37 = vpop.xlane.xlu1 %7542 }
0x108e   : > { %v7711_v62 = vrot.slane %v7534_v19, %v15499_v54  ;;  %v7725_v10 = vrot.slane %v7543_v37, %v15496_v28 }
0x1090   : > { %v7712_v36 = vsel %vm7616_vm9, %v7711_v62, %v7707_v27  ;;  %v7726_v44 = vsel %vm7609_vm7, %v7725_v10, %v7721_v52  ;;  %v7867_v10 = vsub.f32 %v7865_v47, %v7866_v17 }
0x1091   : > { %v7549_v1 = vpop.xlane.xlu0 %7548  ;;  %v7552_v41 = vpop.xlane.xlu1 %7551 }
0x1092   : > { %v7735_v30 = vrot.slane %v7549_v1, %v15493_v61  ;;  %v7739_v14 = vrot.slane %v7552_v41, %v15486_v9  ;;  %v7756_v61 = vsel %vm7755_vm1, %v7674_v25, %v7754_v51  ;;  %v7772_v1 = vld [vmem:[%s15694_s9 + $0x10] sm:$0xff]  ;;  %v7855_v41 = vand.u32 4294901760, %v7854_v6 }
0x1093   : > { %v7758_v4 = vsel %vm7757_vm3, %v7693_v38, %v7756_v61  ;;  %v7781_v18 = vsel %vm4922_vm5, %v7772_v1, 0 }
0x1094   : > { %v7740_v22 = vsel %vm7602_vm6, %v7739_v14, %v7735_v30  ;;  %v7760_v19 = vsel %vm7759_vm8, %v7712_v36, %v7758_v4  ;;  %v7856_v53 = vsub.f32 %v7854_v6, %v7855_v41  ;;  %v15611_v57 = vand.u32 4294901760, %v7781_v18 }
0x1095   : > { %v7546_v23 = vpop.xlane.xlu0 %7545  ;;  %v7555_v31 = vpop.xlane.xlu1 %7554 }
0x1096   : > { %v7730_v15 = vrot.slane %v7546_v23, %v15499_v54  ;;  %v7744_v43 = vrot.slane %v7555_v31, %v15496_v28  ;;  %v7857_v62 = vand.u32 4294901760, %v7856_v53  ;;  %v7876_v32 = vsub.f32 %v7781_v18, %v15611_v57 }
0x1097   : > { %v7868_v23 = vand.u32 4294901760, %v7867_v10  ;;  %v8455_v10 = vld [vmem:[%s9570_s11 + $0x8] sm:$0xff] }
0x1098   : > { %v7731_v9 = vsel %vm7616_vm9, %v7730_v15, %v7726_v44  ;;  %v7745_v28 = vsel %vm7609_vm7, %v7744_v43, %v7740_v22  ;;  %v7877_v34 = vand.u32 4294901760, %v7876_v32 }
0x1099   : > { %v7558_v42 = vpop.xlane.xlu0 %7557  ;;  %v7762_v0 = vsel %vm7761_vm10, %v7731_v9, %v7760_v19 }
0x109a   : > { %v7749_v40 = vrot.slane %v7558_v42, %v15499_v54  ;;  %v7773_v54 = vld [vmem:[%s15694_s9 + $0x18] sm:$0xff]  ;;  %v7878_v29 = vsub.f32 %v7876_v32, %v7877_v34 }
0x109b   : > { %v7784_v49 = vsel %vm4922_vm5, %v7773_v54, 0 }
0x109c   : > { %v7750_v37 = vsel %vm7616_vm9, %v7749_v40, %v7745_v28  ;;  %v15584_v60 = vand.u32 4294901760, %v7784_v49  ;;  %v7879_v14 = vand.u32 4294901760, %v7878_v29  ;;  %v8459_v29 = vld [vmem:[%s9570_s11 + $0x28] sm:$0xff] }
0x109d   : > { %v7764_v13 = vsel %vm7763_vm13, %v7750_v37, %v7762_v0 }
0x109e   : > { %v7766_v50 = vsel %vm1510_vm12, %v7764_v13, 0.0  ;;  %v15590_v20 = vsub.f32 %v7784_v49, %v15584_v60 }
0x109f   : > { %7767 = vadd.xlane.f32.xlu1 %v7766_v50 }
0x10a0   : > { %v7888_v16 = vand.u32 4294901760, %v15590_v20 }
0x10a2   : > { %v7889_v7 = vsub.f32 %v15590_v20, %v7888_v16 }
0x10a4   : > { %v7890_v21 = vand.u32 4294901760, %v7889_v7 }
0x112c   : > { %v7768_v26 = vpop.xlane.xlu1 %7767 }
0x112d   : > { %v7769_v33 = vmax.f32 %v7768_v26, 0.0 }
0x112f   : > { %v7786_v48 = vand.u32 4294901760, %v7769_v33 }
0x1131   : > { %v7898_v45 = vsub.f32 %v7769_v33, %v7786_v48  ;;  %7787 = vmatprep.subr.mxu0 %v7786_v48  ;;  %9057 = vmatprep.subr.mxu1 %v7786_v48 }
0x1132   : > { %7789 = vmatpush1.msra.mxu0 %v7786_v48  ;;  %9058 = vmatpush1.msra.mxu1 %v7786_v48 }
0x1133   : > { %7891 = vmatmul.mubr.f32.vlgmr.msra.gmra.mrb[32].mxu1 %v7890_v21  ;;  %v7899_v25 = vand.u32 4294901760, %v7898_v45  ;;  %7858 = vmatmul.mubr.f32.vlgmr.msra.gmra.mrb[56].mxu0 %v7857_v62  ;;  %v8454_v62 = vld [vmem:[%s9570_s11] sm:$0xff] }
0x1134   : > { %7971 = vmatprep.mubr.f32.mxu1 %v9388_v3  ;;  %7863 = vmatprep.mubr.f32.mxu0 %v9388_v3 }
0x1135   : > { %v7900_v31 = vsub.f32 %v7898_v45, %v7899_v25 }
0x1137   : > { %v7901_v30 = vand.u32 4294901760, %v7900_v31  ;;  %7869 = vmatmul.mubr.f32.gmra.mrb[58].mxu0 %v7868_v23  ;;  %v8458_v23 = vld [vmem:[%s9570_s11 + $0x20] sm:$0xff] }
0x1138   : > { %7874 = vmatprep.mubr.f32.mxu0 %v9388_v3 }
0x1139   : > { %7902 = vmatprep.subr.mxu1 %v7901_v30 }
0x113a   : > { %7908 = vmatpush1.msra.mxu1 %v7901_v30  ;;  %v8460_v30 = vld [vmem:[%s9570_s11 + $0x30] sm:$0xff] }
0x113b   : > { %7973 = vmatmul.mubr.f32.vlgmr.msra.gmra.mrb[34].mxu1 %v15596_v24  ;;  %8002 = vmatprep.subr.mxu1 %v7898_v45 }
0x113c   : > { %8005 = vmatpush1.msra.mxu1 %v7898_v45  ;;  %7978 = vmatprep.mubr.f32.mxu1 %v9388_v3 }
0x113d   : > { %8102 = vmatprep.subr.mxu1 %v7786_v48  ;;  %7880 = vmatmul.mubr.f32.gmra.mrb[60].mxu0 %v7879_v14  ;;  %v8461_v14 = vld [vmem:[%s9570_s11 + $0x38] sm:$0xff] }
0x113f   : > { %7980 = vmatmul.mubr.f32.gmra.mrb[36].mxu1 %v15601_v35 }
0x1140   : > { %7985 = vmatprep.mubr.f32.mxu1 %v9388_v3 }
0x1143   : > { %7987 = vmatmul.mubr.f32.gmra.mrb[38].mxu1 %v15611_v57 }
0x1144   : > { %7992 = vmatprep.mubr.f32.mxu1 %v9388_v3 }
0x1147   : > { %7994 = vmatmul.mubr.f32.gmra.mrb[32].mxu1 %v15584_v60 }
0x1148   : > { %8068 = vmatprep.mubr.f32.mxu1 %v9388_v3 }
0x114b   : > { %8071 = vmatmul.mubr.f32.vlgmr.msra.gmra.mrb[34].mxu1 %v7854_v6 }
0x114c   : > { %8104 = vmatpush1.msra.mxu1 %v7786_v48  ;;  %8076 = vmatprep.mubr.f32.mxu1 %v9388_v3 }
0x114d   : > { %8207 = vmatprep.subr.mxu1 %v7899_v25 }
0x114f   : > { %8079 = vmatmul.mubr.f32.gmra.mrb[36].mxu1 %v7865_v47 }
0x1150   : > { %8084 = vmatprep.mubr.f32.mxu1 %v9388_v3 }
0x1153   : > { %8087 = vmatmul.mubr.f32.gmra.mrb[38].mxu1 %v7876_v32 }
0x1154   : > { %8092 = vmatprep.mubr.f32.mxu1 %v9388_v3 }
0x1157   : > { %8095 = vmatmul.mubr.f32.gmra.mrb[32].mxu1 %v15590_v20 }
0x1158   : > { %8167 = vmatprep.mubr.f32.mxu1 %v9388_v3 }
0x115b   : > { %8171 = vmatmul.mubr.f32.vlgmr.msra.gmra.mrb[34].mxu1 %v7855_v41 }
0x115c   : > { %8211 = vmatpush1.msra.mxu1 %v7899_v25  ;;  %8176 = vmatprep.mubr.f32.mxu1 %v9388_v3  ;;  %v8456_v25 = vld [vmem:[%s9570_s11 + $0x10] sm:$0xff] }
0x115d   : > { %8304 = vmatprep.subr.mxu1 %v7786_v48 }
0x115f   : > { %8180 = vmatmul.mubr.f32.gmra.mrb[36].mxu1 %v7866_v17 }
0x1160   : > { %8185 = vmatprep.mubr.f32.mxu1 %v9388_v3 }
0x1163   : > { %8189 = vmatmul.mubr.f32.gmra.mrb[38].mxu1 %v7877_v34  ;;  %v8457_v34 = vld [vmem:[%s9570_s11 + $0x18] sm:$0xff] }
0x1164   : > { %8194 = vmatprep.mubr.f32.mxu1 %v9388_v3 }
0x1167   : > { %8198 = vmatmul.mubr.f32.gmra.mrb[32].mxu1 %v7888_v16 }
0x1168   : > { %8274 = vmatprep.mubr.f32.mxu1 %v9388_v3 }
0x116b   : > { %8276 = vmatmul.mubr.f32.vlgmr.msra.gmra.mrb[34].mxu1 %v15596_v24 }
0x116c   : > { %8306 = vmatpush1.msra.mxu1 %v7786_v48  ;;  %8281 = vmatprep.mubr.f32.mxu1 %v9388_v3 }
0x116f   : > { %8283 = vmatmul.mubr.f32.gmra.mrb[36].mxu1 %v15601_v35 }
0x1170   : > { %8288 = vmatprep.mubr.f32.mxu1 %v9388_v3 }
0x1173   : > { %8290 = vmatmul.mubr.f32.gmra.mrb[38].mxu1 %v15611_v57 }
0x1174   : > { %8295 = vmatprep.mubr.f32.mxu1 %v9388_v3 }
0x1177   : > { %8297 = vmatmul.mubr.f32.gmra.mrb[32].mxu1 %v15584_v60 }
0x1178   : > { %8369 = vmatprep.mubr.f32.mxu1 %v9388_v3 }
0x117b   : > { %8371 = vmatmul.mubr.f32.vlgmr.msra.gmra.mrb[34].mxu1 %v15596_v24 }
0x117c   : > { %8376 = vmatprep.mubr.f32.mxu1 %v9388_v3 }
0x117f   : > { %8378 = vmatmul.mubr.f32.gmra.mrb[36].mxu1 %v15601_v35 }
0x1180   : > { %8383 = vmatprep.mubr.f32.mxu1 %v9388_v3 }
0x1183   : > { %8385 = vmatmul.mubr.f32.gmra.mrb[38].mxu1 %v15611_v57 }
0x1184   : > { %8390 = vmatprep.mubr.f32.mxu1 %v9388_v3 }
0x1187   : > { %8392 = vmatmul.mubr.f32.gmra.mrb[32].mxu1 %v15584_v60 }
0x1206   : > { %v7859_v15 = vpop.f32.mrb[56].mxu0 }
0x1207   : > { %v7861_v38 = vpop.f32.mrb[57].mxu0 }
0x120a   : > { %v7870_v27 = vpop.f32.mrb[58].mxu0 }
0x120b   : > { %v7872_v52 = vpop.f32.mrb[59].mxu0 }
0x1210   : > { %v7881_v43 = vpop.f32.mrb[60].mxu0 }
0x1211   : > { %v7883_v51 = vpop.f32.mrb[61].mxu0 }
0x124e   : > { %v8372_v36 = vpop.f32.mrb[34].mxu1 }
0x124f   : > { %v9059_v44 = vadd.f32 %v8372_v36, %v7859_v15  ;;  %v8374_v61 = vpop.f32.mrb[35].mxu1 }
0x1250   : > { %v9060_v9 = vadd.f32 %v8374_v61, %v7861_v38 }
0x1251   : > { %v8573_v42 = vmul.f32 -1.442695, %v9059_v44 }
0x1252   : > { %v8574_v4 = vmul.f32 -1.442695, %v9060_v9  ;;  %v8379_v22 = vpop.f32.mrb[36].mxu1 }
0x1253   : > { %9289 = vpow2.f32 %v8573_v42  ;;  %v9061_v40 = vadd.f32 %v8379_v22, %v7870_v27  ;;  %v8381_v28 = vpop.f32.mrb[37].mxu1 }
0x1254   : > { %9291 = vpow2.f32 %v8574_v4  ;;  %v9062_v19 = vadd.f32 %v8381_v28, %v7872_v52 }
0x1255   : > { %v8575_v37 = vmul.f32 -1.442695, %v9061_v40 }
0x1256   : > { %v8576_v0 = vmul.f32 -1.442695, %v9062_v19  ;;  %v8386_v13 = vpop.f32.mrb[38].mxu1 }
0x1257   : > { %9293 = vpow2.f32 %v8575_v37  ;;  %v9063_v50 = vadd.f32 %v8386_v13, %v7881_v43  ;;  %v8388_v3 = vpop.f32.mrb[39].mxu1 }
0x1258   : > { %9295 = vpow2.f32 %v8576_v0  ;;  %v9064_v54 = vadd.f32 %v8388_v3, %v7883_v51 }
0x1259   : > { %v8577_v49 = vmul.f32 -1.442695, %v9063_v50 }
0x125a   : > { %v8578_v60 = vmul.f32 -1.442695, %v9064_v54  ;;  %v8393_v56 = vpop.f32.mrb[32].mxu1 }
0x125b   : > { %9297 = vpow2.f32 %v8577_v49  ;;  %v8579_v20 = vmul.f32 -1.442695, %v8393_v56  ;;  %v8395_v8 = vpop.f32.mrb[33].mxu1 }
0x125c   : > { %9299 = vpow2.f32 %v8578_v60  ;;  %v8580_v12 = vmul.f32 -1.442695, %v8395_v8 }
0x125d   : > { %v9290_v24 = vpop.eup %9289  ;;  %9301 = vpow2.f32 %v8579_v20 }
0x125e   : > { %v9292_v16 = vpop.eup %9291  ;;  %v8422_v39 = vadd.f32 1.0, %v9290_v24  ;;  %9303 = vpow2.f32 %v8580_v12 }
0x125f   : > { %v8423_v6 = vadd.f32 1.0, %v9292_v16 }
0x1260   : > { %9305 = vrcp.f32 %v8422_v39 }
0x1261   : > { %v9294_v35 = vpop.eup %9293  ;;  %9307 = vrcp.f32 %v8423_v6 }
0x1262   : > { %v9296_v1 = vpop.eup %9295  ;;  %v8424_v41 = vadd.f32 1.0, %v9294_v35 }
0x1263   : > { %v8425_v7 = vadd.f32 1.0, %v9296_v1 }
0x1264   : > { %9309 = vrcp.f32 %v8424_v41 }
0x1265   : > { %v9298_v47 = vpop.eup %9297  ;;  %9311 = vrcp.f32 %v8425_v7 }
0x1266   : > { %v9300_v53 = vpop.eup %9299  ;;  %v8426_v26 = vadd.f32 1.0, %v9298_v47 }
0x1267   : > { %v9302_v18 = vpop.eup %9301  ;;  %v8427_v33 = vadd.f32 1.0, %v9300_v53 }
0x1268   : > { %v9304_v17 = vpop.eup %9303  ;;  %9313 = vrcp.f32 %v8426_v26  ;;  %v8428_v21 = vadd.f32 1.0, %v9302_v18 }
0x1269   : > { %9315 = vrcp.f32 %v8427_v33  ;;  %v8429_v48 = vadd.f32 1.0, %v9304_v17 }
0x126a   : > { %v9306_v57 = vpop.eup %9305  ;;  %9317 = vrcp.f32 %v8428_v21 }
0x126b   : > { %v9308_v45 = vpop.eup %9307  ;;  %v8446_v32 = vmul.f32 %v9306_v57, %v15063_v59  ;;  %9319 = vrcp.f32 %v8429_v48 }
0x126c   : > { %v8447_v31 = vmul.f32 %v9308_v45, %v15068_v2 }
0x126d   : > { %v8462_v15 = vadd.f32 %v8454_v62, %v8446_v32 }
0x126e   : > { %v9310_v59 = vpop.eup %9309  ;;  %v8463_v38 = vadd.f32 %v8455_v10, %v8447_v31 }
0x126f   : > { %v9312_v27 = vpop.eup %9311  ;;  %v8448_v52 = vmul.f32 %v9310_v59, %v15077_v55  ;;  %8470 = vst [vmem:[%s15662_s30] sm:$0xff] %v8462_v15 }
0x1270   : > { %v8449_v43 = vmul.f32 %v9312_v27, %v15083_v11  ;;  %8471 = vst [vmem:[%s15662_s30 + $0x8] sm:$0xff] %v8463_v38 }
0x1271   : > { %v8464_v51 = vadd.f32 %v8456_v25, %v8448_v52 }
0x1272   : > { %v9314_v36 = vpop.eup %9313  ;;  %v8465_v2 = vadd.f32 %v8457_v34, %v8449_v43 }
0x1273   : > { %v9316_v44 = vpop.eup %9315  ;;  %v8450_v61 = vmul.f32 %v9314_v36, %v15104_v46  ;;  %8472 = vst [vmem:[%s15662_s30 + $0x10] sm:$0xff] %v8464_v51 }
0x1274   : > { %v9318_v9 = vpop.eup %9317  ;;  %v8451_v42 = vmul.f32 %v9316_v44, %v15112_v5  ;;  %8473 = vst [vmem:[%s15662_s30 + $0x18] sm:$0xff] %v8465_v2 }
0x1275   : > { %v9320_v55 = vpop.eup %9319  ;;  %v8466_v4 = vadd.f32 %v8458_v23, %v8450_v61  ;;  %v8452_v11 = vmul.f32 %v9318_v9, %v15136_v63 }
0x1276   : > { %v8467_v22 = vadd.f32 %v8459_v29, %v8451_v42  ;;  %v8453_v40 = vmul.f32 %v9320_v55, %v15161_v58 }
0x1277   : > { %v8468_v28 = vadd.f32 %v8460_v30, %v8452_v11  ;;  %8474 = vst [vmem:[%s15662_s30 + $0x20] sm:$0xff] %v8466_v4 }
0x1278   : > { %v8469_v19 = vadd.f32 %v8461_v14, %v8453_v40  ;;  %8475 = vst [vmem:[%s15662_s30 + $0x28] sm:$0xff] %v8467_v22 }
0x1279   : > { %8476 = vst [vmem:[%s15662_s30 + $0x30] sm:$0xff] %v8468_v28 }
0x127a   : > { %8477 = vst [vmem:[%s15662_s30 + $0x38] sm:$0xff] %v8469_v19 }
0x127b PF: > { %s20_s13 = sadd.s32 1, %s9351_s13  }
0x127c   : > { %p17_p4 = scmp.ge.s32.totalorder %s20_s13, 4  }
0x127e   :  { %19 = sbr.rel (!%p17_p4) target bundleno = 1 (0x1), region = 97 }

</bundles_post_ra>
